<compile_context>
chip_gen: v6e
topology: v6e:2x2x1
jax: 0.10.0
libtpu: 0.0.40
codegen_flags: <defaults>
</compile_context>

<pallas_src>
import functools
import math

import jax
import jax.numpy as jnp
from jax import lax
from jax.experimental import pallas as pl
from jax.experimental.pallas import tpu as pltpu


def _round_up(x, m):
    return ((x + m - 1) // m) * m


def _cdiv(a, b):
    return -(-a // b)


# ----------------------------------------------------------------------------
# Fused (BN+ReLU) -> matmul -> +bias Pallas kernel over channel "pieces"
# ----------------------------------------------------------------------------

def _mm_pieces_kernel(*refs, n, relu):
    """o = sum_i (relu(x_i*s_i+t_i) if relu else x_i) @ w_i  + b.

    Each DenseNet feature piece is its own whole-block ref, so the growing
    channel concatenation never round-trips through HBM.  BN affine + ReLU run
    in f32 on the VPU; the MXU consumes bf16 with f32 accumulation held in
    values (single pass over K -> no scratch accumulator, no K grid axis).
    """
    x_refs = refs[:n]
    w_refs = refs[n:2 * n]
    if relu:
        s_refs = refs[2 * n:3 * n]
        t_refs = refs[3 * n:4 * n]
        b_ref, o_ref = refs[4 * n:]
    else:
        b_ref, o_ref = refs[2 * n:]

    acc = None
    for i in range(n):
        xv = x_refs[i][...]
        if relu:
            xv = jnp.maximum(xv.astype(jnp.float32) * s_refs[i][...]
                             + t_refs[i][...], 0.0)
        part = jnp.dot(xv.astype(jnp.bfloat16), w_refs[i][...],
                       preferred_element_type=jnp.float32)
        acc = part if acc is None else acc + part
    o_ref[...] = (acc + b_ref[...]).astype(o_ref.dtype)


def fused_matmul_pieces(pieces, w, b, scale=None, shift=None, *, relu=False,
                        out_dtype=jnp.bfloat16):
    """pieces: list of (M, C_i) arrays; w: (sum C_i, Nout); b: (Nout,)."""
    M = int(pieces[0].shape[0])
    chans = [int(p.shape[1]) for p in pieces]
    n = len(chans)
    K = sum(chans)
    Nout = int(w.shape[1])

    # >= 2 M tiles whenever possible (keeps both v7x TensorCores busy via the
    # "parallel" axis), TM <= 512 so blocks stay small on every generation.
    TM = min(512, max(8, _round_up(_cdiv(M, 2), 8)))
    Mp = _round_up(M, TM)

    xs = [p.astype(jnp.bfloat16) for p in pieces]
    if Mp != M:
        xs = [jnp.pad(p, ((0, Mp - M), (0, 0))) for p in xs]

    offs = [0]
    for c in chans:
        offs.append(offs[-1] + c)
    ws = [w[offs[i]:offs[i + 1]].astype(jnp.bfloat16) for i in range(n)]

    args = list(xs) + list(ws)
    in_specs = ([pl.BlockSpec((TM, c), lambda i: (i, 0)) for c in chans]
                + [pl.BlockSpec((c, Nout), lambda i: (0, 0)) for c in chans])
    if relu:
        ss = [scale[offs[i]:offs[i + 1]].reshape(1, -1).astype(jnp.float32)
              for i in range(n)]
        ts = [shift[offs[i]:offs[i + 1]].reshape(1, -1).astype(jnp.float32)
              for i in range(n)]
        args += ss + ts
        in_specs += [pl.BlockSpec((1, c), lambda i: (0, 0)) for c in chans]
        in_specs += [pl.BlockSpec((1, c), lambda i: (0, 0)) for c in chans]
    args.append(b.reshape(1, Nout).astype(jnp.float32))
    in_specs.append(pl.BlockSpec((1, Nout), lambda i: (0, 0)))

    osize = jnp.dtype(out_dtype).itemsize
    flops = 2 * Mp * K * Nout
    bytes_acc = Mp * K * 2 + K * Nout * 2 + Mp * Nout * osize + 2 * K * 4 + Nout * 4

    out = pl.pallas_call(
        functools.partial(_mm_pieces_kernel, n=n, relu=relu),
        out_shape=jax.ShapeDtypeStruct((Mp, Nout), out_dtype),
        grid=(Mp // TM,),
        in_specs=in_specs,
        out_specs=pl.BlockSpec((TM, Nout), lambda i: (i, 0)),
        compiler_params=pltpu.CompilerParams(dimension_semantics=("parallel",)),
        cost_estimate=pl.CostEstimate(flops=flops, transcendentals=0,
                                      bytes_accessed=bytes_acc),
    )(*args)
    return out[:M] if Mp != M else out


# ----------------------------------------------------------------------------
# Conv layers built on the fused matmul kernel
# ----------------------------------------------------------------------------

def conv3x3(pieces, w_hwio, b, scale=None, shift=None):
    """3x3 stride-1 pad-1 conv over a list of NHWC channel pieces.

    Output-side decomposition: relu(bn(x)) @ (Ci, 9*Co) in one lane-dense MXU
    matmul (BN+ReLU fused in-kernel when scale/shift are given), then the nine
    Co-wide tap slices are zero-pad-shifted and summed.  Exact w.r.t. PyTorch's
    zero padding (padding applies to relu(bn(x))), so no border correction.
    """
    N, H, W = pieces[0].shape[:3]
    Co = int(w_hwio.shape[3])
    Ci = sum(int(p.shape[-1]) for p in pieces)
    wcat = jnp.transpose(w_hwio, (2, 0, 1, 3)).reshape(Ci, 9 * Co)
    flat = [p.reshape(N * H * W, p.shape[-1]) for p in pieces]
    y = fused_matmul_pieces(flat, wcat, jnp.zeros((9 * Co,), jnp.float32),
                            scale, shift, relu=(scale is not None),
                            out_dtype=jnp.bfloat16)
    y = y.reshape(N, H, W, 3, 3, Co)
    # TODO(synk): the 9-way shifted-slice combine is XLA glue (it fuses into a
    # single elementwise pass); an in-kernel combine needs halo BlockSpecs.
    yp = jnp.pad(y, ((0, 0), (1, 1), (1, 1), (0, 0), (0, 0), (0, 0)))
    acc = None
    for ky in range(3):
        for kx in range(3):
            term = yp[:, ky:ky + H, kx:kx + W, ky, kx, :].astype(jnp.float32)
            acc = term if acc is None else acc + term
    return (acc + b.astype(jnp.float32)).astype(jnp.bfloat16)


def conv1x1(pieces, w, b, out_dtype=jnp.bfloat16):
    N, H, W = pieces[0].shape[:3]
    Co = int(w.shape[1])
    flat = [p.reshape(N * H * W, p.shape[-1]) for p in pieces]
    out = fused_matmul_pieces(flat, w, b, relu=False, out_dtype=out_dtype)
    return out.reshape(N, H, W, Co)


def conv_transpose_3x3_s2(x, w_iohw, b):
    """PyTorch ConvTranspose2d(k=3, stride=2, padding=0), weight (Ci, Co, 3, 3),
    cropped to the top-left (2H, 2W) window (== center-crop for even dims).

    Sub-pixel decomposition:
        out[2A+dy, 2B+dx] = sum_{r,s in {0,1}} x[A-r, B-s] @ W[:, :, dy+2r, dx+2s]
    (terms with kernel index > 2 or negative x index are zero).
    """
    N, H, W, Ci = x.shape
    Co = int(w_iohw.shape[1])
    xp = jnp.pad(x, ((0, 0), (1, 0), (1, 0), (0, 0)))
    taps = [xp[:, 1 - r:1 - r + H, 1 - s:1 - s + W, :]   # tap (r,s) reads x[A-r, B-s]
            for r in range(2) for s in range(2)]
    patches = jnp.concatenate(taps, axis=-1).reshape(N * H * W, 4 * Ci)

    rows = []
    for r in range(2):
        for s in range(2):
            cols = []
            for dy in range(2):
                for dx in range(2):
                    ky, kx = dy + 2 * r, dx + 2 * s
                    if ky <= 2 and kx <= 2:
                        cols.append(w_iohw[:, :, ky, kx])
                    else:
                        cols.append(jnp.zeros((Ci, Co), w_iohw.dtype))
            rows.append(jnp.concatenate(cols, axis=1))    # (Ci, 4*Co), cols=(dy,dx)
    w_eff = jnp.concatenate(rows, axis=0)                 # (4*Ci, 4*Co), rows=(r,s)
    b_eff = jnp.tile(b, 4)

    y = fused_matmul_pieces([patches], w_eff, b_eff, relu=False,
                            out_dtype=jnp.bfloat16)       # (N*H*W, 4*Co)
    # TODO(synk): the sub-pixel interleave is an XLA transpose of the upsampled
    # tensor; a strided out_spec / in-kernel split store would remove it.
    y = y.reshape(N, H, W, 2, 2, Co).transpose(0, 1, 3, 2, 4, 5)
    return y.reshape(N, 2 * H, 2 * W, Co)


# ----------------------------------------------------------------------------
# Fused TransitionDown kernel: BN+ReLU -> 1x1 conv -> 2x2 max-pool
# ----------------------------------------------------------------------------

def _td_kernel(x_ref, s_ref, t_ref, w_ref, b_ref, o_ref):
    TR, _two, W, C = x_ref.shape
    Co = w_ref.shape[1]
    Wo = W // 2
    s = s_ref[...].reshape(1, 1, 1, C)
    t = t_ref[...].reshape(1, 1, 1, C)
    h = jnp.maximum(x_ref[...].astype(jnp.float32) * s + t, 0.0)      # BN+ReLU (f32)
    y = jnp.dot(h.reshape(TR * 2 * W, C).astype(jnp.bfloat16), w_ref[...],
                preferred_element_type=jnp.float32) + b_ref[...]       # 1x1 conv
    y = y.reshape(TR, 2, W, Co)
    rmax = jnp.maximum(y[:, 0], y[:, 1])                               # row-pair max
    rr = rmax.reshape(TR, Wo, 2, Co)
    o_ref[...] = jnp.maximum(rr[:, :, 0, :], rr[:, :, 1, :]).astype(o_ref.dtype)


def transition_down_fused(x, scale, shift, w, b):
    N, H, W, C = x.shape
    Co = int(w.shape[1])
    Ho, Wo = H // 2, W // 2
    rows = N * Ho
    # >=2 grid tiles whenever possible (v7x megacore); cap the bf16 input block
    # at ~3 MiB so the f32 intermediates keep the total well under the default
    # scoped VMEM limit on every generation (incl. v7x's 64 MiB physical).
    TR = min(_round_up(rows, 8), 256, max(8, _round_up(_cdiv(rows, 2), 8)))
    while TR > 8 and TR * 2 * W * C * 2 > (3 << 20):
        TR -= 8
    rows_p = _round_up(rows, TR)

    xr = x.astype(jnp.bfloat16).reshape(rows, 2, W, C)
    if rows_p != rows:
        xr = jnp.pad(xr, ((0, rows_p - rows), (0, 0), (0, 0), (0, 0)))

    out = pl.pallas_call(
        _td_kernel,
        out_shape=jax.ShapeDtypeStruct((rows_p, Wo, Co), jnp.bfloat16),
        grid=(rows_p // TR,),
        in_specs=[
            pl.BlockSpec((TR, 2, W, C), lambda i: (i, 0, 0, 0)),
            pl.BlockSpec((1, C), lambda i: (0, 0)),
            pl.BlockSpec((1, C), lambda i: (0, 0)),
            pl.BlockSpec((C, Co), lambda i: (0, 0)),
            pl.BlockSpec((1, Co), lambda i: (0, 0)),
        ],
        out_specs=pl.BlockSpec((TR, Wo, Co), lambda i: (i, 0, 0)),
        compiler_params=pltpu.CompilerParams(dimension_semantics=("parallel",)),
    )(xr,
      scale.reshape(1, C).astype(jnp.float32),
      shift.reshape(1, C).astype(jnp.float32),
      w.astype(jnp.bfloat16),
      b.reshape(1, Co).astype(jnp.float32))
    return out[:rows].reshape(N, Ho, Wo, Co)


# ----------------------------------------------------------------------------
# DULR spatial recurrence (SCNN-style message passing on the skip connection)
# ----------------------------------------------------------------------------

def _dir_msg(prev, w):  # prev: (N, L, C), w: (3, C, C) -- 1x3 conv along L
    L = prev.shape[1]
    pp = jnp.pad(prev, ((0, 0), (1, 1), (0, 0)))
    m = sum(jnp.einsum("nlc,cd->nld", pp[:, t:t + L, :], w[t]) for t in range(3))
    return jax.nn.relu(m)


def _scan_pass(seq, w):  # seq: (L, N, K, C), sequential along axis 0
    if seq.shape[0] == 1:
        return seq

    def step(carry, xi):
        new = xi + _dir_msg(carry, w)
        return new, new

    first = seq[0]
    _, rest = lax.scan(step, first, seq[1:])
    return jnp.concatenate([first[None], rest], axis=0)


def dulr_fwd(p, x):
    # TODO(synk): DULR is a strictly sequential per-row/per-column recurrence;
    # expressed with lax.scan (weights resident) rather than a Pallas kernel.
    x = x.astype(jnp.float32)
    xs = jnp.transpose(x, (1, 0, 2, 3))                      # (H, N, W, C)
    xs = _scan_pass(xs, p["wd"])                             # down
    xs = jnp.flip(_scan_pass(jnp.flip(xs, 0), p["wu"]), 0)   # up
    x = jnp.transpose(xs, (1, 0, 2, 3))

    xs = jnp.transpose(x, (2, 0, 1, 3))                      # (W, N, H, C)
    xs = _scan_pass(xs, p["wl"])                             # left -> right
    xs = jnp.flip(_scan_pass(jnp.flip(xs, 0), p["wr"]), 0)   # right -> left
    return jnp.transpose(xs, (1, 2, 0, 3)).astype(jnp.bfloat16)


# ----------------------------------------------------------------------------
# Parameter initialization (deterministic, synthetic)
# ----------------------------------------------------------------------------

class KeyGen:
    def __init__(self, seed=0):
        self._key = jax.random.PRNGKey(seed)

    def __call__(self):
        self._key, sub = jax.random.split(self._key)
        return sub


def init_conv(kg, kh, kw, ci, co):
    w = jax.random.normal(kg(), (kh, kw, ci, co), jnp.float32) / math.sqrt(kh * kw * ci)
    b = 0.01 * jax.random.normal(kg(), (co,), jnp.float32)
    return {"w": w, "b": b}


def init_conv1x1(kg, ci, co):
    w = jax.random.normal(kg(), (ci, co), jnp.float32) / math.sqrt(ci)
    b = 0.01 * jax.random.normal(kg(), (co,), jnp.float32)
    return {"w": w, "b": b}


def init_deconv(kg, ci, co):
    # PyTorch ConvTranspose2d weight layout: (Ci, Co, KH, KW)
    w = jax.random.normal(kg(), (ci, co, 3, 3), jnp.float32) / math.sqrt(ci * 9)
    b = 0.01 * jax.random.normal(kg(), (co,), jnp.float32)
    return {"w": w, "b": b}


def init_bn(kg, c, eps=1e-5):
    gamma = 1.0 + 0.1 * jax.random.normal(kg(), (c,), jnp.float32)
    beta = 0.1 * jax.random.normal(kg(), (c,), jnp.float32)
    mean = 0.1 * jax.random.normal(kg(), (c,), jnp.float32)
    var = jnp.abs(1.0 + 0.1 * jax.random.normal(kg(), (c,), jnp.float32))
    scale = gamma / jnp.sqrt(var + eps)
    shift = beta - mean * scale
    return {"scale": scale, "shift": shift}


def init_dense_block(kg, in_c, growth, n_layers):
    layers = []
    c = in_c
    for _ in range(n_layers):
        layers.append({"bn": init_bn(kg, c), "conv": init_conv(kg, 3, 3, c, growth)})
        c += growth
    return {"layers": layers}


def init_dulr(kg, c):
    s = 0.5 / math.sqrt(3 * c)
    return {k: s * jax.random.normal(kg(), (3, c, c), jnp.float32)
            for k in ("wd", "wu", "wl", "wr")}


def init_sdunet(kg, in_channels, down_blocks, up_blocks, bottleneck_layers,
                growth_rate, out_chans_first_conv, n_classes):
    params = {}
    skip_counts = []
    params["firstconv"] = init_conv(kg, 3, 3, in_channels, out_chans_first_conv)
    cur = out_chans_first_conv

    params["db_down"], params["td"] = [], []
    for i in range(len(down_blocks)):
        params["db_down"].append(init_dense_block(kg, cur, growth_rate, down_blocks[i]))
        cur += growth_rate * down_blocks[i]
        skip_counts.insert(0, cur)
        params["td"].append({"bn": init_bn(kg, cur), "conv": init_conv1x1(kg, cur, cur)})

    params["bottleneck"] = init_dense_block(kg, cur, growth_rate, bottleneck_layers)
    prev = growth_rate * bottleneck_layers
    cur += prev

    params["tu"], params["db_up"] = [], []
    for i in range(len(up_blocks) - 1):
        tu = init_deconv(kg, prev, prev)
        if i == 0 or i == 2:
            tu["type"] = "dulr"
            tu["dulr"] = init_dulr(kg, skip_counts[i])
        else:
            tu["type"] = "plain"
        params["tu"].append(tu)
        cur = prev + skip_counts[i]
        params["db_up"].append(init_dense_block(kg, cur, growth_rate, up_blocks[i]))
        prev = growth_rate * up_blocks[i]
        cur += prev

    tu = init_deconv(kg, prev, prev)
    tu["type"] = "plain"
    params["tu"].append(tu)
    cur = prev + skip_counts[-1]
    params["db_up"].append(init_dense_block(kg, cur, growth_rate, up_blocks[-1]))
    cur += growth_rate * up_blocks[-1]

    params["finalConv"] = init_conv1x1(kg, cur, n_classes)
    return params


# ----------------------------------------------------------------------------
# Forward pass
# ----------------------------------------------------------------------------

def dense_layer_fwd(p, pieces):
    # BN -> ReLU fused into the conv kernel; Dropout2d(0.2) is identity (eval).
    return conv3x3(pieces, p["conv"]["w"], p["conv"]["b"],
                   scale=p["bn"]["scale"], shift=p["bn"]["shift"])


def dense_block_fwd(p, pieces, upsample):
    # pieces: list of NHWC tensors; concatenation is never materialized here.
    new_feats = []
    for lp in p["layers"]:
        o = dense_layer_fwd(lp, pieces)
        pieces = pieces + [o]
        new_feats.append(o)
    return new_feats if upsample else pieces


def _concat_pieces(pieces):
    return pieces[0] if len(pieces) == 1 else jnp.concatenate(pieces, axis=-1)


def transition_down_fwd(p, x):
    # fused BN+ReLU -> 1x1 conv -> 2x2 max-pool (dropout identity in eval)
    return transition_down_fused(x, p["bn"]["scale"], p["bn"]["shift"],
                                 p["conv"]["w"], p["conv"]["b"])


def transition_up_fwd(p, x_prev, skip):
    up = conv_transpose_3x3_s2(x_prev, p["w"], p["b"])
    # With even spatial dims the center-crop offset is 0 and target = (2H, 2W),
    # which the sub-pixel deconv produces exactly.
    assert up.shape[1] == skip.shape[1] and up.shape[2] == skip.shape[2]
    if p["type"] == "dulr":
        skip = dulr_fwd(p["dulr"], skip)
    return [up, skip]        # channel order matches torch.cat([out, skip], 1)


def sdunet_forward(params, x_nchw):
    x = jnp.transpose(x_nchw, (0, 2, 3, 1)).astype(jnp.float32)  # NCHW -> NHWC
    n_down = len(params["db_down"])
    assert x.shape[1] % (2 ** n_down) == 0 and x.shape[2] % (2 ** n_down) == 0

    out = conv3x3([x], params["firstconv"]["w"], params["firstconv"]["b"])
    pieces = [out]

    skips = []
    for i in range(n_down):
        pieces = dense_block_fwd(params["db_down"][i], pieces, upsample=False)
        skip = _concat_pieces(pieces)          # one concat per block (skip + TD input)
        skips.append(skip)
        pieces = [transition_down_fwd(params["td"][i], skip)]

    new_feats = dense_block_fwd(params["bottleneck"], pieces, upsample=True)
    prev = _concat_pieces(new_feats)

    n_up = len(params["db_up"])
    for i in range(n_up):
        skip = skips.pop()
        pieces = transition_up_fwd(params["tu"][i], prev, skip)
        if i < n_up - 1:
            new_feats = dense_block_fwd(params["db_up"][i], pieces, upsample=True)
            prev = _concat_pieces(new_feats)
        else:
            pieces = dense_block_fwd(params["db_up"][i], pieces, upsample=False)

    out = conv1x1(pieces, params["finalConv"]["w"], params["finalConv"]["b"],
                  out_dtype=jnp.float32)
    return jnp.transpose(out, (0, 3, 1, 2))  # NHWC -> NCHW


# ----------------------------------------------------------------------------
# Demo
# ----------------------------------------------------------------------------

if __name__ == "__main__":
    in_channels = 3
    down_blocks = (2, 2)
    up_blocks = (2, 2)
    bottleneck_layers = 2
    growth_rate = 4
    out_chans_first_conv = 8
    n_classes = 3
    N, H, W = 2, 16, 16

    kg = KeyGen(0)
    params = init_sdunet(kg, in_channels, down_blocks, up_blocks,
                         bottleneck_layers, growth_rate,
                         out_chans_first_conv, n_classes)

    x = jax.random.normal(jax.random.PRNGKey(0), (N, in_channels, H, W), jnp.float32)

    fwd = jax.jit(lambda inp: sdunet_forward(params, inp))
    y = fwd(x)
    jax.block_until_ready(y)

    assert y.shape == (N, n_classes, H, W), y.shape
    assert bool(jnp.all(jnp.isfinite(y)))
    print("KERNEL_OK")
</pallas_src>

<mosaic_0001>
module attributes {stable_mosaic.version = 11 : i64} {
  func.func @_mm_pieces_kernel(%arg0: i32, %arg1: memref<256x3xbf16, #tpu.memory_space<vmem>>, %arg2: memref<3x72xbf16, #tpu.memory_space<vmem>>, %arg3: memref<1x72xf32, #tpu.memory_space<vmem>>, %arg4: memref<256x72xbf16, #tpu.memory_space<vmem>>) attributes {dimension_semantics = [#tpu.dimension_semantics<parallel>], iteration_bounds = array<i64: 2>, scalar_prefetch = 0 : i64, scratch_operands = 0 : i64, tpu.core_type = #tpu.core_type<tc>, window_params = [{transform_indices = @transform_0, window_bounds = array<i64: 256, 3>}, {pipeline_mode = #tpu.pipeline_mode<synchronous>, transform_indices = @transform_1, window_bounds = array<i64: 3, 72>}, {pipeline_mode = #tpu.pipeline_mode<synchronous>, transform_indices = @transform_2, window_bounds = array<i64: 1, 72>}, {transform_indices = @transform_3, window_bounds = array<i64: 256, 72>}]} {
    %c0 = arith.constant 0 : index
    %c0_0 = arith.constant 0 : index
    %0 = vector.load %arg1[%c0, %c0_0] : memref<256x3xbf16, #tpu.memory_space<vmem>>, vector<256x3xbf16>
    %c0_1 = arith.constant 0 : index
    %c0_2 = arith.constant 0 : index
    %1 = vector.load %arg2[%c0_1, %c0_2] : memref<3x72xbf16, #tpu.memory_space<vmem>>, vector<3x72xbf16>
    %cst = arith.constant dense<0.000000e+00> : vector<256x72xf32>
    %2 = tpu.matmul %0, %1, %cst {dimension_numbers = #tpu.dot_dimension_numbers<[1], [0], [0], [1], [0, 0, 1, 1], [], []>} : vector<256x3xbf16>, vector<3x72xbf16>, vector<256x72xf32> -> vector<256x72xf32>
    %c0_3 = arith.constant 0 : index
    %c0_4 = arith.constant 0 : index
    %3 = vector.load %arg3[%c0_3, %c0_4] : memref<1x72xf32, #tpu.memory_space<vmem>>, vector<1x72xf32>
    %4 = vector.broadcast %3 : vector<1x72xf32> to vector<256x72xf32>
    %5 = arith.addf %2, %4 : vector<256x72xf32>
    %6 = arith.truncf %5 : vector<256x72xf32> to vector<256x72xbf16>
    %c0_5 = arith.constant 0 : index
    %c0_6 = arith.constant 0 : index
    %7 = vector.load %arg4[%c0_5, %c0_6] : memref<256x72xbf16, #tpu.memory_space<vmem>>, vector<256x72xbf16>
    tpu.vector_store %arg4[%c0_5, %c0_6], %6 {strides = array<i32>} : memref<256x72xbf16, #tpu.memory_space<vmem>>, vector<256x72xbf16>,
    return
  }
  func.func @transform_0(%arg0: i32) -> (i32, i32) {
    %c0_i32 = arith.constant 0 : i32
    %c0_i32_0 = arith.constant 0 : i32
    return %arg0, %c0_i32 : i32, i32
  }
  func.func @transform_1(%arg0: i32) -> (i32, i32) {
    %c0_i32 = arith.constant 0 : i32
    %c0_i32_0 = arith.constant 0 : i32
    %c0_i32_1 = arith.constant 0 : i32
    return %c0_i32, %c0_i32_0 : i32, i32
  }
  func.func @transform_2(%arg0: i32) -> (i32, i32) {
    %c0_i32 = arith.constant 0 : i32
    %c0_i32_0 = arith.constant 0 : i32
    %c0_i32_1 = arith.constant 0 : i32
    return %c0_i32, %c0_i32_0 : i32, i32
  }
  func.func @transform_3(%arg0: i32) -> (i32, i32) {
    %c0_i32 = arith.constant 0 : i32
    %c0_i32_0 = arith.constant 0 : i32
    return %arg0, %c0_i32 : i32, i32
  }
}

module attributes {stable_mosaic.version = 11 : i64} {
  func.func @_mm_pieces_kernel(%arg0: i32, %arg1: memref<256x8xbf16, #tpu.memory_space<vmem>>, %arg2: memref<8x36xbf16, #tpu.memory_space<vmem>>, %arg3: memref<1x8xf32, #tpu.memory_space<vmem>>, %arg4: memref<1x8xf32, #tpu.memory_space<vmem>>, %arg5: memref<1x36xf32, #tpu.memory_space<vmem>>, %arg6: memref<256x36xbf16, #tpu.memory_space<vmem>>) attributes {dimension_semantics = [#tpu.dimension_semantics<parallel>], iteration_bounds = array<i64: 2>, scalar_prefetch = 0 : i64, scratch_operands = 0 : i64, tpu.core_type = #tpu.core_type<tc>, window_params = [{transform_indices = @transform_0, window_bounds = array<i64: 256, 8>}, {pipeline_mode = #tpu.pipeline_mode<synchronous>, transform_indices = @transform_1, window_bounds = array<i64: 8, 36>}, {pipeline_mode = #tpu.pipeline_mode<synchronous>, transform_indices = @transform_2, window_bounds = array<i64: 1, 8>}, {pipeline_mode = #tpu.pipeline_mode<synchronous>, transform_indices = @transform_3, window_bounds = array<i64: 1, 8>}, {pipeline_mode = #tpu.pipeline_mode<synchronous>, transform_indices = @transform_4, window_bounds = array<i64: 1, 36>}, {transform_indices = @transform_5, window_bounds = array<i64: 256, 36>}]} {
    %c0 = arith.constant 0 : index
    %c0_0 = arith.constant 0 : index
    %0 = vector.load %arg1[%c0, %c0_0] : memref<256x8xbf16, #tpu.memory_space<vmem>>, vector<256x8xbf16>
    %1 = arith.extf %0 : vector<256x8xbf16> to vector<256x8xf32>
    %c0_1 = arith.constant 0 : index
    %c0_2 = arith.constant 0 : index
    %2 = vector.load %arg3[%c0_1, %c0_2] : memref<1x8xf32, #tpu.memory_space<vmem>>, vector<1x8xf32>
    %3 = vector.broadcast %2 : vector<1x8xf32> to vector<256x8xf32>
    %4 = arith.mulf %1, %3 : vector<256x8xf32>
    %c0_3 = arith.constant 0 : index
    %c0_4 = arith.constant 0 : index
    %5 = vector.load %arg4[%c0_3, %c0_4] : memref<1x8xf32, #tpu.memory_space<vmem>>, vector<1x8xf32>
    %6 = vector.broadcast %5 : vector<1x8xf32> to vector<256x8xf32>
    %7 = arith.addf %4, %6 : vector<256x8xf32>
    %cst = arith.constant 0.000000e+00 : f32
    %8 = vector.broadcast %cst : f32 to vector<256x8xf32>
    %9 = arith.maximumf %7, %8 : vector<256x8xf32>
    %10 = arith.truncf %9 : vector<256x8xf32> to vector<256x8xbf16>
    %c0_5 = arith.constant 0 : index
    %c0_6 = arith.constant 0 : index
    %11 = vector.load %arg2[%c0_5, %c0_6] : memref<8x36xbf16, #tpu.memory_space<vmem>>, vector<8x36xbf16>
    %cst_7 = arith.constant dense<0.000000e+00> : vector<256x36xf32>
    %12 = tpu.matmul %10, %11, %cst_7 {dimension_numbers = #tpu.dot_dimension_numbers<[1], [0], [0], [1], [0, 0, 1, 1], [], []>} : vector<256x8xbf16>, vector<8x36xbf16>, vector<256x36xf32> -> vector<256x36xf32>
    %c0_8 = arith.constant 0 : index
    %c0_9 = arith.constant 0 : index
    %13 = vector.load %arg5[%c0_8, %c0_9] : memref<1x36xf32, #tpu.memory_space<vmem>>, vector<1x36xf32>
    %14 = vector.broadcast %13 : vector<1x36xf32> to vector<256x36xf32>
    %15 = arith.addf %12, %14 : vector<256x36xf32>
    %16 = arith.truncf %15 : vector<256x36xf32> to vector<256x36xbf16>
    %c0_10 = arith.constant 0 : index
    %c0_11 = arith.constant 0 : index
    %17 = vector.load %arg6[%c0_10, %c0_11] : memref<256x36xbf16, #tpu.memory_space<vmem>>, vector<256x36xbf16>
    tpu.vector_store %arg6[%c0_10, %c0_11], %16 {strides = array<i32>} : memref<256x36xbf16, #tpu.memory_space<vmem>>, vector<256x36xbf16>,
    return
  }
  func.func @transform_0(%arg0: i32) -> (i32, i32) {
    %c0_i32 = arith.constant 0 : i32
    %c0_i32_0 = arith.constant 0 : i32
    return %arg0, %c0_i32 : i32, i32
  }
  func.func @transform_1(%arg0: i32) -> (i32, i32) {
    %c0_i32 = arith.constant 0 : i32
    %c0_i32_0 = arith.constant 0 : i32
    %c0_i32_1 = arith.constant 0 : i32
    return %c0_i32, %c0_i32_0 : i32, i32
  }
  func.func @transform_2(%arg0: i32) -> (i32, i32) {
    %c0_i32 = arith.constant 0 : i32
    %c0_i32_0 = arith.constant 0 : i32
    %c0_i32_1 = arith.constant 0 : i32
    return %c0_i32, %c0_i32_0 : i32, i32
  }
  func.func @transform_3(%arg0: i32) -> (i32, i32) {
    %c0_i32 = arith.constant 0 : i32
    %c0_i32_0 = arith.constant 0 : i32
    %c0_i32_1 = arith.constant 0 : i32
    return %c0_i32, %c0_i32_0 : i32, i32
  }
  func.func @transform_4(%arg0: i32) -> (i32, i32) {
    %c0_i32 = arith.constant 0 : i32
    %c0_i32_0 = arith.constant 0 : i32
    %c0_i32_1 = arith.constant 0 : i32
    return %c0_i32, %c0_i32_0 : i32, i32
  }
  func.func @transform_5(%arg0: i32) -> (i32, i32) {
    %c0_i32 = arith.constant 0 : i32
    %c0_i32_0 = arith.constant 0 : i32
    return %arg0, %c0_i32 : i32, i32
  }
}

module attributes {stable_mosaic.version = 11 : i64} {
  func.func @_mm_pieces_kernel(%arg0: i32, %arg1: memref<256x8xbf16, #tpu.memory_space<vmem>>, %arg2: memref<256x4xbf16, #tpu.memory_space<vmem>>, %arg3: memref<8x36xbf16, #tpu.memory_space<vmem>>, %arg4: memref<4x36xbf16, #tpu.memory_space<vmem>>, %arg5: memref<1x8xf32, #tpu.memory_space<vmem>>, %arg6: memref<1x4xf32, #tpu.memory_space<vmem>>, %arg7: memref<1x8xf32, #tpu.memory_space<vmem>>, %arg8: memref<1x4xf32, #tpu.memory_space<vmem>>, %arg9: memref<1x36xf32, #tpu.memory_space<vmem>>, %arg10: memref<256x36xbf16, #tpu.memory_space<vmem>>) attributes {dimension_semantics = [#tpu.dimension_semantics<parallel>], iteration_bounds = array<i64: 2>, scalar_prefetch = 0 : i64, scratch_operands = 0 : i64, tpu.core_type = #tpu.core_type<tc>, window_params = [{transform_indices = @transform_0, window_bounds = array<i64: 256, 8>}, {transform_indices = @transform_1, window_bounds = array<i64: 256, 4>}, {pipeline_mode = #tpu.pipeline_mode<synchronous>, transform_indices = @transform_2, window_bounds = array<i64: 8, 36>}, {pipeline_mode = #tpu.pipeline_mode<synchronous>, transform_indices = @transform_3, window_bounds = array<i64: 4, 36>}, {pipeline_mode = #tpu.pipeline_mode<synchronous>, transform_indices = @transform_4, window_bounds = array<i64: 1, 8>}, {pipeline_mode = #tpu.pipeline_mode<synchronous>, transform_indices = @transform_5, window_bounds = array<i64: 1, 4>}, {pipeline_mode = #tpu.pipeline_mode<synchronous>, transform_indices = @transform_6, window_bounds = array<i64: 1, 8>}, {pipeline_mode = #tpu.pipeline_mode<synchronous>, transform_indices = @transform_7, window_bounds = array<i64: 1, 4>}, {pipeline_mode = #tpu.pipeline_mode<synchronous>, transform_indices = @transform_8, window_bounds = array<i64: 1, 36>}, {transform_indices = @transform_9, window_bounds = array<i64: 256, 36>}]} {
    %c0 = arith.constant 0 : index
    %c0_0 = arith.constant 0 : index
    %0 = vector.load %arg1[%c0, %c0_0] : memref<256x8xbf16, #tpu.memory_space<vmem>>, vector<256x8xbf16>
    %1 = arith.extf %0 : vector<256x8xbf16> to vector<256x8xf32>
    %c0_1 = arith.constant 0 : index
    %c0_2 = arith.constant 0 : index
    %2 = vector.load %arg5[%c0_1, %c0_2] : memref<1x8xf32, #tpu.memory_space<vmem>>, vector<1x8xf32>
    %3 = vector.broadcast %2 : vector<1x8xf32> to vector<256x8xf32>
    %4 = arith.mulf %1, %3 : vector<256x8xf32>
    %c0_3 = arith.constant 0 : index
    %c0_4 = arith.constant 0 : index
    %5 = vector.load %arg7[%c0_3, %c0_4] : memref<1x8xf32, #tpu.memory_space<vmem>>, vector<1x8xf32>
    %6 = vector.broadcast %5 : vector<1x8xf32> to vector<256x8xf32>
    %7 = arith.addf %4, %6 : vector<256x8xf32>
    %cst = arith.constant 0.000000e+00 : f32
    %8 = vector.broadcast %cst : f32 to vector<256x8xf32>
    %9 = arith.maximumf %7, %8 : vector<256x8xf32>
    %10 = arith.truncf %9 : vector<256x8xf32> to vector<256x8xbf16>
    %c0_5 = arith.constant 0 : index
    %c0_6 = arith.constant 0 : index
    %11 = vector.load %arg3[%c0_5, %c0_6] : memref<8x36xbf16, #tpu.memory_space<vmem>>, vector<8x36xbf16>
    %cst_7 = arith.constant dense<0.000000e+00> : vector<256x36xf32>
    %12 = tpu.matmul %10, %11, %cst_7 {dimension_numbers = #tpu.dot_dimension_numbers<[1], [0], [0], [1], [0, 0, 1, 1], [], []>} : vector<256x8xbf16>, vector<8x36xbf16>, vector<256x36xf32> -> vector<256x36xf32>
    %c0_8 = arith.constant 0 : index
    %c0_9 = arith.constant 0 : index
    %13 = vector.load %arg2[%c0_8, %c0_9] : memref<256x4xbf16, #tpu.memory_space<vmem>>, vector<256x4xbf16>
    %14 = arith.extf %13 : vector<256x4xbf16> to vector<256x4xf32>
    %c0_10 = arith.constant 0 : index
    %c0_11 = arith.constant 0 : index
    %15 = vector.load %arg6[%c0_10, %c0_11] : memref<1x4xf32, #tpu.memory_space<vmem>>, vector<1x4xf32>
    %16 = vector.broadcast %15 : vector<1x4xf32> to vector<256x4xf32>
    %17 = arith.mulf %14, %16 : vector<256x4xf32>
    %c0_12 = arith.constant 0 : index
    %c0_13 = arith.constant 0 : index
    %18 = vector.load %arg8[%c0_12, %c0_13] : memref<1x4xf32, #tpu.memory_space<vmem>>, vector<1x4xf32>
    %19 = vector.broadcast %18 : vector<1x4xf32> to vector<256x4xf32>
    %20 = arith.addf %17, %19 : vector<256x4xf32>
    %cst_14 = arith.constant 0.000000e+00 : f32
    %21 = vector.broadcast %cst_14 : f32 to vector<256x4xf32>
    %22 = arith.maximumf %20, %21 : vector<256x4xf32>
    %23 = arith.truncf %22 : vector<256x4xf32> to vector<256x4xbf16>
    %c0_15 = arith.constant 0 : index
    %c0_16 = arith.constant 0 : index
    %24 = vector.load %arg4[%c0_15, %c0_16] : memref<4x36xbf16, #tpu.memory_space<vmem>>, vector<4x36xbf16>
    %cst_17 = arith.constant dense<0.000000e+00> : vector<256x36xf32>
    %25 = tpu.matmul %23, %24, %cst_17 {dimension_numbers = #tpu.dot_dimension_numbers<[1], [0], [0], [1], [0, 0, 1, 1], [], []>} : vector<256x4xbf16>, vector<4x36xbf16>, vector<256x36xf32> -> vector<256x36xf32>
    %26 = arith.addf %12, %25 : vector<256x36xf32>
    %c0_18 = arith.constant 0 : index
    %c0_19 = arith.constant 0 : index
    %27 = vector.load %arg9[%c0_18, %c0_19] : memref<1x36xf32, #tpu.memory_space<vmem>>, vector<1x36xf32>
    %28 = vector.broadcast %27 : vector<1x36xf32> to vector<256x36xf32>
    %29 = arith.addf %26, %28 : vector<256x36xf32>
    %30 = arith.truncf %29 : vector<256x36xf32> to vector<256x36xbf16>
    %c0_20 = arith.constant 0 : index
    %c0_21 = arith.constant 0 : index
    %31 = vector.load %arg10[%c0_20, %c0_21] : memref<256x36xbf16, #tpu.memory_space<vmem>>, vector<256x36xbf16>
    tpu.vector_store %arg10[%c0_20, %c0_21], %30 {strides = array<i32>} : memref<256x36xbf16, #tpu.memory_space<vmem>>, vector<256x36xbf16>,
    return
  }
  func.func @transform_0(%arg0: i32) -> (i32, i32) {
    %c0_i32 = arith.constant 0 : i32
    %c0_i32_0 = arith.constant 0 : i32
    return %arg0, %c0_i32 : i32, i32
  }
  func.func @transform_1(%arg0: i32) -> (i32, i32) {
    %c0_i32 = arith.constant 0 : i32
    %c0_i32_0 = arith.constant 0 : i32
    return %arg0, %c0_i32 : i32, i32
  }
  func.func @transform_2(%arg0: i32) -> (i32, i32) {
    %c0_i32 = arith.constant 0 : i32
    %c0_i32_0 = arith.constant 0 : i32
    %c0_i32_1 = arith.constant 0 : i32
    return %c0_i32, %c0_i32_0 : i32, i32
  }
  func.func @transform_3(%arg0: i32) -> (i32, i32) {
    %c0_i32 = arith.constant 0 : i32
    %c0_i32_0 = arith.constant 0 : i32
    %c0_i32_1 = arith.constant 0 : i32
    return %c0_i32, %c0_i32_0 : i32, i32
  }
  func.func @transform_4(%arg0: i32) -> (i32, i32) {
    %c0_i32 = arith.constant 0 : i32
    %c0_i32_0 = arith.constant 0 : i32
    %c0_i32_1 = arith.constant 0 : i32
    return %c0_i32, %c0_i32_0 : i32, i32
  }
  func.func @transform_5(%arg0: i32) -> (i32, i32) {
    %c0_i32 = arith.constant 0 : i32
    %c0_i32_0 = arith.constant 0 : i32
    %c0_i32_1 = arith.constant 0 : i32
    return %c0_i32, %c0_i32_0 : i32, i32
  }
  func.func @transform_6(%arg0: i32) -> (i32, i32) {
    %c0_i32 = arith.constant 0 : i32
    %c0_i32_0 = arith.constant 0 : i32
    %c0_i32_1 = arith.constant 0 : i32
    return %c0_i32, %c0_i32_0 : i32, i32
  }
  func.func @transform_7(%arg0: i32) -> (i32, i32) {
    %c0_i32 = arith.constant 0 : i32
    %c0_i32_0 = arith.constant 0 : i32
    %c0_i32_1 = arith.constant 0 : i32
    return %c0_i32, %c0_i32_0 : i32, i32
  }
  func.func @transform_8(%arg0: i32) -> (i32, i32) {
    %c0_i32 = arith.constant 0 : i32
    %c0_i32_0 = arith.constant 0 : i32
    %c0_i32_1 = arith.constant 0 : i32
    return %c0_i32, %c0_i32_0 : i32, i32
  }
  func.func @transform_9(%arg0: i32) -> (i32, i32) {
    %c0_i32 = arith.constant 0 : i32
    %c0_i32_0 = arith.constant 0 : i32
    return %arg0, %c0_i32 : i32, i32
  }
}

module attributes {stable_mosaic.version = 11 : i64} {
  func.func @_td_kernel(%arg0: i32, %arg1: memref<8x2x16x16xbf16, #tpu.memory_space<vmem>>, %arg2: memref<1x16xf32, #tpu.memory_space<vmem>>, %arg3: memref<1x16xf32, #tpu.memory_space<vmem>>, %arg4: memref<16x16xbf16, #tpu.memory_space<vmem>>, %arg5: memref<1x16xf32, #tpu.memory_space<vmem>>, %arg6: memref<8x8x16xbf16, #tpu.memory_space<vmem>>) attributes {dimension_semantics = [#tpu.dimension_semantics<parallel>], iteration_bounds = array<i64: 2>, scalar_prefetch = 0 : i64, scratch_operands = 0 : i64, tpu.core_type = #tpu.core_type<tc>, window_params = [{transform_indices = @transform_0, window_bounds = array<i64: 8, 2, 16, 16>}, {pipeline_mode = #tpu.pipeline_mode<synchronous>, transform_indices = @transform_1, window_bounds = array<i64: 1, 16>}, {pipeline_mode = #tpu.pipeline_mode<synchronous>, transform_indices = @transform_2, window_bounds = array<i64: 1, 16>}, {pipeline_mode = #tpu.pipeline_mode<synchronous>, transform_indices = @transform_3, window_bounds = array<i64: 16, 16>}, {pipeline_mode = #tpu.pipeline_mode<synchronous>, transform_indices = @transform_4, window_bounds = array<i64: 1, 16>}, {transform_indices = @transform_5, window_bounds = array<i64: 8, 8, 16>}]} {
    %c0 = arith.constant 0 : index
    %c0_0 = arith.constant 0 : index
    %0 = vector.load %arg2[%c0, %c0_0] : memref<1x16xf32, #tpu.memory_space<vmem>>, vector<1x16xf32>
    %1 = vector.shape_cast %0 : vector<1x16xf32> to vector<1x1x1x16xf32>
    %c0_1 = arith.constant 0 : index
    %c0_2 = arith.constant 0 : index
    %2 = vector.load %arg3[%c0_1, %c0_2] : memref<1x16xf32, #tpu.memory_space<vmem>>, vector<1x16xf32>
    %3 = vector.shape_cast %2 : vector<1x16xf32> to vector<1x1x1x16xf32>
    %c0_3 = arith.constant 0 : index
    %c0_4 = arith.constant 0 : index
    %c0_5 = arith.constant 0 : index
    %c0_6 = arith.constant 0 : index
    %4 = vector.load %arg1[%c0_3, %c0_4, %c0_5, %c0_6] : memref<8x2x16x16xbf16, #tpu.memory_space<vmem>>, vector<8x2x16x16xbf16>
    %5 = arith.extf %4 : vector<8x2x16x16xbf16> to vector<8x2x16x16xf32>
    %6 = vector.broadcast %1 : vector<1x1x1x16xf32> to vector<8x2x16x16xf32>
    %7 = arith.mulf %5, %6 : vector<8x2x16x16xf32>
    %8 = vector.broadcast %3 : vector<1x1x1x16xf32> to vector<8x2x16x16xf32>
    %9 = arith.addf %7, %8 : vector<8x2x16x16xf32>
    %cst = arith.constant 0.000000e+00 : f32
    %10 = vector.broadcast %cst : f32 to vector<8x2x16x16xf32>
    %11 = arith.maximumf %9, %10 : vector<8x2x16x16xf32>
    %12 = vector.shape_cast %11 : vector<8x2x16x16xf32> to vector<256x16xf32>
    %13 = arith.truncf %12 : vector<256x16xf32> to vector<256x16xbf16>
    %c0_7 = arith.constant 0 : index
    %c0_8 = arith.constant 0 : index
    %14 = vector.load %arg4[%c0_7, %c0_8] : memref<16x16xbf16, #tpu.memory_space<vmem>>, vector<16x16xbf16>
    %cst_9 = arith.constant dense<0.000000e+00> : vector<256x16xf32>
    %15 = tpu.matmul %13, %14, %cst_9 {dimension_numbers = #tpu.dot_dimension_numbers<[1], [0], [0], [1], [0, 0, 1, 1], [], []>} : vector<256x16xbf16>, vector<16x16xbf16>, vector<256x16xf32> -> vector<256x16xf32>
    %c0_10 = arith.constant 0 : index
    %c0_11 = arith.constant 0 : index
    %16 = vector.load %arg5[%c0_10, %c0_11] : memref<1x16xf32, #tpu.memory_space<vmem>>, vector<1x16xf32>
    %17 = vector.broadcast %16 : vector<1x16xf32> to vector<256x16xf32>
    %18 = arith.addf %15, %17 : vector<256x16xf32>
    %19 = vector.shape_cast %18 : vector<256x16xf32> to vector<8x2x16x16xf32>
    %20 = vector.extract_strided_slice %19 {offsets = [0, 0, 0, 0], sizes = [8, 1, 16, 16], strides = [1, 1, 1, 1]} : vector<8x2x16x16xf32> to vector<8x1x16x16xf32>
    %21 = vector.shape_cast %20 : vector<8x1x16x16xf32> to vector<8x16x16xf32>
    %22 = vector.extract_strided_slice %19 {offsets = [0, 1, 0, 0], sizes = [8, 1, 16, 16], strides = [1, 1, 1, 1]} : vector<8x2x16x16xf32> to vector<8x1x16x16xf32>
    %23 = vector.shape_cast %22 : vector<8x1x16x16xf32> to vector<8x16x16xf32>
    %24 = arith.maximumf %21, %23 : vector<8x16x16xf32>
    %25 = vector.shape_cast %24 : vector<8x16x16xf32> to vector<8x8x2x16xf32>
    %26 = vector.extract_strided_slice %25 {offsets = [0, 0, 0, 0], sizes = [8, 8, 1, 16], strides = [1, 1, 1, 1]} : vector<8x8x2x16xf32> to vector<8x8x1x16xf32>
    %27 = vector.shape_cast %26 : vector<8x8x1x16xf32> to vector<8x8x16xf32>
    %28 = vector.extract_strided_slice %25 {offsets = [0, 0, 1, 0], sizes = [8, 8, 1, 16], strides = [1, 1, 1, 1]} : vector<8x8x2x16xf32> to vector<8x8x1x16xf32>
    %29 = vector.shape_cast %28 : vector<8x8x1x16xf32> to vector<8x8x16xf32>
    %30 = arith.maximumf %27, %29 : vector<8x8x16xf32>
    %31 = arith.truncf %30 : vector<8x8x16xf32> to vector<8x8x16xbf16>
    %c0_12 = arith.constant 0 : index
    %c0_13 = arith.constant 0 : index
    %c0_14 = arith.constant 0 : index
    %32 = vector.load %arg6[%c0_12, %c0_13, %c0_14] : memref<8x8x16xbf16, #tpu.memory_space<vmem>>, vector<8x8x16xbf16>
    tpu.vector_store %arg6[%c0_12, %c0_13, %c0_14], %31 {strides = array<i32>} : memref<8x8x16xbf16, #tpu.memory_space<vmem>>, vector<8x8x16xbf16>,
    return
  }
  func.func @transform_0(%arg0: i32) -> (i32, i32, i32, i32) {
    %c0_i32 = arith.constant 0 : i32
    %c0_i32_0 = arith.constant 0 : i32
    %c0_i32_1 = arith.constant 0 : i32
    %c0_i32_2 = arith.constant 0 : i32
    return %arg0, %c0_i32, %c0_i32_0, %c0_i32_1 : i32, i32, i32, i32
  }
  func.func @transform_1(%arg0: i32) -> (i32, i32) {
    %c0_i32 = arith.constant 0 : i32
    %c0_i32_0 = arith.constant 0 : i32
    %c0_i32_1 = arith.constant 0 : i32
    return %c0_i32, %c0_i32_0 : i32, i32
  }
  func.func @transform_2(%arg0: i32) -> (i32, i32) {
    %c0_i32 = arith.constant 0 : i32
    %c0_i32_0 = arith.constant 0 : i32
    %c0_i32_1 = arith.constant 0 : i32
    return %c0_i32, %c0_i32_0 : i32, i32
  }
  func.func @transform_3(%arg0: i32) -> (i32, i32) {
    %c0_i32 = arith.constant 0 : i32
    %c0_i32_0 = arith.constant 0 : i32
    %c0_i32_1 = arith.constant 0 : i32
    return %c0_i32, %c0_i32_0 : i32, i32
  }
  func.func @transform_4(%arg0: i32) -> (i32, i32) {
    %c0_i32 = arith.constant 0 : i32
    %c0_i32_0 = arith.constant 0 : i32
    %c0_i32_1 = arith.constant 0 : i32
    return %c0_i32, %c0_i32_0 : i32, i32
  }
  func.func @transform_5(%arg0: i32) -> (i32, i32, i32) {
    %c0_i32 = arith.constant 0 : i32
    %c0_i32_0 = arith.constant 0 : i32
    %c0_i32_1 = arith.constant 0 : i32
    return %arg0, %c0_i32, %c0_i32_0 : i32, i32, i32
  }
}

module attributes {stable_mosaic.version = 11 : i64} {
  func.func @_mm_pieces_kernel(%arg0: i32, %arg1: memref<64x16xbf16, #tpu.memory_space<vmem>>, %arg2: memref<16x36xbf16, #tpu.memory_space<vmem>>, %arg3: memref<1x16xf32, #tpu.memory_space<vmem>>, %arg4: memref<1x16xf32, #tpu.memory_space<vmem>>, %arg5: memref<1x36xf32, #tpu.memory_space<vmem>>, %arg6: memref<64x36xbf16, #tpu.memory_space<vmem>>) attributes {dimension_semantics = [#tpu.dimension_semantics<parallel>], iteration_bounds = array<i64: 2>, scalar_prefetch = 0 : i64, scratch_operands = 0 : i64, tpu.core_type = #tpu.core_type<tc>, window_params = [{transform_indices = @transform_0, window_bounds = array<i64: 64, 16>}, {pipeline_mode = #tpu.pipeline_mode<synchronous>, transform_indices = @transform_1, window_bounds = array<i64: 16, 36>}, {pipeline_mode = #tpu.pipeline_mode<synchronous>, transform_indices = @transform_2, window_bounds = array<i64: 1, 16>}, {pipeline_mode = #tpu.pipeline_mode<synchronous>, transform_indices = @transform_3, window_bounds = array<i64: 1, 16>}, {pipeline_mode = #tpu.pipeline_mode<synchronous>, transform_indices = @transform_4, window_bounds = array<i64: 1, 36>}, {transform_indices = @transform_5, window_bounds = array<i64: 64, 36>}]} {
    %c0 = arith.constant 0 : index
    %c0_0 = arith.constant 0 : index
    %0 = vector.load %arg1[%c0, %c0_0] : memref<64x16xbf16, #tpu.memory_space<vmem>>, vector<64x16xbf16>
    %1 = arith.extf %0 : vector<64x16xbf16> to vector<64x16xf32>
    %c0_1 = arith.constant 0 : index
    %c0_2 = arith.constant 0 : index
    %2 = vector.load %arg3[%c0_1, %c0_2] : memref<1x16xf32, #tpu.memory_space<vmem>>, vector<1x16xf32>
    %3 = vector.broadcast %2 : vector<1x16xf32> to vector<64x16xf32>
    %4 = arith.mulf %1, %3 : vector<64x16xf32>
    %c0_3 = arith.constant 0 : index
    %c0_4 = arith.constant 0 : index
    %5 = vector.load %arg4[%c0_3, %c0_4] : memref<1x16xf32, #tpu.memory_space<vmem>>, vector<1x16xf32>
    %6 = vector.broadcast %5 : vector<1x16xf32> to vector<64x16xf32>
    %7 = arith.addf %4, %6 : vector<64x16xf32>
    %cst = arith.constant 0.000000e+00 : f32
    %8 = vector.broadcast %cst : f32 to vector<64x16xf32>
    %9 = arith.maximumf %7, %8 : vector<64x16xf32>
    %10 = arith.truncf %9 : vector<64x16xf32> to vector<64x16xbf16>
    %c0_5 = arith.constant 0 : index
    %c0_6 = arith.constant 0 : index
    %11 = vector.load %arg2[%c0_5, %c0_6] : memref<16x36xbf16, #tpu.memory_space<vmem>>, vector<16x36xbf16>
    %cst_7 = arith.constant dense<0.000000e+00> : vector<64x36xf32>
    %12 = tpu.matmul %10, %11, %cst_7 {dimension_numbers = #tpu.dot_dimension_numbers<[1], [0], [0], [1], [0, 0, 1, 1], [], []>} : vector<64x16xbf16>, vector<16x36xbf16>, vector<64x36xf32> -> vector<64x36xf32>
    %c0_8 = arith.constant 0 : index
    %c0_9 = arith.constant 0 : index
    %13 = vector.load %arg5[%c0_8, %c0_9] : memref<1x36xf32, #tpu.memory_space<vmem>>, vector<1x36xf32>
    %14 = vector.broadcast %13 : vector<1x36xf32> to vector<64x36xf32>
    %15 = arith.addf %12, %14 : vector<64x36xf32>
    %16 = arith.truncf %15 : vector<64x36xf32> to vector<64x36xbf16>
    %c0_10 = arith.constant 0 : index
    %c0_11 = arith.constant 0 : index
    %17 = vector.load %arg6[%c0_10, %c0_11] : memref<64x36xbf16, #tpu.memory_space<vmem>>, vector<64x36xbf16>
    tpu.vector_store %arg6[%c0_10, %c0_11], %16 {strides = array<i32>} : memref<64x36xbf16, #tpu.memory_space<vmem>>, vector<64x36xbf16>,
    return
  }
  func.func @transform_0(%arg0: i32) -> (i32, i32) {
    %c0_i32 = arith.constant 0 : i32
    %c0_i32_0 = arith.constant 0 : i32
    return %arg0, %c0_i32 : i32, i32
  }
  func.func @transform_1(%arg0: i32) -> (i32, i32) {
    %c0_i32 = arith.constant 0 : i32
    %c0_i32_0 = arith.constant 0 : i32
    %c0_i32_1 = arith.constant 0 : i32
    return %c0_i32, %c0_i32_0 : i32, i32
  }
  func.func @transform_2(%arg0: i32) -> (i32, i32) {
    %c0_i32 = arith.constant 0 : i32
    %c0_i32_0 = arith.constant 0 : i32
    %c0_i32_1 = arith.constant 0 : i32
    return %c0_i32, %c0_i32_0 : i32, i32
  }
  func.func @transform_3(%arg0: i32) -> (i32, i32) {
    %c0_i32 = arith.constant 0 : i32
    %c0_i32_0 = arith.constant 0 : i32
    %c0_i32_1 = arith.constant 0 : i32
    return %c0_i32, %c0_i32_0 : i32, i32
  }
  func.func @transform_4(%arg0: i32) -> (i32, i32) {
    %c0_i32 = arith.constant 0 : i32
    %c0_i32_0 = arith.constant 0 : i32
    %c0_i32_1 = arith.constant 0 : i32
    return %c0_i32, %c0_i32_0 : i32, i32
  }
  func.func @transform_5(%arg0: i32) -> (i32, i32) {
    %c0_i32 = arith.constant 0 : i32
    %c0_i32_0 = arith.constant 0 : i32
    return %arg0, %c0_i32 : i32, i32
  }
}

module attributes {stable_mosaic.version = 11 : i64} {
  func.func @_mm_pieces_kernel(%arg0: i32, %arg1: memref<64x16xbf16, #tpu.memory_space<vmem>>, %arg2: memref<64x4xbf16, #tpu.memory_space<vmem>>, %arg3: memref<16x36xbf16, #tpu.memory_space<vmem>>, %arg4: memref<4x36xbf16, #tpu.memory_space<vmem>>, %arg5: memref<1x16xf32, #tpu.memory_space<vmem>>, %arg6: memref<1x4xf32, #tpu.memory_space<vmem>>, %arg7: memref<1x16xf32, #tpu.memory_space<vmem>>, %arg8: memref<1x4xf32, #tpu.memory_space<vmem>>, %arg9: memref<1x36xf32, #tpu.memory_space<vmem>>, %arg10: memref<64x36xbf16, #tpu.memory_space<vmem>>) attributes {dimension_semantics = [#tpu.dimension_semantics<parallel>], iteration_bounds = array<i64: 2>, scalar_prefetch = 0 : i64, scratch_operands = 0 : i64, tpu.core_type = #tpu.core_type<tc>, window_params = [{transform_indices = @transform_0, window_bounds = array<i64: 64, 16>}, {transform_indices = @transform_1, window_bounds = array<i64: 64, 4>}, {pipeline_mode = #tpu.pipeline_mode<synchronous>, transform_indices = @transform_2, window_bounds = array<i64: 16, 36>}, {pipeline_mode = #tpu.pipeline_mode<synchronous>, transform_indices = @transform_3, window_bounds = array<i64: 4, 36>}, {pipeline_mode = #tpu.pipeline_mode<synchronous>, transform_indices = @transform_4, window_bounds = array<i64: 1, 16>}, {pipeline_mode = #tpu.pipeline_mode<synchronous>, transform_indices = @transform_5, window_bounds = array<i64: 1, 4>}, {pipeline_mode = #tpu.pipeline_mode<synchronous>, transform_indices = @transform_6, window_bounds = array<i64: 1, 16>}, {pipeline_mode = #tpu.pipeline_mode<synchronous>, transform_indices = @transform_7, window_bounds = array<i64: 1, 4>}, {pipeline_mode = #tpu.pipeline_mode<synchronous>, transform_indices = @transform_8, window_bounds = array<i64: 1, 36>}, {transform_indices = @transform_9, window_bounds = array<i64: 64, 36>}]} {
    %c0 = arith.constant 0 : index
    %c0_0 = arith.constant 0 : index
    %0 = vector.load %arg1[%c0, %c0_0] : memref<64x16xbf16, #tpu.memory_space<vmem>>, vector<64x16xbf16>
    %1 = arith.extf %0 : vector<64x16xbf16> to vector<64x16xf32>
    %c0_1 = arith.constant 0 : index
    %c0_2 = arith.constant 0 : index
    %2 = vector.load %arg5[%c0_1, %c0_2] : memref<1x16xf32, #tpu.memory_space<vmem>>, vector<1x16xf32>
    %3 = vector.broadcast %2 : vector<1x16xf32> to vector<64x16xf32>
    %4 = arith.mulf %1, %3 : vector<64x16xf32>
    %c0_3 = arith.constant 0 : index
    %c0_4 = arith.constant 0 : index
    %5 = vector.load %arg7[%c0_3, %c0_4] : memref<1x16xf32, #tpu.memory_space<vmem>>, vector<1x16xf32>
    %6 = vector.broadcast %5 : vector<1x16xf32> to vector<64x16xf32>
    %7 = arith.addf %4, %6 : vector<64x16xf32>
    %cst = arith.constant 0.000000e+00 : f32
    %8 = vector.broadcast %cst : f32 to vector<64x16xf32>
    %9 = arith.maximumf %7, %8 : vector<64x16xf32>
    %10 = arith.truncf %9 : vector<64x16xf32> to vector<64x16xbf16>
    %c0_5 = arith.constant 0 : index
    %c0_6 = arith.constant 0 : index
    %11 = vector.load %arg3[%c0_5, %c0_6] : memref<16x36xbf16, #tpu.memory_space<vmem>>, vector<16x36xbf16>
    %cst_7 = arith.constant dense<0.000000e+00> : vector<64x36xf32>
    %12 = tpu.matmul %10, %11, %cst_7 {dimension_numbers = #tpu.dot_dimension_numbers<[1], [0], [0], [1], [0, 0, 1, 1], [], []>} : vector<64x16xbf16>, vector<16x36xbf16>, vector<64x36xf32> -> vector<64x36xf32>
    %c0_8 = arith.constant 0 : index
    %c0_9 = arith.constant 0 : index
    %13 = vector.load %arg2[%c0_8, %c0_9] : memref<64x4xbf16, #tpu.memory_space<vmem>>, vector<64x4xbf16>
    %14 = arith.extf %13 : vector<64x4xbf16> to vector<64x4xf32>
    %c0_10 = arith.constant 0 : index
    %c0_11 = arith.constant 0 : index
    %15 = vector.load %arg6[%c0_10, %c0_11] : memref<1x4xf32, #tpu.memory_space<vmem>>, vector<1x4xf32>
    %16 = vector.broadcast %15 : vector<1x4xf32> to vector<64x4xf32>
    %17 = arith.mulf %14, %16 : vector<64x4xf32>
    %c0_12 = arith.constant 0 : index
    %c0_13 = arith.constant 0 : index
    %18 = vector.load %arg8[%c0_12, %c0_13] : memref<1x4xf32, #tpu.memory_space<vmem>>, vector<1x4xf32>
    %19 = vector.broadcast %18 : vector<1x4xf32> to vector<64x4xf32>
    %20 = arith.addf %17, %19 : vector<64x4xf32>
    %cst_14 = arith.constant 0.000000e+00 : f32
    %21 = vector.broadcast %cst_14 : f32 to vector<64x4xf32>
    %22 = arith.maximumf %20, %21 : vector<64x4xf32>
    %23 = arith.truncf %22 : vector<64x4xf32> to vector<64x4xbf16>
    %c0_15 = arith.constant 0 : index
    %c0_16 = arith.constant 0 : index
    %24 = vector.load %arg4[%c0_15, %c0_16] : memref<4x36xbf16, #tpu.memory_space<vmem>>, vector<4x36xbf16>
    %cst_17 = arith.constant dense<0.000000e+00> : vector<64x36xf32>
    %25 = tpu.matmul %23, %24, %cst_17 {dimension_numbers = #tpu.dot_dimension_numbers<[1], [0], [0], [1], [0, 0, 1, 1], [], []>} : vector<64x4xbf16>, vector<4x36xbf16>, vector<64x36xf32> -> vector<64x36xf32>
    %26 = arith.addf %12, %25 : vector<64x36xf32>
    %c0_18 = arith.constant 0 : index
    %c0_19 = arith.constant 0 : index
    %27 = vector.load %arg9[%c0_18, %c0_19] : memref<1x36xf32, #tpu.memory_space<vmem>>, vector<1x36xf32>
    %28 = vector.broadcast %27 : vector<1x36xf32> to vector<64x36xf32>
    %29 = arith.addf %26, %28 : vector<64x36xf32>
    %30 = arith.truncf %29 : vector<64x36xf32> to vector<64x36xbf16>
    %c0_20 = arith.constant 0 : index
    %c0_21 = arith.constant 0 : index
    %31 = vector.load %arg10[%c0_20, %c0_21] : memref<64x36xbf16, #tpu.memory_space<vmem>>, vector<64x36xbf16>
    tpu.vector_store %arg10[%c0_20, %c0_21], %30 {strides = array<i32>} : memref<64x36xbf16, #tpu.memory_space<vmem>>, vector<64x36xbf16>,
    return
  }
  func.func @transform_0(%arg0: i32) -> (i32, i32) {
    %c0_i32 = arith.constant 0 : i32
    %c0_i32_0 = arith.constant 0 : i32
    return %arg0, %c0_i32 : i32, i32
  }
  func.func @transform_1(%arg0: i32) -> (i32, i32) {
    %c0_i32 = arith.constant 0 : i32
    %c0_i32_0 = arith.constant 0 : i32
    return %arg0, %c0_i32 : i32, i32
  }
  func.func @transform_2(%arg0: i32) -> (i32, i32) {
    %c0_i32 = arith.constant 0 : i32
    %c0_i32_0 = arith.constant 0 : i32
    %c0_i32_1 = arith.constant 0 : i32
    return %c0_i32, %c0_i32_0 : i32, i32
  }
  func.func @transform_3(%arg0: i32) -> (i32, i32) {
    %c0_i32 = arith.constant 0 : i32
    %c0_i32_0 = arith.constant 0 : i32
    %c0_i32_1 = arith.constant 0 : i32
    return %c0_i32, %c0_i32_0 : i32, i32
  }
  func.func @transform_4(%arg0: i32) -> (i32, i32) {
    %c0_i32 = arith.constant 0 : i32
    %c0_i32_0 = arith.constant 0 : i32
    %c0_i32_1 = arith.constant 0 : i32
    return %c0_i32, %c0_i32_0 : i32, i32
  }
  func.func @transform_5(%arg0: i32) -> (i32, i32) {
    %c0_i32 = arith.constant 0 : i32
    %c0_i32_0 = arith.constant 0 : i32
    %c0_i32_1 = arith.constant 0 : i32
    return %c0_i32, %c0_i32_0 : i32, i32
  }
  func.func @transform_6(%arg0: i32) -> (i32, i32) {
    %c0_i32 = arith.constant 0 : i32
    %c0_i32_0 = arith.constant 0 : i32
    %c0_i32_1 = arith.constant 0 : i32
    return %c0_i32, %c0_i32_0 : i32, i32
  }
  func.func @transform_7(%arg0: i32) -> (i32, i32) {
    %c0_i32 = arith.constant 0 : i32
    %c0_i32_0 = arith.constant 0 : i32
    %c0_i32_1 = arith.constant 0 : i32
    return %c0_i32, %c0_i32_0 : i32, i32
  }
  func.func @transform_8(%arg0: i32) -> (i32, i32) {
    %c0_i32 = arith.constant 0 : i32
    %c0_i32_0 = arith.constant 0 : i32
    %c0_i32_1 = arith.constant 0 : i32
    return %c0_i32, %c0_i32_0 : i32, i32
  }
  func.func @transform_9(%arg0: i32) -> (i32, i32) {
    %c0_i32 = arith.constant 0 : i32
    %c0_i32_0 = arith.constant 0 : i32
    return %arg0, %c0_i32 : i32, i32
  }
}

module attributes {stable_mosaic.version = 11 : i64} {
  func.func @_td_kernel(%arg0: i32, %arg1: memref<8x2x8x24xbf16, #tpu.memory_space<vmem>>, %arg2: memref<1x24xf32, #tpu.memory_space<vmem>>, %arg3: memref<1x24xf32, #tpu.memory_space<vmem>>, %arg4: memref<24x24xbf16, #tpu.memory_space<vmem>>, %arg5: memref<1x24xf32, #tpu.memory_space<vmem>>, %arg6: memref<8x4x24xbf16, #tpu.memory_space<vmem>>) attributes {dimension_semantics = [#tpu.dimension_semantics<parallel>], iteration_bounds = array<i64: 1>, scalar_prefetch = 0 : i64, scratch_operands = 0 : i64, tpu.core_type = #tpu.core_type<tc>, window_params = [{transform_indices = @transform_0, window_bounds = array<i64: 8, 2, 8, 24>}, {pipeline_mode = #tpu.pipeline_mode<synchronous>, transform_indices = @transform_1, window_bounds = array<i64: 1, 24>}, {pipeline_mode = #tpu.pipeline_mode<synchronous>, transform_indices = @transform_2, window_bounds = array<i64: 1, 24>}, {pipeline_mode = #tpu.pipeline_mode<synchronous>, transform_indices = @transform_3, window_bounds = array<i64: 24, 24>}, {pipeline_mode = #tpu.pipeline_mode<synchronous>, transform_indices = @transform_4, window_bounds = array<i64: 1, 24>}, {transform_indices = @transform_5, window_bounds = array<i64: 8, 4, 24>}]} {
    %c0 = arith.constant 0 : index
    %c0_0 = arith.constant 0 : index
    %0 = vector.load %arg2[%c0, %c0_0] : memref<1x24xf32, #tpu.memory_space<vmem>>, vector<1x24xf32>
    %1 = vector.shape_cast %0 : vector<1x24xf32> to vector<1x1x1x24xf32>
    %c0_1 = arith.constant 0 : index
    %c0_2 = arith.constant 0 : index
    %2 = vector.load %arg3[%c0_1, %c0_2] : memref<1x24xf32, #tpu.memory_space<vmem>>, vector<1x24xf32>
    %3 = vector.shape_cast %2 : vector<1x24xf32> to vector<1x1x1x24xf32>
    %c0_3 = arith.constant 0 : index
    %c0_4 = arith.constant 0 : index
    %c0_5 = arith.constant 0 : index
    %c0_6 = arith.constant 0 : index
    %4 = vector.load %arg1[%c0_3, %c0_4, %c0_5, %c0_6] : memref<8x2x8x24xbf16, #tpu.memory_space<vmem>>, vector<8x2x8x24xbf16>
    %5 = arith.extf %4 : vector<8x2x8x24xbf16> to vector<8x2x8x24xf32>
    %6 = vector.broadcast %1 : vector<1x1x1x24xf32> to vector<8x2x8x24xf32>
    %7 = arith.mulf %5, %6 : vector<8x2x8x24xf32>
    %8 = vector.broadcast %3 : vector<1x1x1x24xf32> to vector<8x2x8x24xf32>
    %9 = arith.addf %7, %8 : vector<8x2x8x24xf32>
    %cst = arith.constant 0.000000e+00 : f32
    %10 = vector.broadcast %cst : f32 to vector<8x2x8x24xf32>
    %11 = arith.maximumf %9, %10 : vector<8x2x8x24xf32>
    %12 = vector.shape_cast %11 : vector<8x2x8x24xf32> to vector<128x24xf32>
    %13 = arith.truncf %12 : vector<128x24xf32> to vector<128x24xbf16>
    %c0_7 = arith.constant 0 : index
    %c0_8 = arith.constant 0 : index
    %14 = vector.load %arg4[%c0_7, %c0_8] : memref<24x24xbf16, #tpu.memory_space<vmem>>, vector<24x24xbf16>
    %cst_9 = arith.constant dense<0.000000e+00> : vector<128x24xf32>
    %15 = tpu.matmul %13, %14, %cst_9 {dimension_numbers = #tpu.dot_dimension_numbers<[1], [0], [0], [1], [0, 0, 1, 1], [], []>} : vector<128x24xbf16>, vector<24x24xbf16>, vector<128x24xf32> -> vector<128x24xf32>
    %c0_10 = arith.constant 0 : index
    %c0_11 = arith.constant 0 : index
    %16 = vector.load %arg5[%c0_10, %c0_11] : memref<1x24xf32, #tpu.memory_space<vmem>>, vector<1x24xf32>
    %17 = vector.broadcast %16 : vector<1x24xf32> to vector<128x24xf32>
    %18 = arith.addf %15, %17 : vector<128x24xf32>
    %19 = vector.shape_cast %18 : vector<128x24xf32> to vector<8x2x8x24xf32>
    %20 = vector.extract_strided_slice %19 {offsets = [0, 0, 0, 0], sizes = [8, 1, 8, 24], strides = [1, 1, 1, 1]} : vector<8x2x8x24xf32> to vector<8x1x8x24xf32>
    %21 = vector.shape_cast %20 : vector<8x1x8x24xf32> to vector<8x8x24xf32>
    %22 = vector.extract_strided_slice %19 {offsets = [0, 1, 0, 0], sizes = [8, 1, 8, 24], strides = [1, 1, 1, 1]} : vector<8x2x8x24xf32> to vector<8x1x8x24xf32>
    %23 = vector.shape_cast %22 : vector<8x1x8x24xf32> to vector<8x8x24xf32>
    %24 = arith.maximumf %21, %23 : vector<8x8x24xf32>
    %25 = vector.shape_cast %24 : vector<8x8x24xf32> to vector<8x4x2x24xf32>
    %26 = vector.extract_strided_slice %25 {offsets = [0, 0, 0, 0], sizes = [8, 4, 1, 24], strides = [1, 1, 1, 1]} : vector<8x4x2x24xf32> to vector<8x4x1x24xf32>
    %27 = vector.shape_cast %26 : vector<8x4x1x24xf32> to vector<8x4x24xf32>
    %28 = vector.extract_strided_slice %25 {offsets = [0, 0, 1, 0], sizes = [8, 4, 1, 24], strides = [1, 1, 1, 1]} : vector<8x4x2x24xf32> to vector<8x4x1x24xf32>
    %29 = vector.shape_cast %28 : vector<8x4x1x24xf32> to vector<8x4x24xf32>
    %30 = arith.maximumf %27, %29 : vector<8x4x24xf32>
    %31 = arith.truncf %30 : vector<8x4x24xf32> to vector<8x4x24xbf16>
    %c0_12 = arith.constant 0 : index
    %c0_13 = arith.constant 0 : index
    %c0_14 = arith.constant 0 : index
    %32 = vector.load %arg6[%c0_12, %c0_13, %c0_14] : memref<8x4x24xbf16, #tpu.memory_space<vmem>>, vector<8x4x24xbf16>
    tpu.vector_store %arg6[%c0_12, %c0_13, %c0_14], %31 {strides = array<i32>} : memref<8x4x24xbf16, #tpu.memory_space<vmem>>, vector<8x4x24xbf16>,
    return
  }
  func.func @transform_0(%arg0: i32) -> (i32, i32, i32, i32) {
    %c0_i32 = arith.constant 0 : i32
    %c0_i32_0 = arith.constant 0 : i32
    %c0_i32_1 = arith.constant 0 : i32
    %c0_i32_2 = arith.constant 0 : i32
    return %arg0, %c0_i32, %c0_i32_0, %c0_i32_1 : i32, i32, i32, i32
  }
  func.func @transform_1(%arg0: i32) -> (i32, i32) {
    %c0_i32 = arith.constant 0 : i32
    %c0_i32_0 = arith.constant 0 : i32
    %c0_i32_1 = arith.constant 0 : i32
    return %c0_i32, %c0_i32_0 : i32, i32
  }
  func.func @transform_2(%arg0: i32) -> (i32, i32) {
    %c0_i32 = arith.constant 0 : i32
    %c0_i32_0 = arith.constant 0 : i32
    %c0_i32_1 = arith.constant 0 : i32
    return %c0_i32, %c0_i32_0 : i32, i32
  }
  func.func @transform_3(%arg0: i32) -> (i32, i32) {
    %c0_i32 = arith.constant 0 : i32
    %c0_i32_0 = arith.constant 0 : i32
    %c0_i32_1 = arith.constant 0 : i32
    return %c0_i32, %c0_i32_0 : i32, i32
  }
  func.func @transform_4(%arg0: i32) -> (i32, i32) {
    %c0_i32 = arith.constant 0 : i32
    %c0_i32_0 = arith.constant 0 : i32
    %c0_i32_1 = arith.constant 0 : i32
    return %c0_i32, %c0_i32_0 : i32, i32
  }
  func.func @transform_5(%arg0: i32) -> (i32, i32, i32) {
    %c0_i32 = arith.constant 0 : i32
    %c0_i32_0 = arith.constant 0 : i32
    %c0_i32_1 = arith.constant 0 : i32
    return %arg0, %c0_i32, %c0_i32_0 : i32, i32, i32
  }
}

module attributes {stable_mosaic.version = 11 : i64} {
  func.func @_mm_pieces_kernel(%arg0: i32, %arg1: memref<16x24xbf16, #tpu.memory_space<vmem>>, %arg2: memref<24x36xbf16, #tpu.memory_space<vmem>>, %arg3: memref<1x24xf32, #tpu.memory_space<vmem>>, %arg4: memref<1x24xf32, #tpu.memory_space<vmem>>, %arg5: memref<1x36xf32, #tpu.memory_space<vmem>>, %arg6: memref<16x36xbf16, #tpu.memory_space<vmem>>) attributes {dimension_semantics = [#tpu.dimension_semantics<parallel>], iteration_bounds = array<i64: 2>, scalar_prefetch = 0 : i64, scratch_operands = 0 : i64, tpu.core_type = #tpu.core_type<tc>, window_params = [{transform_indices = @transform_0, window_bounds = array<i64: 16, 24>}, {pipeline_mode = #tpu.pipeline_mode<synchronous>, transform_indices = @transform_1, window_bounds = array<i64: 24, 36>}, {pipeline_mode = #tpu.pipeline_mode<synchronous>, transform_indices = @transform_2, window_bounds = array<i64: 1, 24>}, {pipeline_mode = #tpu.pipeline_mode<synchronous>, transform_indices = @transform_3, window_bounds = array<i64: 1, 24>}, {pipeline_mode = #tpu.pipeline_mode<synchronous>, transform_indices = @transform_4, window_bounds = array<i64: 1, 36>}, {transform_indices = @transform_5, window_bounds = array<i64: 16, 36>}]} {
    %c0 = arith.constant 0 : index
    %c0_0 = arith.constant 0 : index
    %0 = vector.load %arg1[%c0, %c0_0] : memref<16x24xbf16, #tpu.memory_space<vmem>>, vector<16x24xbf16>
    %1 = arith.extf %0 : vector<16x24xbf16> to vector<16x24xf32>
    %c0_1 = arith.constant 0 : index
    %c0_2 = arith.constant 0 : index
    %2 = vector.load %arg3[%c0_1, %c0_2] : memref<1x24xf32, #tpu.memory_space<vmem>>, vector<1x24xf32>
    %3 = vector.broadcast %2 : vector<1x24xf32> to vector<16x24xf32>
    %4 = arith.mulf %1, %3 : vector<16x24xf32>
    %c0_3 = arith.constant 0 : index
    %c0_4 = arith.constant 0 : index
    %5 = vector.load %arg4[%c0_3, %c0_4] : memref<1x24xf32, #tpu.memory_space<vmem>>, vector<1x24xf32>
    %6 = vector.broadcast %5 : vector<1x24xf32> to vector<16x24xf32>
    %7 = arith.addf %4, %6 : vector<16x24xf32>
    %cst = arith.constant 0.000000e+00 : f32
    %8 = vector.broadcast %cst : f32 to vector<16x24xf32>
    %9 = arith.maximumf %7, %8 : vector<16x24xf32>
    %10 = arith.truncf %9 : vector<16x24xf32> to vector<16x24xbf16>
    %c0_5 = arith.constant 0 : index
    %c0_6 = arith.constant 0 : index
    %11 = vector.load %arg2[%c0_5, %c0_6] : memref<24x36xbf16, #tpu.memory_space<vmem>>, vector<24x36xbf16>
    %cst_7 = arith.constant dense<0.000000e+00> : vector<16x36xf32>
    %12 = tpu.matmul %10, %11, %cst_7 {dimension_numbers = #tpu.dot_dimension_numbers<[1], [0], [0], [1], [0, 0, 1, 1], [], []>} : vector<16x24xbf16>, vector<24x36xbf16>, vector<16x36xf32> -> vector<16x36xf32>
    %c0_8 = arith.constant 0 : index
    %c0_9 = arith.constant 0 : index
    %13 = vector.load %arg5[%c0_8, %c0_9] : memref<1x36xf32, #tpu.memory_space<vmem>>, vector<1x36xf32>
    %14 = vector.broadcast %13 : vector<1x36xf32> to vector<16x36xf32>
    %15 = arith.addf %12, %14 : vector<16x36xf32>
    %16 = arith.truncf %15 : vector<16x36xf32> to vector<16x36xbf16>
    %c0_10 = arith.constant 0 : index
    %c0_11 = arith.constant 0 : index
    %17 = vector.load %arg6[%c0_10, %c0_11] : memref<16x36xbf16, #tpu.memory_space<vmem>>, vector<16x36xbf16>
    tpu.vector_store %arg6[%c0_10, %c0_11], %16 {strides = array<i32>} : memref<16x36xbf16, #tpu.memory_space<vmem>>, vector<16x36xbf16>,
    return
  }
  func.func @transform_0(%arg0: i32) -> (i32, i32) {
    %c0_i32 = arith.constant 0 : i32
    %c0_i32_0 = arith.constant 0 : i32
    return %arg0, %c0_i32 : i32, i32
  }
  func.func @transform_1(%arg0: i32) -> (i32, i32) {
    %c0_i32 = arith.constant 0 : i32
    %c0_i32_0 = arith.constant 0 : i32
    %c0_i32_1 = arith.constant 0 : i32
    return %c0_i32, %c0_i32_0 : i32, i32
  }
  func.func @transform_2(%arg0: i32) -> (i32, i32) {
    %c0_i32 = arith.constant 0 : i32
    %c0_i32_0 = arith.constant 0 : i32
    %c0_i32_1 = arith.constant 0 : i32
    return %c0_i32, %c0_i32_0 : i32, i32
  }
  func.func @transform_3(%arg0: i32) -> (i32, i32) {
    %c0_i32 = arith.constant 0 : i32
    %c0_i32_0 = arith.constant 0 : i32
    %c0_i32_1 = arith.constant 0 : i32
    return %c0_i32, %c0_i32_0 : i32, i32
  }
  func.func @transform_4(%arg0: i32) -> (i32, i32) {
    %c0_i32 = arith.constant 0 : i32
    %c0_i32_0 = arith.constant 0 : i32
    %c0_i32_1 = arith.constant 0 : i32
    return %c0_i32, %c0_i32_0 : i32, i32
  }
  func.func @transform_5(%arg0: i32) -> (i32, i32) {
    %c0_i32 = arith.constant 0 : i32
    %c0_i32_0 = arith.constant 0 : i32
    return %arg0, %c0_i32 : i32, i32
  }
}

module attributes {stable_mosaic.version = 11 : i64} {
  func.func @_mm_pieces_kernel(%arg0: i32, %arg1: memref<16x24xbf16, #tpu.memory_space<vmem>>, %arg2: memref<16x4xbf16, #tpu.memory_space<vmem>>, %arg3: memref<24x36xbf16, #tpu.memory_space<vmem>>, %arg4: memref<4x36xbf16, #tpu.memory_space<vmem>>, %arg5: memref<1x24xf32, #tpu.memory_space<vmem>>, %arg6: memref<1x4xf32, #tpu.memory_space<vmem>>, %arg7: memref<1x24xf32, #tpu.memory_space<vmem>>, %arg8: memref<1x4xf32, #tpu.memory_space<vmem>>, %arg9: memref<1x36xf32, #tpu.memory_space<vmem>>, %arg10: memref<16x36xbf16, #tpu.memory_space<vmem>>) attributes {dimension_semantics = [#tpu.dimension_semantics<parallel>], iteration_bounds = array<i64: 2>, scalar_prefetch = 0 : i64, scratch_operands = 0 : i64, tpu.core_type = #tpu.core_type<tc>, window_params = [{transform_indices = @transform_0, window_bounds = array<i64: 16, 24>}, {transform_indices = @transform_1, window_bounds = array<i64: 16, 4>}, {pipeline_mode = #tpu.pipeline_mode<synchronous>, transform_indices = @transform_2, window_bounds = array<i64: 24, 36>}, {pipeline_mode = #tpu.pipeline_mode<synchronous>, transform_indices = @transform_3, window_bounds = array<i64: 4, 36>}, {pipeline_mode = #tpu.pipeline_mode<synchronous>, transform_indices = @transform_4, window_bounds = array<i64: 1, 24>}, {pipeline_mode = #tpu.pipeline_mode<synchronous>, transform_indices = @transform_5, window_bounds = array<i64: 1, 4>}, {pipeline_mode = #tpu.pipeline_mode<synchronous>, transform_indices = @transform_6, window_bounds = array<i64: 1, 24>}, {pipeline_mode = #tpu.pipeline_mode<synchronous>, transform_indices = @transform_7, window_bounds = array<i64: 1, 4>}, {pipeline_mode = #tpu.pipeline_mode<synchronous>, transform_indices = @transform_8, window_bounds = array<i64: 1, 36>}, {transform_indices = @transform_9, window_bounds = array<i64: 16, 36>}]} {
    %c0 = arith.constant 0 : index
    %c0_0 = arith.constant 0 : index
    %0 = vector.load %arg1[%c0, %c0_0] : memref<16x24xbf16, #tpu.memory_space<vmem>>, vector<16x24xbf16>
    %1 = arith.extf %0 : vector<16x24xbf16> to vector<16x24xf32>
    %c0_1 = arith.constant 0 : index
    %c0_2 = arith.constant 0 : index
    %2 = vector.load %arg5[%c0_1, %c0_2] : memref<1x24xf32, #tpu.memory_space<vmem>>, vector<1x24xf32>
    %3 = vector.broadcast %2 : vector<1x24xf32> to vector<16x24xf32>
    %4 = arith.mulf %1, %3 : vector<16x24xf32>
    %c0_3 = arith.constant 0 : index
    %c0_4 = arith.constant 0 : index
    %5 = vector.load %arg7[%c0_3, %c0_4] : memref<1x24xf32, #tpu.memory_space<vmem>>, vector<1x24xf32>
    %6 = vector.broadcast %5 : vector<1x24xf32> to vector<16x24xf32>
    %7 = arith.addf %4, %6 : vector<16x24xf32>
    %cst = arith.constant 0.000000e+00 : f32
    %8 = vector.broadcast %cst : f32 to vector<16x24xf32>
    %9 = arith.maximumf %7, %8 : vector<16x24xf32>
    %10 = arith.truncf %9 : vector<16x24xf32> to vector<16x24xbf16>
    %c0_5 = arith.constant 0 : index
    %c0_6 = arith.constant 0 : index
    %11 = vector.load %arg3[%c0_5, %c0_6] : memref<24x36xbf16, #tpu.memory_space<vmem>>, vector<24x36xbf16>
    %cst_7 = arith.constant dense<0.000000e+00> : vector<16x36xf32>
    %12 = tpu.matmul %10, %11, %cst_7 {dimension_numbers = #tpu.dot_dimension_numbers<[1], [0], [0], [1], [0, 0, 1, 1], [], []>} : vector<16x24xbf16>, vector<24x36xbf16>, vector<16x36xf32> -> vector<16x36xf32>
    %c0_8 = arith.constant 0 : index
    %c0_9 = arith.constant 0 : index
    %13 = vector.load %arg2[%c0_8, %c0_9] : memref<16x4xbf16, #tpu.memory_space<vmem>>, vector<16x4xbf16>
    %14 = arith.extf %13 : vector<16x4xbf16> to vector<16x4xf32>
    %c0_10 = arith.constant 0 : index
    %c0_11 = arith.constant 0 : index
    %15 = vector.load %arg6[%c0_10, %c0_11] : memref<1x4xf32, #tpu.memory_space<vmem>>, vector<1x4xf32>
    %16 = vector.broadcast %15 : vector<1x4xf32> to vector<16x4xf32>
    %17 = arith.mulf %14, %16 : vector<16x4xf32>
    %c0_12 = arith.constant 0 : index
    %c0_13 = arith.constant 0 : index
    %18 = vector.load %arg8[%c0_12, %c0_13] : memref<1x4xf32, #tpu.memory_space<vmem>>, vector<1x4xf32>
    %19 = vector.broadcast %18 : vector<1x4xf32> to vector<16x4xf32>
    %20 = arith.addf %17, %19 : vector<16x4xf32>
    %cst_14 = arith.constant 0.000000e+00 : f32
    %21 = vector.broadcast %cst_14 : f32 to vector<16x4xf32>
    %22 = arith.maximumf %20, %21 : vector<16x4xf32>
    %23 = arith.truncf %22 : vector<16x4xf32> to vector<16x4xbf16>
    %c0_15 = arith.constant 0 : index
    %c0_16 = arith.constant 0 : index
    %24 = vector.load %arg4[%c0_15, %c0_16] : memref<4x36xbf16, #tpu.memory_space<vmem>>, vector<4x36xbf16>
    %cst_17 = arith.constant dense<0.000000e+00> : vector<16x36xf32>
    %25 = tpu.matmul %23, %24, %cst_17 {dimension_numbers = #tpu.dot_dimension_numbers<[1], [0], [0], [1], [0, 0, 1, 1], [], []>} : vector<16x4xbf16>, vector<4x36xbf16>, vector<16x36xf32> -> vector<16x36xf32>
    %26 = arith.addf %12, %25 : vector<16x36xf32>
    %c0_18 = arith.constant 0 : index
    %c0_19 = arith.constant 0 : index
    %27 = vector.load %arg9[%c0_18, %c0_19] : memref<1x36xf32, #tpu.memory_space<vmem>>, vector<1x36xf32>
    %28 = vector.broadcast %27 : vector<1x36xf32> to vector<16x36xf32>
    %29 = arith.addf %26, %28 : vector<16x36xf32>
    %30 = arith.truncf %29 : vector<16x36xf32> to vector<16x36xbf16>
    %c0_20 = arith.constant 0 : index
    %c0_21 = arith.constant 0 : index
    %31 = vector.load %arg10[%c0_20, %c0_21] : memref<16x36xbf16, #tpu.memory_space<vmem>>, vector<16x36xbf16>
    tpu.vector_store %arg10[%c0_20, %c0_21], %30 {strides = array<i32>} : memref<16x36xbf16, #tpu.memory_space<vmem>>, vector<16x36xbf16>,
    return
  }
  func.func @transform_0(%arg0: i32) -> (i32, i32) {
    %c0_i32 = arith.constant 0 : i32
    %c0_i32_0 = arith.constant 0 : i32
    return %arg0, %c0_i32 : i32, i32
  }
  func.func @transform_1(%arg0: i32) -> (i32, i32) {
    %c0_i32 = arith.constant 0 : i32
    %c0_i32_0 = arith.constant 0 : i32
    return %arg0, %c0_i32 : i32, i32
  }
  func.func @transform_2(%arg0: i32) -> (i32, i32) {
    %c0_i32 = arith.constant 0 : i32
    %c0_i32_0 = arith.constant 0 : i32
    %c0_i32_1 = arith.constant 0 : i32
    return %c0_i32, %c0_i32_0 : i32, i32
  }
  func.func @transform_3(%arg0: i32) -> (i32, i32) {
    %c0_i32 = arith.constant 0 : i32
    %c0_i32_0 = arith.constant 0 : i32
    %c0_i32_1 = arith.constant 0 : i32
    return %c0_i32, %c0_i32_0 : i32, i32
  }
  func.func @transform_4(%arg0: i32) -> (i32, i32) {
    %c0_i32 = arith.constant 0 : i32
    %c0_i32_0 = arith.constant 0 : i32
    %c0_i32_1 = arith.constant 0 : i32
    return %c0_i32, %c0_i32_0 : i32, i32
  }
  func.func @transform_5(%arg0: i32) -> (i32, i32) {
    %c0_i32 = arith.constant 0 : i32
    %c0_i32_0 = arith.constant 0 : i32
    %c0_i32_1 = arith.constant 0 : i32
    return %c0_i32, %c0_i32_0 : i32, i32
  }
  func.func @transform_6(%arg0: i32) -> (i32, i32) {
    %c0_i32 = arith.constant 0 : i32
    %c0_i32_0 = arith.constant 0 : i32
    %c0_i32_1 = arith.constant 0 : i32
    return %c0_i32, %c0_i32_0 : i32, i32
  }
  func.func @transform_7(%arg0: i32) -> (i32, i32) {
    %c0_i32 = arith.constant 0 : i32
    %c0_i32_0 = arith.constant 0 : i32
    %c0_i32_1 = arith.constant 0 : i32
    return %c0_i32, %c0_i32_0 : i32, i32
  }
  func.func @transform_8(%arg0: i32) -> (i32, i32) {
    %c0_i32 = arith.constant 0 : i32
    %c0_i32_0 = arith.constant 0 : i32
    %c0_i32_1 = arith.constant 0 : i32
    return %c0_i32, %c0_i32_0 : i32, i32
  }
  func.func @transform_9(%arg0: i32) -> (i32, i32) {
    %c0_i32 = arith.constant 0 : i32
    %c0_i32_0 = arith.constant 0 : i32
    return %arg0, %c0_i32 : i32, i32
  }
}

module attributes {stable_mosaic.version = 11 : i64} {
  func.func @_mm_pieces_kernel(%arg0: i32, %arg1: memref<16x32xbf16, #tpu.memory_space<vmem>>, %arg2: memref<32x32xbf16, #tpu.memory_space<vmem>>, %arg3: memref<1x32xf32, #tpu.memory_space<vmem>>, %arg4: memref<16x32xbf16, #tpu.memory_space<vmem>>) attributes {dimension_semantics = [#tpu.dimension_semantics<parallel>], iteration_bounds = array<i64: 2>, scalar_prefetch = 0 : i64, scratch_operands = 0 : i64, tpu.core_type = #tpu.core_type<tc>, window_params = [{transform_indices = @transform_0, window_bounds = array<i64: 16, 32>}, {pipeline_mode = #tpu.pipeline_mode<synchronous>, transform_indices = @transform_1, window_bounds = array<i64: 32, 32>}, {pipeline_mode = #tpu.pipeline_mode<synchronous>, transform_indices = @transform_2, window_bounds = array<i64: 1, 32>}, {transform_indices = @transform_3, window_bounds = array<i64: 16, 32>}]} {
    %c0 = arith.constant 0 : index
    %c0_0 = arith.constant 0 : index
    %0 = vector.load %arg1[%c0, %c0_0] : memref<16x32xbf16, #tpu.memory_space<vmem>>, vector<16x32xbf16>
    %c0_1 = arith.constant 0 : index
    %c0_2 = arith.constant 0 : index
    %1 = vector.load %arg2[%c0_1, %c0_2] : memref<32x32xbf16, #tpu.memory_space<vmem>>, vector<32x32xbf16>
    %cst = arith.constant dense<0.000000e+00> : vector<16x32xf32>
    %2 = tpu.matmul %0, %1, %cst {dimension_numbers = #tpu.dot_dimension_numbers<[1], [0], [0], [1], [0, 0, 1, 1], [], []>} : vector<16x32xbf16>, vector<32x32xbf16>, vector<16x32xf32> -> vector<16x32xf32>
    %c0_3 = arith.constant 0 : index
    %c0_4 = arith.constant 0 : index
    %3 = vector.load %arg3[%c0_3, %c0_4] : memref<1x32xf32, #tpu.memory_space<vmem>>, vector<1x32xf32>
    %4 = vector.broadcast %3 : vector<1x32xf32> to vector<16x32xf32>
    %5 = arith.addf %2, %4 : vector<16x32xf32>
    %6 = arith.truncf %5 : vector<16x32xf32> to vector<16x32xbf16>
    %c0_5 = arith.constant 0 : index
    %c0_6 = arith.constant 0 : index
    %7 = vector.load %arg4[%c0_5, %c0_6] : memref<16x32xbf16, #tpu.memory_space<vmem>>, vector<16x32xbf16>
    tpu.vector_store %arg4[%c0_5, %c0_6], %6 {strides = array<i32>} : memref<16x32xbf16, #tpu.memory_space<vmem>>, vector<16x32xbf16>,
    return
  }
  func.func @transform_0(%arg0: i32) -> (i32, i32) {
    %c0_i32 = arith.constant 0 : i32
    %c0_i32_0 = arith.constant 0 : i32
    return %arg0, %c0_i32 : i32, i32
  }
  func.func @transform_1(%arg0: i32) -> (i32, i32) {
    %c0_i32 = arith.constant 0 : i32
    %c0_i32_0 = arith.constant 0 : i32
    %c0_i32_1 = arith.constant 0 : i32
    return %c0_i32, %c0_i32_0 : i32, i32
  }
  func.func @transform_2(%arg0: i32) -> (i32, i32) {
    %c0_i32 = arith.constant 0 : i32
    %c0_i32_0 = arith.constant 0 : i32
    %c0_i32_1 = arith.constant 0 : i32
    return %c0_i32, %c0_i32_0 : i32, i32
  }
  func.func @transform_3(%arg0: i32) -> (i32, i32) {
    %c0_i32 = arith.constant 0 : i32
    %c0_i32_0 = arith.constant 0 : i32
    return %arg0, %c0_i32 : i32, i32
  }
}

module attributes {stable_mosaic.version = 11 : i64} {
  func.func @_mm_pieces_kernel(%arg0: i32, %arg1: memref<64x8xbf16, #tpu.memory_space<vmem>>, %arg2: memref<64x24xbf16, #tpu.memory_space<vmem>>, %arg3: memref<8x36xbf16, #tpu.memory_space<vmem>>, %arg4: memref<24x36xbf16, #tpu.memory_space<vmem>>, %arg5: memref<1x8xf32, #tpu.memory_space<vmem>>, %arg6: memref<1x24xf32, #tpu.memory_space<vmem>>, %arg7: memref<1x8xf32, #tpu.memory_space<vmem>>, %arg8: memref<1x24xf32, #tpu.memory_space<vmem>>, %arg9: memref<1x36xf32, #tpu.memory_space<vmem>>, %arg10: memref<64x36xbf16, #tpu.memory_space<vmem>>) attributes {dimension_semantics = [#tpu.dimension_semantics<parallel>], iteration_bounds = array<i64: 2>, scalar_prefetch = 0 : i64, scratch_operands = 0 : i64, tpu.core_type = #tpu.core_type<tc>, window_params = [{transform_indices = @transform_0, window_bounds = array<i64: 64, 8>}, {transform_indices = @transform_1, window_bounds = array<i64: 64, 24>}, {pipeline_mode = #tpu.pipeline_mode<synchronous>, transform_indices = @transform_2, window_bounds = array<i64: 8, 36>}, {pipeline_mode = #tpu.pipeline_mode<synchronous>, transform_indices = @transform_3, window_bounds = array<i64: 24, 36>}, {pipeline_mode = #tpu.pipeline_mode<synchronous>, transform_indices = @transform_4, window_bounds = array<i64: 1, 8>}, {pipeline_mode = #tpu.pipeline_mode<synchronous>, transform_indices = @transform_5, window_bounds = array<i64: 1, 24>}, {pipeline_mode = #tpu.pipeline_mode<synchronous>, transform_indices = @transform_6, window_bounds = array<i64: 1, 8>}, {pipeline_mode = #tpu.pipeline_mode<synchronous>, transform_indices = @transform_7, window_bounds = array<i64: 1, 24>}, {pipeline_mode = #tpu.pipeline_mode<synchronous>, transform_indices = @transform_8, window_bounds = array<i64: 1, 36>}, {transform_indices = @transform_9, window_bounds = array<i64: 64, 36>}]} {
    %c0 = arith.constant 0 : index
    %c0_0 = arith.constant 0 : index
    %0 = vector.load %arg1[%c0, %c0_0] : memref<64x8xbf16, #tpu.memory_space<vmem>>, vector<64x8xbf16>
    %1 = arith.extf %0 : vector<64x8xbf16> to vector<64x8xf32>
    %c0_1 = arith.constant 0 : index
    %c0_2 = arith.constant 0 : index
    %2 = vector.load %arg5[%c0_1, %c0_2] : memref<1x8xf32, #tpu.memory_space<vmem>>, vector<1x8xf32>
    %3 = vector.broadcast %2 : vector<1x8xf32> to vector<64x8xf32>
    %4 = arith.mulf %1, %3 : vector<64x8xf32>
    %c0_3 = arith.constant 0 : index
    %c0_4 = arith.constant 0 : index
    %5 = vector.load %arg7[%c0_3, %c0_4] : memref<1x8xf32, #tpu.memory_space<vmem>>, vector<1x8xf32>
    %6 = vector.broadcast %5 : vector<1x8xf32> to vector<64x8xf32>
    %7 = arith.addf %4, %6 : vector<64x8xf32>
    %cst = arith.constant 0.000000e+00 : f32
    %8 = vector.broadcast %cst : f32 to vector<64x8xf32>
    %9 = arith.maximumf %7, %8 : vector<64x8xf32>
    %10 = arith.truncf %9 : vector<64x8xf32> to vector<64x8xbf16>
    %c0_5 = arith.constant 0 : index
    %c0_6 = arith.constant 0 : index
    %11 = vector.load %arg3[%c0_5, %c0_6] : memref<8x36xbf16, #tpu.memory_space<vmem>>, vector<8x36xbf16>
    %cst_7 = arith.constant dense<0.000000e+00> : vector<64x36xf32>
    %12 = tpu.matmul %10, %11, %cst_7 {dimension_numbers = #tpu.dot_dimension_numbers<[1], [0], [0], [1], [0, 0, 1, 1], [], []>} : vector<64x8xbf16>, vector<8x36xbf16>, vector<64x36xf32> -> vector<64x36xf32>
    %c0_8 = arith.constant 0 : index
    %c0_9 = arith.constant 0 : index
    %13 = vector.load %arg2[%c0_8, %c0_9] : memref<64x24xbf16, #tpu.memory_space<vmem>>, vector<64x24xbf16>
    %14 = arith.extf %13 : vector<64x24xbf16> to vector<64x24xf32>
    %c0_10 = arith.constant 0 : index
    %c0_11 = arith.constant 0 : index
    %15 = vector.load %arg6[%c0_10, %c0_11] : memref<1x24xf32, #tpu.memory_space<vmem>>, vector<1x24xf32>
    %16 = vector.broadcast %15 : vector<1x24xf32> to vector<64x24xf32>
    %17 = arith.mulf %14, %16 : vector<64x24xf32>
    %c0_12 = arith.constant 0 : index
    %c0_13 = arith.constant 0 : index
    %18 = vector.load %arg8[%c0_12, %c0_13] : memref<1x24xf32, #tpu.memory_space<vmem>>, vector<1x24xf32>
    %19 = vector.broadcast %18 : vector<1x24xf32> to vector<64x24xf32>
    %20 = arith.addf %17, %19 : vector<64x24xf32>
    %cst_14 = arith.constant 0.000000e+00 : f32
    %21 = vector.broadcast %cst_14 : f32 to vector<64x24xf32>
    %22 = arith.maximumf %20, %21 : vector<64x24xf32>
    %23 = arith.truncf %22 : vector<64x24xf32> to vector<64x24xbf16>
    %c0_15 = arith.constant 0 : index
    %c0_16 = arith.constant 0 : index
    %24 = vector.load %arg4[%c0_15, %c0_16] : memref<24x36xbf16, #tpu.memory_space<vmem>>, vector<24x36xbf16>
    %cst_17 = arith.constant dense<0.000000e+00> : vector<64x36xf32>
    %25 = tpu.matmul %23, %24, %cst_17 {dimension_numbers = #tpu.dot_dimension_numbers<[1], [0], [0], [1], [0, 0, 1, 1], [], []>} : vector<64x24xbf16>, vector<24x36xbf16>, vector<64x36xf32> -> vector<64x36xf32>
    %26 = arith.addf %12, %25 : vector<64x36xf32>
    %c0_18 = arith.constant 0 : index
    %c0_19 = arith.constant 0 : index
    %27 = vector.load %arg9[%c0_18, %c0_19] : memref<1x36xf32, #tpu.memory_space<vmem>>, vector<1x36xf32>
    %28 = vector.broadcast %27 : vector<1x36xf32> to vector<64x36xf32>
    %29 = arith.addf %26, %28 : vector<64x36xf32>
    %30 = arith.truncf %29 : vector<64x36xf32> to vector<64x36xbf16>
    %c0_20 = arith.constant 0 : index
    %c0_21 = arith.constant 0 : index
    %31 = vector.load %arg10[%c0_20, %c0_21] : memref<64x36xbf16, #tpu.memory_space<vmem>>, vector<64x36xbf16>
    tpu.vector_store %arg10[%c0_20, %c0_21], %30 {strides = array<i32>} : memref<64x36xbf16, #tpu.memory_space<vmem>>, vector<64x36xbf16>,
    return
  }
  func.func @transform_0(%arg0: i32) -> (i32, i32) {
    %c0_i32 = arith.constant 0 : i32
    %c0_i32_0 = arith.constant 0 : i32
    return %arg0, %c0_i32 : i32, i32
  }
  func.func @transform_1(%arg0: i32) -> (i32, i32) {
    %c0_i32 = arith.constant 0 : i32
    %c0_i32_0 = arith.constant 0 : i32
    return %arg0, %c0_i32 : i32, i32
  }
  func.func @transform_2(%arg0: i32) -> (i32, i32) {
    %c0_i32 = arith.constant 0 : i32
    %c0_i32_0 = arith.constant 0 : i32
    %c0_i32_1 = arith.constant 0 : i32
    return %c0_i32, %c0_i32_0 : i32, i32
  }
  func.func @transform_3(%arg0: i32) -> (i32, i32) {
    %c0_i32 = arith.constant 0 : i32
    %c0_i32_0 = arith.constant 0 : i32
    %c0_i32_1 = arith.constant 0 : i32
    return %c0_i32, %c0_i32_0 : i32, i32
  }
  func.func @transform_4(%arg0: i32) -> (i32, i32) {
    %c0_i32 = arith.constant 0 : i32
    %c0_i32_0 = arith.constant 0 : i32
    %c0_i32_1 = arith.constant 0 : i32
    return %c0_i32, %c0_i32_0 : i32, i32
  }
  func.func @transform_5(%arg0: i32) -> (i32, i32) {
    %c0_i32 = arith.constant 0 : i32
    %c0_i32_0 = arith.constant 0 : i32
    %c0_i32_1 = arith.constant 0 : i32
    return %c0_i32, %c0_i32_0 : i32, i32
  }
  func.func @transform_6(%arg0: i32) -> (i32, i32) {
    %c0_i32 = arith.constant 0 : i32
    %c0_i32_0 = arith.constant 0 : i32
    %c0_i32_1 = arith.constant 0 : i32
    return %c0_i32, %c0_i32_0 : i32, i32
  }
  func.func @transform_7(%arg0: i32) -> (i32, i32) {
    %c0_i32 = arith.constant 0 : i32
    %c0_i32_0 = arith.constant 0 : i32
    %c0_i32_1 = arith.constant 0 : i32
    return %c0_i32, %c0_i32_0 : i32, i32
  }
  func.func @transform_8(%arg0: i32) -> (i32, i32) {
    %c0_i32 = arith.constant 0 : i32
    %c0_i32_0 = arith.constant 0 : i32
    %c0_i32_1 = arith.constant 0 : i32
    return %c0_i32, %c0_i32_0 : i32, i32
  }
  func.func @transform_9(%arg0: i32) -> (i32, i32) {
    %c0_i32 = arith.constant 0 : i32
    %c0_i32_0 = arith.constant 0 : i32
    return %arg0, %c0_i32 : i32, i32
  }
}

module attributes {stable_mosaic.version = 11 : i64} {
  func.func @_mm_pieces_kernel(%arg0: i32, %arg1: memref<64x8xbf16, #tpu.memory_space<vmem>>, %arg2: memref<64x24xbf16, #tpu.memory_space<vmem>>, %arg3: memref<64x4xbf16, #tpu.memory_space<vmem>>, %arg4: memref<8x36xbf16, #tpu.memory_space<vmem>>, %arg5: memref<24x36xbf16, #tpu.memory_space<vmem>>, %arg6: memref<4x36xbf16, #tpu.memory_space<vmem>>, %arg7: memref<1x8xf32, #tpu.memory_space<vmem>>, %arg8: memref<1x24xf32, #tpu.memory_space<vmem>>, %arg9: memref<1x4xf32, #tpu.memory_space<vmem>>, %arg10: memref<1x8xf32, #tpu.memory_space<vmem>>, %arg11: memref<1x24xf32, #tpu.memory_space<vmem>>, %arg12: memref<1x4xf32, #tpu.memory_space<vmem>>, %arg13: memref<1x36xf32, #tpu.memory_space<vmem>>, %arg14: memref<64x36xbf16, #tpu.memory_space<vmem>>) attributes {dimension_semantics = [#tpu.dimension_semantics<parallel>], iteration_bounds = array<i64: 2>, scalar_prefetch = 0 : i64, scratch_operands = 0 : i64, tpu.core_type = #tpu.core_type<tc>, window_params = [{transform_indices = @transform_0, window_bounds = array<i64: 64, 8>}, {transform_indices = @transform_1, window_bounds = array<i64: 64, 24>}, {transform_indices = @transform_2, window_bounds = array<i64: 64, 4>}, {pipeline_mode = #tpu.pipeline_mode<synchronous>, transform_indices = @transform_3, window_bounds = array<i64: 8, 36>}, {pipeline_mode = #tpu.pipeline_mode<synchronous>, transform_indices = @transform_4, window_bounds = array<i64: 24, 36>}, {pipeline_mode = #tpu.pipeline_mode<synchronous>, transform_indices = @transform_5, window_bounds = array<i64: 4, 36>}, {pipeline_mode = #tpu.pipeline_mode<synchronous>, transform_indices = @transform_6, window_bounds = array<i64: 1, 8>}, {pipeline_mode = #tpu.pipeline_mode<synchronous>, transform_indices = @transform_7, window_bounds = array<i64: 1, 24>}, {pipeline_mode = #tpu.pipeline_mode<synchronous>, transform_indices = @transform_8, window_bounds = array<i64: 1, 4>}, {pipeline_mode = #tpu.pipeline_mode<synchronous>, transform_indices = @transform_9, window_bounds = array<i64: 1, 8>}, {pipeline_mode = #tpu.pipeline_mode<synchronous>, transform_indices = @transform_10, window_bounds = array<i64: 1, 24>}, {pipeline_mode = #tpu.pipeline_mode<synchronous>, transform_indices = @transform_11, window_bounds = array<i64: 1, 4>}, {pipeline_mode = #tpu.pipeline_mode<synchronous>, transform_indices = @transform_12, window_bounds = array<i64: 1, 36>}, {transform_indices = @transform_13, window_bounds = array<i64: 64, 36>}]} {
    %c0 = arith.constant 0 : index
    %c0_0 = arith.constant 0 : index
    %0 = vector.load %arg1[%c0, %c0_0] : memref<64x8xbf16, #tpu.memory_space<vmem>>, vector<64x8xbf16>
    %1 = arith.extf %0 : vector<64x8xbf16> to vector<64x8xf32>
    %c0_1 = arith.constant 0 : index
    %c0_2 = arith.constant 0 : index
    %2 = vector.load %arg7[%c0_1, %c0_2] : memref<1x8xf32, #tpu.memory_space<vmem>>, vector<1x8xf32>
    %3 = vector.broadcast %2 : vector<1x8xf32> to vector<64x8xf32>
    %4 = arith.mulf %1, %3 : vector<64x8xf32>
    %c0_3 = arith.constant 0 : index
    %c0_4 = arith.constant 0 : index
    %5 = vector.load %arg10[%c0_3, %c0_4] : memref<1x8xf32, #tpu.memory_space<vmem>>, vector<1x8xf32>
    %6 = vector.broadcast %5 : vector<1x8xf32> to vector<64x8xf32>
    %7 = arith.addf %4, %6 : vector<64x8xf32>
    %cst = arith.constant 0.000000e+00 : f32
    %8 = vector.broadcast %cst : f32 to vector<64x8xf32>
    %9 = arith.maximumf %7, %8 : vector<64x8xf32>
    %10 = arith.truncf %9 : vector<64x8xf32> to vector<64x8xbf16>
    %c0_5 = arith.constant 0 : index
    %c0_6 = arith.constant 0 : index
    %11 = vector.load %arg4[%c0_5, %c0_6] : memref<8x36xbf16, #tpu.memory_space<vmem>>, vector<8x36xbf16>
    %cst_7 = arith.constant dense<0.000000e+00> : vector<64x36xf32>
    %12 = tpu.matmul %10, %11, %cst_7 {dimension_numbers = #tpu.dot_dimension_numbers<[1], [0], [0], [1], [0, 0, 1, 1], [], []>} : vector<64x8xbf16>, vector<8x36xbf16>, vector<64x36xf32> -> vector<64x36xf32>
    %c0_8 = arith.constant 0 : index
    %c0_9 = arith.constant 0 : index
    %13 = vector.load %arg2[%c0_8, %c0_9] : memref<64x24xbf16, #tpu.memory_space<vmem>>, vector<64x24xbf16>
    %14 = arith.extf %13 : vector<64x24xbf16> to vector<64x24xf32>
    %c0_10 = arith.constant 0 : index
    %c0_11 = arith.constant 0 : index
    %15 = vector.load %arg8[%c0_10, %c0_11] : memref<1x24xf32, #tpu.memory_space<vmem>>, vector<1x24xf32>
    %16 = vector.broadcast %15 : vector<1x24xf32> to vector<64x24xf32>
    %17 = arith.mulf %14, %16 : vector<64x24xf32>
    %c0_12 = arith.constant 0 : index
    %c0_13 = arith.constant 0 : index
    %18 = vector.load %arg11[%c0_12, %c0_13] : memref<1x24xf32, #tpu.memory_space<vmem>>, vector<1x24xf32>
    %19 = vector.broadcast %18 : vector<1x24xf32> to vector<64x24xf32>
    %20 = arith.addf %17, %19 : vector<64x24xf32>
    %cst_14 = arith.constant 0.000000e+00 : f32
    %21 = vector.broadcast %cst_14 : f32 to vector<64x24xf32>
    %22 = arith.maximumf %20, %21 : vector<64x24xf32>
    %23 = arith.truncf %22 : vector<64x24xf32> to vector<64x24xbf16>
    %c0_15 = arith.constant 0 : index
    %c0_16 = arith.constant 0 : index
    %24 = vector.load %arg5[%c0_15, %c0_16] : memref<24x36xbf16, #tpu.memory_space<vmem>>, vector<24x36xbf16>
    %cst_17 = arith.constant dense<0.000000e+00> : vector<64x36xf32>
    %25 = tpu.matmul %23, %24, %cst_17 {dimension_numbers = #tpu.dot_dimension_numbers<[1], [0], [0], [1], [0, 0, 1, 1], [], []>} : vector<64x24xbf16>, vector<24x36xbf16>, vector<64x36xf32> -> vector<64x36xf32>
    %26 = arith.addf %12, %25 : vector<64x36xf32>
    %c0_18 = arith.constant 0 : index
    %c0_19 = arith.constant 0 : index
    %27 = vector.load %arg3[%c0_18, %c0_19] : memref<64x4xbf16, #tpu.memory_space<vmem>>, vector<64x4xbf16>
    %28 = arith.extf %27 : vector<64x4xbf16> to vector<64x4xf32>
    %c0_20 = arith.constant 0 : index
    %c0_21 = arith.constant 0 : index
    %29 = vector.load %arg9[%c0_20, %c0_21] : memref<1x4xf32, #tpu.memory_space<vmem>>, vector<1x4xf32>
    %30 = vector.broadcast %29 : vector<1x4xf32> to vector<64x4xf32>
    %31 = arith.mulf %28, %30 : vector<64x4xf32>
    %c0_22 = arith.constant 0 : index
    %c0_23 = arith.constant 0 : index
    %32 = vector.load %arg12[%c0_22, %c0_23] : memref<1x4xf32, #tpu.memory_space<vmem>>, vector<1x4xf32>
    %33 = vector.broadcast %32 : vector<1x4xf32> to vector<64x4xf32>
    %34 = arith.addf %31, %33 : vector<64x4xf32>
    %cst_24 = arith.constant 0.000000e+00 : f32
    %35 = vector.broadcast %cst_24 : f32 to vector<64x4xf32>
    %36 = arith.maximumf %34, %35 : vector<64x4xf32>
    %37 = arith.truncf %36 : vector<64x4xf32> to vector<64x4xbf16>
    %c0_25 = arith.constant 0 : index
    %c0_26 = arith.constant 0 : index
    %38 = vector.load %arg6[%c0_25, %c0_26] : memref<4x36xbf16, #tpu.memory_space<vmem>>, vector<4x36xbf16>
    %cst_27 = arith.constant dense<0.000000e+00> : vector<64x36xf32>
    %39 = tpu.matmul %37, %38, %cst_27 {dimension_numbers = #tpu.dot_dimension_numbers<[1], [0], [0], [1], [0, 0, 1, 1], [], []>} : vector<64x4xbf16>, vector<4x36xbf16>, vector<64x36xf32> -> vector<64x36xf32>
    %40 = arith.addf %26, %39 : vector<64x36xf32>
    %c0_28 = arith.constant 0 : index
    %c0_29 = arith.constant 0 : index
    %41 = vector.load %arg13[%c0_28, %c0_29] : memref<1x36xf32, #tpu.memory_space<vmem>>, vector<1x36xf32>
    %42 = vector.broadcast %41 : vector<1x36xf32> to vector<64x36xf32>
    %43 = arith.addf %40, %42 : vector<64x36xf32>
    %44 = arith.truncf %43 : vector<64x36xf32> to vector<64x36xbf16>
    %c0_30 = arith.constant 0 : index
    %c0_31 = arith.constant 0 : index
    %45 = vector.load %arg14[%c0_30, %c0_31] : memref<64x36xbf16, #tpu.memory_space<vmem>>, vector<64x36xbf16>
    tpu.vector_store %arg14[%c0_30, %c0_31], %44 {strides = array<i32>} : memref<64x36xbf16, #tpu.memory_space<vmem>>, vector<64x36xbf16>,
    return
  }
  func.func @transform_0(%arg0: i32) -> (i32, i32) {
    %c0_i32 = arith.constant 0 : i32
    %c0_i32_0 = arith.constant 0 : i32
    return %arg0, %c0_i32 : i32, i32
  }
  func.func @transform_1(%arg0: i32) -> (i32, i32) {
    %c0_i32 = arith.constant 0 : i32
    %c0_i32_0 = arith.constant 0 : i32
    return %arg0, %c0_i32 : i32, i32
  }
  func.func @transform_2(%arg0: i32) -> (i32, i32) {
    %c0_i32 = arith.constant 0 : i32
    %c0_i32_0 = arith.constant 0 : i32
    return %arg0, %c0_i32 : i32, i32
  }
  func.func @transform_3(%arg0: i32) -> (i32, i32) {
    %c0_i32 = arith.constant 0 : i32
    %c0_i32_0 = arith.constant 0 : i32
    %c0_i32_1 = arith.constant 0 : i32
    return %c0_i32, %c0_i32_0 : i32, i32
  }
  func.func @transform_4(%arg0: i32) -> (i32, i32) {
    %c0_i32 = arith.constant 0 : i32
    %c0_i32_0 = arith.constant 0 : i32
    %c0_i32_1 = arith.constant 0 : i32
    return %c0_i32, %c0_i32_0 : i32, i32
  }
  func.func @transform_5(%arg0: i32) -> (i32, i32) {
    %c0_i32 = arith.constant 0 : i32
    %c0_i32_0 = arith.constant 0 : i32
    %c0_i32_1 = arith.constant 0 : i32
    return %c0_i32, %c0_i32_0 : i32, i32
  }
  func.func @transform_6(%arg0: i32) -> (i32, i32) {
    %c0_i32 = arith.constant 0 : i32
    %c0_i32_0 = arith.constant 0 : i32
    %c0_i32_1 = arith.constant 0 : i32
    return %c0_i32, %c0_i32_0 : i32, i32
  }
  func.func @transform_7(%arg0: i32) -> (i32, i32) {
    %c0_i32 = arith.constant 0 : i32
    %c0_i32_0 = arith.constant 0 : i32
    %c0_i32_1 = arith.constant 0 : i32
    return %c0_i32, %c0_i32_0 : i32, i32
  }
  func.func @transform_8(%arg0: i32) -> (i32, i32) {
    %c0_i32 = arith.constant 0 : i32
    %c0_i32_0 = arith.constant 0 : i32
    %c0_i32_1 = arith.constant 0 : i32
    return %c0_i32, %c0_i32_0 : i32, i32
  }
  func.func @transform_9(%arg0: i32) -> (i32, i32) {
    %c0_i32 = arith.constant 0 : i32
    %c0_i32_0 = arith.constant 0 : i32
    %c0_i32_1 = arith.constant 0 : i32
    return %c0_i32, %c0_i32_0 : i32, i32
  }
  func.func @transform_10(%arg0: i32) -> (i32, i32) {
    %c0_i32 = arith.constant 0 : i32
    %c0_i32_0 = arith.constant 0 : i32
    %c0_i32_1 = arith.constant 0 : i32
    return %c0_i32, %c0_i32_0 : i32, i32
  }
  func.func @transform_11(%arg0: i32) -> (i32, i32) {
    %c0_i32 = arith.constant 0 : i32
    %c0_i32_0 = arith.constant 0 : i32
    %c0_i32_1 = arith.constant 0 : i32
    return %c0_i32, %c0_i32_0 : i32, i32
  }
  func.func @transform_12(%arg0: i32) -> (i32, i32) {
    %c0_i32 = arith.constant 0 : i32
    %c0_i32_0 = arith.constant 0 : i32
    %c0_i32_1 = arith.constant 0 : i32
    return %c0_i32, %c0_i32_0 : i32, i32
  }
  func.func @transform_13(%arg0: i32) -> (i32, i32) {
    %c0_i32 = arith.constant 0 : i32
    %c0_i32_0 = arith.constant 0 : i32
    return %arg0, %c0_i32 : i32, i32
  }
}

module attributes {stable_mosaic.version = 11 : i64} {
  func.func @_mm_pieces_kernel(%arg0: i32, %arg1: memref<64x32xbf16, #tpu.memory_space<vmem>>, %arg2: memref<32x32xbf16, #tpu.memory_space<vmem>>, %arg3: memref<1x32xf32, #tpu.memory_space<vmem>>, %arg4: memref<64x32xbf16, #tpu.memory_space<vmem>>) attributes {dimension_semantics = [#tpu.dimension_semantics<parallel>], iteration_bounds = array<i64: 2>, scalar_prefetch = 0 : i64, scratch_operands = 0 : i64, tpu.core_type = #tpu.core_type<tc>, window_params = [{transform_indices = @transform_0, window_bounds = array<i64: 64, 32>}, {pipeline_mode = #tpu.pipeline_mode<synchronous>, transform_indices = @transform_1, window_bounds = array<i64: 32, 32>}, {pipeline_mode = #tpu.pipeline_mode<synchronous>, transform_indices = @transform_2, window_bounds = array<i64: 1, 32>}, {transform_indices = @transform_3, window_bounds = array<i64: 64, 32>}]} {
    %c0 = arith.constant 0 : index
    %c0_0 = arith.constant 0 : index
    %0 = vector.load %arg1[%c0, %c0_0] : memref<64x32xbf16, #tpu.memory_space<vmem>>, vector<64x32xbf16>
    %c0_1 = arith.constant 0 : index
    %c0_2 = arith.constant 0 : index
    %1 = vector.load %arg2[%c0_1, %c0_2] : memref<32x32xbf16, #tpu.memory_space<vmem>>, vector<32x32xbf16>
    %cst = arith.constant dense<0.000000e+00> : vector<64x32xf32>
    %2 = tpu.matmul %0, %1, %cst {dimension_numbers = #tpu.dot_dimension_numbers<[1], [0], [0], [1], [0, 0, 1, 1], [], []>} : vector<64x32xbf16>, vector<32x32xbf16>, vector<64x32xf32> -> vector<64x32xf32>
    %c0_3 = arith.constant 0 : index
    %c0_4 = arith.constant 0 : index
    %3 = vector.load %arg3[%c0_3, %c0_4] : memref<1x32xf32, #tpu.memory_space<vmem>>, vector<1x32xf32>
    %4 = vector.broadcast %3 : vector<1x32xf32> to vector<64x32xf32>
    %5 = arith.addf %2, %4 : vector<64x32xf32>
    %6 = arith.truncf %5 : vector<64x32xf32> to vector<64x32xbf16>
    %c0_5 = arith.constant 0 : index
    %c0_6 = arith.constant 0 : index
    %7 = vector.load %arg4[%c0_5, %c0_6] : memref<64x32xbf16, #tpu.memory_space<vmem>>, vector<64x32xbf16>
    tpu.vector_store %arg4[%c0_5, %c0_6], %6 {strides = array<i32>} : memref<64x32xbf16, #tpu.memory_space<vmem>>, vector<64x32xbf16>,
    return
  }
  func.func @transform_0(%arg0: i32) -> (i32, i32) {
    %c0_i32 = arith.constant 0 : i32
    %c0_i32_0 = arith.constant 0 : i32
    return %arg0, %c0_i32 : i32, i32
  }
  func.func @transform_1(%arg0: i32) -> (i32, i32) {
    %c0_i32 = arith.constant 0 : i32
    %c0_i32_0 = arith.constant 0 : i32
    %c0_i32_1 = arith.constant 0 : i32
    return %c0_i32, %c0_i32_0 : i32, i32
  }
  func.func @transform_2(%arg0: i32) -> (i32, i32) {
    %c0_i32 = arith.constant 0 : i32
    %c0_i32_0 = arith.constant 0 : i32
    %c0_i32_1 = arith.constant 0 : i32
    return %c0_i32, %c0_i32_0 : i32, i32
  }
  func.func @transform_3(%arg0: i32) -> (i32, i32) {
    %c0_i32 = arith.constant 0 : i32
    %c0_i32_0 = arith.constant 0 : i32
    return %arg0, %c0_i32 : i32, i32
  }
}

module attributes {stable_mosaic.version = 11 : i64} {
  func.func @_mm_pieces_kernel(%arg0: i32, %arg1: memref<256x8xbf16, #tpu.memory_space<vmem>>, %arg2: memref<256x16xbf16, #tpu.memory_space<vmem>>, %arg3: memref<256x4xbf16, #tpu.memory_space<vmem>>, %arg4: memref<8x36xbf16, #tpu.memory_space<vmem>>, %arg5: memref<16x36xbf16, #tpu.memory_space<vmem>>, %arg6: memref<4x36xbf16, #tpu.memory_space<vmem>>, %arg7: memref<1x8xf32, #tpu.memory_space<vmem>>, %arg8: memref<1x16xf32, #tpu.memory_space<vmem>>, %arg9: memref<1x4xf32, #tpu.memory_space<vmem>>, %arg10: memref<1x8xf32, #tpu.memory_space<vmem>>, %arg11: memref<1x16xf32, #tpu.memory_space<vmem>>, %arg12: memref<1x4xf32, #tpu.memory_space<vmem>>, %arg13: memref<1x36xf32, #tpu.memory_space<vmem>>, %arg14: memref<256x36xbf16, #tpu.memory_space<vmem>>) attributes {dimension_semantics = [#tpu.dimension_semantics<parallel>], iteration_bounds = array<i64: 2>, scalar_prefetch = 0 : i64, scratch_operands = 0 : i64, tpu.core_type = #tpu.core_type<tc>, window_params = [{transform_indices = @transform_0, window_bounds = array<i64: 256, 8>}, {transform_indices = @transform_1, window_bounds = array<i64: 256, 16>}, {transform_indices = @transform_2, window_bounds = array<i64: 256, 4>}, {pipeline_mode = #tpu.pipeline_mode<synchronous>, transform_indices = @transform_3, window_bounds = array<i64: 8, 36>}, {pipeline_mode = #tpu.pipeline_mode<synchronous>, transform_indices = @transform_4, window_bounds = array<i64: 16, 36>}, {pipeline_mode = #tpu.pipeline_mode<synchronous>, transform_indices = @transform_5, window_bounds = array<i64: 4, 36>}, {pipeline_mode = #tpu.pipeline_mode<synchronous>, transform_indices = @transform_6, window_bounds = array<i64: 1, 8>}, {pipeline_mode = #tpu.pipeline_mode<synchronous>, transform_indices = @transform_7, window_bounds = array<i64: 1, 16>}, {pipeline_mode = #tpu.pipeline_mode<synchronous>, transform_indices = @transform_8, window_bounds = array<i64: 1, 4>}, {pipeline_mode = #tpu.pipeline_mode<synchronous>, transform_indices = @transform_9, window_bounds = array<i64: 1, 8>}, {pipeline_mode = #tpu.pipeline_mode<synchronous>, transform_indices = @transform_10, window_bounds = array<i64: 1, 16>}, {pipeline_mode = #tpu.pipeline_mode<synchronous>, transform_indices = @transform_11, window_bounds = array<i64: 1, 4>}, {pipeline_mode = #tpu.pipeline_mode<synchronous>, transform_indices = @transform_12, window_bounds = array<i64: 1, 36>}, {transform_indices = @transform_13, window_bounds = array<i64: 256, 36>}]} {
    %c0 = arith.constant 0 : index
    %c0_0 = arith.constant 0 : index
    %0 = vector.load %arg1[%c0, %c0_0] : memref<256x8xbf16, #tpu.memory_space<vmem>>, vector<256x8xbf16>
    %1 = arith.extf %0 : vector<256x8xbf16> to vector<256x8xf32>
    %c0_1 = arith.constant 0 : index
    %c0_2 = arith.constant 0 : index
    %2 = vector.load %arg7[%c0_1, %c0_2] : memref<1x8xf32, #tpu.memory_space<vmem>>, vector<1x8xf32>
    %3 = vector.broadcast %2 : vector<1x8xf32> to vector<256x8xf32>
    %4 = arith.mulf %1, %3 : vector<256x8xf32>
    %c0_3 = arith.constant 0 : index
    %c0_4 = arith.constant 0 : index
    %5 = vector.load %arg10[%c0_3, %c0_4] : memref<1x8xf32, #tpu.memory_space<vmem>>, vector<1x8xf32>
    %6 = vector.broadcast %5 : vector<1x8xf32> to vector<256x8xf32>
    %7 = arith.addf %4, %6 : vector<256x8xf32>
    %cst = arith.constant 0.000000e+00 : f32
    %8 = vector.broadcast %cst : f32 to vector<256x8xf32>
    %9 = arith.maximumf %7, %8 : vector<256x8xf32>
    %10 = arith.truncf %9 : vector<256x8xf32> to vector<256x8xbf16>
    %c0_5 = arith.constant 0 : index
    %c0_6 = arith.constant 0 : index
    %11 = vector.load %arg4[%c0_5, %c0_6] : memref<8x36xbf16, #tpu.memory_space<vmem>>, vector<8x36xbf16>
    %cst_7 = arith.constant dense<0.000000e+00> : vector<256x36xf32>
    %12 = tpu.matmul %10, %11, %cst_7 {dimension_numbers = #tpu.dot_dimension_numbers<[1], [0], [0], [1], [0, 0, 1, 1], [], []>} : vector<256x8xbf16>, vector<8x36xbf16>, vector<256x36xf32> -> vector<256x36xf32>
    %c0_8 = arith.constant 0 : index
    %c0_9 = arith.constant 0 : index
    %13 = vector.load %arg2[%c0_8, %c0_9] : memref<256x16xbf16, #tpu.memory_space<vmem>>, vector<256x16xbf16>
    %14 = arith.extf %13 : vector<256x16xbf16> to vector<256x16xf32>
    %c0_10 = arith.constant 0 : index
    %c0_11 = arith.constant 0 : index
    %15 = vector.load %arg8[%c0_10, %c0_11] : memref<1x16xf32, #tpu.memory_space<vmem>>, vector<1x16xf32>
    %16 = vector.broadcast %15 : vector<1x16xf32> to vector<256x16xf32>
    %17 = arith.mulf %14, %16 : vector<256x16xf32>
    %c0_12 = arith.constant 0 : index
    %c0_13 = arith.constant 0 : index
    %18 = vector.load %arg11[%c0_12, %c0_13] : memref<1x16xf32, #tpu.memory_space<vmem>>, vector<1x16xf32>
    %19 = vector.broadcast %18 : vector<1x16xf32> to vector<256x16xf32>
    %20 = arith.addf %17, %19 : vector<256x16xf32>
    %cst_14 = arith.constant 0.000000e+00 : f32
    %21 = vector.broadcast %cst_14 : f32 to vector<256x16xf32>
    %22 = arith.maximumf %20, %21 : vector<256x16xf32>
    %23 = arith.truncf %22 : vector<256x16xf32> to vector<256x16xbf16>
    %c0_15 = arith.constant 0 : index
    %c0_16 = arith.constant 0 : index
    %24 = vector.load %arg5[%c0_15, %c0_16] : memref<16x36xbf16, #tpu.memory_space<vmem>>, vector<16x36xbf16>
    %cst_17 = arith.constant dense<0.000000e+00> : vector<256x36xf32>
    %25 = tpu.matmul %23, %24, %cst_17 {dimension_numbers = #tpu.dot_dimension_numbers<[1], [0], [0], [1], [0, 0, 1, 1], [], []>} : vector<256x16xbf16>, vector<16x36xbf16>, vector<256x36xf32> -> vector<256x36xf32>
    %26 = arith.addf %12, %25 : vector<256x36xf32>
    %c0_18 = arith.constant 0 : index
    %c0_19 = arith.constant 0 : index
    %27 = vector.load %arg3[%c0_18, %c0_19] : memref<256x4xbf16, #tpu.memory_space<vmem>>, vector<256x4xbf16>
    %28 = arith.extf %27 : vector<256x4xbf16> to vector<256x4xf32>
    %c0_20 = arith.constant 0 : index
    %c0_21 = arith.constant 0 : index
    %29 = vector.load %arg9[%c0_20, %c0_21] : memref<1x4xf32, #tpu.memory_space<vmem>>, vector<1x4xf32>
    %30 = vector.broadcast %29 : vector<1x4xf32> to vector<256x4xf32>
    %31 = arith.mulf %28, %30 : vector<256x4xf32>
    %c0_22 = arith.constant 0 : index
    %c0_23 = arith.constant 0 : index
    %32 = vector.load %arg12[%c0_22, %c0_23] : memref<1x4xf32, #tpu.memory_space<vmem>>, vector<1x4xf32>
    %33 = vector.broadcast %32 : vector<1x4xf32> to vector<256x4xf32>
    %34 = arith.addf %31, %33 : vector<256x4xf32>
    %cst_24 = arith.constant 0.000000e+00 : f32
    %35 = vector.broadcast %cst_24 : f32 to vector<256x4xf32>
    %36 = arith.maximumf %34, %35 : vector<256x4xf32>
    %37 = arith.truncf %36 : vector<256x4xf32> to vector<256x4xbf16>
    %c0_25 = arith.constant 0 : index
    %c0_26 = arith.constant 0 : index
    %38 = vector.load %arg6[%c0_25, %c0_26] : memref<4x36xbf16, #tpu.memory_space<vmem>>, vector<4x36xbf16>
    %cst_27 = arith.constant dense<0.000000e+00> : vector<256x36xf32>
    %39 = tpu.matmul %37, %38, %cst_27 {dimension_numbers = #tpu.dot_dimension_numbers<[1], [0], [0], [1], [0, 0, 1, 1], [], []>} : vector<256x4xbf16>, vector<4x36xbf16>, vector<256x36xf32> -> vector<256x36xf32>
    %40 = arith.addf %26, %39 : vector<256x36xf32>
    %c0_28 = arith.constant 0 : index
    %c0_29 = arith.constant 0 : index
    %41 = vector.load %arg13[%c0_28, %c0_29] : memref<1x36xf32, #tpu.memory_space<vmem>>, vector<1x36xf32>
    %42 = vector.broadcast %41 : vector<1x36xf32> to vector<256x36xf32>
    %43 = arith.addf %40, %42 : vector<256x36xf32>
    %44 = arith.truncf %43 : vector<256x36xf32> to vector<256x36xbf16>
    %c0_30 = arith.constant 0 : index
    %c0_31 = arith.constant 0 : index
    %45 = vector.load %arg14[%c0_30, %c0_31] : memref<256x36xbf16, #tpu.memory_space<vmem>>, vector<256x36xbf16>
    tpu.vector_store %arg14[%c0_30, %c0_31], %44 {strides = array<i32>} : memref<256x36xbf16, #tpu.memory_space<vmem>>, vector<256x36xbf16>,
    return
  }
  func.func @transform_0(%arg0: i32) -> (i32, i32) {
    %c0_i32 = arith.constant 0 : i32
    %c0_i32_0 = arith.constant 0 : i32
    return %arg0, %c0_i32 : i32, i32
  }
  func.func @transform_1(%arg0: i32) -> (i32, i32) {
    %c0_i32 = arith.constant 0 : i32
    %c0_i32_0 = arith.constant 0 : i32
    return %arg0, %c0_i32 : i32, i32
  }
  func.func @transform_2(%arg0: i32) -> (i32, i32) {
    %c0_i32 = arith.constant 0 : i32
    %c0_i32_0 = arith.constant 0 : i32
    return %arg0, %c0_i32 : i32, i32
  }
  func.func @transform_3(%arg0: i32) -> (i32, i32) {
    %c0_i32 = arith.constant 0 : i32
    %c0_i32_0 = arith.constant 0 : i32
    %c0_i32_1 = arith.constant 0 : i32
    return %c0_i32, %c0_i32_0 : i32, i32
  }
  func.func @transform_4(%arg0: i32) -> (i32, i32) {
    %c0_i32 = arith.constant 0 : i32
    %c0_i32_0 = arith.constant 0 : i32
    %c0_i32_1 = arith.constant 0 : i32
    return %c0_i32, %c0_i32_0 : i32, i32
  }
  func.func @transform_5(%arg0: i32) -> (i32, i32) {
    %c0_i32 = arith.constant 0 : i32
    %c0_i32_0 = arith.constant 0 : i32
    %c0_i32_1 = arith.constant 0 : i32
    return %c0_i32, %c0_i32_0 : i32, i32
  }
  func.func @transform_6(%arg0: i32) -> (i32, i32) {
    %c0_i32 = arith.constant 0 : i32
    %c0_i32_0 = arith.constant 0 : i32
    %c0_i32_1 = arith.constant 0 : i32
    return %c0_i32, %c0_i32_0 : i32, i32
  }
  func.func @transform_7(%arg0: i32) -> (i32, i32) {
    %c0_i32 = arith.constant 0 : i32
    %c0_i32_0 = arith.constant 0 : i32
    %c0_i32_1 = arith.constant 0 : i32
    return %c0_i32, %c0_i32_0 : i32, i32
  }
  func.func @transform_8(%arg0: i32) -> (i32, i32) {
    %c0_i32 = arith.constant 0 : i32
    %c0_i32_0 = arith.constant 0 : i32
    %c0_i32_1 = arith.constant 0 : i32
    return %c0_i32, %c0_i32_0 : i32, i32
  }
  func.func @transform_9(%arg0: i32) -> (i32, i32) {
    %c0_i32 = arith.constant 0 : i32
    %c0_i32_0 = arith.constant 0 : i32
    %c0_i32_1 = arith.constant 0 : i32
    return %c0_i32, %c0_i32_0 : i32, i32
  }
  func.func @transform_10(%arg0: i32) -> (i32, i32) {
    %c0_i32 = arith.constant 0 : i32
    %c0_i32_0 = arith.constant 0 : i32
    %c0_i32_1 = arith.constant 0 : i32
    return %c0_i32, %c0_i32_0 : i32, i32
  }
  func.func @transform_11(%arg0: i32) -> (i32, i32) {
    %c0_i32 = arith.constant 0 : i32
    %c0_i32_0 = arith.constant 0 : i32
    %c0_i32_1 = arith.constant 0 : i32
    return %c0_i32, %c0_i32_0 : i32, i32
  }
  func.func @transform_12(%arg0: i32) -> (i32, i32) {
    %c0_i32 = arith.constant 0 : i32
    %c0_i32_0 = arith.constant 0 : i32
    %c0_i32_1 = arith.constant 0 : i32
    return %c0_i32, %c0_i32_0 : i32, i32
  }
  func.func @transform_13(%arg0: i32) -> (i32, i32) {
    %c0_i32 = arith.constant 0 : i32
    %c0_i32_0 = arith.constant 0 : i32
    return %arg0, %c0_i32 : i32, i32
  }
}

module attributes {stable_mosaic.version = 11 : i64} {
  func.func @_mm_pieces_kernel(%arg0: i32, %arg1: memref<256x8xbf16, #tpu.memory_space<vmem>>, %arg2: memref<256x16xbf16, #tpu.memory_space<vmem>>, %arg3: memref<8x36xbf16, #tpu.memory_space<vmem>>, %arg4: memref<16x36xbf16, #tpu.memory_space<vmem>>, %arg5: memref<1x8xf32, #tpu.memory_space<vmem>>, %arg6: memref<1x16xf32, #tpu.memory_space<vmem>>, %arg7: memref<1x8xf32, #tpu.memory_space<vmem>>, %arg8: memref<1x16xf32, #tpu.memory_space<vmem>>, %arg9: memref<1x36xf32, #tpu.memory_space<vmem>>, %arg10: memref<256x36xbf16, #tpu.memory_space<vmem>>) attributes {dimension_semantics = [#tpu.dimension_semantics<parallel>], iteration_bounds = array<i64: 2>, scalar_prefetch = 0 : i64, scratch_operands = 0 : i64, tpu.core_type = #tpu.core_type<tc>, window_params = [{transform_indices = @transform_0, window_bounds = array<i64: 256, 8>}, {transform_indices = @transform_1, window_bounds = array<i64: 256, 16>}, {pipeline_mode = #tpu.pipeline_mode<synchronous>, transform_indices = @transform_2, window_bounds = array<i64: 8, 36>}, {pipeline_mode = #tpu.pipeline_mode<synchronous>, transform_indices = @transform_3, window_bounds = array<i64: 16, 36>}, {pipeline_mode = #tpu.pipeline_mode<synchronous>, transform_indices = @transform_4, window_bounds = array<i64: 1, 8>}, {pipeline_mode = #tpu.pipeline_mode<synchronous>, transform_indices = @transform_5, window_bounds = array<i64: 1, 16>}, {pipeline_mode = #tpu.pipeline_mode<synchronous>, transform_indices = @transform_6, window_bounds = array<i64: 1, 8>}, {pipeline_mode = #tpu.pipeline_mode<synchronous>, transform_indices = @transform_7, window_bounds = array<i64: 1, 16>}, {pipeline_mode = #tpu.pipeline_mode<synchronous>, transform_indices = @transform_8, window_bounds = array<i64: 1, 36>}, {transform_indices = @transform_9, window_bounds = array<i64: 256, 36>}]} {
    %c0 = arith.constant 0 : index
    %c0_0 = arith.constant 0 : index
    %0 = vector.load %arg1[%c0, %c0_0] : memref<256x8xbf16, #tpu.memory_space<vmem>>, vector<256x8xbf16>
    %1 = arith.extf %0 : vector<256x8xbf16> to vector<256x8xf32>
    %c0_1 = arith.constant 0 : index
    %c0_2 = arith.constant 0 : index
    %2 = vector.load %arg5[%c0_1, %c0_2] : memref<1x8xf32, #tpu.memory_space<vmem>>, vector<1x8xf32>
    %3 = vector.broadcast %2 : vector<1x8xf32> to vector<256x8xf32>
    %4 = arith.mulf %1, %3 : vector<256x8xf32>
    %c0_3 = arith.constant 0 : index
    %c0_4 = arith.constant 0 : index
    %5 = vector.load %arg7[%c0_3, %c0_4] : memref<1x8xf32, #tpu.memory_space<vmem>>, vector<1x8xf32>
    %6 = vector.broadcast %5 : vector<1x8xf32> to vector<256x8xf32>
    %7 = arith.addf %4, %6 : vector<256x8xf32>
    %cst = arith.constant 0.000000e+00 : f32
    %8 = vector.broadcast %cst : f32 to vector<256x8xf32>
    %9 = arith.maximumf %7, %8 : vector<256x8xf32>
    %10 = arith.truncf %9 : vector<256x8xf32> to vector<256x8xbf16>
    %c0_5 = arith.constant 0 : index
    %c0_6 = arith.constant 0 : index
    %11 = vector.load %arg3[%c0_5, %c0_6] : memref<8x36xbf16, #tpu.memory_space<vmem>>, vector<8x36xbf16>
    %cst_7 = arith.constant dense<0.000000e+00> : vector<256x36xf32>
    %12 = tpu.matmul %10, %11, %cst_7 {dimension_numbers = #tpu.dot_dimension_numbers<[1], [0], [0], [1], [0, 0, 1, 1], [], []>} : vector<256x8xbf16>, vector<8x36xbf16>, vector<256x36xf32> -> vector<256x36xf32>
    %c0_8 = arith.constant 0 : index
    %c0_9 = arith.constant 0 : index
    %13 = vector.load %arg2[%c0_8, %c0_9] : memref<256x16xbf16, #tpu.memory_space<vmem>>, vector<256x16xbf16>
    %14 = arith.extf %13 : vector<256x16xbf16> to vector<256x16xf32>
    %c0_10 = arith.constant 0 : index
    %c0_11 = arith.constant 0 : index
    %15 = vector.load %arg6[%c0_10, %c0_11] : memref<1x16xf32, #tpu.memory_space<vmem>>, vector<1x16xf32>
    %16 = vector.broadcast %15 : vector<1x16xf32> to vector<256x16xf32>
    %17 = arith.mulf %14, %16 : vector<256x16xf32>
    %c0_12 = arith.constant 0 : index
    %c0_13 = arith.constant 0 : index
    %18 = vector.load %arg8[%c0_12, %c0_13] : memref<1x16xf32, #tpu.memory_space<vmem>>, vector<1x16xf32>
    %19 = vector.broadcast %18 : vector<1x16xf32> to vector<256x16xf32>
    %20 = arith.addf %17, %19 : vector<256x16xf32>
    %cst_14 = arith.constant 0.000000e+00 : f32
    %21 = vector.broadcast %cst_14 : f32 to vector<256x16xf32>
    %22 = arith.maximumf %20, %21 : vector<256x16xf32>
    %23 = arith.truncf %22 : vector<256x16xf32> to vector<256x16xbf16>
    %c0_15 = arith.constant 0 : index
    %c0_16 = arith.constant 0 : index
    %24 = vector.load %arg4[%c0_15, %c0_16] : memref<16x36xbf16, #tpu.memory_space<vmem>>, vector<16x36xbf16>
    %cst_17 = arith.constant dense<0.000000e+00> : vector<256x36xf32>
    %25 = tpu.matmul %23, %24, %cst_17 {dimension_numbers = #tpu.dot_dimension_numbers<[1], [0], [0], [1], [0, 0, 1, 1], [], []>} : vector<256x16xbf16>, vector<16x36xbf16>, vector<256x36xf32> -> vector<256x36xf32>
    %26 = arith.addf %12, %25 : vector<256x36xf32>
    %c0_18 = arith.constant 0 : index
    %c0_19 = arith.constant 0 : index
    %27 = vector.load %arg9[%c0_18, %c0_19] : memref<1x36xf32, #tpu.memory_space<vmem>>, vector<1x36xf32>
    %28 = vector.broadcast %27 : vector<1x36xf32> to vector<256x36xf32>
    %29 = arith.addf %26, %28 : vector<256x36xf32>
    %30 = arith.truncf %29 : vector<256x36xf32> to vector<256x36xbf16>
    %c0_20 = arith.constant 0 : index
    %c0_21 = arith.constant 0 : index
    %31 = vector.load %arg10[%c0_20, %c0_21] : memref<256x36xbf16, #tpu.memory_space<vmem>>, vector<256x36xbf16>
    tpu.vector_store %arg10[%c0_20, %c0_21], %30 {strides = array<i32>} : memref<256x36xbf16, #tpu.memory_space<vmem>>, vector<256x36xbf16>,
    return
  }
  func.func @transform_0(%arg0: i32) -> (i32, i32) {
    %c0_i32 = arith.constant 0 : i32
    %c0_i32_0 = arith.constant 0 : i32
    return %arg0, %c0_i32 : i32, i32
  }
  func.func @transform_1(%arg0: i32) -> (i32, i32) {
    %c0_i32 = arith.constant 0 : i32
    %c0_i32_0 = arith.constant 0 : i32
    return %arg0, %c0_i32 : i32, i32
  }
  func.func @transform_2(%arg0: i32) -> (i32, i32) {
    %c0_i32 = arith.constant 0 : i32
    %c0_i32_0 = arith.constant 0 : i32
    %c0_i32_1 = arith.constant 0 : i32
    return %c0_i32, %c0_i32_0 : i32, i32
  }
  func.func @transform_3(%arg0: i32) -> (i32, i32) {
    %c0_i32 = arith.constant 0 : i32
    %c0_i32_0 = arith.constant 0 : i32
    %c0_i32_1 = arith.constant 0 : i32
    return %c0_i32, %c0_i32_0 : i32, i32
  }
  func.func @transform_4(%arg0: i32) -> (i32, i32) {
    %c0_i32 = arith.constant 0 : i32
    %c0_i32_0 = arith.constant 0 : i32
    %c0_i32_1 = arith.constant 0 : i32
    return %c0_i32, %c0_i32_0 : i32, i32
  }
  func.func @transform_5(%arg0: i32) -> (i32, i32) {
    %c0_i32 = arith.constant 0 : i32
    %c0_i32_0 = arith.constant 0 : i32
    %c0_i32_1 = arith.constant 0 : i32
    return %c0_i32, %c0_i32_0 : i32, i32
  }
  func.func @transform_6(%arg0: i32) -> (i32, i32) {
    %c0_i32 = arith.constant 0 : i32
    %c0_i32_0 = arith.constant 0 : i32
    %c0_i32_1 = arith.constant 0 : i32
    return %c0_i32, %c0_i32_0 : i32, i32
  }
  func.func @transform_7(%arg0: i32) -> (i32, i32) {
    %c0_i32 = arith.constant 0 : i32
    %c0_i32_0 = arith.constant 0 : i32
    %c0_i32_1 = arith.constant 0 : i32
    return %c0_i32, %c0_i32_0 : i32, i32
  }
  func.func @transform_8(%arg0: i32) -> (i32, i32) {
    %c0_i32 = arith.constant 0 : i32
    %c0_i32_0 = arith.constant 0 : i32
    %c0_i32_1 = arith.constant 0 : i32
    return %c0_i32, %c0_i32_0 : i32, i32
  }
  func.func @transform_9(%arg0: i32) -> (i32, i32) {
    %c0_i32 = arith.constant 0 : i32
    %c0_i32_0 = arith.constant 0 : i32
    return %arg0, %c0_i32 : i32, i32
  }
}

module attributes {stable_mosaic.version = 11 : i64} {
  func.func @_mm_pieces_kernel(%arg0: i32, %arg1: memref<256x8xbf16, #tpu.memory_space<vmem>>, %arg2: memref<256x16xbf16, #tpu.memory_space<vmem>>, %arg3: memref<256x4xbf16, #tpu.memory_space<vmem>>, %arg4: memref<256x4xbf16, #tpu.memory_space<vmem>>, %arg5: memref<8x3xbf16, #tpu.memory_space<vmem>>, %arg6: memref<16x3xbf16, #tpu.memory_space<vmem>>, %arg7: memref<4x3xbf16, #tpu.memory_space<vmem>>, %arg8: memref<4x3xbf16, #tpu.memory_space<vmem>>, %arg9: memref<1x3xf32, #tpu.memory_space<vmem>>, %arg10: memref<256x3xf32, #tpu.memory_space<vmem>>) attributes {dimension_semantics = [#tpu.dimension_semantics<parallel>], iteration_bounds = array<i64: 2>, scalar_prefetch = 0 : i64, scratch_operands = 0 : i64, tpu.core_type = #tpu.core_type<tc>, window_params = [{transform_indices = @transform_0, window_bounds = array<i64: 256, 8>}, {transform_indices = @transform_1, window_bounds = array<i64: 256, 16>}, {transform_indices = @transform_2, window_bounds = array<i64: 256, 4>}, {transform_indices = @transform_3, window_bounds = array<i64: 256, 4>}, {pipeline_mode = #tpu.pipeline_mode<synchronous>, transform_indices = @transform_4, window_bounds = array<i64: 8, 3>}, {pipeline_mode = #tpu.pipeline_mode<synchronous>, transform_indices = @transform_5, window_bounds = array<i64: 16, 3>}, {pipeline_mode = #tpu.pipeline_mode<synchronous>, transform_indices = @transform_6, window_bounds = array<i64: 4, 3>}, {pipeline_mode = #tpu.pipeline_mode<synchronous>, transform_indices = @transform_7, window_bounds = array<i64: 4, 3>}, {pipeline_mode = #tpu.pipeline_mode<synchronous>, transform_indices = @transform_8, window_bounds = array<i64: 1, 3>}, {transform_indices = @transform_9, window_bounds = array<i64: 256, 3>}]} {
    %c0 = arith.constant 0 : index
    %c0_0 = arith.constant 0 : index
    %0 = vector.load %arg1[%c0, %c0_0] : memref<256x8xbf16, #tpu.memory_space<vmem>>, vector<256x8xbf16>
    %c0_1 = arith.constant 0 : index
    %c0_2 = arith.constant 0 : index
    %1 = vector.load %arg5[%c0_1, %c0_2] : memref<8x3xbf16, #tpu.memory_space<vmem>>, vector<8x3xbf16>
    %cst = arith.constant dense<0.000000e+00> : vector<256x3xf32>
    %2 = tpu.matmul %0, %1, %cst {dimension_numbers = #tpu.dot_dimension_numbers<[1], [0], [0], [1], [0, 0, 1, 1], [], []>} : vector<256x8xbf16>, vector<8x3xbf16>, vector<256x3xf32> -> vector<256x3xf32>
    %c0_3 = arith.constant 0 : index
    %c0_4 = arith.constant 0 : index
    %3 = vector.load %arg2[%c0_3, %c0_4] : memref<256x16xbf16, #tpu.memory_space<vmem>>, vector<256x16xbf16>
    %c0_5 = arith.constant 0 : index
    %c0_6 = arith.constant 0 : index
    %4 = vector.load %arg6[%c0_5, %c0_6] : memref<16x3xbf16, #tpu.memory_space<vmem>>, vector<16x3xbf16>
    %cst_7 = arith.constant dense<0.000000e+00> : vector<256x3xf32>
    %5 = tpu.matmul %3, %4, %cst_7 {dimension_numbers = #tpu.dot_dimension_numbers<[1], [0], [0], [1], [0, 0, 1, 1], [], []>} : vector<256x16xbf16>, vector<16x3xbf16>, vector<256x3xf32> -> vector<256x3xf32>
    %6 = arith.addf %2, %5 : vector<256x3xf32>
    %c0_8 = arith.constant 0 : index
    %c0_9 = arith.constant 0 : index
    %7 = vector.load %arg3[%c0_8, %c0_9] : memref<256x4xbf16, #tpu.memory_space<vmem>>, vector<256x4xbf16>
    %c0_10 = arith.constant 0 : index
    %c0_11 = arith.constant 0 : index
    %8 = vector.load %arg7[%c0_10, %c0_11] : memref<4x3xbf16, #tpu.memory_space<vmem>>, vector<4x3xbf16>
    %cst_12 = arith.constant dense<0.000000e+00> : vector<256x3xf32>
    %9 = tpu.matmul %7, %8, %cst_12 {dimension_numbers = #tpu.dot_dimension_numbers<[1], [0], [0], [1], [0, 0, 1, 1], [], []>} : vector<256x4xbf16>, vector<4x3xbf16>, vector<256x3xf32> -> vector<256x3xf32>
    %10 = arith.addf %6, %9 : vector<256x3xf32>
    %c0_13 = arith.constant 0 : index
    %c0_14 = arith.constant 0 : index
    %11 = vector.load %arg4[%c0_13, %c0_14] : memref<256x4xbf16, #tpu.memory_space<vmem>>, vector<256x4xbf16>
    %c0_15 = arith.constant 0 : index
    %c0_16 = arith.constant 0 : index
    %12 = vector.load %arg8[%c0_15, %c0_16] : memref<4x3xbf16, #tpu.memory_space<vmem>>, vector<4x3xbf16>
    %cst_17 = arith.constant dense<0.000000e+00> : vector<256x3xf32>
    %13 = tpu.matmul %11, %12, %cst_17 {dimension_numbers = #tpu.dot_dimension_numbers<[1], [0], [0], [1], [0, 0, 1, 1], [], []>} : vector<256x4xbf16>, vector<4x3xbf16>, vector<256x3xf32> -> vector<256x3xf32>
    %14 = arith.addf %10, %13 : vector<256x3xf32>
    %c0_18 = arith.constant 0 : index
    %c0_19 = arith.constant 0 : index
    %15 = vector.load %arg9[%c0_18, %c0_19] : memref<1x3xf32, #tpu.memory_space<vmem>>, vector<1x3xf32>
    %16 = vector.broadcast %15 : vector<1x3xf32> to vector<256x3xf32>
    %17 = arith.addf %14, %16 : vector<256x3xf32>
    %c0_20 = arith.constant 0 : index
    %c0_21 = arith.constant 0 : index
    %18 = vector.load %arg10[%c0_20, %c0_21] : memref<256x3xf32, #tpu.memory_space<vmem>>, vector<256x3xf32>
    tpu.vector_store %arg10[%c0_20, %c0_21], %17 {strides = array<i32>} : memref<256x3xf32, #tpu.memory_space<vmem>>, vector<256x3xf32>,
    return
  }
  func.func @transform_0(%arg0: i32) -> (i32, i32) {
    %c0_i32 = arith.constant 0 : i32
    %c0_i32_0 = arith.constant 0 : i32
    return %arg0, %c0_i32 : i32, i32
  }
  func.func @transform_1(%arg0: i32) -> (i32, i32) {
    %c0_i32 = arith.constant 0 : i32
    %c0_i32_0 = arith.constant 0 : i32
    return %arg0, %c0_i32 : i32, i32
  }
  func.func @transform_2(%arg0: i32) -> (i32, i32) {
    %c0_i32 = arith.constant 0 : i32
    %c0_i32_0 = arith.constant 0 : i32
    return %arg0, %c0_i32 : i32, i32
  }
  func.func @transform_3(%arg0: i32) -> (i32, i32) {
    %c0_i32 = arith.constant 0 : i32
    %c0_i32_0 = arith.constant 0 : i32
    return %arg0, %c0_i32 : i32, i32
  }
  func.func @transform_4(%arg0: i32) -> (i32, i32) {
    %c0_i32 = arith.constant 0 : i32
    %c0_i32_0 = arith.constant 0 : i32
    %c0_i32_1 = arith.constant 0 : i32
    return %c0_i32, %c0_i32_0 : i32, i32
  }
  func.func @transform_5(%arg0: i32) -> (i32, i32) {
    %c0_i32 = arith.constant 0 : i32
    %c0_i32_0 = arith.constant 0 : i32
    %c0_i32_1 = arith.constant 0 : i32
    return %c0_i32, %c0_i32_0 : i32, i32
  }
  func.func @transform_6(%arg0: i32) -> (i32, i32) {
    %c0_i32 = arith.constant 0 : i32
    %c0_i32_0 = arith.constant 0 : i32
    %c0_i32_1 = arith.constant 0 : i32
    return %c0_i32, %c0_i32_0 : i32, i32
  }
  func.func @transform_7(%arg0: i32) -> (i32, i32) {
    %c0_i32 = arith.constant 0 : i32
    %c0_i32_0 = arith.constant 0 : i32
    %c0_i32_1 = arith.constant 0 : i32
    return %c0_i32, %c0_i32_0 : i32, i32
  }
  func.func @transform_8(%arg0: i32) -> (i32, i32) {
    %c0_i32 = arith.constant 0 : i32
    %c0_i32_0 = arith.constant 0 : i32
    %c0_i32_1 = arith.constant 0 : i32
    return %c0_i32, %c0_i32_0 : i32, i32
  }
  func.func @transform_9(%arg0: i32) -> (i32, i32) {
    %c0_i32 = arith.constant 0 : i32
    %c0_i32_0 = arith.constant 0 : i32
    return %arg0, %c0_i32 : i32, i32
  }
}

</mosaic_0001>

<bundles_post_ra>
// kernel: _lambda_.16
= control target key start
LH: loop header
LB: loop body
LE: loop exit
PB: predicated region body
PF: predicated region fallthrough
CT: control target
= control target key end

     0   :  { %s944_s12 = smov 0   ;;  %s1108_s0 = inlined_call_operand.vmem [shape: bf16[512,3], index: 0, kind: input, shape index: {}]   ;;  %s1109_s1 = inlined_call_operand.vmem [shape: bf16[3,72], index: 1, kind: input, shape index: {}]   ;;  %s1110_s2 = inlined_call_operand.vmem [shape: f32[1,72], index: 2, kind: input, shape index: {}]   ;;  %s1111_s3 = inlined_call_operand.vmem [shape: bf16[512,72], index: 3, kind: output, shape index: {}]  }
   0x1 LB: > { %s729_s13 = sadd.s32 4294967295, %s921_s12   ;;  %p733_p0 = scmp.ge.s32.totalorder %s921_s12, 1  ;;  %s921_s12 = sphi %s944_s12, %s13_s12  }
   0x2   : > { %p138_p1 = scmp.lt.s32.totalorder %s921_s12, 3 }
   0x4   : > { %p139_p2 = pnand %p733_p0, %p138_p1 }
   0x5   : > { %s734_s16 = sshll.u32 (!%p139_p2), %s729_s13, 5 }
   0x6   : > { %142 = sbr.rel (%p139_p2) target bundleno = 248 (0xf8), region = 32  ;;  %p163_p3 = scmp.lt.s32.totalorder (!%p139_p2), %s734_s16, 63 }
   0xb   : > { %v207_v0 = vld [vmem:[%s1109_s1] sm:$0x3]  ;;  %vm344_vm0 = vcmask 1040384   ;;  %vm345_vm1 = vcmask 1041408   ;;  %v923_v1 = vmov 65535   ;;  %s1113_s16 = smov (!%p163_p3, %s734_s16), 63 }
   0xc   : > { %v346_v2 = vsel %vm344_vm0, 4294967295, %v923_v1  ;;  %s735_s17 = sshll.u32 %s1113_s16, 2  ;;  %vm295_vm2 = vcmask 23552   ;;  %v1000_v21 = vld [vmem:[%s1110_s2] ss:$0 sm:$0xff]  ;;  %vm640_vm3 = vcmask 584704  }
   0xd   : > { %v347_v3 = vsel %vm345_vm1, %v346_v2, 0  ;;  %s963_s20 = scalar_lea.vmem %s1108_s0, %s735_s17  ;;  %s1008_s25 = scalar_lea.vmem %s1111_s3, %s735_s17 }
   0xe   : > { %v349_v4 = vand.u32 %v347_v3, %v207_v0  ;;  %v899_v5 = vld [vmem:[%s963_s20] sm:$0xff]   ;;  %v901_v7 = vld [vmem:[%s963_s20 + $0x8] sm:$0xff]   ;;  %v903_v9 = vld [vmem:[%s963_s20 + $0x10] sm:$0xff]  }
   0xf   : > { %v900_v6 = vld [vmem:[%s963_s20 + $0x40] sm:$0xff]   ;;  %856 = vmatprep.mubr.msk.bf16.mxu0 %vm295_vm2, %v899_v5  ;;  %v902_v8 = vld [vmem:[%s963_s20 + $0x48] sm:$0xff]   ;;  %v904_v10 = vld [vmem:[%s963_s20 + $0x50] sm:$0xff]  }
  0x10   : > { %854 = vmatprep.subr.bf16.mxu0 %v349_v4  ;;  %888 = vmatprep.subr.bf16.mxu1 %v349_v4  ;;  %v905_v11 = vld [vmem:[%s963_s20 + $0x18] sm:$0xff]   ;;  %v907_v13 = vld [vmem:[%s963_s20 + $0x20] sm:$0xff]   ;;  %v909_v15 = vld [vmem:[%s963_s20 + $0x28] sm:$0xff]  }
  0x11   : > { %855 = vmatpush3.bf16.msra.mxu0 %v349_v4  ;;  %889 = vmatpush3.bf16.msra.mxu1 %v349_v4  ;;  %v906_v12 = vld [vmem:[%s963_s20 + $0x58] sm:$0xff]   ;;  %v908_v14 = vld [vmem:[%s963_s20 + $0x60] sm:$0xff]   ;;  %v910_v16 = vld [vmem:[%s963_s20 + $0x68] sm:$0xff]  }
  0x12   : > { %872 = vmatprep.mubr.msk.bf16.mxu1 %vm295_vm2, %v900_v6  ;;  %v911_v17 = vld [vmem:[%s963_s20 + $0x30] sm:$0xff]   ;;  %v913_v19 = vld [vmem:[%s963_s20 + $0x38] sm:$0xff]  }
  0x13   : > { %v912_v18 = vld [vmem:[%s963_s20 + $0x70] sm:$0xff]   ;;  %v914_v20 = vld [vmem:[%s963_s20 + $0x78] sm:$0xff]  }
  0x14   : > { %857 = vmatmul.mubr.msk.bf16.vlgmr.msra.gmra.mxu0 %vm295_vm2, %v901_v7  ;;  %873 = vmatmul.mubr.msk.bf16.vlgmr.msra.gmra.mxu1 %vm295_vm2, %v902_v8 }
  0x15   : > { %860 = vmatprep.mubr.msk.bf16.mxu0 %vm295_vm2, %v903_v9  ;;  %876 = vmatprep.mubr.msk.bf16.mxu1 %vm295_vm2, %v904_v10 }
  0x1c   : > { %861 = vmatmul.mubr.msk.bf16.gmra.mxu0 %vm295_vm2, %v905_v11  ;;  %877 = vmatmul.mubr.msk.bf16.gmra.mxu1 %vm295_vm2, %v906_v12 }
  0x1d   : > { %864 = vmatprep.mubr.msk.bf16.mxu0 %vm295_vm2, %v907_v13  ;;  %880 = vmatprep.mubr.msk.bf16.mxu1 %vm295_vm2, %v908_v14 }
  0x24   : > { %865 = vmatmul.mubr.msk.bf16.gmra.mxu0 %vm295_vm2, %v909_v15  ;;  %881 = vmatmul.mubr.msk.bf16.gmra.mxu1 %vm295_vm2, %v910_v16 }
  0x25   : > { %868 = vmatprep.mubr.msk.bf16.mxu0 %vm295_vm2, %v911_v17  ;;  %884 = vmatprep.mubr.msk.bf16.mxu1 %vm295_vm2, %v912_v18 }
  0x2c   : > { %869 = vmatmul.mubr.msk.bf16.gmra.mxu0 %vm295_vm2, %v913_v19  ;;  %885 = vmatmul.mubr.msk.bf16.gmra.mxu1 %vm295_vm2, %v914_v20 }
  0xd4   : > { %v858_v22 = vpop.f32.mrf.mxu0  ;;  %v874_v24 = vpop.f32.mrf.mxu1 }
  0xd5   : > { %v394_v23 = vadd.f32 %v858_v22, %v1000_v21  ;;  %v458_v25 = vadd.f32 %v874_v24, %v1000_v21 }
  0xd6   : > { %v385_v26 = vpop.f32.mrf.mxu0  ;;  %v449_v29 = vpop.f32.mrf.mxu1 }
  0xd7   : > { %v807_v27 = vpack.c.bf16 %v394_v23, %v394_v23  ;;  %v386_v28 = vadd.f32 %v1000_v21, %v385_v26  ;;  %v823_v30 = vpack.c.bf16 %v458_v25, %v458_v25  ;;  %v450_v31 = vadd.f32 %v1000_v21, %v449_v29 }
  0xd8   : > { %v859_v32 = vpop.f32.mrf.mxu0  ;;  %v875_v35 = vpop.f32.mrf.mxu1 }
  0xd9   : > { %643 = vst.msk [vmem:[%s1008_s25 + $0x8] sm:$0xf] %vm640_vm3, %v807_v27  ;;  %v805_v33 = vpack.c.bf16 %v386_v28, %v386_v28  ;;  %v397_v34 = vadd.f32 %v859_v32, %v1000_v21  ;;  %659 = vst.msk [vmem:[%s1008_s25 + $0x48] sm:$0xf] %vm640_vm3, %v823_v30  ;;  %v821_v36 = vpack.c.bf16 %v450_v31, %v450_v31 }
  0xda   : > { %v461_v37 = vadd.f32 %v875_v35, %v1000_v21  ;;  %v388_v38 = vpop.f32.mrf.mxu0  ;;  %v452_v41 = vpop.f32.mrf.mxu1 }
  0xdb   : > { %641 = vst.msk [vmem:[%s1008_s25] sm:$0xf] %vm640_vm3, %v805_v33  ;;  %v808_v39 = vpack.c.bf16 %v397_v34, %v397_v34  ;;  %v389_v40 = vadd.f32 %v1000_v21, %v388_v38  ;;  %657 = vst.msk [vmem:[%s1008_s25 + $0x40] sm:$0xf] %vm640_vm3, %v821_v36  ;;  %v453_v43 = vadd.f32 %v1000_v21, %v452_v41 }
  0xdc   : > { %v824_v42 = vpack.c.bf16 %v461_v37, %v461_v37  ;;  %v862_v44 = vpop.f32.mrf.mxu0  ;;  %v878_v47 = vpop.f32.mrf.mxu1 }
  0xdd   : > { %644 = vst.msk [vmem:[%s1008_s25 + $0xc] sm:$0xf] %vm640_vm3, %v808_v39  ;;  %v806_v45 = vpack.c.bf16 %v389_v40, %v389_v40  ;;  %v410_v46 = vadd.f32 %v862_v44, %v1000_v21  ;;  %v822_v48 = vpack.c.bf16 %v453_v43, %v453_v43  ;;  %v474_v49 = vadd.f32 %v878_v47, %v1000_v21 }
  0xde   : > { %660 = vst.msk [vmem:[%s1008_s25 + $0x4c] sm:$0xf] %vm640_vm3, %v824_v42  ;;  %v401_v50 = vpop.f32.mrf.mxu0  ;;  %v465_v53 = vpop.f32.mrf.mxu1 }
  0xdf   : > { %642 = vst.msk [vmem:[%s1008_s25 + $0x4] sm:$0xf] %vm640_vm3, %v806_v45  ;;  %v811_v51 = vpack.c.bf16 %v410_v46, %v410_v46  ;;  %v402_v52 = vadd.f32 %v1000_v21, %v401_v50  ;;  %658 = vst.msk [vmem:[%s1008_s25 + $0x44] sm:$0xf] %vm640_vm3, %v822_v48  ;;  %v827_v54 = vpack.c.bf16 %v474_v49, %v474_v49 }
  0xe0   : > { %v466_v55 = vadd.f32 %v1000_v21, %v465_v53  ;;  %v863_v56 = vpop.f32.mrf.mxu0  ;;  %v879_v59 = vpop.f32.mrf.mxu1 }
  0xe1   : > { %647 = vst.msk [vmem:[%s1008_s25 + $0x18] sm:$0xf] %vm640_vm3, %v811_v51  ;;  %v809_v57 = vpack.c.bf16 %v402_v52, %v402_v52  ;;  %v413_v58 = vadd.f32 %v863_v56, %v1000_v21  ;;  %663 = vst.msk [vmem:[%s1008_s25 + $0x58] sm:$0xf] %vm640_vm3, %v827_v54  ;;  %v477_v61 = vadd.f32 %v879_v59, %v1000_v21 }
  0xe2   : > { %v825_v60 = vpack.c.bf16 %v466_v55, %v466_v55  ;;  %v404_v62 = vpop.f32.mrf.mxu0  ;;  %v468_v1 = vpop.f32.mrf.mxu1 }
  0xe3   : > { %645 = vst.msk [vmem:[%s1008_s25 + $0x10] sm:$0xf] %vm640_vm3, %v809_v57  ;;  %v812_v63 = vpack.c.bf16 %v413_v58, %v413_v58  ;;  %v405_v0 = vadd.f32 %v1000_v21, %v404_v62  ;;  %v828_v2 = vpack.c.bf16 %v477_v61, %v477_v61  ;;  %v469_v3 = vadd.f32 %v1000_v21, %v468_v1 }
  0xe4   : > { %661 = vst.msk [vmem:[%s1008_s25 + $0x50] sm:$0xf] %vm640_vm3, %v825_v60  ;;  %v866_v4 = vpop.f32.mrf.mxu0  ;;  %v882_v7 = vpop.f32.mrf.mxu1 }
  0xe5   : > { %648 = vst.msk [vmem:[%s1008_s25 + $0x1c] sm:$0xf] %vm640_vm3, %v812_v63  ;;  %v810_v5 = vpack.c.bf16 %v405_v0, %v405_v0  ;;  %v426_v6 = vadd.f32 %v866_v4, %v1000_v21  ;;  %664 = vst.msk [vmem:[%s1008_s25 + $0x5c] sm:$0xf] %vm640_vm3, %v828_v2  ;;  %v826_v8 = vpack.c.bf16 %v469_v3, %v469_v3 }
  0xe6   : > { %v490_v9 = vadd.f32 %v882_v7, %v1000_v21  ;;  %v417_v10 = vpop.f32.mrf.mxu0  ;;  %v481_v13 = vpop.f32.mrf.mxu1 }
  0xe7   : > { %646 = vst.msk [vmem:[%s1008_s25 + $0x14] sm:$0xf] %vm640_vm3, %v810_v5  ;;  %v815_v11 = vpack.c.bf16 %v426_v6, %v426_v6  ;;  %v418_v12 = vadd.f32 %v1000_v21, %v417_v10  ;;  %662 = vst.msk [vmem:[%s1008_s25 + $0x54] sm:$0xf] %vm640_vm3, %v826_v8  ;;  %v482_v15 = vadd.f32 %v1000_v21, %v481_v13 }
  0xe8   : > { %v831_v14 = vpack.c.bf16 %v490_v9, %v490_v9  ;;  %v867_v16 = vpop.f32.mrf.mxu0  ;;  %v883_v19 = vpop.f32.mrf.mxu1 }
  0xe9   : > { %651 = vst.msk [vmem:[%s1008_s25 + $0x28] sm:$0xf] %vm640_vm3, %v815_v11  ;;  %v813_v17 = vpack.c.bf16 %v418_v12, %v418_v12  ;;  %v429_v18 = vadd.f32 %v867_v16, %v1000_v21  ;;  %v829_v20 = vpack.c.bf16 %v482_v15, %v482_v15  ;;  %v493_v22 = vadd.f32 %v883_v19, %v1000_v21 }
  0xea   : > { %667 = vst.msk [vmem:[%s1008_s25 + $0x68] sm:$0xf] %vm640_vm3, %v831_v14  ;;  %v420_v23 = vpop.f32.mrf.mxu0  ;;  %v484_v26 = vpop.f32.mrf.mxu1 }
  0xeb   : > { %649 = vst.msk [vmem:[%s1008_s25 + $0x20] sm:$0xf] %vm640_vm3, %v813_v17  ;;  %v816_v24 = vpack.c.bf16 %v429_v18, %v429_v18  ;;  %v421_v25 = vadd.f32 %v1000_v21, %v420_v23  ;;  %665 = vst.msk [vmem:[%s1008_s25 + $0x60] sm:$0xf] %vm640_vm3, %v829_v20  ;;  %v832_v27 = vpack.c.bf16 %v493_v22, %v493_v22 }
  0xec   : > { %v485_v28 = vadd.f32 %v1000_v21, %v484_v26  ;;  %v870_v29 = vpop.f32.mrf.mxu0  ;;  %v886_v32 = vpop.f32.mrf.mxu1 }
  0xed   : > { %652 = vst.msk [vmem:[%s1008_s25 + $0x2c] sm:$0xf] %vm640_vm3, %v816_v24  ;;  %v814_v30 = vpack.c.bf16 %v421_v25, %v421_v25  ;;  %v442_v31 = vadd.f32 %v870_v29, %v1000_v21  ;;  %668 = vst.msk [vmem:[%s1008_s25 + $0x6c] sm:$0xf] %vm640_vm3, %v832_v27  ;;  %v506_v34 = vadd.f32 %v886_v32, %v1000_v21 }
  0xee   : > { %v830_v33 = vpack.c.bf16 %v485_v28, %v485_v28  ;;  %v433_v35 = vpop.f32.mrf.mxu0  ;;  %v497_v38 = vpop.f32.mrf.mxu1 }
  0xef   : > { %650 = vst.msk [vmem:[%s1008_s25 + $0x24] sm:$0xf] %vm640_vm3, %v814_v30  ;;  %v819_v36 = vpack.c.bf16 %v442_v31, %v442_v31  ;;  %v434_v37 = vadd.f32 %v1000_v21, %v433_v35  ;;  %v835_v39 = vpack.c.bf16 %v506_v34, %v506_v34  ;;  %v498_v40 = vadd.f32 %v1000_v21, %v497_v38 }
  0xf0   : > { %666 = vst.msk [vmem:[%s1008_s25 + $0x64] sm:$0xf] %vm640_vm3, %v830_v33  ;;  %v871_v41 = vpop.f32.mrf.mxu0  ;;  %v887_v44 = vpop.f32.mrf.mxu1 }
  0xf1   : > { %655 = vst.msk [vmem:[%s1008_s25 + $0x38] sm:$0xf] %vm640_vm3, %v819_v36  ;;  %v817_v42 = vpack.c.bf16 %v434_v37, %v434_v37  ;;  %v445_v43 = vadd.f32 %v871_v41, %v1000_v21  ;;  %671 = vst.msk [vmem:[%s1008_s25 + $0x78] sm:$0xf] %vm640_vm3, %v835_v39  ;;  %v833_v45 = vpack.c.bf16 %v498_v40, %v498_v40 }
  0xf2   : > { %v509_v46 = vadd.f32 %v887_v44, %v1000_v21  ;;  %v436_v47 = vpop.f32.mrf.mxu0  ;;  %v500_v50 = vpop.f32.mrf.mxu1 }
  0xf3   : > { %653 = vst.msk [vmem:[%s1008_s25 + $0x30] sm:$0xf] %vm640_vm3, %v817_v42  ;;  %v820_v48 = vpack.c.bf16 %v445_v43, %v445_v43  ;;  %v437_v49 = vadd.f32 %v1000_v21, %v436_v47  ;;  %669 = vst.msk [vmem:[%s1008_s25 + $0x70] sm:$0xf] %vm640_vm3, %v833_v45  ;;  %v501_v52 = vadd.f32 %v1000_v21, %v500_v50 }
  0xf4   : > { %v836_v51 = vpack.c.bf16 %v509_v46, %v509_v46 }
  0xf5   : > { %656 = vst.msk [vmem:[%s1008_s25 + $0x3c] sm:$0xf] %vm640_vm3, %v820_v48  ;;  %v818_v53 = vpack.c.bf16 %v437_v49, %v437_v49  ;;  %v834_v54 = vpack.c.bf16 %v501_v52, %v501_v52 }
  0xf6   : > { %672 = vst.msk [vmem:[%s1008_s25 + $0x7c] sm:$0xf] %vm640_vm3, %v836_v51 }
  0xf7   : > { %654 = vst.msk [vmem:[%s1008_s25 + $0x34] sm:$0xf] %vm640_vm3, %v818_v53  ;;  %670 = vst.msk [vmem:[%s1008_s25 + $0x74] sm:$0xf] %vm640_vm3, %v834_v54 }
  0xf8 PF: > { %s13_s12 = sadd.s32 1, %s921_s12  }
  0xf9   : > { %p10_p4 = scmp.ge.s32.totalorder %s13_s12, 4  }
  0xfb   :  { %12 = sbr.rel (!%p10_p4) target bundleno = 1 (0x1), region = 62 }

// kernel: _lambda_.17
= control target key start
LH: loop header
LB: loop body
LE: loop exit
PB: predicated region body
PF: predicated region fallthrough
CT: control target
= control target key end

     0   :  { %s1132_s18 = smov 0   ;;  %s1370_s0 = inlined_call_operand.vmem [shape: bf16[512,8], index: 0, kind: input, shape index: {}]   ;;  %s1371_s1 = inlined_call_operand.vmem [shape: bf16[8,36], index: 1, kind: input, shape index: {}]   ;;  %s1372_s2 = inlined_call_operand.vmem [shape: f32[1,8], index: 2, kind: input, shape index: {}]   ;;  %s1373_s3 = inlined_call_operand.vmem [shape: f32[1,8], index: 3, kind: input, shape index: {}]   ;;  %s1374_s4 = inlined_call_operand.vmem [shape: f32[1,36], index: 4, kind: input, shape index: {}]   ;;  %s1375_s5 = inlined_call_operand.vmem [shape: bf16[512,36], index: 5, kind: output, shape index: {}]  }
   0x1 LB: > { %s858_s19 = sadd.s32 4294967295, %s1100_s18   ;;  %p862_p0 = scmp.ge.s32.totalorder %s1100_s18, 1  ;;  %s1100_s18 = sphi %s1132_s18, %s15_s18  }
   0x2   : > { %p188_p1 = scmp.lt.s32.totalorder %s1100_s18, 3 }
   0x4   : > { %p189_p2 = pnand %p862_p0, %p188_p1 }
   0x5   : > { %s863_s22 = sshll.u32 (!%p189_p2), %s858_s19, 5 }
   0x6   : > { %192 = sbr.rel (%p189_p2) target bundleno = 260 (0x104), region = 40  ;;  %p217_p3 = scmp.lt.s32.totalorder (!%p189_p2), %s863_s22, 63 }
   0xb   : > { %v419_v0 = vld [vmem:[%s1371_s1] sm:$0xf]  ;;  %vm476_vm0 = vcmask 1043456   ;;  %s1377_s22 = smov (!%p217_p3, %s863_s22), 63  ;;  %vm427_vm1 = vcmask 64512   ;;  %vm769_vm2 = vcmask 289792  }
   0xc   : > { %1084 = vmatprep.subr.msk.bf16.mxu0 %vm476_vm0, %v419_v0  ;;  %1085 = vmatprep.subr.msk.bf16.mxu1 %vm476_vm0, %v419_v0  ;;  %v478_v1 = vsel %vm476_vm0, %v419_v0, 0  ;;  %s864_s23 = sshll.u32 %s1377_s22, 2  ;;  %v1156_v2 = vld [vmem:[%s1372_s2] ss:$0 sm:$0xff] }
   0xd   : > { %1049 = vmatpush3.bf16.msra.mxu0 %v478_v1  ;;  %1083 = vmatpush3.bf16.msra.mxu1 %v478_v1  ;;  %s1151_s26 = scalar_lea.vmem %s1370_s0, %s864_s23  ;;  %v1165_v11 = vld [vmem:[%s1373_s3] ss:$0 sm:$0xff]  ;;  %s1271_s10 = scalar_lea.vmem %s1375_s5, %s864_s23 }
   0xe   : > { %v953_v3 = vld [vmem:[%s1151_s26] sm:$0xff]   ;;  %v1016_v5 = vld [vmem:[%s1151_s26 + $0x8] sm:$0xff]   ;;  %v1017_v32 = vld [vmem:[%s1151_s26 + $0x10] sm:$0xff]  }
   0xf   : > { %v1023_v4 = vld [vmem:[%s1151_s26 + $0x40] sm:$0xff]   ;;  %v954_v6 = vunpack.c.l.bf16 %v953_v3  ;;  %v955_v7 = vunpack.c.h.bf16 %v953_v3  ;;  %v1024_v10 = vld [vmem:[%s1151_s26 + $0x48] sm:$0xff]   ;;  %v958_v12 = vunpack.c.l.bf16 %v1016_v5  ;;  %v959_v13 = vunpack.c.h.bf16 %v1016_v5  ;;  %v1025_v37 = vld [vmem:[%s1151_s26 + $0x50] sm:$0xff]  }
  0x10   : > { %v986_v8 = vunpack.c.l.bf16 %v1023_v4  ;;  %v987_v9 = vunpack.c.h.bf16 %v1023_v4  ;;  %v990_v14 = vunpack.c.l.bf16 %v1024_v10  ;;  %v991_v15 = vunpack.c.h.bf16 %v1024_v10  ;;  %v1018_v42 = vld [vmem:[%s1151_s26 + $0x18] sm:$0xff]   ;;  %v1019_v5 = vld [vmem:[%s1151_s26 + $0x20] sm:$0xff]  }
  0x11   : > { %v300_v16 = vmul.f32 %v954_v6, %v1156_v2  ;;  %v301_v17 = vmul.f32 %v955_v7, %v1156_v2  ;;  %v302_v20 = vmul.f32 %v958_v12, %v1156_v2  ;;  %v303_v21 = vmul.f32 %v959_v13, %v1156_v2  ;;  %v1026_v47 = vld [vmem:[%s1151_s26 + $0x58] sm:$0xff]  }
  0x12   : > { %v316_v18 = vmul.f32 %v986_v8, %v1156_v2  ;;  %v317_v19 = vmul.f32 %v987_v9, %v1156_v2  ;;  %v318_v22 = vmul.f32 %v990_v14, %v1156_v2  ;;  %v319_v23 = vmul.f32 %v991_v15, %v1156_v2  ;;  %v1027_v15 = vld [vmem:[%s1151_s26 + $0x60] sm:$0xff]  }
  0x13   : > { %v339_v24 = vadd.f32 %v1165_v11, %v300_v16  ;;  %v340_v25 = vadd.f32 %v1165_v11, %v301_v17  ;;  %v341_v28 = vadd.f32 %v1165_v11, %v302_v20  ;;  %v342_v29 = vadd.f32 %v1165_v11, %v303_v21  ;;  %v1020_v20 = vld [vmem:[%s1151_s26 + $0x28] sm:$0xff]  }
  0x14   : > { %v355_v26 = vadd.f32 %v1165_v11, %v316_v18  ;;  %v356_v27 = vadd.f32 %v1165_v11, %v317_v19  ;;  %v357_v30 = vadd.f32 %v1165_v11, %v318_v22  ;;  %v358_v31 = vadd.f32 %v1165_v11, %v319_v23 }
  0x15   : > { %v371_v33 = vmax.f32 %v339_v24, 0.0  ;;  %v372_v34 = vmax.f32 %v340_v25, 0.0  ;;  %v373_v38 = vmax.f32 %v341_v28, 0.0  ;;  %v374_v39 = vmax.f32 %v342_v29, 0.0  ;;  %v1028_v25 = vld [vmem:[%s1151_s26 + $0x68] sm:$0xff]  }
  0x16   : > { %v387_v35 = vmax.f32 %v355_v26, 0.0  ;;  %v388_v36 = vmax.f32 %v356_v27, 0.0  ;;  %v389_v40 = vmax.f32 %v357_v30, 0.0  ;;  %v390_v41 = vmax.f32 %v358_v31, 0.0 }
  0x17   : > { %v403_v43 = vpack.c.bf16 %v372_v34, %v371_v33  ;;  %v962_v45 = vunpack.c.l.bf16 %v1017_v32  ;;  %v963_v46 = vunpack.c.h.bf16 %v1017_v32  ;;  %v404_v48 = vpack.c.bf16 %v374_v39, %v373_v38 }
  0x18   : > { %v411_v44 = vpack.c.bf16 %v388_v36, %v387_v35  ;;  %v412_v49 = vpack.c.bf16 %v390_v41, %v389_v40  ;;  %v994_v50 = vunpack.c.l.bf16 %v1025_v37  ;;  %v995_v51 = vunpack.c.h.bf16 %v1025_v37 }
  0x19   : > { %1050 = vmatprep.mubr.msk.bf16.mxu0 %vm427_vm1, %v403_v43  ;;  %v304_v52 = vmul.f32 %v962_v45, %v1156_v2  ;;  %v305_v53 = vmul.f32 %v963_v46, %v1156_v2  ;;  %v966_v54 = vunpack.c.l.bf16 %v1018_v42  ;;  %v967_v55 = vunpack.c.h.bf16 %v1018_v42  ;;  %v1021_v42 = vld [vmem:[%s1151_s26 + $0x30] sm:$0xff]  }
  0x1a   : > { %1066 = vmatprep.mubr.msk.bf16.mxu1 %vm427_vm1, %v411_v44  ;;  %1051 = vmatmul.mubr.msk.bf16.vlgmr.msra.gmra.mxu0 %vm427_vm1, %v404_v48  ;;  %v320_v56 = vmul.f32 %v994_v50, %v1156_v2  ;;  %v321_v57 = vmul.f32 %v995_v51, %v1156_v2  ;;  %v998_v58 = vunpack.c.l.bf16 %v1026_v47  ;;  %v999_v59 = vunpack.c.h.bf16 %v1026_v47 }
  0x1b   : > { %1067 = vmatmul.mubr.msk.bf16.vlgmr.msra.gmra.mxu1 %vm427_vm1, %v412_v49  ;;  %v343_v60 = vadd.f32 %v1165_v11, %v304_v52  ;;  %v344_v61 = vadd.f32 %v1165_v11, %v305_v53  ;;  %v306_v62 = vmul.f32 %v966_v54, %v1156_v2  ;;  %v307_v63 = vmul.f32 %v967_v55, %v1156_v2  ;;  %v1029_v55 = vld [vmem:[%s1151_s26 + $0x70] sm:$0xff]  }
  0x1c   : > { %v359_v0 = vadd.f32 %v1165_v11, %v320_v56  ;;  %v360_v1 = vadd.f32 %v1165_v11, %v321_v57  ;;  %v322_v3 = vmul.f32 %v998_v58, %v1156_v2  ;;  %v323_v4 = vmul.f32 %v999_v59, %v1156_v2 }
  0x1d   : > { %v375_v6 = vmax.f32 %v343_v60, 0.0  ;;  %v376_v7 = vmax.f32 %v344_v61, 0.0  ;;  %v345_v8 = vadd.f32 %v1165_v11, %v306_v62  ;;  %v346_v9 = vadd.f32 %v1165_v11, %v307_v63  ;;  %v1022_v60 = vld [vmem:[%s1151_s26 + $0x38] sm:$0xff]  }
  0x1e   : > { %v391_v10 = vmax.f32 %v359_v0, 0.0  ;;  %v392_v12 = vmax.f32 %v360_v1, 0.0  ;;  %v361_v13 = vadd.f32 %v1165_v11, %v322_v3  ;;  %v362_v14 = vadd.f32 %v1165_v11, %v323_v4  ;;  %v1030_v1 = vld [vmem:[%s1151_s26 + $0x78] sm:$0xff]  }
  0x1f   : > { %v405_v16 = vpack.c.bf16 %v376_v7, %v375_v6  ;;  %v377_v17 = vmax.f32 %v345_v8, 0.0  ;;  %v378_v18 = vmax.f32 %v346_v9, 0.0  ;;  %v970_v19 = vunpack.c.l.bf16 %v1019_v5 }
  0x20   : > { %v413_v21 = vpack.c.bf16 %v392_v12, %v391_v10  ;;  %v393_v22 = vmax.f32 %v361_v13, 0.0  ;;  %v394_v23 = vmax.f32 %v362_v14, 0.0  ;;  %v971_v24 = vunpack.c.h.bf16 %v1019_v5 }
  0x21   : > { %1054 = vmatprep.mubr.msk.bf16.mxu0 %vm427_vm1, %v405_v16  ;;  %v406_v26 = vpack.c.bf16 %v378_v18, %v377_v17  ;;  %v308_v27 = vmul.f32 %v970_v19, %v1156_v2  ;;  %v1002_v28 = vunpack.c.l.bf16 %v1027_v15  ;;  %v1003_v29 = vunpack.c.h.bf16 %v1027_v15 }
  0x22   : > { %1070 = vmatprep.mubr.msk.bf16.mxu1 %vm427_vm1, %v413_v21  ;;  %v414_v30 = vpack.c.bf16 %v394_v23, %v393_v22  ;;  %v309_v31 = vmul.f32 %v971_v24, %v1156_v2  ;;  %v974_v32 = vunpack.c.l.bf16 %v1020_v20  ;;  %v975_v33 = vunpack.c.h.bf16 %v1020_v20 }
  0x23   : > { %1055 = vmatmul.mubr.msk.bf16.gmra.mxu0 %vm427_vm1, %v406_v26  ;;  %v347_v34 = vadd.f32 %v1165_v11, %v308_v27  ;;  %v324_v35 = vmul.f32 %v1002_v28, %v1156_v2  ;;  %v325_v36 = vmul.f32 %v1003_v29, %v1156_v2  ;;  %v1006_v37 = vunpack.c.l.bf16 %v1028_v25 }
  0x24   : > { %1071 = vmatmul.mubr.msk.bf16.gmra.mxu1 %vm427_vm1, %v414_v30  ;;  %v348_v38 = vadd.f32 %v1165_v11, %v309_v31  ;;  %v310_v39 = vmul.f32 %v974_v32, %v1156_v2  ;;  %v311_v40 = vmul.f32 %v975_v33, %v1156_v2  ;;  %v1007_v41 = vunpack.c.h.bf16 %v1028_v25 }
  0x25   : > { %v379_v43 = vmax.f32 %v347_v34, 0.0  ;;  %v363_v44 = vadd.f32 %v1165_v11, %v324_v35  ;;  %v364_v45 = vadd.f32 %v1165_v11, %v325_v36  ;;  %v326_v46 = vmul.f32 %v1006_v37, %v1156_v2 }
  0x26   : > { %v380_v47 = vmax.f32 %v348_v38, 0.0  ;;  %v349_v48 = vadd.f32 %v1165_v11, %v310_v39  ;;  %v350_v49 = vadd.f32 %v1165_v11, %v311_v40  ;;  %v327_v50 = vmul.f32 %v1007_v41, %v1156_v2 }
  0x27   : > { %v395_v51 = vmax.f32 %v363_v44, 0.0  ;;  %v396_v52 = vmax.f32 %v364_v45, 0.0  ;;  %v365_v53 = vadd.f32 %v1165_v11, %v326_v46  ;;  %v978_v54 = vunpack.c.l.bf16 %v1021_v42 }
  0x28   : > { %v407_v56 = vpack.c.bf16 %v380_v47, %v379_v43  ;;  %v381_v57 = vmax.f32 %v349_v48, 0.0  ;;  %v382_v58 = vmax.f32 %v350_v49, 0.0  ;;  %v366_v59 = vadd.f32 %v1165_v11, %v327_v50 }
  0x29   : > { %v415_v61 = vpack.c.bf16 %v396_v52, %v395_v51  ;;  %v397_v62 = vmax.f32 %v365_v53, 0.0  ;;  %v979_v63 = vunpack.c.h.bf16 %v1021_v42  ;;  %v312_v0 = vmul.f32 %v978_v54, %v1156_v2 }
  0x2a   : > { %1058 = vmatprep.mubr.msk.bf16.mxu0 %vm427_vm1, %v407_v56  ;;  %v408_v3 = vpack.c.bf16 %v382_v58, %v381_v57  ;;  %v398_v4 = vmax.f32 %v366_v59, 0.0  ;;  %v1010_v5 = vunpack.c.l.bf16 %v1029_v55  ;;  %v1011_v6 = vunpack.c.h.bf16 %v1029_v55 }
  0x2b   : > { %1074 = vmatprep.mubr.msk.bf16.mxu1 %vm427_vm1, %v415_v61  ;;  %v313_v7 = vmul.f32 %v979_v63, %v1156_v2  ;;  %v351_v8 = vadd.f32 %v1165_v11, %v312_v0  ;;  %v982_v9 = vunpack.c.l.bf16 %v1022_v60  ;;  %v983_v10 = vunpack.c.h.bf16 %v1022_v60 }
  0x2c   : > { %1059 = vmatmul.mubr.msk.bf16.gmra.mxu0 %vm427_vm1, %v408_v3  ;;  %v416_v12 = vpack.c.bf16 %v398_v4, %v397_v62  ;;  %v328_v13 = vmul.f32 %v1010_v5, %v1156_v2  ;;  %v329_v14 = vmul.f32 %v1011_v6, %v1156_v2  ;;  %v1014_v15 = vunpack.c.l.bf16 %v1030_v1 }
  0x2d   : > { %v352_v16 = vadd.f32 %v1165_v11, %v313_v7  ;;  %v383_v17 = vmax.f32 %v351_v8, 0.0  ;;  %v314_v18 = vmul.f32 %v982_v9, %v1156_v2  ;;  %v315_v19 = vmul.f32 %v983_v10, %v1156_v2 }
  0x2e   : > { %1075 = vmatmul.mubr.msk.bf16.gmra.mxu1 %vm427_vm1, %v416_v12  ;;  %v367_v20 = vadd.f32 %v1165_v11, %v328_v13  ;;  %v368_v21 = vadd.f32 %v1165_v11, %v329_v14  ;;  %v1015_v22 = vunpack.c.h.bf16 %v1030_v1  ;;  %v330_v23 = vmul.f32 %v1014_v15, %v1156_v2 }
  0x2f   : > { %v384_v24 = vmax.f32 %v352_v16, 0.0  ;;  %v353_v25 = vadd.f32 %v1165_v11, %v314_v18  ;;  %v354_v26 = vadd.f32 %v1165_v11, %v315_v19 }
  0x30   : > { %v399_v27 = vmax.f32 %v367_v20, 0.0  ;;  %v400_v28 = vmax.f32 %v368_v21, 0.0  ;;  %v331_v29 = vmul.f32 %v1015_v22, %v1156_v2  ;;  %v369_v30 = vadd.f32 %v1165_v11, %v330_v23  ;;  %v1262_v2 = vld [vmem:[%s1374_s4] ss:$0 sm:$0xff] }
  0x31   : > { %v409_v31 = vpack.c.bf16 %v384_v24, %v383_v17  ;;  %v385_v32 = vmax.f32 %v353_v25, 0.0  ;;  %v386_v33 = vmax.f32 %v354_v26, 0.0 }
  0x32   : > { %v417_v34 = vpack.c.bf16 %v400_v28, %v399_v27  ;;  %v370_v35 = vadd.f32 %v1165_v11, %v331_v29  ;;  %v401_v36 = vmax.f32 %v369_v30, 0.0 }
  0x33   : > { %1062 = vmatprep.mubr.msk.bf16.mxu0 %vm427_vm1, %v409_v31  ;;  %v410_v37 = vpack.c.bf16 %v386_v33, %v385_v32 }
  0x34   : > { %1078 = vmatprep.mubr.msk.bf16.mxu1 %vm427_vm1, %v417_v34  ;;  %v402_v38 = vmax.f32 %v370_v35, 0.0 }
  0x35   : > { %1063 = vmatmul.mubr.msk.bf16.gmra.mxu0 %vm427_vm1, %v410_v37 }
  0x36   : > { %v418_v39 = vpack.c.bf16 %v402_v38, %v401_v36 }
  0x38   : > { %1079 = vmatmul.mubr.msk.bf16.gmra.mxu1 %vm427_vm1, %v418_v39 }
  0xda   : > { %v1052_v40 = vpop.f32.mrf.mxu0 }
  0xdb   : > { %v1068_v41 = vpop.f32.mrf.mxu1  ;;  %v523_v11 = vadd.f32 %v1052_v40, %v1262_v2 }
  0xdc   : > { %v587_v42 = vadd.f32 %v1068_v41, %v1262_v2  ;;  %v514_v43 = vpop.f32.mrf.mxu0 }
  0xdd   : > { %v578_v44 = vpop.f32.mrf.mxu1  ;;  %v922_v45 = vpack.c.bf16 %v523_v11, %v523_v11  ;;  %v515_v47 = vadd.f32 %v1262_v2, %v514_v43 }
  0xde   : > { %v938_v46 = vpack.c.bf16 %v587_v42, %v587_v42  ;;  %v579_v48 = vadd.f32 %v1262_v2, %v578_v44  ;;  %v1053_v49 = vpop.f32.mrf.mxu0 }
  0xdf   : > { %v1069_v50 = vpop.f32.mrf.mxu1  ;;  %772 = vst.msk [vmem:[%s1271_s10 + $0x8] sm:$0xf] %vm769_vm2, %v922_v45  ;;  %v920_v51 = vpack.c.bf16 %v515_v47, %v515_v47  ;;  %v526_v53 = vadd.f32 %v1053_v49, %v1262_v2 }
  0xe0   : > { %788 = vst.msk [vmem:[%s1271_s10 + $0x48] sm:$0xf] %vm769_vm2, %v938_v46  ;;  %v936_v52 = vpack.c.bf16 %v579_v48, %v579_v48  ;;  %v590_v54 = vadd.f32 %v1069_v50, %v1262_v2  ;;  %v517_v55 = vpop.f32.mrf.mxu0 }
  0xe1   : > { %v581_v56 = vpop.f32.mrf.mxu1  ;;  %770 = vst.msk [vmem:[%s1271_s10] sm:$0xf] %vm769_vm2, %v920_v51  ;;  %v923_v57 = vpack.c.bf16 %v526_v53, %v526_v53  ;;  %v518_v59 = vadd.f32 %v1262_v2, %v517_v55 }
  0xe2   : > { %786 = vst.msk [vmem:[%s1271_s10 + $0x40] sm:$0xf] %vm769_vm2, %v936_v52  ;;  %v939_v58 = vpack.c.bf16 %v590_v54, %v590_v54  ;;  %v582_v60 = vadd.f32 %v1262_v2, %v581_v56 }
  0xe3   : > { %773 = vst.msk [vmem:[%s1271_s10 + $0xc] sm:$0xf] %vm769_vm2, %v923_v57  ;;  %v921_v61 = vpack.c.bf16 %v518_v59, %v518_v59  ;;  %v1056_v63 = vpop.f32.mrf.mxu0 }
  0xe4   : > { %789 = vst.msk [vmem:[%s1271_s10 + $0x4c] sm:$0xf] %vm769_vm2, %v939_v58  ;;  %v937_v62 = vpack.c.bf16 %v582_v60, %v582_v60  ;;  %v539_v0 = vadd.f32 %v1056_v63, %v1262_v2  ;;  %v1072_v1 = vpop.f32.mrf.mxu1 }
  0xe5   : > { %771 = vst.msk [vmem:[%s1271_s10 + $0x4] sm:$0xf] %vm769_vm2, %v921_v61  ;;  %v603_v3 = vadd.f32 %v1072_v1, %v1262_v2  ;;  %v530_v4 = vpop.f32.mrf.mxu0 }
  0xe6   : > { %787 = vst.msk [vmem:[%s1271_s10 + $0x44] sm:$0xf] %vm769_vm2, %v937_v62  ;;  %v926_v5 = vpack.c.bf16 %v539_v0, %v539_v0  ;;  %v531_v6 = vadd.f32 %v1262_v2, %v530_v4  ;;  %v594_v7 = vpop.f32.mrf.mxu1 }
  0xe7   : > { %v942_v8 = vpack.c.bf16 %v603_v3, %v603_v3  ;;  %v595_v9 = vadd.f32 %v1262_v2, %v594_v7  ;;  %v1057_v10 = vpop.f32.mrf.mxu0 }
  0xe8   : > { %776 = vst.msk [vmem:[%s1271_s10 + $0x18] sm:$0xf] %vm769_vm2, %v926_v5  ;;  %v924_v12 = vpack.c.bf16 %v531_v6, %v531_v6  ;;  %v542_v13 = vadd.f32 %v1057_v10, %v1262_v2  ;;  %v1073_v14 = vpop.f32.mrf.mxu1 }
  0xe9   : > { %792 = vst.msk [vmem:[%s1271_s10 + $0x58] sm:$0xf] %vm769_vm2, %v942_v8  ;;  %v940_v15 = vpack.c.bf16 %v595_v9, %v595_v9  ;;  %v606_v16 = vadd.f32 %v1073_v14, %v1262_v2  ;;  %v533_v17 = vpop.f32.mrf.mxu0 }
  0xea   : > { %774 = vst.msk [vmem:[%s1271_s10 + $0x10] sm:$0xf] %vm769_vm2, %v924_v12  ;;  %v927_v18 = vpack.c.bf16 %v542_v13, %v542_v13  ;;  %v534_v19 = vadd.f32 %v1262_v2, %v533_v17  ;;  %v597_v20 = vpop.f32.mrf.mxu1 }
  0xeb   : > { %790 = vst.msk [vmem:[%s1271_s10 + $0x50] sm:$0xf] %vm769_vm2, %v940_v15  ;;  %v943_v21 = vpack.c.bf16 %v606_v16, %v606_v16  ;;  %v598_v22 = vadd.f32 %v1262_v2, %v597_v20 }
  0xec   : > { %777 = vst.msk [vmem:[%s1271_s10 + $0x1c] sm:$0xf] %vm769_vm2, %v927_v18  ;;  %v925_v23 = vpack.c.bf16 %v534_v19, %v534_v19  ;;  %v1060_v24 = vpop.f32.mrf.mxu0 }
  0xed   : > { %793 = vst.msk [vmem:[%s1271_s10 + $0x5c] sm:$0xf] %vm769_vm2, %v943_v21  ;;  %v941_v25 = vpack.c.bf16 %v598_v22, %v598_v22  ;;  %v555_v26 = vadd.f32 %v1060_v24, %v1262_v2 }
  0xee   : > { %775 = vst.msk [vmem:[%s1271_s10 + $0x14] sm:$0xf] %vm769_vm2, %v925_v23  ;;  %v1076_v27 = vpop.f32.mrf.mxu1  ;;  %v546_v28 = vpop.f32.mrf.mxu0 }
  0xef   : > { %791 = vst.msk [vmem:[%s1271_s10 + $0x54] sm:$0xf] %vm769_vm2, %v941_v25  ;;  %v930_v29 = vpack.c.bf16 %v555_v26, %v555_v26  ;;  %v619_v30 = vadd.f32 %v1076_v27, %v1262_v2  ;;  %v547_v31 = vadd.f32 %v1262_v2, %v546_v28 }
  0xf0   : > { %v610_v32 = vpop.f32.mrf.mxu1  ;;  %v1061_v33 = vpop.f32.mrf.mxu0 }
  0xf1   : > { %780 = vst.msk [vmem:[%s1271_s10 + $0x28] sm:$0xf] %vm769_vm2, %v930_v29  ;;  %v946_v34 = vpack.c.bf16 %v619_v30, %v619_v30  ;;  %v928_v35 = vpack.c.bf16 %v547_v31, %v547_v31  ;;  %v611_v36 = vadd.f32 %v1262_v2, %v610_v32  ;;  %v558_v37 = vadd.f32 %v1061_v33, %v1262_v2 }
  0xf2   : > { %v1077_v38 = vpop.f32.mrf.mxu1  ;;  %v549_v39 = vpop.f32.mrf.mxu0 }
  0xf3   : > { %796 = vst.msk [vmem:[%s1271_s10 + $0x68] sm:$0xf] %vm769_vm2, %v946_v34  ;;  %778 = vst.msk [vmem:[%s1271_s10 + $0x20] sm:$0xf] %vm769_vm2, %v928_v35  ;;  %v944_v40 = vpack.c.bf16 %v611_v36, %v611_v36  ;;  %v931_v41 = vpack.c.bf16 %v558_v37, %v558_v37  ;;  %v622_v11 = vadd.f32 %v1077_v38, %v1262_v2 }
  0xf4   : > { %v550_v42 = vadd.f32 %v1262_v2, %v549_v39  ;;  %v613_v43 = vpop.f32.mrf.mxu1 }
  0xf5   : > { %794 = vst.msk [vmem:[%s1271_s10 + $0x60] sm:$0xf] %vm769_vm2, %v944_v40  ;;  %781 = vst.msk [vmem:[%s1271_s10 + $0x2c] sm:$0xf] %vm769_vm2, %v931_v41  ;;  %v947_v44 = vpack.c.bf16 %v622_v11, %v622_v11  ;;  %v614_v46 = vadd.f32 %v1262_v2, %v613_v43  ;;  %v1064_v47 = vpop.f32.mrf.mxu0 }
  0xf6   : > { %v929_v45 = vpack.c.bf16 %v550_v42, %v550_v42  ;;  %v571_v48 = vadd.f32 %v1064_v47, %v1262_v2 }
  0xf7   : > { %797 = vst.msk [vmem:[%s1271_s10 + $0x6c] sm:$0xf] %vm769_vm2, %v947_v44  ;;  %v945_v49 = vpack.c.bf16 %v614_v46, %v614_v46  ;;  %v562_v50 = vpop.f32.mrf.mxu0 }
  0xf8   : > { %779 = vst.msk [vmem:[%s1271_s10 + $0x24] sm:$0xf] %vm769_vm2, %v929_v45  ;;  %v934_v51 = vpack.c.bf16 %v571_v48, %v571_v48  ;;  %v1080_v52 = vpop.f32.mrf.mxu1  ;;  %v563_v53 = vadd.f32 %v1262_v2, %v562_v50 }
  0xf9   : > { %795 = vst.msk [vmem:[%s1271_s10 + $0x64] sm:$0xf] %vm769_vm2, %v945_v49  ;;  %v635_v54 = vadd.f32 %v1080_v52, %v1262_v2  ;;  %v1065_v55 = vpop.f32.mrf.mxu0 }
  0xfa   : > { %784 = vst.msk [vmem:[%s1271_s10 + $0x38] sm:$0xf] %vm769_vm2, %v934_v51  ;;  %v932_v56 = vpack.c.bf16 %v563_v53, %v563_v53  ;;  %v626_v57 = vpop.f32.mrf.mxu1  ;;  %v574_v58 = vadd.f32 %v1065_v55, %v1262_v2 }
  0xfb   : > { %v950_v59 = vpack.c.bf16 %v635_v54, %v635_v54  ;;  %v627_v60 = vadd.f32 %v1262_v2, %v626_v57  ;;  %v565_v61 = vpop.f32.mrf.mxu0 }
  0xfc   : > { %782 = vst.msk [vmem:[%s1271_s10 + $0x30] sm:$0xf] %vm769_vm2, %v932_v56  ;;  %v935_v62 = vpack.c.bf16 %v574_v58, %v574_v58  ;;  %v1081_v63 = vpop.f32.mrf.mxu1  ;;  %v566_v0 = vadd.f32 %v1262_v2, %v565_v61 }
  0xfd   : > { %800 = vst.msk [vmem:[%s1271_s10 + $0x78] sm:$0xf] %vm769_vm2, %v950_v59  ;;  %v948_v1 = vpack.c.bf16 %v627_v60, %v627_v60  ;;  %v638_v3 = vadd.f32 %v1081_v63, %v1262_v2 }
  0xfe   : > { %785 = vst.msk [vmem:[%s1271_s10 + $0x3c] sm:$0xf] %vm769_vm2, %v935_v62  ;;  %v933_v4 = vpack.c.bf16 %v566_v0, %v566_v0  ;;  %v629_v5 = vpop.f32.mrf.mxu1 }
  0xff   : > { %798 = vst.msk [vmem:[%s1271_s10 + $0x70] sm:$0xf] %vm769_vm2, %v948_v1  ;;  %v951_v6 = vpack.c.bf16 %v638_v3, %v638_v3  ;;  %v630_v7 = vadd.f32 %v1262_v2, %v629_v5 }
 0x100   : > { %783 = vst.msk [vmem:[%s1271_s10 + $0x34] sm:$0xf] %vm769_vm2, %v933_v4 }
 0x101   : > { %801 = vst.msk [vmem:[%s1271_s10 + $0x7c] sm:$0xf] %vm769_vm2, %v951_v6  ;;  %v949_v8 = vpack.c.bf16 %v630_v7, %v630_v7 }
 0x103   : > { %799 = vst.msk [vmem:[%s1271_s10 + $0x74] sm:$0xf] %vm769_vm2, %v949_v8 }
 0x104 PF: > { %s15_s18 = sadd.s32 1, %s1100_s18  }
 0x105   : > { %p12_p4 = scmp.ge.s32.totalorder %s15_s18, 4  }
 0x107   :  { %14 = sbr.rel (!%p12_p4) target bundleno = 1 (0x1), region = 70 }

// kernel: _lambda_.18
= control target key start
LH: loop header
LB: loop body
LE: loop exit
PB: predicated region body
PF: predicated region fallthrough
CT: control target
= control target key end

     0   :  { %s1879_s30 = smov 0   ;;  %s2229_s0 = inlined_call_operand.vmem [shape: bf16[512,8], index: 0, kind: input, shape index: {}]   ;;  %s2230_s1 = inlined_call_operand.vmem [shape: bf16[512,4], index: 1, kind: input, shape index: {}]   ;;  %s2231_s2 = inlined_call_operand.vmem [shape: bf16[8,36], index: 2, kind: input, shape index: {}]   ;;  %s2232_s3 = inlined_call_operand.vmem [shape: bf16[4,36], index: 3, kind: input, shape index: {}]   ;;  %s2233_s4 = inlined_call_operand.vmem [shape: f32[1,8], index: 4, kind: input, shape index: {}]   ;;  %s2234_s5 = inlined_call_operand.vmem [shape: f32[1,4], index: 5, kind: input, shape index: {}]   ;;  %s2235_s6 = inlined_call_operand.vmem [shape: f32[1,8], index: 6, kind: input, shape index: {}]   ;;  %s2236_s7 = inlined_call_operand.vmem [shape: f32[1,4], index: 7, kind: input, shape index: {}]   ;;  %s2237_s8 = inlined_call_operand.vmem [shape: f32[1,36], index: 8, kind: input, shape index: {}]   ;;  %s2238_s9 = inlined_call_operand.vmem [shape: bf16[512,36], index: 9, kind: output, shape index: {}]  }
   0x1 LB: > { %s1437_s10 = sadd.s32 4294967295, %s1827_s30   ;;  %p1441_p0 = scmp.ge.s32.totalorder %s1827_s30, 1  ;;  %s1827_s30 = sphi %s1879_s30, %s19_s30  }
   0x2   : > { %p299_p1 = scmp.lt.s32.totalorder %s1827_s30, 3 }
   0x4   : > { %p300_p2 = pnand %p1441_p0, %p299_p1 }
   0x5   : > { %s1442_s15 = sshll.u32 (!%p300_p2), %s1437_s10, 5 }
   0x6   : > { %303 = sbr.rel (%p300_p2) target bundleno = 298 (0x12a), region = 56  ;;  %p341_p3 = scmp.lt.s32.totalorder (!%p300_p2), %s1442_s15, 63 }
   0xb   : > { %v740_v0 = vld [vmem:[%s2232_s3] sm:$0x3]  ;;  %vm790_vm0 = vcmask 1041408   ;;  %vm1004_vm1 = vcmask 1043456   ;;  %s2240_s15 = smov (!%p341_p3, %s1442_s15), 63  ;;  %vm741_vm2 = vcmask 31744  }
   0xc   : > { %v549_v1 = vld [vmem:[%s2231_s2] sm:$0xf]  ;;  %1811 = vmatprep.subr.msk.bf16.mxu0 %vm790_vm0, %v740_v0  ;;  %v792_v2 = vsel %vm790_vm0, %v740_v0, 0  ;;  %s1893_s16 = sshll.u32 %s2240_s15, 2  ;;  %vm955_vm3 = vcmask 64512   ;;  %vm1336_vm4 = vcmask 289792  }
   0xd   : > { %1812 = vmatprep.subr.msk.bf16.mxu1 %vm1004_vm1, %v549_v1  ;;  %v1006_v3 = vsel %vm1004_vm1, %v549_v1, 0  ;;  %1744 = vmatpush3.bf16.msra.mxu0 %v792_v2  ;;  %s1899_s19 = scalar_lea.vmem %s2230_s1, %s1893_s16  ;;  %v1905_v5 = vld [vmem:[%s2234_s5] ss:$0 sm:$0xff]  ;;  %s1911_s24 = scalar_lea.vmem %s2229_s0, %s1893_s16 }
   0xe   : > { %1778 = vmatpush3.bf16.msra.mxu1 %v1006_v3  ;;  %v1616_v4 = vld [vmem:[%s1899_s19] sm:$0xff]   ;;  %v1694_v6 = vld [vmem:[%s1899_s19 + $0x8] sm:$0xff]   ;;  %v1695_v36 = vld [vmem:[%s1899_s19 + $0x10] sm:$0xff]   ;;  %s2129_s15 = scalar_lea.vmem %s2238_s9, %s1893_s16 }
   0xf   : > { %v1617_v7 = vunpack.c.l.bf16 %v1616_v4  ;;  %v1618_v8 = vunpack.c.h.bf16 %v1616_v4  ;;  %v1552_v9 = vld [vmem:[%s1911_s24] sm:$0xff]   ;;  %v1621_v11 = vunpack.c.l.bf16 %v1694_v6  ;;  %v1622_v12 = vunpack.c.h.bf16 %v1694_v6  ;;  %v1679_v13 = vld [vmem:[%s1911_s24 + $0x8] sm:$0xff]   ;;  %v1680_v41 = vld [vmem:[%s1911_s24 + $0x10] sm:$0xff]  }
  0x10   : > { %v1918_v10 = vld [vmem:[%s2233_s4] ss:$0 sm:$0xff]  ;;  %v1553_v15 = vunpack.c.l.bf16 %v1552_v9  ;;  %v1554_v16 = vunpack.c.h.bf16 %v1552_v9  ;;  %v1557_v17 = vunpack.c.l.bf16 %v1679_v13  ;;  %v1558_v18 = vunpack.c.h.bf16 %v1679_v13  ;;  %v1696_v46 = vld [vmem:[%s1899_s19 + $0x18] sm:$0xff]  }
  0x11   : > { %v1924_v14 = vld [vmem:[%s2236_s7] ss:$0 sm:$0xff]  ;;  %v621_v19 = vmul.f32 %v1617_v7, %v1905_v5  ;;  %v622_v20 = vmul.f32 %v1618_v8, %v1905_v5  ;;  %v623_v22 = vmul.f32 %v1621_v11, %v1905_v5  ;;  %v624_v23 = vmul.f32 %v1622_v12, %v1905_v5  ;;  %v1681_v51 = vld [vmem:[%s1911_s24 + $0x18] sm:$0xff]  }
  0x12   : > { %v1931_v21 = vld [vmem:[%s2235_s6] ss:$0 sm:$0xff]  ;;  %v430_v24 = vmul.f32 %v1553_v15, %v1918_v10  ;;  %v431_v25 = vmul.f32 %v1554_v16, %v1918_v10  ;;  %v432_v26 = vmul.f32 %v1557_v17, %v1918_v10  ;;  %v433_v27 = vmul.f32 %v1558_v18, %v1918_v10 }
  0x13   : > { %v660_v28 = vadd.f32 %v1924_v14, %v621_v19  ;;  %v661_v29 = vadd.f32 %v1924_v14, %v622_v20  ;;  %v662_v30 = vadd.f32 %v1924_v14, %v623_v22  ;;  %v663_v31 = vadd.f32 %v1924_v14, %v624_v23  ;;  %v1697_v9 = vld [vmem:[%s1899_s19 + $0x20] sm:$0xff]  }
  0x14   : > { %v469_v32 = vadd.f32 %v1931_v21, %v430_v24  ;;  %v470_v33 = vadd.f32 %v1931_v21, %v431_v25  ;;  %v471_v34 = vadd.f32 %v1931_v21, %v432_v26  ;;  %v472_v35 = vadd.f32 %v1931_v21, %v433_v27  ;;  %v1682_v20 = vld [vmem:[%s1911_s24 + $0x20] sm:$0xff]   ;;  %v1698_v26 = vld [vmem:[%s1899_s19 + $0x28] sm:$0xff]  }
  0x15   : > { %v692_v37 = vmax.f32 %v660_v28, 0.0  ;;  %v693_v38 = vmax.f32 %v661_v29, 0.0  ;;  %v694_v39 = vmax.f32 %v662_v30, 0.0  ;;  %v695_v40 = vmax.f32 %v663_v31, 0.0  ;;  %v1683_v31 = vld [vmem:[%s1911_s24 + $0x28] sm:$0xff]  }
  0x16   : > { %v501_v42 = vmax.f32 %v469_v32, 0.0  ;;  %v502_v43 = vmax.f32 %v470_v33, 0.0  ;;  %v503_v44 = vmax.f32 %v471_v34, 0.0  ;;  %v504_v45 = vmax.f32 %v472_v35, 0.0 }
  0x17   : > { %v724_v47 = vpack.c.bf16 %v693_v38, %v692_v37  ;;  %v725_v48 = vpack.c.bf16 %v695_v40, %v694_v39  ;;  %v1625_v49 = vunpack.c.l.bf16 %v1695_v36  ;;  %v1626_v50 = vunpack.c.h.bf16 %v1695_v36 }
  0x18   : > { %v533_v52 = vpack.c.bf16 %v502_v43, %v501_v42  ;;  %v534_v53 = vpack.c.bf16 %v504_v45, %v503_v44  ;;  %v1561_v54 = vunpack.c.l.bf16 %v1680_v41  ;;  %v1562_v55 = vunpack.c.h.bf16 %v1680_v41 }
  0x19   : > { %1745 = vmatprep.mubr.msk.bf16.mxu0 %vm741_vm2, %v724_v47  ;;  %v625_v56 = vmul.f32 %v1625_v49, %v1905_v5  ;;  %v626_v57 = vmul.f32 %v1626_v50, %v1905_v5  ;;  %v1629_v58 = vunpack.c.l.bf16 %v1696_v46  ;;  %v1630_v59 = vunpack.c.h.bf16 %v1696_v46 }
  0x1a   : > { %1779 = vmatprep.mubr.msk.bf16.mxu1 %vm955_vm3, %v533_v52  ;;  %1746 = vmatmul.mubr.msk.bf16.vlgmr.msra.gmra.mxu0 %vm741_vm2, %v725_v48  ;;  %v434_v60 = vmul.f32 %v1561_v54, %v1918_v10  ;;  %v435_v61 = vmul.f32 %v1562_v55, %v1918_v10  ;;  %v1565_v62 = vunpack.c.l.bf16 %v1681_v51  ;;  %v1566_v63 = vunpack.c.h.bf16 %v1681_v51  ;;  %v1699_v48 = vld [vmem:[%s1899_s19 + $0x30] sm:$0xff]  }
  0x1b   : > { %1780 = vmatmul.mubr.msk.bf16.vlgmr.msra.gmra.mxu1 %vm955_vm3, %v534_v53  ;;  %v664_v0 = vadd.f32 %v1924_v14, %v625_v56  ;;  %v665_v1 = vadd.f32 %v1924_v14, %v626_v57  ;;  %v627_v2 = vmul.f32 %v1629_v58, %v1905_v5  ;;  %v628_v3 = vmul.f32 %v1630_v59, %v1905_v5 }
  0x1c   : > { %v473_v4 = vadd.f32 %v1931_v21, %v434_v60  ;;  %v474_v6 = vadd.f32 %v1931_v21, %v435_v61  ;;  %v436_v7 = vmul.f32 %v1565_v62, %v1918_v10  ;;  %v437_v8 = vmul.f32 %v1566_v63, %v1918_v10  ;;  %v1684_v61 = vld [vmem:[%s1911_s24 + $0x30] sm:$0xff]  }
  0x1d   : > { %v696_v11 = vmax.f32 %v664_v0, 0.0  ;;  %v697_v12 = vmax.f32 %v665_v1, 0.0  ;;  %v666_v13 = vadd.f32 %v1924_v14, %v627_v2  ;;  %v667_v15 = vadd.f32 %v1924_v14, %v628_v3  ;;  %v1700_v2 = vld [vmem:[%s1899_s19 + $0x38] sm:$0xff]  }
  0x1e   : > { %v505_v16 = vmax.f32 %v473_v4, 0.0  ;;  %v506_v17 = vmax.f32 %v474_v6, 0.0  ;;  %v475_v18 = vadd.f32 %v1931_v21, %v436_v7  ;;  %v476_v19 = vadd.f32 %v1931_v21, %v437_v8  ;;  %v1685_v8 = vld [vmem:[%s1911_s24 + $0x38] sm:$0xff]  }
  0x1f   : > { %v726_v22 = vpack.c.bf16 %v697_v12, %v696_v11  ;;  %v698_v23 = vmax.f32 %v666_v13, 0.0  ;;  %v699_v24 = vmax.f32 %v667_v15, 0.0  ;;  %v1633_v25 = vunpack.c.l.bf16 %v1697_v9 }
  0x20   : > { %v535_v27 = vpack.c.bf16 %v506_v17, %v505_v16  ;;  %v507_v28 = vmax.f32 %v475_v18, 0.0  ;;  %v508_v29 = vmax.f32 %v476_v19, 0.0  ;;  %v1634_v30 = vunpack.c.h.bf16 %v1697_v9 }
  0x21   : > { %1749 = vmatprep.mubr.msk.bf16.mxu0 %vm741_vm2, %v726_v22  ;;  %v727_v32 = vpack.c.bf16 %v699_v24, %v698_v23  ;;  %v629_v33 = vmul.f32 %v1633_v25, %v1905_v5  ;;  %v1569_v34 = vunpack.c.l.bf16 %v1682_v20  ;;  %v1570_v35 = vunpack.c.h.bf16 %v1682_v20  ;;  %v1701_v24 = vld [vmem:[%s1899_s19 + $0x40] sm:$0xff]  }
  0x22   : > { %1783 = vmatprep.mubr.msk.bf16.mxu1 %vm955_vm3, %v535_v27  ;;  %v536_v36 = vpack.c.bf16 %v508_v29, %v507_v28  ;;  %v630_v37 = vmul.f32 %v1634_v30, %v1905_v5  ;;  %v1637_v38 = vunpack.c.l.bf16 %v1698_v26  ;;  %v1638_v39 = vunpack.c.h.bf16 %v1698_v26 }
  0x23   : > { %1750 = vmatmul.mubr.msk.bf16.gmra.mxu0 %vm741_vm2, %v727_v32  ;;  %v668_v40 = vadd.f32 %v1924_v14, %v629_v33  ;;  %v438_v41 = vmul.f32 %v1569_v34, %v1918_v10  ;;  %v439_v42 = vmul.f32 %v1570_v35, %v1918_v10  ;;  %v1573_v43 = vunpack.c.l.bf16 %v1683_v31 }
  0x24   : > { %1784 = vmatmul.mubr.msk.bf16.gmra.mxu1 %vm955_vm3, %v536_v36  ;;  %v669_v44 = vadd.f32 %v1924_v14, %v630_v37  ;;  %v631_v45 = vmul.f32 %v1637_v38, %v1905_v5  ;;  %v632_v46 = vmul.f32 %v1638_v39, %v1905_v5  ;;  %v1574_v47 = vunpack.c.h.bf16 %v1683_v31 }
  0x25   : > { %v700_v49 = vmax.f32 %v668_v40, 0.0  ;;  %v477_v50 = vadd.f32 %v1931_v21, %v438_v41  ;;  %v478_v51 = vadd.f32 %v1931_v21, %v439_v42  ;;  %v440_v52 = vmul.f32 %v1573_v43, %v1918_v10  ;;  %v1686_v41 = vld [vmem:[%s1911_s24 + $0x40] sm:$0xff]  }
  0x26   : > { %v701_v53 = vmax.f32 %v669_v44, 0.0  ;;  %v670_v54 = vadd.f32 %v1924_v14, %v631_v45  ;;  %v671_v55 = vadd.f32 %v1924_v14, %v632_v46  ;;  %v441_v56 = vmul.f32 %v1574_v47, %v1918_v10  ;;  %v1702_v46 = vld [vmem:[%s1899_s19 + $0x48] sm:$0xff]  }
  0x27   : > { %v509_v57 = vmax.f32 %v477_v50, 0.0  ;;  %v510_v58 = vmax.f32 %v478_v51, 0.0  ;;  %v479_v59 = vadd.f32 %v1931_v21, %v440_v52  ;;  %v1641_v60 = vunpack.c.l.bf16 %v1699_v48  ;;  %v1687_v51 = vld [vmem:[%s1911_s24 + $0x48] sm:$0xff]  }
  0x28   : > { %v728_v62 = vpack.c.bf16 %v701_v53, %v700_v49  ;;  %v702_v63 = vmax.f32 %v670_v54, 0.0  ;;  %v703_v0 = vmax.f32 %v671_v55, 0.0  ;;  %v480_v1 = vadd.f32 %v1931_v21, %v441_v56 }
  0x29   : > { %v537_v3 = vpack.c.bf16 %v510_v58, %v509_v57  ;;  %v511_v4 = vmax.f32 %v479_v59, 0.0  ;;  %v1642_v6 = vunpack.c.h.bf16 %v1699_v48  ;;  %v633_v7 = vmul.f32 %v1641_v60, %v1905_v5 }
  0x2a   : > { %1753 = vmatprep.mubr.msk.bf16.mxu0 %vm741_vm2, %v728_v62  ;;  %v729_v9 = vpack.c.bf16 %v703_v0, %v702_v63  ;;  %v512_v11 = vmax.f32 %v480_v1, 0.0  ;;  %v1577_v12 = vunpack.c.l.bf16 %v1684_v61  ;;  %v1578_v13 = vunpack.c.h.bf16 %v1684_v61  ;;  %v1703_v0 = vld [vmem:[%s1899_s19 + $0x50] sm:$0xff]  }
  0x2b   : > { %1787 = vmatprep.mubr.msk.bf16.mxu1 %vm955_vm3, %v537_v3  ;;  %v634_v15 = vmul.f32 %v1642_v6, %v1905_v5  ;;  %v672_v16 = vadd.f32 %v1924_v14, %v633_v7  ;;  %v1645_v17 = vunpack.c.l.bf16 %v1700_v2  ;;  %v1646_v18 = vunpack.c.h.bf16 %v1700_v2 }
  0x2c   : > { %1754 = vmatmul.mubr.msk.bf16.gmra.mxu0 %vm741_vm2, %v729_v9  ;;  %v538_v19 = vpack.c.bf16 %v512_v11, %v511_v4  ;;  %v442_v20 = vmul.f32 %v1577_v12, %v1918_v10  ;;  %v443_v22 = vmul.f32 %v1578_v13, %v1918_v10  ;;  %v1581_v23 = vunpack.c.l.bf16 %v1685_v8 }
  0x2d   : > { %v673_v25 = vadd.f32 %v1924_v14, %v634_v15  ;;  %v704_v26 = vmax.f32 %v672_v16, 0.0  ;;  %v635_v27 = vmul.f32 %v1645_v17, %v1905_v5  ;;  %v636_v28 = vmul.f32 %v1646_v18, %v1905_v5  ;;  %v1688_v16 = vld [vmem:[%s1911_s24 + $0x50] sm:$0xff]  }
  0x2e   : > { %1788 = vmatmul.mubr.msk.bf16.gmra.mxu1 %vm955_vm3, %v538_v19  ;;  %v481_v29 = vadd.f32 %v1931_v21, %v442_v20  ;;  %v482_v30 = vadd.f32 %v1931_v21, %v443_v22  ;;  %v1582_v31 = vunpack.c.h.bf16 %v1685_v8  ;;  %v444_v32 = vmul.f32 %v1581_v23, %v1918_v10 }
  0x2f   : > { %v705_v33 = vmax.f32 %v673_v25, 0.0  ;;  %v674_v34 = vadd.f32 %v1924_v14, %v635_v27  ;;  %v675_v35 = vadd.f32 %v1924_v14, %v636_v28  ;;  %v1649_v36 = vunpack.c.l.bf16 %v1701_v24 }
  0x30   : > { %v513_v37 = vmax.f32 %v481_v29, 0.0  ;;  %v514_v38 = vmax.f32 %v482_v30, 0.0  ;;  %v445_v39 = vmul.f32 %v1582_v31, %v1918_v10  ;;  %v483_v40 = vadd.f32 %v1931_v21, %v444_v32  ;;  %v1689_v31 = vld [vmem:[%s1911_s24 + $0x58] sm:$0xff]  }
  0x31   : > { %v730_v42 = vpack.c.bf16 %v705_v33, %v704_v26  ;;  %v706_v43 = vmax.f32 %v674_v34, 0.0  ;;  %v707_v44 = vmax.f32 %v675_v35, 0.0  ;;  %v1650_v45 = vunpack.c.h.bf16 %v1701_v24  ;;  %v1704_v26 = vld [vmem:[%s1899_s19 + $0x58] sm:$0xff]  }
  0x32   : > { %v539_v47 = vpack.c.bf16 %v514_v38, %v513_v37  ;;  %v484_v48 = vadd.f32 %v1931_v21, %v445_v39  ;;  %v515_v49 = vmax.f32 %v483_v40, 0.0  ;;  %v637_v50 = vmul.f32 %v1649_v36, %v1905_v5 }
  0x33   : > { %1757 = vmatprep.mubr.msk.bf16.mxu0 %vm741_vm2, %v730_v42  ;;  %v731_v52 = vpack.c.bf16 %v707_v44, %v706_v43  ;;  %v638_v53 = vmul.f32 %v1650_v45, %v1905_v5  ;;  %v1585_v54 = vunpack.c.l.bf16 %v1686_v41  ;;  %v1586_v55 = vunpack.c.h.bf16 %v1686_v41  ;;  %v1705_v44 = vld [vmem:[%s1899_s19 + $0x60] sm:$0xff]  }
  0x34   : > { %1791 = vmatprep.mubr.msk.bf16.mxu1 %vm955_vm3, %v539_v47  ;;  %v516_v56 = vmax.f32 %v484_v48, 0.0  ;;  %v676_v57 = vadd.f32 %v1924_v14, %v637_v50  ;;  %v1653_v58 = vunpack.c.l.bf16 %v1702_v46  ;;  %v1654_v59 = vunpack.c.h.bf16 %v1702_v46 }
  0x35   : > { %1758 = vmatmul.mubr.msk.bf16.gmra.mxu0 %vm741_vm2, %v731_v52  ;;  %v677_v60 = vadd.f32 %v1924_v14, %v638_v53  ;;  %v446_v61 = vmul.f32 %v1585_v54, %v1918_v10  ;;  %v447_v62 = vmul.f32 %v1586_v55, %v1918_v10  ;;  %v1589_v63 = vunpack.c.l.bf16 %v1687_v51 }
  0x36   : > { %v540_v1 = vpack.c.bf16 %v516_v56, %v515_v49  ;;  %v708_v2 = vmax.f32 %v676_v57, 0.0  ;;  %v639_v3 = vmul.f32 %v1653_v58, %v1905_v5  ;;  %v640_v4 = vmul.f32 %v1654_v59, %v1905_v5  ;;  %v1690_v57 = vld [vmem:[%s1911_s24 + $0x60] sm:$0xff]  }
  0x37   : > { %v709_v6 = vmax.f32 %v677_v60, 0.0  ;;  %v485_v7 = vadd.f32 %v1931_v21, %v446_v61  ;;  %v486_v8 = vadd.f32 %v1931_v21, %v447_v62  ;;  %v1590_v9 = vunpack.c.h.bf16 %v1687_v51 }
  0x38   : > { %1792 = vmatmul.mubr.msk.bf16.gmra.mxu1 %vm955_vm3, %v540_v1  ;;  %v678_v11 = vadd.f32 %v1924_v14, %v639_v3  ;;  %v679_v12 = vadd.f32 %v1924_v14, %v640_v4  ;;  %v448_v13 = vmul.f32 %v1589_v63, %v1918_v10  ;;  %v1657_v15 = vunpack.c.l.bf16 %v1703_v0 }
  0x39   : > { %v732_v17 = vpack.c.bf16 %v709_v6, %v708_v2  ;;  %v517_v18 = vmax.f32 %v485_v7, 0.0  ;;  %v518_v19 = vmax.f32 %v486_v8, 0.0  ;;  %v449_v20 = vmul.f32 %v1590_v9, %v1918_v10  ;;  %v1706_v2 = vld [vmem:[%s1899_s19 + $0x68] sm:$0xff]  }
  0x3a   : > { %v710_v22 = vmax.f32 %v678_v11, 0.0  ;;  %v711_v23 = vmax.f32 %v679_v12, 0.0  ;;  %v487_v24 = vadd.f32 %v1931_v21, %v448_v13  ;;  %v1658_v25 = vunpack.c.h.bf16 %v1703_v0  ;;  %v1691_v13 = vld [vmem:[%s1911_s24 + $0x68] sm:$0xff]  }
  0x3b   : > { %1761 = vmatprep.mubr.msk.bf16.mxu0 %vm741_vm2, %v732_v17  ;;  %v541_v27 = vpack.c.bf16 %v518_v19, %v517_v18  ;;  %v488_v28 = vadd.f32 %v1931_v21, %v449_v20  ;;  %v641_v29 = vmul.f32 %v1657_v15, %v1905_v5  ;;  %v1593_v30 = vunpack.c.l.bf16 %v1688_v16 }
  0x3c   : > { %v733_v32 = vpack.c.bf16 %v711_v23, %v710_v22  ;;  %v519_v33 = vmax.f32 %v487_v24, 0.0  ;;  %v642_v34 = vmul.f32 %v1658_v25, %v1905_v5  ;;  %v1594_v35 = vunpack.c.h.bf16 %v1688_v16  ;;  %v1707_v24 = vld [vmem:[%s1899_s19 + $0x70] sm:$0xff]  }
  0x3d   : > { %1795 = vmatprep.mubr.msk.bf16.mxu1 %vm955_vm3, %v541_v27  ;;  %v520_v36 = vmax.f32 %v488_v28, 0.0  ;;  %v680_v37 = vadd.f32 %v1924_v14, %v641_v29  ;;  %v450_v38 = vmul.f32 %v1593_v30, %v1918_v10  ;;  %v1661_v39 = vunpack.c.l.bf16 %v1704_v26 }
  0x3e   : > { %1762 = vmatmul.mubr.msk.bf16.gmra.mxu0 %vm741_vm2, %v733_v32  ;;  %v681_v40 = vadd.f32 %v1924_v14, %v642_v34  ;;  %v451_v41 = vmul.f32 %v1594_v35, %v1918_v10  ;;  %v1662_v42 = vunpack.c.h.bf16 %v1704_v26  ;;  %v1597_v43 = vunpack.c.l.bf16 %v1689_v31 }
  0x3f   : > { %v542_v45 = vpack.c.bf16 %v520_v36, %v519_v33  ;;  %v712_v46 = vmax.f32 %v680_v37, 0.0  ;;  %v489_v47 = vadd.f32 %v1931_v21, %v450_v38  ;;  %v643_v48 = vmul.f32 %v1661_v39, %v1905_v5  ;;  %v1692_v37 = vld [vmem:[%s1911_s24 + $0x70] sm:$0xff]  }
  0x40   : > { %v713_v49 = vmax.f32 %v681_v40, 0.0  ;;  %v490_v50 = vadd.f32 %v1931_v21, %v451_v41  ;;  %v644_v51 = vmul.f32 %v1662_v42, %v1905_v5  ;;  %v1598_v52 = vunpack.c.h.bf16 %v1689_v31 }
  0x41   : > { %1796 = vmatmul.mubr.msk.bf16.gmra.mxu1 %vm955_vm3, %v542_v45  ;;  %v521_v53 = vmax.f32 %v489_v47, 0.0  ;;  %v682_v54 = vadd.f32 %v1924_v14, %v643_v48  ;;  %v452_v55 = vmul.f32 %v1597_v43, %v1918_v10  ;;  %v1665_v56 = vunpack.c.l.bf16 %v1705_v44 }
  0x42   : > { %v734_v58 = vpack.c.bf16 %v713_v49, %v712_v46  ;;  %v522_v59 = vmax.f32 %v490_v50, 0.0  ;;  %v683_v60 = vadd.f32 %v1924_v14, %v644_v51  ;;  %v453_v61 = vmul.f32 %v1598_v52, %v1918_v10  ;;  %v1708_v46 = vld [vmem:[%s1899_s19 + $0x78] sm:$0xff]  }
  0x43   : > { %v714_v62 = vmax.f32 %v682_v54, 0.0  ;;  %v491_v63 = vadd.f32 %v1931_v21, %v452_v55  ;;  %v1666_v0 = vunpack.c.h.bf16 %v1705_v44  ;;  %v645_v1 = vmul.f32 %v1665_v56, %v1905_v5  ;;  %v1693_v55 = vld [vmem:[%s1911_s24 + $0x78] sm:$0xff]  }
  0x44   : > { %1765 = vmatprep.mubr.msk.bf16.mxu0 %vm741_vm2, %v734_v58  ;;  %v543_v3 = vpack.c.bf16 %v522_v59, %v521_v53  ;;  %v715_v4 = vmax.f32 %v683_v60, 0.0  ;;  %v492_v6 = vadd.f32 %v1931_v21, %v453_v61  ;;  %v1601_v7 = vunpack.c.l.bf16 %v1690_v57 }
  0x45   : > { %v523_v8 = vmax.f32 %v491_v63, 0.0  ;;  %v646_v9 = vmul.f32 %v1666_v0, %v1905_v5  ;;  %v684_v11 = vadd.f32 %v1924_v14, %v645_v1  ;;  %v1602_v12 = vunpack.c.h.bf16 %v1690_v57 }
  0x46   : > { %1799 = vmatprep.mubr.msk.bf16.mxu1 %vm955_vm3, %v543_v3  ;;  %v735_v15 = vpack.c.bf16 %v715_v4, %v714_v62  ;;  %v524_v16 = vmax.f32 %v492_v6, 0.0  ;;  %v454_v17 = vmul.f32 %v1601_v7, %v1918_v10  ;;  %v1669_v18 = vunpack.c.l.bf16 %v1706_v2 }
  0x47   : > { %v685_v19 = vadd.f32 %v1924_v14, %v646_v9  ;;  %v716_v20 = vmax.f32 %v684_v11, 0.0  ;;  %v455_v22 = vmul.f32 %v1602_v12, %v1918_v10  ;;  %v1670_v23 = vunpack.c.h.bf16 %v1706_v2 }
  0x48   : > { %1766 = vmatmul.mubr.msk.bf16.gmra.mxu0 %vm741_vm2, %v735_v15  ;;  %v544_v25 = vpack.c.bf16 %v524_v16, %v523_v8  ;;  %v493_v26 = vadd.f32 %v1931_v21, %v454_v17  ;;  %v647_v27 = vmul.f32 %v1669_v18, %v1905_v5  ;;  %v1605_v28 = vunpack.c.l.bf16 %v1691_v13 }
  0x49   : > { %v717_v29 = vmax.f32 %v685_v19, 0.0  ;;  %v494_v30 = vadd.f32 %v1931_v21, %v455_v22  ;;  %v648_v31 = vmul.f32 %v1670_v23, %v1905_v5  ;;  %v1606_v32 = vunpack.c.h.bf16 %v1691_v13 }
  0x4a   : > { %1800 = vmatmul.mubr.msk.bf16.gmra.mxu1 %vm955_vm3, %v544_v25  ;;  %v525_v33 = vmax.f32 %v493_v26, 0.0  ;;  %v686_v34 = vadd.f32 %v1924_v14, %v647_v27  ;;  %v456_v35 = vmul.f32 %v1605_v28, %v1918_v10  ;;  %v1673_v36 = vunpack.c.l.bf16 %v1707_v24  ;;  %v2122_v27 = vld [vmem:[%s2237_s8] ss:$0 sm:$0xff] }
  0x4b   : > { %v736_v38 = vpack.c.bf16 %v717_v29, %v716_v20  ;;  %v526_v39 = vmax.f32 %v494_v30, 0.0  ;;  %v687_v40 = vadd.f32 %v1924_v14, %v648_v31  ;;  %v457_v41 = vmul.f32 %v1606_v32, %v1918_v10 }
  0x4c   : > { %v718_v42 = vmax.f32 %v686_v34, 0.0  ;;  %v495_v43 = vadd.f32 %v1931_v21, %v456_v35  ;;  %v1674_v44 = vunpack.c.h.bf16 %v1707_v24  ;;  %v649_v45 = vmul.f32 %v1673_v36, %v1905_v5 }
  0x4d   : > { %1769 = vmatprep.mubr.msk.bf16.mxu0 %vm741_vm2, %v736_v38  ;;  %v545_v47 = vpack.c.bf16 %v526_v39, %v525_v33  ;;  %v719_v48 = vmax.f32 %v687_v40, 0.0  ;;  %v496_v49 = vadd.f32 %v1931_v21, %v457_v41  ;;  %v1609_v50 = vunpack.c.l.bf16 %v1692_v37 }
  0x4e   : > { %v527_v51 = vmax.f32 %v495_v43, 0.0  ;;  %v650_v52 = vmul.f32 %v1674_v44, %v1905_v5  ;;  %v688_v53 = vadd.f32 %v1924_v14, %v649_v45  ;;  %v1610_v54 = vunpack.c.h.bf16 %v1692_v37 }
  0x4f   : > { %1803 = vmatprep.mubr.msk.bf16.mxu1 %vm955_vm3, %v545_v47  ;;  %v737_v56 = vpack.c.bf16 %v719_v48, %v718_v42  ;;  %v528_v57 = vmax.f32 %v496_v49, 0.0  ;;  %v458_v58 = vmul.f32 %v1609_v50, %v1918_v10  ;;  %v1677_v59 = vunpack.c.l.bf16 %v1708_v46 }
  0x50   : > { %v689_v60 = vadd.f32 %v1924_v14, %v650_v52  ;;  %v720_v61 = vmax.f32 %v688_v53, 0.0  ;;  %v459_v62 = vmul.f32 %v1610_v54, %v1918_v10  ;;  %v1678_v63 = vunpack.c.h.bf16 %v1708_v46 }
  0x51   : > { %1770 = vmatmul.mubr.msk.bf16.gmra.mxu0 %vm741_vm2, %v737_v56  ;;  %v546_v0 = vpack.c.bf16 %v528_v57, %v527_v51  ;;  %v497_v1 = vadd.f32 %v1931_v21, %v458_v58  ;;  %v651_v2 = vmul.f32 %v1677_v59, %v1905_v5  ;;  %v1613_v3 = vunpack.c.l.bf16 %v1693_v55 }
  0x52   : > { %v721_v4 = vmax.f32 %v689_v60, 0.0  ;;  %v498_v6 = vadd.f32 %v1931_v21, %v459_v62  ;;  %v652_v7 = vmul.f32 %v1678_v63, %v1905_v5  ;;  %v1614_v8 = vunpack.c.h.bf16 %v1693_v55 }
  0x53   : > { %1804 = vmatmul.mubr.msk.bf16.gmra.mxu1 %vm955_vm3, %v546_v0  ;;  %v529_v9 = vmax.f32 %v497_v1, 0.0  ;;  %v690_v11 = vadd.f32 %v1924_v14, %v651_v2  ;;  %v460_v12 = vmul.f32 %v1613_v3, %v1918_v10 }
  0x54   : > { %v738_v13 = vpack.c.bf16 %v721_v4, %v720_v61  ;;  %v530_v15 = vmax.f32 %v498_v6, 0.0  ;;  %v691_v16 = vadd.f32 %v1924_v14, %v652_v7  ;;  %v461_v17 = vmul.f32 %v1614_v8, %v1918_v10 }
  0x55   : > { %v722_v18 = vmax.f32 %v690_v11, 0.0  ;;  %v499_v19 = vadd.f32 %v1931_v21, %v460_v12 }
  0x56   : > { %1773 = vmatprep.mubr.msk.bf16.mxu0 %vm741_vm2, %v738_v13  ;;  %v547_v5 = vpack.c.bf16 %v530_v15, %v529_v9  ;;  %v723_v20 = vmax.f32 %v691_v16, 0.0  ;;  %v500_v22 = vadd.f32 %v1931_v21, %v461_v17 }
  0x57   : > { %v531_v23 = vmax.f32 %v499_v19, 0.0 }
  0x58   : > { %1807 = vmatprep.mubr.msk.bf16.mxu1 %vm955_vm3, %v547_v5  ;;  %v739_v24 = vpack.c.bf16 %v723_v20, %v722_v18  ;;  %v532_v25 = vmax.f32 %v500_v22, 0.0 }
  0x5a   : > { %1774 = vmatmul.mubr.msk.bf16.gmra.mxu0 %vm741_vm2, %v739_v24  ;;  %v548_v14 = vpack.c.bf16 %v532_v25, %v531_v23 }
  0x5c   : > { %1808 = vmatmul.mubr.msk.bf16.gmra.mxu1 %vm955_vm3, %v548_v14 }
  0xda   : > { %v1747_v10 = vpop.f32.mrf.mxu0 }
  0xdb   : > { %v1781_v26 = vpop.f32.mrf.mxu1 }
  0xdc   : > { %v1051_v28 = vadd.f32 %v1781_v26, %v1747_v10  ;;  %v828_v21 = vpop.f32.mrf.mxu0 }
  0xdd   : > { %v1042_v29 = vpop.f32.mrf.mxu1 }
  0xde   : > { %v1178_v30 = vadd.f32 %v2122_v27, %v1051_v28  ;;  %v1043_v31 = vadd.f32 %v1042_v29, %v828_v21  ;;  %v1748_v32 = vpop.f32.mrf.mxu0 }
  0xdf   : > { %v1782_v33 = vpop.f32.mrf.mxu1 }
  0xe0   : > { %v1521_v34 = vpack.c.bf16 %v1178_v30, %v1178_v30  ;;  %v1176_v35 = vadd.f32 %v2122_v27, %v1043_v31  ;;  %v1054_v36 = vadd.f32 %v1782_v33, %v1748_v32  ;;  %v831_v37 = vpop.f32.mrf.mxu0 }
  0xe1   : > { %v1045_v38 = vpop.f32.mrf.mxu1 }
  0xe2   : > { %1339 = vst.msk [vmem:[%s2129_s15 + $0x8] sm:$0xf] %vm1336_vm4, %v1521_v34  ;;  %v1519_v39 = vpack.c.bf16 %v1176_v35, %v1176_v35  ;;  %v1179_v40 = vadd.f32 %v2122_v27, %v1054_v36  ;;  %v1046_v41 = vadd.f32 %v1045_v38, %v831_v37 }
  0xe3   : > { %v1751_v42 = vpop.f32.mrf.mxu0 }
  0xe4   : > { %1337 = vst.msk [vmem:[%s2129_s15] sm:$0xf] %vm1336_vm4, %v1519_v39  ;;  %v1522_v43 = vpack.c.bf16 %v1179_v40, %v1179_v40  ;;  %v1177_v44 = vadd.f32 %v2122_v27, %v1046_v41  ;;  %v1785_v45 = vpop.f32.mrf.mxu1 }
  0xe5   : > { %v1067_v46 = vadd.f32 %v1785_v45, %v1751_v42  ;;  %v844_v47 = vpop.f32.mrf.mxu0 }
  0xe6   : > { %1340 = vst.msk [vmem:[%s2129_s15 + $0xc] sm:$0xf] %vm1336_vm4, %v1522_v43  ;;  %v1520_v48 = vpack.c.bf16 %v1177_v44, %v1177_v44  ;;  %v1058_v49 = vpop.f32.mrf.mxu1 }
  0xe7   : > { %v1182_v50 = vadd.f32 %v2122_v27, %v1067_v46  ;;  %v1059_v51 = vadd.f32 %v1058_v49, %v844_v47  ;;  %v1752_v52 = vpop.f32.mrf.mxu0 }
  0xe8   : > { %1338 = vst.msk [vmem:[%s2129_s15 + $0x4] sm:$0xf] %vm1336_vm4, %v1520_v48  ;;  %v1786_v53 = vpop.f32.mrf.mxu1 }
  0xe9   : > { %v1525_v54 = vpack.c.bf16 %v1182_v50, %v1182_v50  ;;  %v1180_v55 = vadd.f32 %v2122_v27, %v1059_v51  ;;  %v1070_v56 = vadd.f32 %v1786_v53, %v1752_v52  ;;  %v847_v57 = vpop.f32.mrf.mxu0 }
  0xea   : > { %v1061_v58 = vpop.f32.mrf.mxu1 }
  0xeb   : > { %1343 = vst.msk [vmem:[%s2129_s15 + $0x18] sm:$0xf] %vm1336_vm4, %v1525_v54  ;;  %v1523_v59 = vpack.c.bf16 %v1180_v55, %v1180_v55  ;;  %v1183_v60 = vadd.f32 %v2122_v27, %v1070_v56  ;;  %v1062_v61 = vadd.f32 %v1061_v58, %v847_v57 }
  0xec   : > { %v1755_v62 = vpop.f32.mrf.mxu0 }
  0xed   : > { %1341 = vst.msk [vmem:[%s2129_s15 + $0x10] sm:$0xf] %vm1336_vm4, %v1523_v59  ;;  %v1526_v63 = vpack.c.bf16 %v1183_v60, %v1183_v60  ;;  %v1181_v0 = vadd.f32 %v2122_v27, %v1062_v61 }
  0xee   : > { %v1789_v1 = vpop.f32.mrf.mxu1  ;;  %v860_v2 = vpop.f32.mrf.mxu0 }
  0xef   : > { %1344 = vst.msk [vmem:[%s2129_s15 + $0x1c] sm:$0xf] %vm1336_vm4, %v1526_v63  ;;  %v1524_v3 = vpack.c.bf16 %v1181_v0, %v1181_v0  ;;  %v1083_v4 = vadd.f32 %v1789_v1, %v1755_v62 }
  0xf0   : > { %v1074_v6 = vpop.f32.mrf.mxu1  ;;  %v1756_v7 = vpop.f32.mrf.mxu0 }
  0xf1   : > { %1342 = vst.msk [vmem:[%s2129_s15 + $0x14] sm:$0xf] %vm1336_vm4, %v1524_v3  ;;  %v1186_v8 = vadd.f32 %v2122_v27, %v1083_v4  ;;  %v1075_v9 = vadd.f32 %v1074_v6, %v860_v2 }
  0xf2   : > { %v1790_v11 = vpop.f32.mrf.mxu1  ;;  %v863_v12 = vpop.f32.mrf.mxu0 }
  0xf3   : > { %v1529_v13 = vpack.c.bf16 %v1186_v8, %v1186_v8  ;;  %v1184_v15 = vadd.f32 %v2122_v27, %v1075_v9  ;;  %v1086_v16 = vadd.f32 %v1790_v11, %v1756_v7 }
  0xf4   : > { %v1077_v17 = vpop.f32.mrf.mxu1 }
  0xf5   : > { %1347 = vst.msk [vmem:[%s2129_s15 + $0x28] sm:$0xf] %vm1336_vm4, %v1529_v13  ;;  %v1527_v18 = vpack.c.bf16 %v1184_v15, %v1184_v15  ;;  %v1187_v19 = vadd.f32 %v2122_v27, %v1086_v16  ;;  %v1078_v5 = vadd.f32 %v1077_v17, %v863_v12  ;;  %v1759_v20 = vpop.f32.mrf.mxu0 }
  0xf7   : > { %1345 = vst.msk [vmem:[%s2129_s15 + $0x20] sm:$0xf] %vm1336_vm4, %v1527_v18  ;;  %v1530_v22 = vpack.c.bf16 %v1187_v19, %v1187_v19  ;;  %v1185_v23 = vadd.f32 %v2122_v27, %v1078_v5  ;;  %v876_v24 = vpop.f32.mrf.mxu0 }
  0xf8   : > { %v1793_v25 = vpop.f32.mrf.mxu1 }
  0xf9   : > { %1348 = vst.msk [vmem:[%s2129_s15 + $0x2c] sm:$0xf] %vm1336_vm4, %v1530_v22  ;;  %v1528_v14 = vpack.c.bf16 %v1185_v23, %v1185_v23  ;;  %v1099_v10 = vadd.f32 %v1793_v25, %v1759_v20  ;;  %v1760_v26 = vpop.f32.mrf.mxu0 }
  0xfa   : > { %v1090_v28 = vpop.f32.mrf.mxu1 }
  0xfb   : > { %1346 = vst.msk [vmem:[%s2129_s15 + $0x24] sm:$0xf] %vm1336_vm4, %v1528_v14  ;;  %v1190_v21 = vadd.f32 %v2122_v27, %v1099_v10  ;;  %v1091_v29 = vadd.f32 %v1090_v28, %v876_v24  ;;  %v879_v30 = vpop.f32.mrf.mxu0 }
  0xfc   : > { %v1794_v31 = vpop.f32.mrf.mxu1 }
  0xfd   : > { %v1533_v32 = vpack.c.bf16 %v1190_v21, %v1190_v21  ;;  %v1188_v33 = vadd.f32 %v2122_v27, %v1091_v29  ;;  %v1102_v34 = vadd.f32 %v1794_v31, %v1760_v26 }
  0xfe   : > { %v1093_v35 = vpop.f32.mrf.mxu1  ;;  %v1763_v36 = vpop.f32.mrf.mxu0 }
  0xff   : > { %1351 = vst.msk [vmem:[%s2129_s15 + $0x38] sm:$0xf] %vm1336_vm4, %v1533_v32  ;;  %v1531_v37 = vpack.c.bf16 %v1188_v33, %v1188_v33  ;;  %v1191_v38 = vadd.f32 %v2122_v27, %v1102_v34  ;;  %v1094_v39 = vadd.f32 %v1093_v35, %v879_v30 }
 0x100   : > { %v892_v40 = vpop.f32.mrf.mxu0 }
 0x101   : > { %1349 = vst.msk [vmem:[%s2129_s15 + $0x30] sm:$0xf] %vm1336_vm4, %v1531_v37  ;;  %v1534_v41 = vpack.c.bf16 %v1191_v38, %v1191_v38  ;;  %v1189_v42 = vadd.f32 %v2122_v27, %v1094_v39  ;;  %v1797_v43 = vpop.f32.mrf.mxu1 }
 0x102   : > { %v1115_v44 = vadd.f32 %v1797_v43, %v1763_v36  ;;  %v1764_v45 = vpop.f32.mrf.mxu0 }
 0x103   : > { %1352 = vst.msk [vmem:[%s2129_s15 + $0x3c] sm:$0xf] %vm1336_vm4, %v1534_v41  ;;  %v1532_v46 = vpack.c.bf16 %v1189_v42, %v1189_v42  ;;  %v1106_v47 = vpop.f32.mrf.mxu1 }
 0x104   : > { %v1194_v48 = vadd.f32 %v2122_v27, %v1115_v44  ;;  %v1107_v49 = vadd.f32 %v1106_v47, %v892_v40  ;;  %v895_v50 = vpop.f32.mrf.mxu0 }
 0x105   : > { %1350 = vst.msk [vmem:[%s2129_s15 + $0x34] sm:$0xf] %vm1336_vm4, %v1532_v46  ;;  %v1798_v51 = vpop.f32.mrf.mxu1 }
 0x106   : > { %v1537_v52 = vpack.c.bf16 %v1194_v48, %v1194_v48  ;;  %v1192_v53 = vadd.f32 %v2122_v27, %v1107_v49  ;;  %v1118_v54 = vadd.f32 %v1798_v51, %v1764_v45 }
 0x107   : > { %v1109_v55 = vpop.f32.mrf.mxu1 }
 0x108   : > { %1355 = vst.msk [vmem:[%s2129_s15 + $0x48] sm:$0xf] %vm1336_vm4, %v1537_v52  ;;  %v1535_v56 = vpack.c.bf16 %v1192_v53, %v1192_v53  ;;  %v1195_v57 = vadd.f32 %v2122_v27, %v1118_v54  ;;  %v1110_v58 = vadd.f32 %v1109_v55, %v895_v50  ;;  %v1767_v59 = vpop.f32.mrf.mxu0 }
 0x10a   : > { %1353 = vst.msk [vmem:[%s2129_s15 + $0x40] sm:$0xf] %vm1336_vm4, %v1535_v56  ;;  %v1538_v60 = vpack.c.bf16 %v1195_v57, %v1195_v57  ;;  %v1193_v61 = vadd.f32 %v2122_v27, %v1110_v58  ;;  %v1801_v62 = vpop.f32.mrf.mxu1  ;;  %v908_v63 = vpop.f32.mrf.mxu0 }
 0x10b   : > { %v1131_v0 = vadd.f32 %v1801_v62, %v1767_v59 }
 0x10c   : > { %1356 = vst.msk [vmem:[%s2129_s15 + $0x4c] sm:$0xf] %vm1336_vm4, %v1538_v60  ;;  %v1536_v1 = vpack.c.bf16 %v1193_v61, %v1193_v61  ;;  %v1122_v2 = vpop.f32.mrf.mxu1  ;;  %v1768_v3 = vpop.f32.mrf.mxu0 }
 0x10d   : > { %v1198_v4 = vadd.f32 %v2122_v27, %v1131_v0  ;;  %v1123_v6 = vadd.f32 %v1122_v2, %v908_v63 }
 0x10e   : > { %1354 = vst.msk [vmem:[%s2129_s15 + $0x44] sm:$0xf] %vm1336_vm4, %v1536_v1  ;;  %v1802_v7 = vpop.f32.mrf.mxu1  ;;  %v911_v8 = vpop.f32.mrf.mxu0 }
 0x10f   : > { %v1541_v9 = vpack.c.bf16 %v1198_v4, %v1198_v4  ;;  %v1196_v11 = vadd.f32 %v2122_v27, %v1123_v6  ;;  %v1134_v12 = vadd.f32 %v1802_v7, %v1768_v3 }
 0x110   : > { %v1125_v13 = vpop.f32.mrf.mxu1 }
 0x111   : > { %1359 = vst.msk [vmem:[%s2129_s15 + $0x58] sm:$0xf] %vm1336_vm4, %v1541_v9  ;;  %v1539_v15 = vpack.c.bf16 %v1196_v11, %v1196_v11  ;;  %v1199_v16 = vadd.f32 %v2122_v27, %v1134_v12  ;;  %v1126_v17 = vadd.f32 %v1125_v13, %v911_v8  ;;  %v1771_v18 = vpop.f32.mrf.mxu0 }
 0x113   : > { %1357 = vst.msk [vmem:[%s2129_s15 + $0x50] sm:$0xf] %vm1336_vm4, %v1539_v15  ;;  %v1542_v19 = vpack.c.bf16 %v1199_v16, %v1199_v16  ;;  %v1197_v5 = vadd.f32 %v2122_v27, %v1126_v17  ;;  %v1805_v20 = vpop.f32.mrf.mxu1  ;;  %v924_v22 = vpop.f32.mrf.mxu0 }
 0x114   : > { %v1147_v23 = vadd.f32 %v1805_v20, %v1771_v18 }
 0x115   : > { %1360 = vst.msk [vmem:[%s2129_s15 + $0x5c] sm:$0xf] %vm1336_vm4, %v1542_v19  ;;  %v1540_v24 = vpack.c.bf16 %v1197_v5, %v1197_v5  ;;  %v1138_v25 = vpop.f32.mrf.mxu1  ;;  %v1772_v14 = vpop.f32.mrf.mxu0 }
 0x116   : > { %v1202_v10 = vadd.f32 %v2122_v27, %v1147_v23  ;;  %v1139_v26 = vadd.f32 %v1138_v25, %v924_v22 }
 0x117   : > { %1358 = vst.msk [vmem:[%s2129_s15 + $0x54] sm:$0xf] %vm1336_vm4, %v1540_v24  ;;  %v1806_v28 = vpop.f32.mrf.mxu1  ;;  %v927_v21 = vpop.f32.mrf.mxu0 }
 0x118   : > { %v1545_v29 = vpack.c.bf16 %v1202_v10, %v1202_v10  ;;  %v1200_v30 = vadd.f32 %v2122_v27, %v1139_v26  ;;  %v1150_v31 = vadd.f32 %v1806_v28, %v1772_v14 }
 0x119   : > { %v1141_v32 = vpop.f32.mrf.mxu1 }
 0x11a   : > { %1363 = vst.msk [vmem:[%s2129_s15 + $0x68] sm:$0xf] %vm1336_vm4, %v1545_v29  ;;  %v1543_v33 = vpack.c.bf16 %v1200_v30, %v1200_v30  ;;  %v1203_v34 = vadd.f32 %v2122_v27, %v1150_v31  ;;  %v1142_v35 = vadd.f32 %v1141_v32, %v927_v21  ;;  %v1775_v36 = vpop.f32.mrf.mxu0 }
 0x11c   : > { %1361 = vst.msk [vmem:[%s2129_s15 + $0x60] sm:$0xf] %vm1336_vm4, %v1543_v33  ;;  %v1546_v37 = vpack.c.bf16 %v1203_v34, %v1203_v34  ;;  %v1201_v38 = vadd.f32 %v2122_v27, %v1142_v35  ;;  %v1809_v39 = vpop.f32.mrf.mxu1  ;;  %v940_v40 = vpop.f32.mrf.mxu0 }
 0x11d   : > { %v1163_v41 = vadd.f32 %v1809_v39, %v1775_v36 }
 0x11e   : > { %1364 = vst.msk [vmem:[%s2129_s15 + $0x6c] sm:$0xf] %vm1336_vm4, %v1546_v37  ;;  %v1544_v42 = vpack.c.bf16 %v1201_v38, %v1201_v38  ;;  %v1154_v43 = vpop.f32.mrf.mxu1  ;;  %v1776_v44 = vpop.f32.mrf.mxu0 }
 0x11f   : > { %v1206_v45 = vadd.f32 %v2122_v27, %v1163_v41  ;;  %v1155_v46 = vadd.f32 %v1154_v43, %v940_v40 }
 0x120   : > { %1362 = vst.msk [vmem:[%s2129_s15 + $0x64] sm:$0xf] %vm1336_vm4, %v1544_v42  ;;  %v1810_v47 = vpop.f32.mrf.mxu1  ;;  %v943_v48 = vpop.f32.mrf.mxu0 }
 0x121   : > { %v1549_v49 = vpack.c.bf16 %v1206_v45, %v1206_v45  ;;  %v1204_v50 = vadd.f32 %v2122_v27, %v1155_v46  ;;  %v1166_v51 = vadd.f32 %v1810_v47, %v1776_v44 }
 0x122   : > { %v1157_v52 = vpop.f32.mrf.mxu1 }
 0x123   : > { %1367 = vst.msk [vmem:[%s2129_s15 + $0x78] sm:$0xf] %vm1336_vm4, %v1549_v49  ;;  %v1547_v53 = vpack.c.bf16 %v1204_v50, %v1204_v50  ;;  %v1207_v54 = vadd.f32 %v2122_v27, %v1166_v51  ;;  %v1158_v55 = vadd.f32 %v1157_v52, %v943_v48 }
 0x125   : > { %1365 = vst.msk [vmem:[%s2129_s15 + $0x70] sm:$0xf] %vm1336_vm4, %v1547_v53  ;;  %v1550_v56 = vpack.c.bf16 %v1207_v54, %v1207_v54  ;;  %v1205_v57 = vadd.f32 %v2122_v27, %v1158_v55 }
 0x127   : > { %1368 = vst.msk [vmem:[%s2129_s15 + $0x7c] sm:$0xf] %vm1336_vm4, %v1550_v56  ;;  %v1548_v58 = vpack.c.bf16 %v1205_v57, %v1205_v57 }
 0x129   : > { %1366 = vst.msk [vmem:[%s2129_s15 + $0x74] sm:$0xf] %vm1336_vm4, %v1548_v58 }
 0x12a PF: > { %s19_s30 = sadd.s32 1, %s1827_s30  }
 0x12b   : > { %p16_p4 = scmp.ge.s32.totalorder %s19_s30, 4  }
 0x12d   :  { %18 = sbr.rel (!%p16_p4) target bundleno = 1 (0x1), region = 89 }

// kernel: _lambda_.20
= control target key start
LH: loop header
LB: loop body
LE: loop exit
PB: predicated region body
PF: predicated region fallthrough
CT: control target
= control target key end

     0   :  { %s595_s18 = smov 0   ;;  %s643_s0 = inlined_call_operand.vmem [shape: bf16[128,16], index: 0, kind: input, shape index: {}]   ;;  %s644_s1 = inlined_call_operand.vmem [shape: bf16[16,36], index: 1, kind: input, shape index: {}]   ;;  %s645_s2 = inlined_call_operand.vmem [shape: f32[1,16], index: 2, kind: input, shape index: {}]   ;;  %s646_s3 = inlined_call_operand.vmem [shape: f32[1,16], index: 3, kind: input, shape index: {}]   ;;  %s647_s4 = inlined_call_operand.vmem [shape: f32[1,36], index: 4, kind: input, shape index: {}]   ;;  %s648_s5 = inlined_call_operand.vmem [shape: bf16[128,36], index: 5, kind: output, shape index: {}]  }
   0x1 LB: > { %s477_s19 = sadd.s32 4294967295, %s563_s18   ;;  %p481_p0 = scmp.ge.s32.totalorder %s563_s18, 1  ;;  %s563_s18 = sphi %s595_s18, %s15_s18  }
   0x2   : > { %p188_p1 = scmp.lt.s32.totalorder %s563_s18, 3 }
   0x4   : > { %p189_p2 = pnand %p481_p0, %p188_p1 }
   0x5   : > { %s482_s22 = sshll.u32 (!%p189_p2), %s477_s19, 3 }
   0x6   : > { %192 = sbr.rel (%p189_p2) target bundleno = 230 (0xe6), region = 40  ;;  %p217_p3 = scmp.lt.s32.totalorder (!%p189_p2), %s482_s22, 15 }
   0xb   : > { %v556_v0 = vld [vmem:[%s644_s1] sm:$0xff]   ;;  %s650_s22 = smov (!%p217_p3, %s482_s22), 15  ;;  %vm302_vm0 = vcmask 130048   ;;  %vm412_vm1 = vcmask 289792  }
   0xc   : > { %536 = vmatprep.subr.bf16.mxu0 %v556_v0  ;;  %546 = vmatprep.subr.bf16.mxu1 %v556_v0  ;;  %s483_s23 = sshll.u32 %s650_s22, 2  ;;  %v486_v1 = vld [vmem:[%s645_s2] ss:$0 sm:$0xff] }
   0xd   : > { %537 = vmatpush3.bf16.msra.mxu0 %v556_v0  ;;  %547 = vmatpush3.bf16.msra.mxu1 %v556_v0  ;;  %s220_s26 = scalar_lea.vmem %s643_s0, %s483_s23  ;;  %v487_v10 = vld [vmem:[%s646_s3] ss:$0 sm:$0xff]  ;;  %s226_s10 = scalar_lea.vmem %s648_s5, %s483_s23 }
   0xe   : > { %v513_v2 = vld [vmem:[%s220_s26] sm:$0xff]   ;;  %v529_v3 = vld [vmem:[%s220_s26 + $0x10] sm:$0xff]   ;;  %v528_v4 = vld [vmem:[%s220_s26 + $0x8] sm:$0xff]  }
   0xf   : > { %v514_v5 = vunpack.c.l.bf16 %v513_v2  ;;  %v515_v6 = vunpack.c.h.bf16 %v513_v2  ;;  %v522_v7 = vunpack.c.l.bf16 %v529_v3  ;;  %v523_v8 = vunpack.c.h.bf16 %v529_v3  ;;  %v530_v9 = vld [vmem:[%s220_s26 + $0x18] sm:$0xff]   ;;  %v488_v43 = vld [vmem:[%s647_s4] ss:$0 sm:$0xff] }
  0x10   : > { %v518_v11 = vunpack.c.l.bf16 %v528_v4  ;;  %v519_v12 = vunpack.c.h.bf16 %v528_v4  ;;  %v526_v13 = vunpack.c.l.bf16 %v530_v9  ;;  %v527_v14 = vunpack.c.h.bf16 %v530_v9 }
  0x11   : > { %v252_v15 = vmul.f32 %v514_v5, %v486_v1  ;;  %v253_v16 = vmul.f32 %v515_v6, %v486_v1  ;;  %v256_v17 = vmul.f32 %v522_v7, %v486_v1  ;;  %v257_v18 = vmul.f32 %v523_v8, %v486_v1 }
  0x12   : > { %v254_v19 = vmul.f32 %v518_v11, %v486_v1  ;;  %v255_v20 = vmul.f32 %v519_v12, %v486_v1  ;;  %v258_v21 = vmul.f32 %v526_v13, %v486_v1  ;;  %v259_v22 = vmul.f32 %v527_v14, %v486_v1 }
  0x13   : > { %v267_v23 = vadd.f32 %v487_v10, %v252_v15  ;;  %v268_v24 = vadd.f32 %v487_v10, %v253_v16  ;;  %v271_v25 = vadd.f32 %v487_v10, %v256_v17  ;;  %v272_v26 = vadd.f32 %v487_v10, %v257_v18 }
  0x14   : > { %v269_v27 = vadd.f32 %v487_v10, %v254_v19  ;;  %v270_v28 = vadd.f32 %v487_v10, %v255_v20  ;;  %v273_v29 = vadd.f32 %v487_v10, %v258_v21  ;;  %v274_v30 = vadd.f32 %v487_v10, %v259_v22 }
  0x15   : > { %v275_v31 = vmax.f32 %v267_v23, 0.0  ;;  %v276_v32 = vmax.f32 %v268_v24, 0.0  ;;  %v279_v33 = vmax.f32 %v271_v25, 0.0  ;;  %v280_v34 = vmax.f32 %v272_v26, 0.0 }
  0x16   : > { %v277_v35 = vmax.f32 %v269_v27, 0.0  ;;  %v278_v36 = vmax.f32 %v270_v28, 0.0  ;;  %v281_v37 = vmax.f32 %v273_v29, 0.0  ;;  %v282_v38 = vmax.f32 %v274_v30, 0.0 }
  0x17   : > { %v283_v39 = vpack.c.bf16 %v276_v32, %v275_v31  ;;  %v285_v40 = vpack.c.bf16 %v280_v34, %v279_v33 }
  0x18   : > { %v284_v41 = vpack.c.bf16 %v278_v36, %v277_v35  ;;  %v286_v42 = vpack.c.bf16 %v282_v38, %v281_v37 }
  0x19   : > { %538 = vmatprep.mubr.msk.bf16.mxu0 %vm302_vm0, %v283_v39  ;;  %542 = vmatprep.mubr.msk.bf16.mxu1 %vm302_vm0, %v285_v40 }
  0x1a   : > { %539 = vmatmul.mubr.msk.bf16.vlgmr.msra.gmra.mxu0 %vm302_vm0, %v284_v41  ;;  %543 = vmatmul.mubr.msk.bf16.vlgmr.msra.gmra.mxu1 %vm302_vm0, %v286_v42 }
  0xda   : > { %v540_v44 = vpop.f32.mrf.mxu0  ;;  %v544_v45 = vpop.f32.mrf.mxu1 }
  0xdb   : > { %v358_v46 = vadd.f32 %v540_v44, %v488_v43  ;;  %v374_v47 = vadd.f32 %v544_v45, %v488_v43 }
  0xdc   : > { %v349_v48 = vpop.f32.mrf.mxu0  ;;  %v365_v49 = vpop.f32.mrf.mxu1 }
  0xdd   : > { %v506_v50 = vpack.c.bf16 %v358_v46, %v358_v46  ;;  %v510_v51 = vpack.c.bf16 %v374_v47, %v374_v47  ;;  %v350_v52 = vadd.f32 %v488_v43, %v349_v48  ;;  %v366_v53 = vadd.f32 %v488_v43, %v365_v49 }
  0xde   : > { %v541_v54 = vpop.f32.mrf.mxu0  ;;  %v545_v55 = vpop.f32.mrf.mxu1 }
  0xdf   : > { %415 = vst.msk [vmem:[%s226_s10 + $0x8] sm:$0xf] %vm412_vm1, %v506_v50  ;;  %419 = vst.msk [vmem:[%s226_s10 + $0x18] sm:$0xf] %vm412_vm1, %v510_v51  ;;  %v504_v56 = vpack.c.bf16 %v350_v52, %v350_v52  ;;  %v508_v57 = vpack.c.bf16 %v366_v53, %v366_v53  ;;  %v361_v58 = vadd.f32 %v541_v54, %v488_v43 }
  0xe0   : > { %v377_v59 = vadd.f32 %v545_v55, %v488_v43  ;;  %v352_v60 = vpop.f32.mrf.mxu0  ;;  %v368_v61 = vpop.f32.mrf.mxu1 }
  0xe1   : > { %413 = vst.msk [vmem:[%s226_s10] sm:$0xf] %vm412_vm1, %v504_v56  ;;  %417 = vst.msk [vmem:[%s226_s10 + $0x10] sm:$0xf] %vm412_vm1, %v508_v57  ;;  %v507_v62 = vpack.c.bf16 %v361_v58, %v361_v58  ;;  %v353_v0 = vadd.f32 %v488_v43, %v352_v60  ;;  %v369_v1 = vadd.f32 %v488_v43, %v368_v61 }
  0xe2   : > { %v511_v63 = vpack.c.bf16 %v377_v59, %v377_v59 }
  0xe3   : > { %416 = vst.msk [vmem:[%s226_s10 + $0xc] sm:$0xf] %vm412_vm1, %v507_v62  ;;  %v505_v2 = vpack.c.bf16 %v353_v0, %v353_v0  ;;  %v509_v3 = vpack.c.bf16 %v369_v1, %v369_v1 }
  0xe4   : > { %420 = vst.msk [vmem:[%s226_s10 + $0x1c] sm:$0xf] %vm412_vm1, %v511_v63 }
  0xe5   : > { %414 = vst.msk [vmem:[%s226_s10 + $0x4] sm:$0xf] %vm412_vm1, %v505_v2  ;;  %418 = vst.msk [vmem:[%s226_s10 + $0x14] sm:$0xf] %vm412_vm1, %v509_v3 }
  0xe6 PF: > { %s15_s18 = sadd.s32 1, %s563_s18  }
  0xe7   : > { %p12_p4 = scmp.ge.s32.totalorder %s15_s18, 4  }
  0xe9   :  { %14 = sbr.rel (!%p12_p4) target bundleno = 1 (0x1), region = 70 }

// kernel: _lambda_.19
= control target key start
LH: loop header
LB: loop body
LE: loop exit
PB: predicated region body
PF: predicated region fallthrough
CT: control target
= control target key end

     0   :  { %s2197_s18 = smov 0   ;;  %s2482_s0 = inlined_call_operand.vmem [shape: bf16[16,2,16,16], index: 0, kind: input, shape index: {}]   ;;  %s2483_s1 = inlined_call_operand.vmem [shape: f32[1,16], index: 1, kind: input, shape index: {}]   ;;  %s2484_s2 = inlined_call_operand.vmem [shape: f32[1,16], index: 2, kind: input, shape index: {}]   ;;  %s2485_s3 = inlined_call_operand.vmem [shape: bf16[16,16], index: 3, kind: input, shape index: {}]   ;;  %s2486_s4 = inlined_call_operand.vmem [shape: f32[1,16], index: 4, kind: input, shape index: {}]   ;;  %s2487_s5 = inlined_call_operand.vmem [shape: bf16[16,8,16], index: 5, kind: output, shape index: {}]  }
   0x1 LB: > { %s1791_s19 = sadd.s32 4294967295, %s2164_s18   ;;  %p1795_p0 = scmp.ge.s32.totalorder %s2164_s18, 1  ;;  %s2164_s18 = sphi %s2197_s18, %s15_s18  }
   0x2   : > { %p189_p1 = scmp.lt.s32.totalorder %s2164_s18, 3 }
   0x4   : > { %p190_p2 = pnand %p1795_p0, %p189_p1 }
   0x5   : > { %s1796_s22 = sshll.u32 (!%p190_p2), %s1791_s19, 3 }
   0x6   : > { %193 = sbr.rel (%p190_p2) target bundleno = 357 (0x165), region = 40  ;;  %p219_p3 = scmp.lt.s32.totalorder (!%p190_p2), %s1796_s22, 15 }
   0xb   : > { %v2157_v0 = vld [vmem:[%s2485_s3] sm:$0xff]   ;;  %s2489_s22 = smov (!%p219_p3, %s1796_s22), 15  ;;  %vm437_vm0 = vcmask 130048   ;;  %vm1592_vm1 = vcmask 1041409   ;;  %vm1595_vm2 = vcmask 1042434   ;;  %vm1598_vm3 = vcmask 1043459  }
   0xc   : > { %2112 = vmatprep.subr.bf16.mxu0 %v2157_v0  ;;  %2146 = vmatprep.subr.bf16.mxu1 %v2157_v0  ;;  %s1951_s23 = sshll.u32 %s2489_s22, 4  ;;  %v2219_v1 = vld [vmem:[%s2483_s1] ss:$0 sm:$0xff]  ;;  %vm1601_vm4 = vcmask 1044484   ;;  %vm1604_vm5 = vcmask 1045509   ;;  %vm1607_vm6 = vcmask 1046534  }
   0xd   : > { %2113 = vmatpush3.bf16.msra.mxu0 %v2157_v0  ;;  %2147 = vmatpush3.bf16.msra.mxu1 %v2157_v0  ;;  %s2214_s26 = scalar_lea.vmem %s2482_s0, %s1951_s23  ;;  %v2228_v10 = vld [vmem:[%s2484_s2] ss:$0 sm:$0xff]  ;;  %vm1610_vm7 = vcmask 1047559   ;;  %vm1726_vm8 = vcmask 125952   ;;  %s1800_s8 = sshll.u32 %s2489_s22, 2 }
   0xe   : > { %v2017_v2 = vld [vmem:[%s2214_s26] sm:$0xff]   ;;  %v2080_v4 = vld [vmem:[%s2214_s26 + $0x8] sm:$0xff]   ;;  %v2081_v31 = vld [vmem:[%s2214_s26 + $0x10] sm:$0xff]   ;;  %s2366_s11 = scalar_lea.vmem %s2487_s5, %s1800_s8 }
   0xf   : > { %v2087_v3 = vld [vmem:[%s2214_s26 + $0x40] sm:$0xff]   ;;  %v2018_v5 = vunpack.c.l.bf16 %v2017_v2  ;;  %v2019_v6 = vunpack.c.h.bf16 %v2017_v2  ;;  %v2088_v9 = vld [vmem:[%s2214_s26 + $0x48] sm:$0xff]   ;;  %v2022_v11 = vunpack.c.l.bf16 %v2080_v4  ;;  %v2023_v12 = vunpack.c.h.bf16 %v2080_v4  ;;  %v2089_v36 = vld [vmem:[%s2214_s26 + $0x50] sm:$0xff]  }
  0x10   : > { %v2050_v7 = vunpack.c.l.bf16 %v2087_v3  ;;  %v2051_v8 = vunpack.c.h.bf16 %v2087_v3  ;;  %v2054_v13 = vunpack.c.l.bf16 %v2088_v9  ;;  %v2055_v14 = vunpack.c.h.bf16 %v2088_v9  ;;  %v2082_v41 = vld [vmem:[%s2214_s26 + $0x18] sm:$0xff]   ;;  %v2083_v4 = vld [vmem:[%s2214_s26 + $0x20] sm:$0xff]  }
  0x11   : > { %v304_v15 = vmul.f32 %v2018_v5, %v2219_v1  ;;  %v305_v16 = vmul.f32 %v2019_v6, %v2219_v1  ;;  %v306_v19 = vmul.f32 %v2022_v11, %v2219_v1  ;;  %v307_v20 = vmul.f32 %v2023_v12, %v2219_v1  ;;  %v2090_v46 = vld [vmem:[%s2214_s26 + $0x58] sm:$0xff]  }
  0x12   : > { %v320_v17 = vmul.f32 %v2050_v7, %v2219_v1  ;;  %v321_v18 = vmul.f32 %v2051_v8, %v2219_v1  ;;  %v322_v21 = vmul.f32 %v2054_v13, %v2219_v1  ;;  %v323_v22 = vmul.f32 %v2055_v14, %v2219_v1  ;;  %v2091_v14 = vld [vmem:[%s2214_s26 + $0x60] sm:$0xff]  }
  0x13   : > { %v342_v23 = vadd.f32 %v2228_v10, %v304_v15  ;;  %v343_v24 = vadd.f32 %v2228_v10, %v305_v16  ;;  %v344_v27 = vadd.f32 %v2228_v10, %v306_v19  ;;  %v345_v28 = vadd.f32 %v2228_v10, %v307_v20  ;;  %v2084_v19 = vld [vmem:[%s2214_s26 + $0x28] sm:$0xff]  }
  0x14   : > { %v358_v25 = vadd.f32 %v2228_v10, %v320_v17  ;;  %v359_v26 = vadd.f32 %v2228_v10, %v321_v18  ;;  %v360_v29 = vadd.f32 %v2228_v10, %v322_v21  ;;  %v361_v30 = vadd.f32 %v2228_v10, %v323_v22 }
  0x15   : > { %v374_v32 = vmax.f32 %v342_v23, 0.0  ;;  %v375_v33 = vmax.f32 %v343_v24, 0.0  ;;  %v376_v37 = vmax.f32 %v344_v27, 0.0  ;;  %v377_v38 = vmax.f32 %v345_v28, 0.0  ;;  %v2092_v24 = vld [vmem:[%s2214_s26 + $0x68] sm:$0xff]  }
  0x16   : > { %v390_v34 = vmax.f32 %v358_v25, 0.0  ;;  %v391_v35 = vmax.f32 %v359_v26, 0.0  ;;  %v392_v39 = vmax.f32 %v360_v29, 0.0  ;;  %v393_v40 = vmax.f32 %v361_v30, 0.0 }
  0x17   : > { %v406_v42 = vpack.c.bf16 %v375_v33, %v374_v32  ;;  %v2026_v44 = vunpack.c.l.bf16 %v2081_v31  ;;  %v2027_v45 = vunpack.c.h.bf16 %v2081_v31  ;;  %v407_v47 = vpack.c.bf16 %v377_v38, %v376_v37 }
  0x18   : > { %v414_v43 = vpack.c.bf16 %v391_v35, %v390_v34  ;;  %v415_v48 = vpack.c.bf16 %v393_v40, %v392_v39  ;;  %v2058_v49 = vunpack.c.l.bf16 %v2089_v36  ;;  %v2059_v50 = vunpack.c.h.bf16 %v2089_v36 }
  0x19   : > { %2114 = vmatprep.mubr.msk.bf16.mxu0 %vm437_vm0, %v406_v42  ;;  %v308_v51 = vmul.f32 %v2026_v44, %v2219_v1  ;;  %v309_v52 = vmul.f32 %v2027_v45, %v2219_v1  ;;  %v2030_v53 = vunpack.c.l.bf16 %v2082_v41  ;;  %v2031_v54 = vunpack.c.h.bf16 %v2082_v41  ;;  %v2085_v41 = vld [vmem:[%s2214_s26 + $0x30] sm:$0xff]  }
  0x1a   : > { %2130 = vmatprep.mubr.msk.bf16.mxu1 %vm437_vm0, %v414_v43  ;;  %2115 = vmatmul.mubr.msk.bf16.vlgmr.msra.gmra.mxu0 %vm437_vm0, %v407_v47  ;;  %v324_v55 = vmul.f32 %v2058_v49, %v2219_v1  ;;  %v325_v56 = vmul.f32 %v2059_v50, %v2219_v1  ;;  %v2062_v57 = vunpack.c.l.bf16 %v2090_v46  ;;  %v2063_v58 = vunpack.c.h.bf16 %v2090_v46 }
  0x1b   : > { %2131 = vmatmul.mubr.msk.bf16.vlgmr.msra.gmra.mxu1 %vm437_vm0, %v415_v48  ;;  %v346_v59 = vadd.f32 %v2228_v10, %v308_v51  ;;  %v347_v60 = vadd.f32 %v2228_v10, %v309_v52  ;;  %v310_v61 = vmul.f32 %v2030_v53, %v2219_v1  ;;  %v311_v62 = vmul.f32 %v2031_v54, %v2219_v1  ;;  %v2093_v54 = vld [vmem:[%s2214_s26 + $0x70] sm:$0xff]  }
  0x1c   : > { %v362_v63 = vadd.f32 %v2228_v10, %v324_v55  ;;  %v363_v0 = vadd.f32 %v2228_v10, %v325_v56  ;;  %v326_v2 = vmul.f32 %v2062_v57, %v2219_v1  ;;  %v327_v3 = vmul.f32 %v2063_v58, %v2219_v1 }
  0x1d   : > { %v378_v5 = vmax.f32 %v346_v59, 0.0  ;;  %v379_v6 = vmax.f32 %v347_v60, 0.0  ;;  %v348_v7 = vadd.f32 %v2228_v10, %v310_v61  ;;  %v349_v8 = vadd.f32 %v2228_v10, %v311_v62  ;;  %v2086_v59 = vld [vmem:[%s2214_s26 + $0x38] sm:$0xff]  }
  0x1e   : > { %v394_v9 = vmax.f32 %v362_v63, 0.0  ;;  %v395_v11 = vmax.f32 %v363_v0, 0.0  ;;  %v364_v12 = vadd.f32 %v2228_v10, %v326_v2  ;;  %v365_v13 = vadd.f32 %v2228_v10, %v327_v3  ;;  %v2094_v0 = vld [vmem:[%s2214_s26 + $0x78] sm:$0xff]  }
  0x1f   : > { %v408_v15 = vpack.c.bf16 %v379_v6, %v378_v5  ;;  %v380_v16 = vmax.f32 %v348_v7, 0.0  ;;  %v381_v17 = vmax.f32 %v349_v8, 0.0  ;;  %v2034_v18 = vunpack.c.l.bf16 %v2083_v4 }
  0x20   : > { %v416_v20 = vpack.c.bf16 %v395_v11, %v394_v9  ;;  %v396_v21 = vmax.f32 %v364_v12, 0.0  ;;  %v397_v22 = vmax.f32 %v365_v13, 0.0  ;;  %v2035_v23 = vunpack.c.h.bf16 %v2083_v4 }
  0x21   : > { %2118 = vmatprep.mubr.msk.bf16.mxu0 %vm437_vm0, %v408_v15  ;;  %v409_v25 = vpack.c.bf16 %v381_v17, %v380_v16  ;;  %v312_v26 = vmul.f32 %v2034_v18, %v2219_v1  ;;  %v2066_v27 = vunpack.c.l.bf16 %v2091_v14  ;;  %v2067_v28 = vunpack.c.h.bf16 %v2091_v14 }
  0x22   : > { %2134 = vmatprep.mubr.msk.bf16.mxu1 %vm437_vm0, %v416_v20  ;;  %v417_v29 = vpack.c.bf16 %v397_v22, %v396_v21  ;;  %v313_v30 = vmul.f32 %v2035_v23, %v2219_v1  ;;  %v2038_v31 = vunpack.c.l.bf16 %v2084_v19  ;;  %v2039_v32 = vunpack.c.h.bf16 %v2084_v19 }
  0x23   : > { %2119 = vmatmul.mubr.msk.bf16.gmra.mxu0 %vm437_vm0, %v409_v25  ;;  %v350_v33 = vadd.f32 %v2228_v10, %v312_v26  ;;  %v328_v34 = vmul.f32 %v2066_v27, %v2219_v1  ;;  %v329_v35 = vmul.f32 %v2067_v28, %v2219_v1  ;;  %v2070_v36 = vunpack.c.l.bf16 %v2092_v24 }
  0x24   : > { %2135 = vmatmul.mubr.msk.bf16.gmra.mxu1 %vm437_vm0, %v417_v29  ;;  %v351_v37 = vadd.f32 %v2228_v10, %v313_v30  ;;  %v314_v38 = vmul.f32 %v2038_v31, %v2219_v1  ;;  %v315_v39 = vmul.f32 %v2039_v32, %v2219_v1  ;;  %v2071_v40 = vunpack.c.h.bf16 %v2092_v24 }
  0x25   : > { %v382_v42 = vmax.f32 %v350_v33, 0.0  ;;  %v366_v43 = vadd.f32 %v2228_v10, %v328_v34  ;;  %v367_v44 = vadd.f32 %v2228_v10, %v329_v35  ;;  %v330_v45 = vmul.f32 %v2070_v36, %v2219_v1 }
  0x26   : > { %v383_v46 = vmax.f32 %v351_v37, 0.0  ;;  %v352_v47 = vadd.f32 %v2228_v10, %v314_v38  ;;  %v353_v48 = vadd.f32 %v2228_v10, %v315_v39  ;;  %v331_v49 = vmul.f32 %v2071_v40, %v2219_v1 }
  0x27   : > { %v398_v50 = vmax.f32 %v366_v43, 0.0  ;;  %v399_v51 = vmax.f32 %v367_v44, 0.0  ;;  %v368_v52 = vadd.f32 %v2228_v10, %v330_v45  ;;  %v2042_v53 = vunpack.c.l.bf16 %v2085_v41 }
  0x28   : > { %v410_v55 = vpack.c.bf16 %v383_v46, %v382_v42  ;;  %v384_v56 = vmax.f32 %v352_v47, 0.0  ;;  %v385_v57 = vmax.f32 %v353_v48, 0.0  ;;  %v369_v58 = vadd.f32 %v2228_v10, %v331_v49 }
  0x29   : > { %v418_v60 = vpack.c.bf16 %v399_v51, %v398_v50  ;;  %v400_v61 = vmax.f32 %v368_v52, 0.0  ;;  %v2043_v62 = vunpack.c.h.bf16 %v2085_v41  ;;  %v316_v63 = vmul.f32 %v2042_v53, %v2219_v1 }
  0x2a   : > { %2122 = vmatprep.mubr.msk.bf16.mxu0 %vm437_vm0, %v410_v55  ;;  %v411_v2 = vpack.c.bf16 %v385_v57, %v384_v56  ;;  %v401_v3 = vmax.f32 %v369_v58, 0.0  ;;  %v2074_v4 = vunpack.c.l.bf16 %v2093_v54  ;;  %v2075_v5 = vunpack.c.h.bf16 %v2093_v54 }
  0x2b   : > { %2138 = vmatprep.mubr.msk.bf16.mxu1 %vm437_vm0, %v418_v60  ;;  %v317_v6 = vmul.f32 %v2043_v62, %v2219_v1  ;;  %v354_v7 = vadd.f32 %v2228_v10, %v316_v63  ;;  %v2046_v8 = vunpack.c.l.bf16 %v2086_v59  ;;  %v2047_v9 = vunpack.c.h.bf16 %v2086_v59 }
  0x2c   : > { %2123 = vmatmul.mubr.msk.bf16.gmra.mxu0 %vm437_vm0, %v411_v2  ;;  %v419_v11 = vpack.c.bf16 %v401_v3, %v400_v61  ;;  %v332_v12 = vmul.f32 %v2074_v4, %v2219_v1  ;;  %v333_v13 = vmul.f32 %v2075_v5, %v2219_v1  ;;  %v2078_v14 = vunpack.c.l.bf16 %v2094_v0 }
  0x2d   : > { %v355_v15 = vadd.f32 %v2228_v10, %v317_v6  ;;  %v386_v16 = vmax.f32 %v354_v7, 0.0  ;;  %v318_v17 = vmul.f32 %v2046_v8, %v2219_v1  ;;  %v319_v18 = vmul.f32 %v2047_v9, %v2219_v1 }
  0x2e   : > { %2139 = vmatmul.mubr.msk.bf16.gmra.mxu1 %vm437_vm0, %v419_v11  ;;  %v370_v19 = vadd.f32 %v2228_v10, %v332_v12  ;;  %v371_v20 = vadd.f32 %v2228_v10, %v333_v13  ;;  %v2079_v21 = vunpack.c.h.bf16 %v2094_v0  ;;  %v334_v22 = vmul.f32 %v2078_v14, %v2219_v1 }
  0x2f   : > { %v387_v23 = vmax.f32 %v355_v15, 0.0  ;;  %v356_v24 = vadd.f32 %v2228_v10, %v318_v17  ;;  %v357_v25 = vadd.f32 %v2228_v10, %v319_v18  ;;  %v683_v40 = vlaneseq }
  0x30   : > { %v402_v26 = vmax.f32 %v370_v19, 0.0  ;;  %v403_v27 = vmax.f32 %v371_v20, 0.0  ;;  %v335_v28 = vmul.f32 %v2079_v21, %v2219_v1  ;;  %v372_v29 = vadd.f32 %v2228_v10, %v334_v22 }
  0x31   : > { %v412_v30 = vpack.c.bf16 %v387_v23, %v386_v16  ;;  %v388_v31 = vmax.f32 %v356_v24, 0.0  ;;  %v389_v32 = vmax.f32 %v357_v25, 0.0  ;;  %v2166_v1 = vmov 1983009808  }
  0x32   : > { %v420_v33 = vpack.c.bf16 %v403_v27, %v402_v26  ;;  %v373_v34 = vadd.f32 %v2228_v10, %v335_v28  ;;  %v404_v35 = vmax.f32 %v372_v29, 0.0  ;;  %v681_v39 = vunpack.c.l.s4 %v2166_v1  ;;  %v2325_v10 = vld [vmem:[%s2486_s4] ss:$0 sm:$0xff] }
  0x33   : > { %2126 = vmatprep.mubr.msk.bf16.mxu0 %vm437_vm0, %v412_v30  ;;  %v413_v36 = vpack.c.bf16 %v389_v32, %v388_v31  ;;  %v684_v42 = vshrl.u32 %v683_v40, 7 }
  0x34   : > { %2142 = vmatprep.mubr.msk.bf16.mxu1 %vm437_vm0, %v420_v33  ;;  %v405_v37 = vmax.f32 %v373_v34, 0.0  ;;  %v682_v41 = vunpack.c.0.s8 %v681_v39 }
  0x35   : > { %2127 = vmatmul.mubr.msk.bf16.gmra.mxu0 %vm437_vm0, %v413_v36 }
  0x36   : > { %v421_v38 = vpack.c.bf16 %v405_v37, %v404_v35  ;;  %v2327_v46 = vsub.s32 %v682_v41, %v684_v42 }
  0x38   : > { %2143 = vmatmul.mubr.msk.bf16.gmra.mxu1 %vm437_vm0, %v421_v38 }
  0xda   : > { %v2116_v43 = vpop.f32.mrf.mxu0 }
  0xdb   : > { %v2132_v44 = vpop.f32.mrf.mxu1  ;;  %v529_v48 = vadd.f32 %v2116_v43, %v2325_v10 }
  0xdc   : > { %v520_v45 = vpop.f32.mrf.mxu0  ;;  %v593_v49 = vadd.f32 %v2132_v44, %v2325_v10 }
  0xdd   : > { %v584_v47 = vpop.f32.mrf.mxu1  ;;  %v521_v50 = vadd.f32 %v2325_v10, %v520_v45 }
  0xde   : > { %v585_v51 = vadd.f32 %v2325_v10, %v584_v47  ;;  %v2117_v52 = vpop.f32.mrf.mxu0 }
  0xdf   : > { %v2133_v53 = vpop.f32.mrf.mxu1  ;;  %v647_v54 = vmax.f32 %v521_v50, %v529_v48  ;;  %v532_v62 = vadd.f32 %v2117_v52, %v2325_v10 }
  0xe0   : > { %v655_v55 = vmax.f32 %v585_v51, %v593_v49  ;;  %v523_v56 = vpop.f32.mrf.mxu0  ;;  %v596_v63 = vadd.f32 %v2133_v53, %v2325_v10 }
  0xe1   : > { %v587_v57 = vpop.f32.mrf.mxu1  ;;  %v679_v58 = vcombine.high %v647_v54, %v647_v54  ;;  %v686_v59 = vrot.slane %v647_v54, %v2327_v46  ;;  %v524_v0 = vadd.f32 %v2325_v10, %v523_v56 }
  0xe2   : > { %v815_v60 = vcombine.high %v655_v55, %v655_v55  ;;  %v822_v61 = vrot.slane %v655_v55, %v2327_v46  ;;  %v588_v2 = vadd.f32 %v2325_v10, %v587_v57 }
  0xe3   : > { %v693_v3 = vrot.slane %v679_v58, %v2327_v46  ;;  %v694_v4 = vcombine.high %v686_v59, %v686_v59  ;;  %v1821_v5 = vrot.slane %v686_v59, 9  ;;  %v648_v9 = vmax.f32 %v524_v0, %v532_v62  ;;  %v2120_v0 = vpop.f32.mrf.mxu0 }
  0xe4   : > { %v829_v6 = vrot.slane %v815_v60, %v2327_v46  ;;  %v830_v7 = vcombine.high %v822_v61, %v822_v61  ;;  %v1853_v8 = vrot.slane %v822_v61, 9  ;;  %v2341_v11 = vmax.f32 %v588_v2, %v596_v63 }
  0xe5   : > { %v695_v12 = vcombine.high %v693_v3, %v693_v3  ;;  %v1822_v13 = vrot.slane %v694_v4, 9  ;;  %v1823_v14 = vrot.slane %v693_v3, 9  ;;  %v1207_v15 = vmax.f32 %v686_v59, %v1821_v5 }
  0xe6   : > { %v831_v16 = vcombine.high %v829_v6, %v829_v6  ;;  %v1854_v17 = vrot.slane %v830_v7, 9  ;;  %v1855_v18 = vrot.slane %v829_v6, 9  ;;  %v1239_v19 = vmax.f32 %v822_v61, %v1853_v8 }
  0xe7   : > { %v1824_v20 = vrot.slane %v695_v12, 9  ;;  %v1208_v21 = vmax.f32 %v694_v4, %v1822_v13  ;;  %v1209_v22 = vmax.f32 %v693_v3, %v1823_v14  ;;  %v1952_v23 = vpack.c.bf16 %v1207_v15, %v1207_v15 }
  0xe8   : > { %v1856_v24 = vrot.slane %v831_v16, 9  ;;  %v1240_v25 = vmax.f32 %v830_v7, %v1854_v17  ;;  %v1241_v26 = vmax.f32 %v829_v6, %v1855_v18  ;;  %v1984_v27 = vpack.c.bf16 %v1239_v19, %v1239_v19 }
  0xe9   : > { %v1210_v28 = vmax.f32 %v695_v12, %v1824_v20  ;;  %v1953_v29 = vpack.c.bf16 %v1208_v21, %v1208_v21  ;;  %v1954_v30 = vpack.c.bf16 %v1209_v22, %v1209_v22  ;;  %v1527_v31 = vunpack.c.l.b16 %v1952_v23  ;;  %v2136_v20 = vpop.f32.mrf.mxu1  ;;  %v536_v21 = vpop.f32.mrf.mxu0 }
  0xea   : > { %v1242_v32 = vmax.f32 %v831_v16, %v1856_v24  ;;  %v1985_v33 = vpack.c.bf16 %v1240_v25, %v1240_v25  ;;  %v1986_v34 = vpack.c.bf16 %v1241_v26, %v1241_v26  ;;  %v1559_v35 = vunpack.c.l.b16 %v1984_v27 }
  0xeb   : > { %v1955_v36 = vpack.c.bf16 %v1210_v28, %v1210_v28  ;;  %v1528_v37 = vunpack.c.l.b16 %v1953_v29  ;;  %v1529_v38 = vunpack.c.l.b16 %v1954_v30  ;;  %v696_v1 = vcombine.high %v648_v9, %v648_v9 }
  0xec   : > { %v1987_v39 = vpack.c.bf16 %v1242_v32, %v1242_v32  ;;  %v1560_v40 = vunpack.c.l.b16 %v1985_v33  ;;  %v1561_v41 = vunpack.c.l.b16 %v1986_v34  ;;  %v703_v42 = vrot.slane %v648_v9, %v2327_v46 }
  0xed   : > { %v1530_v43 = vunpack.c.l.b16 %v1955_v36  ;;  %v1591_v44 = vrot.slane %v1528_v37, 7  ;;  %v1594_v45 = vrot.slane %v1529_v38, 6  ;;  %v710_v47 = vrot.slane %v696_v1, %v2327_v46  ;;  %v600_v37 = vpop.f32.mrf.mxu1  ;;  %v2121_v38 = vpop.f32.mrf.mxu0 }
  0xee   : > { %v1562_v48 = vunpack.c.l.b16 %v1987_v39  ;;  %v1654_v49 = vrot.slane %v1560_v40, 7  ;;  %v1656_v50 = vrot.slane %v1561_v41, 6  ;;  %v711_v51 = vcombine.high %v703_v42, %v703_v42 }
  0xef   : > { %v1593_v52 = vsel %vm1592_vm1, %v1591_v44, %v1527_v31  ;;  %v1597_v53 = vrot.slane %v1530_v43, 5  ;;  %v712_v54 = vcombine.high %v710_v47, %v710_v47  ;;  %v1825_v55 = vrot.slane %v703_v42, 9 }
  0xf0   : > { %v1596_v56 = vsel %vm1595_vm2, %v1594_v45, %v1593_v52  ;;  %v1655_v57 = vsel %vm1592_vm1, %v1654_v49, %v1559_v35  ;;  %v1658_v58 = vrot.slane %v1562_v48, 5  ;;  %v1826_v59 = vrot.slane %v711_v51, 9 }
  0xf1   : > { %v1657_v60 = vsel %vm1595_vm2, %v1656_v50, %v1655_v57  ;;  %v1827_v61 = vrot.slane %v710_v47, 9  ;;  %v1828_v62 = vrot.slane %v712_v54, 9  ;;  %v1211_v63 = vmax.f32 %v703_v42, %v1825_v55  ;;  %v2137_v55 = vpop.f32.mrf.mxu1 }
  0xf2   : > { %v1212_v2 = vmax.f32 %v711_v51, %v1826_v59  ;;  %v1599_v3 = vsel %vm1598_vm3, %v1597_v53, %v1596_v56  ;;  %v832_v4 = vcombine.high %v2341_v11, %v2341_v11  ;;  %v839_v5 = vrot.slane %v2341_v11, %v2327_v46  ;;  %v539_v56 = vpop.f32.mrf.mxu0 }
  0xf3   : > { %v1213_v6 = vmax.f32 %v710_v47, %v1827_v61  ;;  %v1214_v7 = vmax.f32 %v712_v54, %v1828_v62  ;;  %v1956_v8 = vpack.c.bf16 %v1211_v63, %v1211_v63  ;;  %v1659_v9 = vsel %vm1598_vm3, %v1658_v58, %v1657_v60 }
  0xf4   : > { %v1957_v12 = vpack.c.bf16 %v1212_v2, %v1212_v2  ;;  %v846_v13 = vrot.slane %v832_v4, %v2327_v46  ;;  %v847_v14 = vcombine.high %v839_v5, %v839_v5  ;;  %v1857_v15 = vrot.slane %v839_v5, 9 }
  0xf5   : > { %v1958_v16 = vpack.c.bf16 %v1213_v6, %v1213_v6  ;;  %v1959_v17 = vpack.c.bf16 %v1214_v7, %v1214_v7  ;;  %v1531_v18 = vunpack.c.l.b16 %v1956_v8  ;;  %v545_v19 = vadd.f32 %v2120_v0, %v2325_v10 }
  0xf6   : > { %v1532_v11 = vunpack.c.l.b16 %v1957_v12  ;;  %v848_v22 = vcombine.high %v846_v13, %v846_v13  ;;  %v1858_v23 = vrot.slane %v847_v14, 9  ;;  %v1859_v24 = vrot.slane %v846_v13, 9 }
  0xf7   : > { %v1533_v25 = vunpack.c.l.b16 %v1958_v16  ;;  %v1534_v26 = vunpack.c.l.b16 %v1959_v17  ;;  %v1600_v27 = vrot.slane %v1531_v18, 4  ;;  %v1243_v28 = vmax.f32 %v839_v5, %v1857_v15 }
  0xf8   : > { %v1603_v29 = vrot.slane %v1532_v11, 3  ;;  %v1860_v30 = vrot.slane %v848_v22, 9  ;;  %v1244_v31 = vmax.f32 %v847_v14, %v1858_v23  ;;  %v1245_v32 = vmax.f32 %v846_v13, %v1859_v24 }
  0xf9   : > { %v1602_v33 = vsel %vm1601_vm4, %v1600_v27, %v1599_v3  ;;  %v1606_v34 = vrot.slane %v1533_v25, 2  ;;  %v1609_v35 = vrot.slane %v1534_v26, 1  ;;  %v1988_v36 = vpack.c.bf16 %v1243_v28, %v1243_v28 }
  0xfa   : > { %v1605_v1 = vsel %vm1604_vm5, %v1603_v29, %v1602_v33  ;;  %v1246_v39 = vmax.f32 %v848_v22, %v1860_v30  ;;  %v1989_v40 = vpack.c.bf16 %v1244_v31, %v1244_v31  ;;  %v1990_v41 = vpack.c.bf16 %v1245_v32, %v1245_v32 }
  0xfb   : > { %v1608_v42 = vsel %vm1607_vm6, %v1606_v34, %v1605_v1  ;;  %v1563_v43 = vunpack.c.l.b16 %v1988_v36  ;;  %v609_v44 = vadd.f32 %v2136_v20, %v2325_v10  ;;  %v537_v45 = vadd.f32 %v2325_v10, %v536_v21 }
  0xfc   : > { %v1611_v47 = vsel %vm1610_vm7, %v1609_v35, %v1608_v42  ;;  %v1991_v48 = vpack.c.bf16 %v1246_v39, %v1246_v39  ;;  %v1564_v49 = vunpack.c.l.b16 %v1989_v40  ;;  %v1565_v50 = vunpack.c.l.b16 %v1990_v41 }
  0xfd   : > { %v1710_v51 = vpack.c.b16 %v1611_v47, %v1611_v47  ;;  %v1660_v52 = vrot.slane %v1563_v43, 4  ;;  %v649_v53 = vmax.f32 %v537_v45, %v545_v19  ;;  %v601_v54 = vadd.f32 %v2325_v10, %v600_v37  ;;  %v603_v47 = vpop.f32.mrf.mxu1 }
  0xfe   : > { %v1566_v57 = vunpack.c.l.b16 %v1991_v48  ;;  %v1662_v58 = vrot.slane %v1564_v49, 3  ;;  %v1664_v59 = vrot.slane %v1565_v50, 2  ;;  %v548_v60 = vadd.f32 %v2121_v38, %v2325_v10 }
  0xff   : > { %1727 = vst.msk [vmem:[%s2366_s11] sm:$0xf] %vm1726_vm8, %v1710_v51  ;;  %v1661_v61 = vsel %vm1601_vm4, %v1660_v52, %v1659_v9  ;;  %v713_v62 = vcombine.high %v649_v53, %v649_v53  ;;  %v720_v63 = vrot.slane %v649_v53, %v2327_v46  ;;  %v657_v0 = vmax.f32 %v601_v54, %v609_v44 }
 0x100   : > { %v1663_v2 = vsel %vm1604_vm5, %v1662_v58, %v1661_v61  ;;  %v1666_v3 = vrot.slane %v1566_v57, 1  ;;  %v2377_v4 = vadd.f32 %v2137_v55, %v2325_v10  ;;  %v540_v5 = vadd.f32 %v2325_v10, %v539_v56 }
 0x101   : > { %v1665_v6 = vsel %vm1607_vm6, %v1664_v59, %v1663_v2  ;;  %v727_v7 = vrot.slane %v713_v62, %v2327_v46  ;;  %v728_v8 = vcombine.high %v720_v63, %v720_v63  ;;  %v1829_v12 = vrot.slane %v720_v63, 9  ;;  %v2140_v2 = vpop.f32.mrf.mxu1 }
 0x102   : > { %v1667_v9 = vsel %vm1610_vm7, %v1666_v3, %v1665_v6  ;;  %v849_v13 = vcombine.high %v657_v0, %v657_v0  ;;  %v856_v14 = vrot.slane %v657_v0, %v2327_v46  ;;  %v650_v15 = vmax.f32 %v540_v5, %v548_v60  ;;  %v2124_v60 = vpop.f32.mrf.mxu0 }
 0x103   : > { %v1714_v16 = vpack.c.b16 %v1667_v9, %v1667_v9  ;;  %v729_v17 = vcombine.high %v727_v7, %v727_v7  ;;  %v1830_v18 = vrot.slane %v728_v8, 9  ;;  %v1831_v19 = vrot.slane %v727_v7, 9 }
 0x104   : > { %v1215_v20 = vmax.f32 %v720_v63, %v1829_v12  ;;  %v863_v21 = vrot.slane %v849_v13, %v2327_v46  ;;  %v864_v11 = vcombine.high %v856_v14, %v856_v14  ;;  %v1861_v22 = vrot.slane %v856_v14, 9 }
 0x105   : > { %1731 = vst.msk [vmem:[%s2366_s11 + $0x10] sm:$0xf] %vm1726_vm8, %v1714_v16  ;;  %v1832_v23 = vrot.slane %v729_v17, 9  ;;  %v1216_v24 = vmax.f32 %v728_v8, %v1830_v18  ;;  %v1217_v25 = vmax.f32 %v727_v7, %v1831_v19  ;;  %v730_v26 = vcombine.high %v650_v15, %v650_v15  ;;  %v552_v18 = vpop.f32.mrf.mxu0 }
 0x106   : > { %v1960_v27 = vpack.c.bf16 %v1215_v20, %v1215_v20  ;;  %v865_v28 = vcombine.high %v863_v21, %v863_v21  ;;  %v1862_v29 = vrot.slane %v864_v11, 9  ;;  %v1863_v30 = vrot.slane %v863_v21, 9 }
 0x107   : > { %v1218_v31 = vmax.f32 %v729_v17, %v1832_v23  ;;  %v1961_v32 = vpack.c.bf16 %v1216_v24, %v1216_v24  ;;  %v1962_v33 = vpack.c.bf16 %v1217_v25, %v1217_v25  ;;  %v1247_v34 = vmax.f32 %v856_v14, %v1861_v22  ;;  %v616_v22 = vpop.f32.mrf.mxu1 }
 0x108   : > { %v1535_v35 = vunpack.c.l.b16 %v1960_v27  ;;  %v1864_v36 = vrot.slane %v865_v28, 9  ;;  %v1248_v37 = vmax.f32 %v864_v11, %v1862_v29  ;;  %v1249_v38 = vmax.f32 %v863_v21, %v1863_v30 }
 0x109   : > { %v1963_v1 = vpack.c.bf16 %v1218_v31, %v1218_v31  ;;  %v1536_v39 = vunpack.c.l.b16 %v1961_v32  ;;  %v1537_v40 = vunpack.c.l.b16 %v1962_v33  ;;  %v1992_v41 = vpack.c.bf16 %v1247_v34, %v1247_v34 }
 0x10a   : > { %v1250_v42 = vmax.f32 %v865_v28, %v1864_v36  ;;  %v1993_v43 = vpack.c.bf16 %v1248_v37, %v1248_v37  ;;  %v1994_v44 = vpack.c.bf16 %v1249_v38, %v1249_v38  ;;  %v737_v45 = vrot.slane %v650_v15, %v2327_v46 }
 0x10b   : > { %v1538_v48 = vunpack.c.l.b16 %v1963_v1  ;;  %v1612_v49 = vrot.slane %v1536_v39, 7  ;;  %v1614_v50 = vrot.slane %v1537_v40, 6  ;;  %v1567_v51 = vunpack.c.l.b16 %v1992_v41 }
 0x10c   : > { %v1995_v52 = vpack.c.bf16 %v1250_v42, %v1250_v42  ;;  %v1568_v53 = vunpack.c.l.b16 %v1993_v43  ;;  %v1569_v54 = vunpack.c.l.b16 %v1994_v44  ;;  %v744_v55 = vrot.slane %v730_v26, %v2327_v46 }
 0x10d   : > { %v1613_v56 = vsel %vm1592_vm1, %v1612_v49, %v1535_v35  ;;  %v1616_v57 = vrot.slane %v1538_v48, 5  ;;  %v745_v58 = vcombine.high %v737_v45, %v737_v45  ;;  %v1833_v59 = vrot.slane %v737_v45, 9 }
 0x10e   : > { %v1615_v61 = vsel %vm1595_vm2, %v1614_v50, %v1613_v56  ;;  %v1570_v62 = vunpack.c.l.b16 %v1995_v52  ;;  %v1668_v63 = vrot.slane %v1568_v53, 7  ;;  %v1670_v0 = vrot.slane %v1569_v54, 6 }
 0x10f   : > { %v746_v3 = vcombine.high %v744_v55, %v744_v55  ;;  %v1834_v5 = vrot.slane %v745_v58, 9  ;;  %v1835_v6 = vrot.slane %v744_v55, 9  ;;  %v1219_v7 = vmax.f32 %v737_v45, %v1833_v59 }
 0x110   : > { %v1669_v8 = vsel %vm1592_vm1, %v1668_v63, %v1567_v51  ;;  %v1672_v12 = vrot.slane %v1570_v62, 5  ;;  %v1617_v9 = vsel %vm1598_vm3, %v1616_v57, %v1615_v61  ;;  %v604_v13 = vadd.f32 %v2325_v10, %v603_v47 }
 0x111   : > { %v1671_v14 = vsel %vm1595_vm2, %v1670_v0, %v1669_v8  ;;  %v1836_v15 = vrot.slane %v746_v3, 9  ;;  %v1220_v16 = vmax.f32 %v745_v58, %v1834_v5  ;;  %v1221_v17 = vmax.f32 %v744_v55, %v1835_v6 }
 0x112   : > { %v1964_v19 = vpack.c.bf16 %v1219_v7, %v1219_v7  ;;  %v658_v20 = vmax.f32 %v604_v13, %v2377_v4  ;;  %v1673_v21 = vsel %vm1598_vm3, %v1672_v12, %v1671_v14  ;;  %v561_v11 = vadd.f32 %v2124_v60, %v2325_v10 }
 0x113   : > { %v1222_v23 = vmax.f32 %v746_v3, %v1836_v15  ;;  %v1965_v24 = vpack.c.bf16 %v1220_v16, %v1220_v16  ;;  %v1966_v25 = vpack.c.bf16 %v1221_v17, %v1221_v17  ;;  %v625_v26 = vadd.f32 %v2140_v2, %v2325_v10 }
 0x114   : > { %v1539_v27 = vunpack.c.l.b16 %v1964_v19  ;;  %v866_v28 = vcombine.high %v658_v20, %v658_v20  ;;  %v873_v29 = vrot.slane %v658_v20, %v2327_v46  ;;  %v553_v30 = vadd.f32 %v2325_v10, %v552_v18  ;;  %v2125_v18 = vpop.f32.mrf.mxu0 }
 0x115   : > { %v1967_v31 = vpack.c.bf16 %v1222_v23, %v1222_v23  ;;  %v1540_v32 = vunpack.c.l.b16 %v1965_v24  ;;  %v1541_v33 = vunpack.c.l.b16 %v1966_v25  ;;  %v617_v4 = vadd.f32 %v2325_v10, %v616_v22 }
 0x116   : > { %v1618_v34 = vrot.slane %v1539_v27, 4  ;;  %v880_v35 = vrot.slane %v866_v28, %v2327_v46  ;;  %v881_v36 = vcombine.high %v873_v29, %v873_v29  ;;  %v1865_v37 = vrot.slane %v873_v29, 9  ;;  %v2141_v28 = vpop.f32.mrf.mxu1 }
 0x117   : > { %v1542_v38 = vunpack.c.l.b16 %v1967_v31  ;;  %v1620_v1 = vrot.slane %v1540_v32, 3  ;;  %v1622_v39 = vrot.slane %v1541_v33, 2  ;;  %v651_v40 = vmax.f32 %v553_v30, %v561_v11 }
 0x118   : > { %v1619_v41 = vsel %vm1601_vm4, %v1618_v34, %v1617_v9  ;;  %v882_v42 = vcombine.high %v880_v35, %v880_v35  ;;  %v1866_v43 = vrot.slane %v881_v36, 9  ;;  %v1867_v44 = vrot.slane %v880_v35, 9 }
 0x119   : > { %v1621_v45 = vsel %vm1604_vm5, %v1620_v1, %v1619_v41  ;;  %v1624_v47 = vrot.slane %v1542_v38, 1  ;;  %v1251_v48 = vmax.f32 %v873_v29, %v1865_v37  ;;  %v747_v49 = vcombine.high %v651_v40, %v651_v40  ;;  %v619_v41 = vpop.f32.mrf.mxu1 }
 0x11a   : > { %v1623_v50 = vsel %vm1607_vm6, %v1622_v39, %v1621_v45  ;;  %v1868_v51 = vrot.slane %v882_v42, 9  ;;  %v1252_v52 = vmax.f32 %v881_v36, %v1866_v43  ;;  %v1253_v53 = vmax.f32 %v880_v35, %v1867_v44  ;;  %v555_v35 = vpop.f32.mrf.mxu0 }
 0x11b   : > { %v1625_v54 = vsel %vm1610_vm7, %v1624_v47, %v1623_v50  ;;  %v1996_v55 = vpack.c.bf16 %v1251_v48, %v1251_v48  ;;  %v754_v56 = vrot.slane %v651_v40, %v2327_v46  ;;  %v761_v57 = vrot.slane %v747_v49, %v2327_v46 }
 0x11c   : > { %v1711_v58 = vpack.c.b16 %v1625_v54, %v1625_v54  ;;  %v1254_v59 = vmax.f32 %v882_v42, %v1868_v51  ;;  %v1997_v60 = vpack.c.bf16 %v1252_v52, %v1252_v52  ;;  %v1998_v61 = vpack.c.bf16 %v1253_v53, %v1253_v53 }
 0x11d   : > { %v1571_v62 = vunpack.c.l.b16 %v1996_v55  ;;  %v762_v63 = vcombine.high %v754_v56, %v754_v56  ;;  %v763_v0 = vcombine.high %v761_v57, %v761_v57  ;;  %v1837_v2 = vrot.slane %v754_v56, 9 }
 0x11e   : > { %1728 = vst.msk [vmem:[%s2366_s11 + $0x4] sm:$0xf] %vm1726_vm8, %v1711_v58  ;;  %v1999_v3 = vpack.c.bf16 %v1254_v59, %v1254_v59  ;;  %v1572_v5 = vunpack.c.l.b16 %v1997_v60  ;;  %v1573_v6 = vunpack.c.l.b16 %v1998_v61  ;;  %v1839_v7 = vrot.slane %v761_v57, 9 }
 0x11f   : > { %v1674_v8 = vrot.slane %v1571_v62, 4  ;;  %v1838_v12 = vrot.slane %v762_v63, 9  ;;  %v1840_v9 = vrot.slane %v763_v0, 9  ;;  %v1223_v13 = vmax.f32 %v754_v56, %v1837_v2 }
 0x120   : > { %v1574_v14 = vunpack.c.l.b16 %v1999_v3  ;;  %v1676_v15 = vrot.slane %v1572_v5, 3  ;;  %v1678_v16 = vrot.slane %v1573_v6, 2  ;;  %v1225_v17 = vmax.f32 %v761_v57, %v1839_v7 }
 0x121   : > { %v1675_v19 = vsel %vm1601_vm4, %v1674_v8, %v1673_v21  ;;  %v1224_v20 = vmax.f32 %v762_v63, %v1838_v12  ;;  %v1226_v11 = vmax.f32 %v763_v0, %v1840_v9  ;;  %v1968_v22 = vpack.c.bf16 %v1223_v13, %v1223_v13 }
 0x122   : > { %v1677_v23 = vsel %vm1604_vm5, %v1676_v15, %v1675_v19  ;;  %v1680_v24 = vrot.slane %v1574_v14, 1  ;;  %v1970_v25 = vpack.c.bf16 %v1225_v17, %v1225_v17  ;;  %v659_v27 = vmax.f32 %v617_v4, %v625_v26  ;;  %v2128_v19 = vpop.f32.mrf.mxu0 }
 0x123   : > { %v1679_v29 = vsel %vm1607_vm6, %v1678_v16, %v1677_v23  ;;  %v1969_v30 = vpack.c.bf16 %v1224_v20, %v1224_v20  ;;  %v1971_v31 = vpack.c.bf16 %v1226_v11, %v1226_v11  ;;  %v1543_v37 = vunpack.c.l.b16 %v1968_v22 }
 0x124   : > { %v1681_v32 = vsel %vm1610_vm7, %v1680_v24, %v1679_v29  ;;  %v1545_v33 = vunpack.c.l.b16 %v1970_v25  ;;  %v883_v34 = vcombine.high %v659_v27, %v659_v27  ;;  %v890_v21 = vrot.slane %v659_v27, %v2327_v46 }
 0x125   : > { %v1715_v36 = vpack.c.b16 %v1681_v32, %v1681_v32  ;;  %v1544_v38 = vunpack.c.l.b16 %v1969_v30  ;;  %v1546_v1 = vunpack.c.l.b16 %v1971_v31  ;;  %v564_v44 = vadd.f32 %v2125_v18, %v2325_v10 }
 0x126   : > { %v1628_v39 = vrot.slane %v1545_v33, 6  ;;  %v897_v26 = vrot.slane %v883_v34, %v2327_v46  ;;  %v898_v4 = vcombine.high %v890_v21, %v890_v21  ;;  %v1869_v40 = vrot.slane %v890_v21, 9 }
 0x127   : > { %1732 = vst.msk [vmem:[%s2366_s11 + $0x14] sm:$0xf] %vm1726_vm8, %v1715_v36  ;;  %v1626_v42 = vrot.slane %v1544_v38, 7  ;;  %v1630_v43 = vrot.slane %v1546_v1, 5  ;;  %v556_v45 = vadd.f32 %v2325_v10, %v555_v35  ;;  %v628_v52 = vadd.f32 %v2141_v28, %v2325_v10  ;;  %v568_v36 = vpop.f32.mrf.mxu0 }
 0x128   : > { %v899_v47 = vcombine.high %v897_v26, %v897_v26  ;;  %v1870_v48 = vrot.slane %v898_v4, 9  ;;  %v1871_v49 = vrot.slane %v897_v26, 9  ;;  %v1255_v50 = vmax.f32 %v890_v21, %v1869_v40 }
 0x129   : > { %v1627_v51 = vsel %vm1592_vm1, %v1626_v42, %v1543_v37  ;;  %v652_v53 = vmax.f32 %v556_v45, %v564_v44  ;;  %v620_v54 = vadd.f32 %v2325_v10, %v619_v41 }
 0x12a   : > { %v1629_v55 = vsel %vm1595_vm2, %v1628_v39, %v1627_v51  ;;  %v1872_v56 = vrot.slane %v899_v47, 9  ;;  %v1256_v57 = vmax.f32 %v898_v4, %v1870_v48  ;;  %v1257_v58 = vmax.f32 %v897_v26, %v1871_v49 }
 0x12b   : > { %v2000_v59 = vpack.c.bf16 %v1255_v50, %v1255_v50  ;;  %v764_v60 = vcombine.high %v652_v53, %v652_v53  ;;  %v771_v61 = vrot.slane %v652_v53, %v2327_v46  ;;  %v1631_v62 = vsel %vm1598_vm3, %v1630_v43, %v1629_v55 }
 0x12c   : > { %v1258_v63 = vmax.f32 %v899_v47, %v1872_v56  ;;  %v2001_v0 = vpack.c.bf16 %v1256_v57, %v1256_v57  ;;  %v2002_v2 = vpack.c.bf16 %v1257_v58, %v1257_v58  ;;  %v660_v3 = vmax.f32 %v620_v54, %v628_v52  ;;  %v2144_v47 = vpop.f32.mrf.mxu1  ;;  %v2129_v52 = vpop.f32.mrf.mxu0 }
 0x12d   : > { %v1575_v5 = vunpack.c.l.b16 %v2000_v59  ;;  %v778_v6 = vrot.slane %v764_v60, %v2327_v46  ;;  %v779_v7 = vcombine.high %v771_v61, %v771_v61  ;;  %v1841_v8 = vrot.slane %v771_v61, 9 }
 0x12e   : > { %v2003_v12 = vpack.c.bf16 %v1258_v63, %v1258_v63  ;;  %v1576_v9 = vunpack.c.l.b16 %v2001_v0  ;;  %v1577_v13 = vunpack.c.l.b16 %v2002_v2  ;;  %v900_v14 = vcombine.high %v660_v3, %v660_v3 }
 0x12f   : > { %v780_v15 = vcombine.high %v778_v6, %v778_v6  ;;  %v1842_v16 = vrot.slane %v779_v7, 9  ;;  %v1843_v17 = vrot.slane %v778_v6, 9  ;;  %v1227_v18 = vmax.f32 %v771_v61, %v1841_v8  ;;  %v571_v8 = vpop.f32.mrf.mxu0 }
 0x130   : > { %v1578_v20 = vunpack.c.l.b16 %v2003_v12  ;;  %v1682_v11 = vrot.slane %v1576_v9, 7  ;;  %v1684_v22 = vrot.slane %v1577_v13, 6  ;;  %v907_v23 = vrot.slane %v660_v3, %v2327_v46  ;;  %v632_v3 = vpop.f32.mrf.mxu1 }
 0x131   : > { %v1844_v24 = vrot.slane %v780_v15, 9  ;;  %v1228_v25 = vmax.f32 %v779_v7, %v1842_v16  ;;  %v1229_v27 = vmax.f32 %v778_v6, %v1843_v17  ;;  %v1972_v28 = vpack.c.bf16 %v1227_v18, %v1227_v18 }
 0x132   : > { %v1683_v29 = vsel %vm1592_vm1, %v1682_v11, %v1575_v5  ;;  %v1686_v30 = vrot.slane %v1578_v20, 5  ;;  %v914_v31 = vrot.slane %v900_v14, %v2327_v46  ;;  %v915_v32 = vcombine.high %v907_v23, %v907_v23 }
 0x133   : > { %v1685_v33 = vsel %vm1595_vm2, %v1684_v22, %v1683_v29  ;;  %v1230_v34 = vmax.f32 %v780_v15, %v1844_v24  ;;  %v1973_v21 = vpack.c.bf16 %v1228_v25, %v1228_v25  ;;  %v1974_v35 = vpack.c.bf16 %v1229_v27, %v1229_v27 }
 0x134   : > { %v1547_v37 = vunpack.c.l.b16 %v1972_v28  ;;  %v916_v38 = vcombine.high %v914_v31, %v914_v31  ;;  %v1873_v1 = vrot.slane %v907_v23, 9  ;;  %v1874_v39 = vrot.slane %v915_v32, 9 }
 0x135   : > { %v1975_v26 = vpack.c.bf16 %v1230_v34, %v1230_v34  ;;  %v1548_v4 = vunpack.c.l.b16 %v1973_v21  ;;  %v1549_v40 = vunpack.c.l.b16 %v1974_v35  ;;  %v1875_v41 = vrot.slane %v914_v31, 9  ;;  %v2145_v34 = vpop.f32.mrf.mxu1 }
 0x136   : > { %v1632_v42 = vrot.slane %v1547_v37, 4  ;;  %v1876_v43 = vrot.slane %v916_v38, 9  ;;  %v1259_v44 = vmax.f32 %v907_v23, %v1873_v1  ;;  %v1260_v45 = vmax.f32 %v915_v32, %v1874_v39 }
 0x137   : > { %v1550_v48 = vunpack.c.l.b16 %v1975_v26  ;;  %v1634_v49 = vrot.slane %v1548_v4, 3  ;;  %v1636_v50 = vrot.slane %v1549_v40, 2  ;;  %v1261_v51 = vmax.f32 %v914_v31, %v1875_v41 }
 0x138   : > { %v1633_v53 = vsel %vm1601_vm4, %v1632_v42, %v1631_v62  ;;  %v1262_v54 = vmax.f32 %v916_v38, %v1876_v43  ;;  %v2004_v55 = vpack.c.bf16 %v1259_v44, %v1259_v44  ;;  %v2005_v56 = vpack.c.bf16 %v1260_v45, %v1260_v45 }
 0x139   : > { %v1635_v57 = vsel %vm1604_vm5, %v1634_v49, %v1633_v53  ;;  %v1638_v58 = vrot.slane %v1550_v48, 1  ;;  %v2006_v59 = vpack.c.bf16 %v1261_v51, %v1261_v51  ;;  %v577_v60 = vadd.f32 %v2128_v19, %v2325_v10 }
 0x13a   : > { %v1637_v61 = vsel %vm1607_vm6, %v1636_v50, %v1635_v57  ;;  %v2007_v63 = vpack.c.bf16 %v1262_v54, %v1262_v54  ;;  %v1579_v0 = vunpack.c.l.b16 %v2004_v55  ;;  %v1580_v2 = vunpack.c.l.b16 %v2005_v56 }
 0x13b   : > { %v1639_v5 = vsel %vm1610_vm7, %v1638_v58, %v1637_v61  ;;  %v1581_v6 = vunpack.c.l.b16 %v2006_v59  ;;  %v1687_v62 = vsel %vm1598_vm3, %v1686_v30, %v1685_v33  ;;  %v569_v7 = vadd.f32 %v2325_v10, %v568_v36 }
 0x13c   : > { %v1712_v12 = vpack.c.b16 %v1639_v5, %v1639_v5  ;;  %v1582_v9 = vunpack.c.l.b16 %v2007_v63  ;;  %v1688_v13 = vrot.slane %v1579_v0, 4  ;;  %v1690_v14 = vrot.slane %v1580_v2, 3 }
 0x13d   : > { %v1692_v15 = vrot.slane %v1581_v6, 2  ;;  %v641_v16 = vadd.f32 %v2144_v47, %v2325_v10  ;;  %v653_v17 = vmax.f32 %v569_v7, %v577_v60  ;;  %v633_v18 = vadd.f32 %v2325_v10, %v632_v3  ;;  %v635_v47 = vpop.f32.mrf.mxu1 }
 0x13e   : > { %1729 = vst.msk [vmem:[%s2366_s11 + $0x8] sm:$0xf] %vm1726_vm8, %v1712_v12  ;;  %v1689_v19 = vsel %vm1601_vm4, %v1688_v13, %v1687_v62  ;;  %v1694_v20 = vrot.slane %v1582_v9, 1  ;;  %v580_v11 = vadd.f32 %v2129_v52, %v2325_v10  ;;  %v572_v22 = vadd.f32 %v2325_v10, %v571_v8 }
 0x13f   : > { %v1691_v23 = vsel %vm1604_vm5, %v1690_v14, %v1689_v19  ;;  %v781_v24 = vcombine.high %v653_v17, %v653_v17  ;;  %v788_v25 = vrot.slane %v653_v17, %v2327_v46  ;;  %v661_v27 = vmax.f32 %v633_v18, %v641_v16 }
 0x140   : > { %v1693_v28 = vsel %vm1607_vm6, %v1692_v15, %v1691_v23  ;;  %v654_v29 = vmax.f32 %v572_v22, %v580_v11  ;;  %v636_v59 = vadd.f32 %v2325_v10, %v635_v47  ;;  %v644_v22 = vadd.f32 %v2145_v34, %v2325_v10 }
 0x141   : > { %v1695_v30 = vsel %vm1610_vm7, %v1694_v20, %v1693_v28  ;;  %v795_v31 = vrot.slane %v781_v24, %v2327_v46  ;;  %v796_v32 = vcombine.high %v788_v25, %v788_v25  ;;  %v1845_v33 = vrot.slane %v788_v25, 9 }
 0x142   : > { %v1716_v21 = vpack.c.b16 %v1695_v30, %v1695_v30  ;;  %v917_v35 = vcombine.high %v661_v27, %v661_v27  ;;  %v924_v36 = vrot.slane %v661_v27, %v2327_v46  ;;  %v798_v41 = vcombine.high %v654_v29, %v654_v29 }
 0x143   : > { %v797_v37 = vcombine.high %v795_v31, %v795_v31  ;;  %v1846_v38 = vrot.slane %v796_v32, 9  ;;  %v1847_v1 = vrot.slane %v795_v31, 9  ;;  %v1231_v39 = vmax.f32 %v788_v25, %v1845_v33 }
 0x144   : > { %1733 = vst.msk [vmem:[%s2366_s11 + $0x18] sm:$0xf] %vm1726_vm8, %v1716_v21  ;;  %v931_v26 = vrot.slane %v917_v35, %v2327_v46  ;;  %v932_v4 = vcombine.high %v924_v36, %v924_v36  ;;  %v1877_v40 = vrot.slane %v924_v36, 9  ;;  %v805_v45 = vrot.slane %v654_v29, %v2327_v46 }
 0x145   : > { %v1848_v42 = vrot.slane %v797_v37, 9  ;;  %v1232_v43 = vmax.f32 %v796_v32, %v1846_v38  ;;  %v1233_v44 = vmax.f32 %v795_v31, %v1847_v1  ;;  %v1976_v48 = vpack.c.bf16 %v1231_v39, %v1231_v39 }
 0x146   : > { %v933_v49 = vcombine.high %v931_v26, %v931_v26  ;;  %v1878_v50 = vrot.slane %v932_v4, 9  ;;  %v1879_v51 = vrot.slane %v931_v26, 9  ;;  %v1263_v55 = vmax.f32 %v924_v36, %v1877_v40 }
 0x147   : > { %v1234_v52 = vmax.f32 %v797_v37, %v1848_v42  ;;  %v1977_v53 = vpack.c.bf16 %v1232_v43, %v1232_v43  ;;  %v1978_v54 = vpack.c.bf16 %v1233_v44, %v1233_v44  ;;  %v812_v0 = vrot.slane %v798_v41, %v2327_v46 }
 0x148   : > { %v1880_v56 = vrot.slane %v933_v49, 9  ;;  %v1264_v57 = vmax.f32 %v932_v4, %v1878_v50  ;;  %v1265_v58 = vmax.f32 %v931_v26, %v1879_v51  ;;  %v1551_v2 = vunpack.c.l.b16 %v1976_v48 }
 0x149   : > { %v1979_v60 = vpack.c.bf16 %v1234_v52, %v1234_v52  ;;  %v1552_v61 = vunpack.c.l.b16 %v1977_v53  ;;  %v1553_v63 = vunpack.c.l.b16 %v1978_v54  ;;  %v2008_v8 = vpack.c.bf16 %v1263_v55, %v1263_v55 }
 0x14a   : > { %v1266_v3 = vmax.f32 %v933_v49, %v1880_v56  ;;  %v2009_v5 = vpack.c.bf16 %v1264_v57, %v1264_v57  ;;  %v2010_v6 = vpack.c.bf16 %v1265_v58, %v1265_v58  ;;  %v813_v12 = vcombine.high %v805_v45, %v805_v45 }
 0x14b   : > { %v1554_v62 = vunpack.c.l.b16 %v1979_v60  ;;  %v1640_v7 = vrot.slane %v1552_v61, 7  ;;  %v1642_v9 = vrot.slane %v1553_v63, 6  ;;  %v814_v15 = vcombine.high %v812_v0, %v812_v0 }
 0x14c   : > { %v2011_v13 = vpack.c.bf16 %v1266_v3, %v1266_v3  ;;  %v1584_v14 = vunpack.c.l.b16 %v2009_v5  ;;  %v1585_v17 = vunpack.c.l.b16 %v2010_v6  ;;  %v1849_v18 = vrot.slane %v805_v45, 9 }
 0x14d   : > { %v1641_v16 = vsel %vm1592_vm1, %v1640_v7, %v1551_v2  ;;  %v1850_v19 = vrot.slane %v813_v12, 9  ;;  %v1644_v20 = vrot.slane %v1554_v62, 5  ;;  %v1851_v23 = vrot.slane %v812_v0, 9 }
 0x14e   : > { %v1696_v11 = vrot.slane %v1584_v14, 7  ;;  %v1852_v24 = vrot.slane %v814_v15, 9  ;;  %v1235_v25 = vmax.f32 %v805_v45, %v1849_v18  ;;  %v1643_v28 = vsel %vm1595_vm2, %v1642_v9, %v1641_v16 }
 0x14f   : > { %v1236_v27 = vmax.f32 %v813_v12, %v1850_v19  ;;  %v1583_v29 = vunpack.c.l.b16 %v2008_v8  ;;  %v1586_v30 = vunpack.c.l.b16 %v2011_v13  ;;  %v662_v31 = vmax.f32 %v636_v59, %v644_v22 }
 0x150   : > { %v1698_v32 = vrot.slane %v1585_v17, 6  ;;  %v1237_v33 = vmax.f32 %v812_v0, %v1851_v23  ;;  %v1238_v21 = vmax.f32 %v814_v15, %v1852_v24  ;;  %v1980_v35 = vpack.c.bf16 %v1235_v25, %v1235_v25 }
 0x151   : > { %v1697_v36 = vsel %vm1592_vm1, %v1696_v11, %v1583_v29  ;;  %v1981_v37 = vpack.c.bf16 %v1236_v27, %v1236_v27  ;;  %v934_v38 = vcombine.high %v662_v31, %v662_v31  ;;  %v941_v1 = vrot.slane %v662_v31, %v2327_v46 }
 0x152   : > { %v1982_v10 = vpack.c.bf16 %v1237_v33, %v1237_v33  ;;  %v1983_v34 = vpack.c.bf16 %v1238_v21, %v1238_v21  ;;  %v1555_v39 = vunpack.c.l.b16 %v1980_v35  ;;  %v1645_v26 = vsel %vm1598_vm3, %v1644_v20, %v1643_v28 }
 0x153   : > { %v1556_v4 = vunpack.c.l.b16 %v1981_v37  ;;  %v948_v40 = vrot.slane %v934_v38, %v2327_v46  ;;  %v949_v41 = vcombine.high %v941_v1, %v941_v1  ;;  %v1881_v42 = vrot.slane %v941_v1, 9 }
 0x154   : > { %v1700_v43 = vrot.slane %v1586_v30, 5  ;;  %v1557_v44 = vunpack.c.l.b16 %v1982_v10  ;;  %v1558_v45 = vunpack.c.l.b16 %v1983_v34  ;;  %v1646_v47 = vrot.slane %v1555_v39, 4 }
 0x155   : > { %v1648_v48 = vrot.slane %v1556_v4, 3  ;;  %v950_v49 = vcombine.high %v948_v40, %v948_v40  ;;  %v1882_v50 = vrot.slane %v949_v41, 9  ;;  %v1883_v51 = vrot.slane %v948_v40, 9 }
 0x156   : > { %v1647_v52 = vsel %vm1601_vm4, %v1646_v47, %v1645_v26  ;;  %v1650_v53 = vrot.slane %v1557_v44, 2  ;;  %v1652_v54 = vrot.slane %v1558_v45, 1  ;;  %v1267_v55 = vmax.f32 %v941_v1, %v1881_v42 }
 0x157   : > { %v1649_v56 = vsel %vm1604_vm5, %v1648_v48, %v1647_v52  ;;  %v1884_v57 = vrot.slane %v950_v49, 9  ;;  %v1268_v46 = vmax.f32 %v949_v41, %v1882_v50  ;;  %v1269_v58 = vmax.f32 %v948_v40, %v1883_v51 }
 0x158   : > { %v1699_v59 = vsel %vm1595_vm2, %v1698_v32, %v1697_v36  ;;  %v1651_v60 = vsel %vm1607_vm6, %v1650_v53, %v1649_v56  ;;  %v2012_v61 = vpack.c.bf16 %v1267_v55, %v1267_v55 }
 0x159   : > { %v1653_v63 = vsel %vm1610_vm7, %v1652_v54, %v1651_v60  ;;  %v1270_v0 = vmax.f32 %v950_v49, %v1884_v57  ;;  %v2013_v2 = vpack.c.bf16 %v1268_v46, %v1268_v46  ;;  %v2014_v3 = vpack.c.bf16 %v1269_v58, %v1269_v58 }
 0x15a   : > { %v1713_v5 = vpack.c.b16 %v1653_v63, %v1653_v63  ;;  %v1587_v6 = vunpack.c.l.b16 %v2012_v61  ;;  %v1701_v12 = vsel %vm1598_vm3, %v1700_v43, %v1699_v59 }
 0x15b   : > { %v2015_v62 = vpack.c.bf16 %v1270_v0, %v1270_v0  ;;  %v1588_v7 = vunpack.c.l.b16 %v2013_v2  ;;  %v1589_v8 = vunpack.c.l.b16 %v2014_v3 }
 0x15c   : > { %1730 = vst.msk [vmem:[%s2366_s11 + $0xc] sm:$0xf] %vm1726_vm8, %v1713_v5  ;;  %v1702_v9 = vrot.slane %v1587_v6, 4 }
 0x15d   : > { %v1590_v13 = vunpack.c.l.b16 %v2015_v62  ;;  %v1704_v14 = vrot.slane %v1588_v7, 3  ;;  %v1706_v15 = vrot.slane %v1589_v8, 2 }
 0x15e   : > { %v1703_v16 = vsel %vm1601_vm4, %v1702_v9, %v1701_v12 }
 0x15f   : > { %v1705_v17 = vsel %vm1604_vm5, %v1704_v14, %v1703_v16  ;;  %v1708_v18 = vrot.slane %v1590_v13, 1 }
 0x160   : > { %v1707_v19 = vsel %vm1607_vm6, %v1706_v15, %v1705_v17 }
 0x161   : > { %v1709_v20 = vsel %vm1610_vm7, %v1708_v18, %v1707_v19 }
 0x162   : > { %v1717_v11 = vpack.c.b16 %v1709_v20, %v1709_v20 }
 0x164   : > { %1734 = vst.msk [vmem:[%s2366_s11 + $0x1c] sm:$0xf] %vm1726_vm8, %v1717_v11 }
 0x165 PF: > { %s15_s18 = sadd.s32 1, %s2164_s18  }
 0x166   : > { %p12_p4 = scmp.ge.s32.totalorder %s15_s18, 4  }
 0x168   :  { %14 = sbr.rel (!%p12_p4) target bundleno = 1 (0x1), region = 70 }

// kernel: reverse.1
= control target key start
LH: loop header
LB: loop body
LE: loop exit
PB: predicated region body
PF: predicated region fallthrough
CT: control target
= control target key end

     0   :  { %s176_s0 = inlined_call_operand.vmem [shape: f32[7,2,8,24], index: 0, kind: input, shape index: {}]   ;;  %s177_s1 = inlined_call_operand.vmem [shape: f32[7,2,8,24], index: 1, kind: output, shape index: {}]  }
   0x1   :  { %v56_v0 = vld [vmem:[%s176_s0 + $0x60] sm:$0xff]  ;;  %v57_v1 = vld [vmem:[%s176_s0 + $0x50] sm:$0xff]  ;;  %v68_v7 = vld [vmem:[%s176_s0 + $0x68] sm:$0xff] }
   0x2   :  { %v59_v2 = vld [vmem:[%s176_s0 + $0x40] sm:$0xff]  ;;  %4 = vst [vmem:[%s177_s1] sm:$0xff] %v56_v0  ;;  %58 = vst [vmem:[%s177_s1 + $0x10] sm:$0xff] %v57_v1  ;;  %v61_v3 = vld [vmem:[%s176_s0 + $0x30] sm:$0xff] }
   0x3   :  { %60 = vst [vmem:[%s177_s1 + $0x20] sm:$0xff] %v59_v2  ;;  %v63_v4 = vld [vmem:[%s176_s0 + $0x20] sm:$0xff]  ;;  %v65_v5 = vld [vmem:[%s176_s0 + $0x10] sm:$0xff]  ;;  %62 = vst [vmem:[%s177_s1 + $0x30] sm:$0xff] %v61_v3 }
   0x4   :  { %64 = vst [vmem:[%s177_s1 + $0x40] sm:$0xff] %v63_v4  ;;  %66 = vst [vmem:[%s177_s1 + $0x50] sm:$0xff] %v65_v5  ;;  %v25_v6 = vld [vmem:[%s176_s0] sm:$0xff]  ;;  %v70_v8 = vld [vmem:[%s176_s0 + $0x58] sm:$0xff] }
   0x5   :  { %67 = vst [vmem:[%s177_s1 + $0x60] sm:$0xff] %v25_v6  ;;  %69 = vst [vmem:[%s177_s1 + $0x8] sm:$0xff] %v68_v7  ;;  %v72_v9 = vld [vmem:[%s176_s0 + $0x48] sm:$0xff]  ;;  %v74_v10 = vld [vmem:[%s176_s0 + $0x38] sm:$0xff] }
   0x6   :  { %71 = vst [vmem:[%s177_s1 + $0x18] sm:$0xff] %v70_v8  ;;  %v76_v11 = vld [vmem:[%s176_s0 + $0x28] sm:$0xff]  ;;  %73 = vst [vmem:[%s177_s1 + $0x28] sm:$0xff] %v72_v9  ;;  %v78_v12 = vld [vmem:[%s176_s0 + $0x18] sm:$0xff] }
   0x7   :  { %75 = vst [vmem:[%s177_s1 + $0x38] sm:$0xff] %v74_v10  ;;  %77 = vst [vmem:[%s177_s1 + $0x48] sm:$0xff] %v76_v11  ;;  %v80_v13 = vld [vmem:[%s176_s0 + $0x8] sm:$0xff] }
   0x8   :  { %79 = vst [vmem:[%s177_s1 + $0x58] sm:$0xff] %v78_v12  ;;  %81 = vst [vmem:[%s177_s1 + $0x68] sm:$0xff] %v80_v13 }

// kernel: custom-call
= control target key start
LH: loop header
LB: loop body
LE: loop exit
PB: predicated region body
PF: predicated region fallthrough
CT: control target
= control target key end

     0   :  { %s6_s0 = inlined_call_operand.vmem [shape: f32[7,2,8,24], index: 0, kind: output, shape index: {}]  }

// kernel: _lambda_.21
= control target key start
LH: loop header
LB: loop body
LE: loop exit
PB: predicated region body
PF: predicated region fallthrough
CT: control target
= control target key end

     0   :  { %s947_s30 = smov 0   ;;  %s1061_s0 = inlined_call_operand.vmem [shape: bf16[128,16], index: 0, kind: input, shape index: {}]   ;;  %s1062_s1 = inlined_call_operand.vmem [shape: bf16[128,4], index: 1, kind: input, shape index: {}]   ;;  %s1063_s2 = inlined_call_operand.vmem [shape: bf16[16,36], index: 2, kind: input, shape index: {}]   ;;  %s1064_s3 = inlined_call_operand.vmem [shape: bf16[4,36], index: 3, kind: input, shape index: {}]   ;;  %s1065_s4 = inlined_call_operand.vmem [shape: f32[1,16], index: 4, kind: input, shape index: {}]   ;;  %s1066_s5 = inlined_call_operand.vmem [shape: f32[1,4], index: 5, kind: input, shape index: {}]   ;;  %s1067_s6 = inlined_call_operand.vmem [shape: f32[1,16], index: 6, kind: input, shape index: {}]   ;;  %s1068_s7 = inlined_call_operand.vmem [shape: f32[1,4], index: 7, kind: input, shape index: {}]   ;;  %s1069_s8 = inlined_call_operand.vmem [shape: f32[1,36], index: 8, kind: input, shape index: {}]   ;;  %s1070_s9 = inlined_call_operand.vmem [shape: bf16[128,36], index: 9, kind: output, shape index: {}]  }
   0x1 LB: > { %s768_s10 = sadd.s32 4294967295, %s895_s30   ;;  %p772_p0 = scmp.ge.s32.totalorder %s895_s30, 1  ;;  %s895_s30 = sphi %s947_s30, %s19_s30  }
   0x2   : > { %p299_p1 = scmp.lt.s32.totalorder %s895_s30, 3 }
   0x4   : > { %p300_p2 = pnand %p772_p0, %p299_p1 }
   0x5   : > { %s773_s15 = sshll.u32 (!%p300_p2), %s768_s10, 3 }
   0x6   : > { %303 = sbr.rel (%p300_p2) target bundleno = 242 (0xf2), region = 56  ;;  %p341_p3 = scmp.lt.s32.totalorder (!%p300_p2), %s773_s15, 15 }
   0xb   : > { %v477_v0 = vld [vmem:[%s1064_s3] sm:$0x3]  ;;  %vm491_vm0 = vcmask 1041408   ;;  %s1072_s15 = smov (!%p341_p3, %s773_s15), 15  ;;  %vm478_vm1 = vcmask 31744   ;;  %vm566_vm2 = vcmask 130048  }
   0xc   : > { %v888_v1 = vld [vmem:[%s1063_s2] sm:$0xff]   ;;  %879 = vmatprep.subr.msk.bf16.mxu0 %vm491_vm0, %v477_v0  ;;  %v493_v2 = vsel %vm491_vm0, %v477_v0, 0  ;;  %s961_s16 = sshll.u32 %s1072_s15, 2  ;;  %vm691_vm3 = vcmask 289792  }
   0xd   : > { %869 = vmatprep.subr.bf16.mxu1 %v888_v1  ;;  %860 = vmatpush3.bf16.msra.mxu0 %v493_v2  ;;  %s967_s19 = scalar_lea.vmem %s1062_s1, %s961_s16  ;;  %v973_v4 = vld [vmem:[%s1066_s5] ss:$0 sm:$0xff]  ;;  %s979_s24 = scalar_lea.vmem %s1061_s0, %s961_s16 }
   0xe   : > { %870 = vmatpush3.bf16.msra.mxu1 %v888_v1  ;;  %v828_v3 = vld [vmem:[%s967_s19] sm:$0xff]   ;;  %v846_v5 = vld [vmem:[%s967_s19 + $0x8] sm:$0xff]   ;;  %v847_v35 = vld [vmem:[%s967_s19 + $0x10] sm:$0xff]   ;;  %s1040_s15 = scalar_lea.vmem %s1070_s9, %s961_s16 }
   0xf   : > { %v829_v6 = vunpack.c.l.bf16 %v828_v3  ;;  %v830_v7 = vunpack.c.h.bf16 %v828_v3  ;;  %v812_v8 = vld [vmem:[%s979_s24] sm:$0xff]   ;;  %v833_v10 = vunpack.c.l.bf16 %v846_v5  ;;  %v834_v11 = vunpack.c.h.bf16 %v846_v5  ;;  %v843_v12 = vld [vmem:[%s979_s24 + $0x8] sm:$0xff]   ;;  %v844_v40 = vld [vmem:[%s979_s24 + $0x10] sm:$0xff]  }
  0x10   : > { %v986_v9 = vld [vmem:[%s1065_s4] ss:$0 sm:$0xff]  ;;  %v813_v14 = vunpack.c.l.bf16 %v812_v8  ;;  %v814_v15 = vunpack.c.h.bf16 %v812_v8  ;;  %v817_v16 = vunpack.c.l.bf16 %v843_v12  ;;  %v818_v17 = vunpack.c.h.bf16 %v843_v12  ;;  %v848_v45 = vld [vmem:[%s967_s19 + $0x18] sm:$0xff]  }
  0x11   : > { %v992_v13 = vld [vmem:[%s1068_s7] ss:$0 sm:$0xff]  ;;  %v442_v18 = vmul.f32 %v829_v6, %v973_v4  ;;  %v443_v19 = vmul.f32 %v830_v7, %v973_v4  ;;  %v444_v21 = vmul.f32 %v833_v10, %v973_v4  ;;  %v445_v22 = vmul.f32 %v834_v11, %v973_v4  ;;  %v845_v50 = vld [vmem:[%s979_s24 + $0x18] sm:$0xff]  }
  0x12   : > { %v780_v20 = vld [vmem:[%s1067_s6] ss:$0 sm:$0xff]  ;;  %v382_v23 = vmul.f32 %v813_v14, %v986_v9  ;;  %v383_v24 = vmul.f32 %v814_v15, %v986_v9  ;;  %v384_v25 = vmul.f32 %v817_v16, %v986_v9  ;;  %v385_v26 = vmul.f32 %v818_v17, %v986_v9 }
  0x13   : > { %v457_v27 = vadd.f32 %v992_v13, %v442_v18  ;;  %v458_v28 = vadd.f32 %v992_v13, %v443_v19  ;;  %v459_v29 = vadd.f32 %v992_v13, %v444_v21  ;;  %v460_v30 = vadd.f32 %v992_v13, %v445_v22 }
  0x14   : > { %v397_v31 = vadd.f32 %v780_v20, %v382_v23  ;;  %v398_v32 = vadd.f32 %v780_v20, %v383_v24  ;;  %v399_v33 = vadd.f32 %v780_v20, %v384_v25  ;;  %v400_v34 = vadd.f32 %v780_v20, %v385_v26 }
  0x15   : > { %v465_v36 = vmax.f32 %v457_v27, 0.0  ;;  %v466_v37 = vmax.f32 %v458_v28, 0.0  ;;  %v467_v38 = vmax.f32 %v459_v29, 0.0  ;;  %v468_v39 = vmax.f32 %v460_v30, 0.0 }
  0x16   : > { %v405_v41 = vmax.f32 %v397_v31, 0.0  ;;  %v406_v42 = vmax.f32 %v398_v32, 0.0  ;;  %v407_v43 = vmax.f32 %v399_v33, 0.0  ;;  %v408_v44 = vmax.f32 %v400_v34, 0.0 }
  0x17   : > { %v473_v46 = vpack.c.bf16 %v466_v37, %v465_v36  ;;  %v474_v47 = vpack.c.bf16 %v468_v39, %v467_v38  ;;  %v837_v48 = vunpack.c.l.bf16 %v847_v35  ;;  %v838_v49 = vunpack.c.h.bf16 %v847_v35 }
  0x18   : > { %v413_v51 = vpack.c.bf16 %v406_v42, %v405_v41  ;;  %v414_v52 = vpack.c.bf16 %v408_v44, %v407_v43  ;;  %v821_v53 = vunpack.c.l.bf16 %v844_v40  ;;  %v822_v54 = vunpack.c.h.bf16 %v844_v40 }
  0x19   : > { %861 = vmatprep.mubr.msk.bf16.mxu0 %vm478_vm1, %v473_v46  ;;  %v446_v55 = vmul.f32 %v837_v48, %v973_v4  ;;  %v447_v56 = vmul.f32 %v838_v49, %v973_v4  ;;  %v841_v57 = vunpack.c.l.bf16 %v848_v45  ;;  %v842_v58 = vunpack.c.h.bf16 %v848_v45 }
  0x1a   : > { %871 = vmatprep.mubr.msk.bf16.mxu1 %vm566_vm2, %v413_v51  ;;  %862 = vmatmul.mubr.msk.bf16.vlgmr.msra.gmra.mxu0 %vm478_vm1, %v474_v47  ;;  %v386_v59 = vmul.f32 %v821_v53, %v986_v9  ;;  %v387_v60 = vmul.f32 %v822_v54, %v986_v9  ;;  %v825_v61 = vunpack.c.l.bf16 %v845_v50  ;;  %v826_v62 = vunpack.c.h.bf16 %v845_v50 }
  0x1b   : > { %872 = vmatmul.mubr.msk.bf16.vlgmr.msra.gmra.mxu1 %vm566_vm2, %v414_v52  ;;  %v461_v63 = vadd.f32 %v992_v13, %v446_v55  ;;  %v462_v0 = vadd.f32 %v992_v13, %v447_v56  ;;  %v448_v1 = vmul.f32 %v841_v57, %v973_v4  ;;  %v449_v2 = vmul.f32 %v842_v58, %v973_v4 }
  0x1c   : > { %v401_v3 = vadd.f32 %v780_v20, %v386_v59  ;;  %v402_v5 = vadd.f32 %v780_v20, %v387_v60  ;;  %v388_v6 = vmul.f32 %v825_v61, %v986_v9  ;;  %v389_v7 = vmul.f32 %v826_v62, %v986_v9 }
  0x1d   : > { %v469_v8 = vmax.f32 %v461_v63, 0.0  ;;  %v470_v10 = vmax.f32 %v462_v0, 0.0  ;;  %v463_v11 = vadd.f32 %v992_v13, %v448_v1  ;;  %v464_v12 = vadd.f32 %v992_v13, %v449_v2 }
  0x1e   : > { %v409_v14 = vmax.f32 %v401_v3, 0.0  ;;  %v410_v15 = vmax.f32 %v402_v5, 0.0  ;;  %v403_v16 = vadd.f32 %v780_v20, %v388_v6  ;;  %v404_v17 = vadd.f32 %v780_v20, %v389_v7  ;;  %v792_v20 = vld [vmem:[%s1069_s8] ss:$0 sm:$0xff] }
  0x1f   : > { %v475_v18 = vpack.c.bf16 %v470_v10, %v469_v8  ;;  %v471_v19 = vmax.f32 %v463_v11, 0.0  ;;  %v472_v21 = vmax.f32 %v464_v12, 0.0 }
  0x20   : > { %v415_v4 = vpack.c.bf16 %v410_v15, %v409_v14  ;;  %v411_v22 = vmax.f32 %v403_v16, 0.0  ;;  %v412_v23 = vmax.f32 %v404_v17, 0.0 }
  0x21   : > { %865 = vmatprep.mubr.msk.bf16.mxu0 %vm478_vm1, %v475_v18  ;;  %v476_v9 = vpack.c.bf16 %v472_v21, %v471_v19 }
  0x22   : > { %875 = vmatprep.mubr.msk.bf16.mxu1 %vm566_vm2, %v415_v4  ;;  %v416_v24 = vpack.c.bf16 %v412_v23, %v411_v22 }
  0x23   : > { %866 = vmatmul.mubr.msk.bf16.gmra.mxu0 %vm478_vm1, %v476_v9 }
  0x24   : > { %876 = vmatmul.mubr.msk.bf16.gmra.mxu1 %vm566_vm2, %v416_v24 }
  0xda   : > { %v863_v13 = vpop.f32.mrf.mxu0 }
  0xdb   : > { %v873_v25 = vpop.f32.mrf.mxu1 }
  0xdc   : > { %v622_v26 = vadd.f32 %v873_v25, %v863_v13  ;;  %v529_v27 = vpop.f32.mrf.mxu0 }
  0xdd   : > { %v613_v28 = vpop.f32.mrf.mxu1 }
  0xde   : > { %v653_v29 = vadd.f32 %v792_v20, %v622_v26  ;;  %v614_v30 = vadd.f32 %v613_v28, %v529_v27  ;;  %v864_v31 = vpop.f32.mrf.mxu0 }
  0xdf   : > { %v874_v32 = vpop.f32.mrf.mxu1 }
  0xe0   : > { %v805_v33 = vpack.c.bf16 %v653_v29, %v653_v29  ;;  %v651_v34 = vadd.f32 %v792_v20, %v614_v30  ;;  %v625_v35 = vadd.f32 %v874_v32, %v864_v31  ;;  %v532_v36 = vpop.f32.mrf.mxu0 }
  0xe1   : > { %v616_v37 = vpop.f32.mrf.mxu1 }
  0xe2   : > { %694 = vst.msk [vmem:[%s1040_s15 + $0x8] sm:$0xf] %vm691_vm3, %v805_v33  ;;  %v803_v38 = vpack.c.bf16 %v651_v34, %v651_v34  ;;  %v654_v39 = vadd.f32 %v792_v20, %v625_v35  ;;  %v617_v40 = vadd.f32 %v616_v37, %v532_v36 }
  0xe3   : > { %v867_v41 = vpop.f32.mrf.mxu0 }
  0xe4   : > { %692 = vst.msk [vmem:[%s1040_s15] sm:$0xf] %vm691_vm3, %v803_v38  ;;  %v806_v42 = vpack.c.bf16 %v654_v39, %v654_v39  ;;  %v652_v43 = vadd.f32 %v792_v20, %v617_v40  ;;  %v877_v44 = vpop.f32.mrf.mxu1 }
  0xe5   : > { %v638_v45 = vadd.f32 %v877_v44, %v867_v41  ;;  %v545_v46 = vpop.f32.mrf.mxu0 }
  0xe6   : > { %695 = vst.msk [vmem:[%s1040_s15 + $0xc] sm:$0xf] %vm691_vm3, %v806_v42  ;;  %v804_v47 = vpack.c.bf16 %v652_v43, %v652_v43  ;;  %v629_v48 = vpop.f32.mrf.mxu1 }
  0xe7   : > { %v657_v49 = vadd.f32 %v792_v20, %v638_v45  ;;  %v630_v50 = vadd.f32 %v629_v48, %v545_v46  ;;  %v868_v51 = vpop.f32.mrf.mxu0 }
  0xe8   : > { %693 = vst.msk [vmem:[%s1040_s15 + $0x4] sm:$0xf] %vm691_vm3, %v804_v47  ;;  %v878_v52 = vpop.f32.mrf.mxu1 }
  0xe9   : > { %v809_v53 = vpack.c.bf16 %v657_v49, %v657_v49  ;;  %v655_v54 = vadd.f32 %v792_v20, %v630_v50  ;;  %v641_v55 = vadd.f32 %v878_v52, %v868_v51  ;;  %v548_v56 = vpop.f32.mrf.mxu0 }
  0xea   : > { %v632_v57 = vpop.f32.mrf.mxu1 }
  0xeb   : > { %698 = vst.msk [vmem:[%s1040_s15 + $0x18] sm:$0xf] %vm691_vm3, %v809_v53  ;;  %v807_v58 = vpack.c.bf16 %v655_v54, %v655_v54  ;;  %v658_v59 = vadd.f32 %v792_v20, %v641_v55  ;;  %v633_v60 = vadd.f32 %v632_v57, %v548_v56 }
  0xed   : > { %696 = vst.msk [vmem:[%s1040_s15 + $0x10] sm:$0xf] %vm691_vm3, %v807_v58  ;;  %v810_v61 = vpack.c.bf16 %v658_v59, %v658_v59  ;;  %v656_v62 = vadd.f32 %v792_v20, %v633_v60 }
  0xef   : > { %699 = vst.msk [vmem:[%s1040_s15 + $0x1c] sm:$0xf] %vm691_vm3, %v810_v61  ;;  %v808_v63 = vpack.c.bf16 %v656_v62, %v656_v62 }
  0xf1   : > { %697 = vst.msk [vmem:[%s1040_s15 + $0x14] sm:$0xf] %vm691_vm3, %v808_v63 }
  0xf2 PF: > { %s19_s30 = sadd.s32 1, %s895_s30  }
  0xf3   : > { %p16_p4 = scmp.ge.s32.totalorder %s19_s30, 4  }
  0xf5   :  { %18 = sbr.rel (!%p16_p4) target bundleno = 1 (0x1), region = 89 }

// kernel: _lambda_.23
= control target key start
LH: loop header
LB: loop body
LE: loop exit
PB: predicated region body
PF: predicated region fallthrough
CT: control target
= control target key end

     0   :  { %s477_s18 = smov 0   ;;  %s509_s0 = inlined_call_operand.vmem [shape: bf16[32,24], index: 0, kind: input, shape index: {}]   ;;  %s510_s1 = inlined_call_operand.vmem [shape: bf16[24,36], index: 1, kind: input, shape index: {}]   ;;  %s511_s2 = inlined_call_operand.vmem [shape: f32[1,24], index: 2, kind: input, shape index: {}]   ;;  %s512_s3 = inlined_call_operand.vmem [shape: f32[1,24], index: 3, kind: input, shape index: {}]   ;;  %s513_s4 = inlined_call_operand.vmem [shape: f32[1,36], index: 4, kind: input, shape index: {}]   ;;  %s514_s5 = inlined_call_operand.vmem [shape: bf16[32,36], index: 5, kind: output, shape index: {}]  }
   0x1 LB: > { %s389_s19 = sadd.s32 4294967295, %s443_s18   ;;  %p393_p0 = scmp.ge.s32.totalorder %s443_s18, 1  ;;  %s443_s18 = sphi %s477_s18, %s15_s18  }
   0x2   : > { %p188_p1 = scmp.lt.s32.totalorder %s443_s18, 3 }
   0x4   : > { %p189_p2 = pnand %p393_p0, %p188_p1 }
   0x5   : > { %s394_s22 = sshll.u32 (!%p189_p2), %s389_s19, 1 }
   0x6   : > { %192 = sbr.rel (%p189_p2) target bundleno = 228 (0xe4), region = 40  ;;  %p217_p3 = scmp.lt.s32.totalorder (!%p189_p2), %s394_s22, 3 }
   0xb   : > { %v435_v0 = vld [vmem:[%s510_s1 + $0x8] ss:$0 sps:$4 sm:$0xff]   ;;  %vm277_vm0 = vcmask 1043456   ;;  %v445_v1 = vmov 0.0   ;;  %vm446_vm1 = vmmov 0   ;;  %v436_v3 = vld [vmem:[%s510_s1] sm:$0xff]  }
   0xc   : > { %417 = vmatprep.subr.bf16.mxu0 %v445_v1  ;;  %v279_v2 = vsel %vm277_vm0, %v435_v0, 0  ;;  %421 = vmatprep.mubr.msk.bf16.mxu0 %vm446_vm1, %v445_v1  ;;  %s516_s22 = smov (!%p217_p3, %s394_s22), 3  ;;  %v398_v5 = vld [vmem:[%s511_s2] ss:$0 sm:$0xff]  ;;  %vm273_vm2 = vcmask 195584   ;;  %vm330_vm3 = vcmask 289792  }
   0xd   : > { %418 = vmatpush3.bf16.msra.mxu0 %v279_v2  ;;  %s395_s25 = sshll.u32 %s516_s22, 2  ;;  %v399_v8 = vld [vmem:[%s512_s3] ss:$0 sm:$0xff] }
   0xe   : > { %419 = vmatprep.subr.bf16.mxu0 %v445_v1  ;;  %s220_s28 = scalar_lea.vmem %s509_s0, %s395_s25  ;;  %v400_v16 = vld [vmem:[%s513_s4] ss:$0 sm:$0xff]  ;;  %s226_s12 = scalar_lea.vmem %s514_s5, %s395_s25 }
   0xf   : > { %v411_v4 = vld [vmem:[%s220_s28] sm:$0xff]  }
  0x10   : > { %v412_v6 = vunpack.c.l.bf16 %v411_v4  ;;  %v413_v7 = vunpack.c.h.bf16 %v411_v4 }
  0x11   : > { %420 = vmatpush3.bf16.msra.mxu0 %v436_v3 }
  0x12   : > { %v240_v9 = vmul.f32 %v412_v6, %v398_v5  ;;  %v241_v10 = vmul.f32 %v413_v7, %v398_v5 }
  0x14   : > { %v249_v11 = vadd.f32 %v399_v8, %v240_v9  ;;  %v250_v12 = vadd.f32 %v399_v8, %v241_v10 }
  0x16   : > { %v251_v13 = vmax.f32 %v249_v11, 0.0  ;;  %v252_v14 = vmax.f32 %v250_v12, 0.0 }
  0x18   : > { %v253_v15 = vpack.c.bf16 %v252_v14, %v251_v13 }
  0x1a   : > { %422 = vmatmul.mubr.msk.bf16.vlgmr.msra.gmra.mxu0 %vm273_vm2, %v253_v15 }
  0xda   : > { %v315_v17 = vpop.f32.mrf.mxu0 }
  0xdb   : > { %v316_v18 = vadd.f32 %v400_v16, %v315_v17 }
  0xdc   : > { %v423_v19 = vpop.f32.mrf.mxu0 }
  0xdd   : > { %v408_v20 = vpack.c.bf16 %v316_v18, %v316_v18 }
  0xde   : > { %v318_v21 = vpop.f32.mrf.mxu0 }
  0xdf   : > { %331 = vst.msk [vmem:[%s226_s12] sm:$0xf] %vm330_vm3, %v408_v20  ;;  %v319_v22 = vadd.f32 %v400_v16, %v318_v21 }
  0xe0   : > { %v424_v23 = vpop.f32.mrf.mxu0 }
  0xe1   : > { %v409_v24 = vpack.c.bf16 %v319_v22, %v319_v22 }
  0xe3   : > { %332 = vst.msk [vmem:[%s226_s12 + $0x4] sm:$0xf] %vm330_vm3, %v409_v24 }
  0xe4 PF: > { %s15_s18 = sadd.s32 1, %s443_s18  }
  0xe5   : > { %p12_p4 = scmp.ge.s32.totalorder %s15_s18, 4  }
  0xe7   :  { %14 = sbr.rel (!%p12_p4) target bundleno = 1 (0x1), region = 70 }

// kernel: tile.10
= control target key start
LH: loop header
LB: loop body
LE: loop exit
PB: predicated region body
PF: predicated region fallthrough
CT: control target
= control target key end

     0   :  { %s22_s0 = inlined_call_operand.vmem [shape: f32[8], index: 0, kind: input, shape index: {}]   ;;  %s23_s1 = inlined_call_operand.vmem [shape: f32[4,8], index: 1, kind: output, shape index: {}]  }
   0x1   :  { %v4_v0 = vld [vmem:[%s22_s0] ss:$0 sm:$0xff] }
   0x2   :  { %5 = vst [vmem:[%s23_s1] sm:$0xf] %v4_v0 }

// kernel: tile.11
= control target key start
LH: loop header
LB: loop body
LE: loop exit
PB: predicated region body
PF: predicated region fallthrough
CT: control target
= control target key end

     0   :  { %vm8_vm0 = vcmask 64512   ;;  %s40_s8 = smov 8   ;;  %s41_s9 = smov 16   ;;  %vm14_vm1 = vcmask 261312   ;;  %vm20_vm2 = vcmask 195712   ;;  %vm26_vm3 = vcmask 130112   ;;  %s58_s0 = inlined_call_operand.vmem [shape: f32[4,8], index: 0, kind: input, shape index: {}]   ;;  %s59_s1 = inlined_call_operand.vmem [shape: f32[1,32], index: 1, kind: output, shape index: {}]  }
   0x1   :  { %v5_v0 = vld [vmem:[%s58_s0] sm:$0xf]  ;;  %s39_s0 = smov 24  }
   0x2   :  { %6 = vst [vmem:[#allocation1] sm:$0xf] %v5_v0 }
   0x9   :  { %v11_v1 = vld [vmem:[#allocation1 + $0x3] sm:$0x1]   ;;  %v23_v2 = vld [vmem:[#allocation1 + $0x1] sm:$0x1]   ;;  %v7_v3 = vld [vmem:[#allocation1] sm:$0x1]  }
   0xa   :  { %12 = vrot.lane.b32.xlu0 %v11_v1, %s39_s0  ;;  %24 = vrot.lane.b32.xlu1 %v23_v2, %s40_s8  ;;  %v17_v4 = vld [vmem:[#allocation1 + $0x2] sm:$0x1]   ;;  %9 = vst.msk [vmem:[#allocation0] sm:$0x1] %vm8_vm0, %v7_v3  }
   0xe   :  { %18 = vrot.lane.b32.xlu0 %v17_v4, %s41_s9 }
  0x7c   :  { %v13_v5 = vpop.permute.xlu0 %12   ;;  %v25_v6 = vpop.permute.xlu1 %24  }
  0x7d   :  { %15 = vst.msk [vmem:[#allocation0] sm:$0x1] %vm14_vm1, %v13_v5  }
  0x80   :  { %v19_v7 = vpop.permute.xlu0 %18  }
  0x81   :  { %21 = vst.msk [vmem:[#allocation0] sm:$0x1] %vm20_vm2, %v19_v7  }
  0x82   :  { %27 = vst.msk [vmem:[#allocation0] sm:$0x1] %vm26_vm3, %v25_v6  }
  0x89   :  { %v32_v8 = vld [vmem:[#allocation0] sm:$0x1] }
  0x8a   :  { %35 = vst [vmem:[%s59_s1] sm:$0x1] %v32_v8 }

// kernel: _lambda_.22
= control target key start
LH: loop header
LB: loop body
LE: loop exit
PB: predicated region body
PF: predicated region fallthrough
CT: control target
= control target key end

     0   :  { %vm167_vm0 = vcmask 1043456   ;;  %vm142_vm1 = vcmask 195584   ;;  %vm1125_vm2 = vcmask 1041409   ;;  %vm1128_vm3 = vcmask 1042434   ;;  %s1685_s3 = inlined_call_operand.vmem [shape: bf16[24,24], index: 3, kind: input, shape index: {}]   ;;  %s1686_s0 = inlined_call_operand.vmem [shape: bf16[8,2,8,24], index: 0, kind: input, shape index: {}]   ;;  %s1687_s1 = inlined_call_operand.vmem [shape: f32[1,24], index: 1, kind: input, shape index: {}]   ;;  %s1688_s2 = inlined_call_operand.vmem [shape: f32[1,24], index: 2, kind: input, shape index: {}]   ;;  %s1689_s4 = inlined_call_operand.vmem [shape: f32[1,24], index: 4, kind: input, shape index: {}]   ;;  %s1690_s5 = inlined_call_operand.vmem [shape: bf16[8,4,24], index: 5, kind: output, shape index: {}]  }
   0x1   :  { %v1381_v0 = vld [vmem:[%s1685_s3 + $0x8] ss:$0 sps:$4 sm:$0xff]   ;;  %v1382_v1 = vld [vmem:[%s1685_s3] sm:$0xff]   ;;  %v1338_v17 = vld [vmem:[%s1686_s0 + $0x10] sm:$0xff]   ;;  %vm1131_vm4 = vcmask 1043459   ;;  %vm1247_vm5 = vcmask 189440  }
   0x2   :  { %1378 = vmatprep.subr.msk.bf16.mxu0 %vm167_vm0, %v1381_v0  ;;  %1379 = vmatprep.subr.msk.bf16.mxu1 %vm167_vm0, %v1381_v0  ;;  %v169_v2 = vsel %vm167_vm0, %v1381_v0, 0  ;;  %v1423_v3 = vld [vmem:[%s1687_s1] ss:$0 sm:$0xff]  ;;  %v1337_v10 = vld [vmem:[%s1686_s0 + $0x8] sm:$0xff]   ;;  %v1315_v29 = vunpack.c.l.bf16 %v1338_v17  ;;  %v1342_v38 = vld [vmem:[%s1686_s0 + $0x30] sm:$0xff]   ;;  %v1316_v46 = vunpack.c.h.bf16 %v1338_v17 }
   0x3   :  { %v1306_v4 = vld [vmem:[%s1686_s0] sm:$0xff]   ;;  %1355 = vmatpush3.bf16.msra.mxu0 %v169_v2  ;;  %1376 = vmatpush3.bf16.msra.mxu1 %v169_v2  ;;  %v1341_v11 = vld [vmem:[%s1686_s0 + $0x28] sm:$0xff]   ;;  %v1311_v13 = vunpack.c.l.bf16 %v1337_v10  ;;  %v1312_v14 = vunpack.c.h.bf16 %v1337_v10  ;;  %v1339_v43 = vld [vmem:[%s1686_s0 + $0x18] sm:$0xff]   ;;  %v1331_v51 = vunpack.c.l.bf16 %v1342_v38  ;;  %v1332_v52 = vunpack.c.h.bf16 %v1342_v38 }
   0x4   :  { %v1340_v5 = vld [vmem:[%s1686_s0 + $0x20] sm:$0xff]   ;;  %v1307_v6 = vunpack.c.l.bf16 %v1306_v4  ;;  %v1308_v7 = vunpack.c.h.bf16 %v1306_v4  ;;  %1356 = vmatprep.subr.bf16.mxu0 %v1382_v1  ;;  %1375 = vmatprep.subr.bf16.mxu1 %v1382_v1  ;;  %v1327_v15 = vunpack.c.l.bf16 %v1341_v11  ;;  %v1328_v16 = vunpack.c.h.bf16 %v1341_v11  ;;  %v1343_v48 = vld [vmem:[%s1686_s0 + $0x38] sm:$0xff]  }
   0x5   :  { %v1323_v8 = vunpack.c.l.bf16 %v1340_v5  ;;  %v1324_v9 = vunpack.c.h.bf16 %v1340_v5  ;;  %v1440_v12 = vld [vmem:[%s1688_s2] ss:$0 sm:$0xff]  ;;  %v63_v22 = vmul.f32 %v1311_v13, %v1423_v3  ;;  %v64_v23 = vmul.f32 %v1312_v14, %v1423_v3 }
   0x6   :  { %v61_v18 = vmul.f32 %v1307_v6, %v1423_v3  ;;  %v62_v19 = vmul.f32 %v1308_v7, %v1423_v3  ;;  %v71_v24 = vmul.f32 %v1327_v15, %v1423_v3  ;;  %v72_v25 = vmul.f32 %v1328_v16, %v1423_v3 }
   0x7   :  { %v69_v20 = vmul.f32 %v1323_v8, %v1423_v3  ;;  %v70_v21 = vmul.f32 %v1324_v9, %v1423_v3  ;;  %1357 = vmatpush3.bf16.msra.mxu0 %v1382_v1  ;;  %1377 = vmatpush3.bf16.msra.mxu1 %v1382_v1  ;;  %v85_v31 = vadd.f32 %v1440_v12, %v63_v22  ;;  %v1319_v56 = vunpack.c.l.bf16 %v1339_v43 }
   0x8   :  { %v83_v26 = vadd.f32 %v1440_v12, %v61_v18  ;;  %v84_v27 = vadd.f32 %v1440_v12, %v62_v19  ;;  %v86_v32 = vadd.f32 %v1440_v12, %v64_v23  ;;  %v93_v33 = vadd.f32 %v1440_v12, %v71_v24 }
   0x9   :  { %v91_v28 = vadd.f32 %v1440_v12, %v69_v20  ;;  %v92_v30 = vadd.f32 %v1440_v12, %v70_v21  ;;  %v94_v37 = vadd.f32 %v1440_v12, %v72_v25  ;;  %v101_v40 = vmax.f32 %v85_v31, 0.0 }
   0xa   :  { %v99_v34 = vmax.f32 %v83_v26, 0.0  ;;  %v100_v35 = vmax.f32 %v84_v27, 0.0  ;;  %v102_v41 = vmax.f32 %v86_v32, 0.0  ;;  %v109_v42 = vmax.f32 %v93_v33, 0.0 }
   0xb   :  { %v107_v36 = vmax.f32 %v91_v28, 0.0  ;;  %v108_v39 = vmax.f32 %v92_v30, 0.0  ;;  %v110_v45 = vmax.f32 %v94_v37, 0.0  ;;  %v65_v47 = vmul.f32 %v1315_v29, %v1423_v3  ;;  %v1497_v28 = vld [vmem:[%s1689_s4] ss:$0 sm:$0xff] }
   0xc   :  { %v115_v44 = vpack.c.bf16 %v100_v35, %v99_v34  ;;  %v116_v50 = vpack.c.bf16 %v102_v41, %v101_v40  ;;  %v66_v54 = vmul.f32 %v1316_v46, %v1423_v3  ;;  %v73_v57 = vmul.f32 %v1331_v51, %v1423_v3 }
   0xd   :  { %v119_v49 = vpack.c.bf16 %v108_v39, %v107_v36  ;;  %v120_v53 = vpack.c.bf16 %v110_v45, %v109_v42  ;;  %v87_v55 = vadd.f32 %v1440_v12, %v65_v47  ;;  %v74_v58 = vmul.f32 %v1332_v52, %v1423_v3 }
   0xe   :  { %1358 = vmatprep.mubr.msk.bf16.mxu0 %vm142_vm1, %v115_v44  ;;  %v1320_v59 = vunpack.c.h.bf16 %v1339_v43  ;;  %v1335_v60 = vunpack.c.l.bf16 %v1343_v48  ;;  %v88_v61 = vadd.f32 %v1440_v12, %v66_v54  ;;  %v67_v63 = vmul.f32 %v1319_v56, %v1423_v3 }
   0xf   :  { %1366 = vmatprep.mubr.msk.bf16.mxu1 %vm142_vm1, %v119_v49  ;;  %1359 = vmatmul.mubr.msk.bf16.vlgmr.msra.gmra.mxu0 %vm142_vm1, %v116_v50  ;;  %v103_v62 = vmax.f32 %v87_v55, 0.0  ;;  %v1336_v0 = vunpack.c.h.bf16 %v1343_v48  ;;  %v95_v1 = vadd.f32 %v1440_v12, %v73_v57  ;;  %v96_v2 = vadd.f32 %v1440_v12, %v74_v58 }
  0x10   :  { %1367 = vmatmul.mubr.msk.bf16.vlgmr.msra.gmra.mxu1 %vm142_vm1, %v120_v53  ;;  %v68_v4 = vmul.f32 %v1320_v59, %v1423_v3  ;;  %v75_v5 = vmul.f32 %v1335_v60, %v1423_v3  ;;  %v104_v6 = vmax.f32 %v88_v61, 0.0  ;;  %v89_v7 = vadd.f32 %v1440_v12, %v67_v63 }
  0x11   :  { %v76_v8 = vmul.f32 %v1336_v0, %v1423_v3  ;;  %v111_v9 = vmax.f32 %v95_v1, 0.0  ;;  %v112_v10 = vmax.f32 %v96_v2, 0.0  ;;  %v1383_v22 = vmov 1983009808  }
  0x12   :  { %v90_v11 = vadd.f32 %v1440_v12, %v68_v4  ;;  %v97_v13 = vadd.f32 %v1440_v12, %v75_v5  ;;  %v117_v14 = vpack.c.bf16 %v104_v6, %v103_v62  ;;  %v105_v15 = vmax.f32 %v89_v7, 0.0 }
  0x13   :  { %v98_v16 = vadd.f32 %v1440_v12, %v76_v8  ;;  %v121_v17 = vpack.c.bf16 %v112_v10, %v111_v9  ;;  %v286_v23 = vunpack.c.l.s4 %v1383_v22  ;;  %v288_v24 = vlaneseq }
  0x14   :  { %v106_v18 = vmax.f32 %v90_v11, 0.0  ;;  %v113_v19 = vmax.f32 %v97_v13, 0.0  ;;  %1362 = vmatprep.mubr.msk.bf16.mxu0 %vm142_vm1, %v117_v14 }
  0x15   :  { %v114_v20 = vmax.f32 %v98_v16, 0.0  ;;  %1370 = vmatprep.mubr.msk.bf16.mxu1 %vm142_vm1, %v121_v17  ;;  %v287_v12 = vunpack.c.0.s8 %v286_v23  ;;  %v289_v27 = vshrl.u32 %v288_v24, 7 }
  0x16   :  { %v118_v21 = vpack.c.bf16 %v106_v18, %v105_v15 }
  0x17   :  { %v122_v3 = vpack.c.bf16 %v114_v20, %v113_v19  ;;  %v1501_v34 = vsub.s32 %v287_v12, %v289_v27 }
  0x18   :  { %1363 = vmatmul.mubr.msk.bf16.gmra.mxu0 %vm142_vm1, %v118_v21 }
  0x19   :  { %1371 = vmatmul.mubr.msk.bf16.gmra.mxu1 %vm142_vm1, %v122_v3 }
  0xcf   :  { %v1360_v25 = vpop.f32.mrf.mxu0 }
  0xd0   :  { %v1368_v26 = vpop.f32.mrf.mxu1  ;;  %v214_v32 = vadd.f32 %v1360_v25, %v1497_v28 }
  0xd1   :  { %v205_v29 = vpop.f32.mrf.mxu0  ;;  %v246_v36 = vadd.f32 %v1368_v26, %v1497_v28 }
  0xd2   :  { %v237_v30 = vpop.f32.mrf.mxu1  ;;  %v206_v39 = vadd.f32 %v1497_v28, %v205_v29 }
  0xd3   :  { %v1361_v31 = vpop.f32.mrf.mxu0  ;;  %v238_v43 = vadd.f32 %v1497_v28, %v237_v30 }
  0xd4   :  { %v217_v33 = vadd.f32 %v1361_v31, %v1497_v28  ;;  %v1369_v35 = vpop.f32.mrf.mxu1 }
  0xd5   :  { %v249_v37 = vadd.f32 %v1369_v35, %v1497_v28  ;;  %v208_v38 = vpop.f32.mrf.mxu0 }
  0xd6   :  { %v269_v40 = vmax.f32 %v214_v32, %v217_v33  ;;  %v209_v41 = vadd.f32 %v1497_v28, %v208_v38  ;;  %v240_v42 = vpop.f32.mrf.mxu1 }
  0xd7   :  { %v273_v44 = vmax.f32 %v246_v36, %v249_v37  ;;  %v241_v45 = vadd.f32 %v1497_v28, %v240_v42 }
  0xd8   :  { %v301_v46 = vcombine.high %v269_v40, %v269_v40  ;;  %v308_v47 = vrot.slane %v269_v40, %v1501_v34  ;;  %v268_v48 = vmax.f32 %v206_v39, %v209_v41 }
  0xd9   :  { %v369_v49 = vcombine.high %v273_v44, %v273_v44  ;;  %v376_v50 = vrot.slane %v273_v44, %v1501_v34  ;;  %v1511_v51 = vmax.f32 %v238_v43, %v241_v45 }
  0xda   :  { %v315_v52 = vrot.slane %v301_v46, %v1501_v34  ;;  %v316_v53 = vcombine.high %v308_v47, %v308_v47  ;;  %v1277_v54 = vrot.slane %v308_v47, 9  ;;  %v284_v55 = vcombine.high %v268_v48, %v268_v48 }
  0xdb   :  { %v383_v56 = vrot.slane %v369_v49, %v1501_v34  ;;  %v384_v57 = vcombine.high %v376_v50, %v376_v50  ;;  %v1293_v58 = vrot.slane %v376_v50, 9  ;;  %v1516_v59 = vrot.slane %v268_v48, %v1501_v34 }
  0xdc   :  { %v317_v60 = vcombine.high %v315_v52, %v315_v52  ;;  %v1278_v61 = vrot.slane %v316_v53, 9  ;;  %v1279_v62 = vrot.slane %v315_v52, 9  ;;  %v552_v63 = vmax.f32 %v308_v47, %v1277_v54 }
  0xdd   :  { %v385_v0 = vcombine.high %v383_v56, %v383_v56  ;;  %v1294_v1 = vrot.slane %v384_v57, 9  ;;  %v1295_v2 = vrot.slane %v383_v56, 9  ;;  %v568_v4 = vmax.f32 %v376_v50, %v1293_v58 }
  0xde   :  { %v1280_v5 = vrot.slane %v317_v60, 9  ;;  %v553_v6 = vmax.f32 %v316_v53, %v1278_v61  ;;  %v554_v7 = vmax.f32 %v315_v52, %v1279_v62  ;;  %v584_v8 = vpack.c.bf16 %v552_v63, %v552_v63 }
  0xdf   :  { %v1296_v9 = vrot.slane %v385_v0, 9  ;;  %v569_v10 = vmax.f32 %v384_v57, %v1294_v1  ;;  %v570_v11 = vmax.f32 %v383_v56, %v1295_v2  ;;  %v600_v13 = vpack.c.bf16 %v568_v4, %v568_v4 }
  0xe0   :  { %v555_v14 = vmax.f32 %v317_v60, %v1280_v5  ;;  %v585_v15 = vpack.c.bf16 %v553_v6, %v553_v6  ;;  %v586_v16 = vpack.c.bf16 %v554_v7, %v554_v7  ;;  %v678_v17 = vrot.slane %v584_v8, %v1501_v34 }
  0xe1   :  { %v571_v18 = vmax.f32 %v385_v0, %v1296_v9  ;;  %v601_v19 = vpack.c.bf16 %v569_v10, %v569_v10  ;;  %v602_v20 = vpack.c.bf16 %v570_v11, %v570_v11  ;;  %v790_v21 = vrot.slane %v600_v13, %v1501_v34  ;;  %v1364_v9 = vpop.f32.mrf.mxu0 }
  0xe2   :  { %v587_v3 = vpack.c.bf16 %v555_v14, %v555_v14  ;;  %v685_v22 = vrot.slane %v585_v15, %v1501_v34  ;;  %v692_v23 = vrot.slane %v586_v16, %v1501_v34  ;;  %v902_v24 = vrot.slane %v678_v17, %v1501_v34  ;;  %v1372_v15 = vpop.f32.mrf.mxu1 }
  0xe3   :  { %v603_v25 = vpack.c.bf16 %v571_v18, %v571_v18  ;;  %v797_v26 = vrot.slane %v601_v19, %v1501_v34  ;;  %v804_v12 = vrot.slane %v602_v20, %v1501_v34  ;;  %v1014_v27 = vrot.slane %v790_v21, %v1501_v34 }
  0xe4   :  { %v699_v29 = vrot.slane %v587_v3, %v1501_v34  ;;  %v909_v30 = vrot.slane %v685_v22, %v1501_v34  ;;  %v916_v31 = vrot.slane %v692_v23, %v1501_v34  ;;  %v1096_v32 = vunpack.c.l.b16 %v902_v24 }
  0xe5   :  { %v811_v33 = vrot.slane %v603_v25, %v1501_v34  ;;  %v1021_v35 = vrot.slane %v797_v26, %v1501_v34  ;;  %v1028_v36 = vrot.slane %v804_v12, %v1501_v34  ;;  %v1112_v37 = vunpack.c.l.b16 %v1014_v27 }
  0xe6   :  { %v923_v38 = vrot.slane %v699_v29, %v1501_v34  ;;  %v1097_v39 = vunpack.c.l.b16 %v909_v30  ;;  %v1098_v40 = vunpack.c.l.b16 %v916_v31  ;;  %v298_v41 = vrot.slane %v284_v55, %v1501_v34  ;;  %v253_v30 = vpop.f32.mrf.mxu1 }
  0xe7   :  { %v1035_v42 = vrot.slane %v811_v33, %v1501_v34  ;;  %v1113_v43 = vunpack.c.l.b16 %v1021_v35  ;;  %v1114_v44 = vunpack.c.l.b16 %v1028_v36  ;;  %v299_v45 = vcombine.high %v1516_v59, %v1516_v59 }
  0xe8   :  { %v1099_v46 = vunpack.c.l.b16 %v923_v38  ;;  %v1133_v47 = vrot.slane %v1097_v39, 7  ;;  %v1135_v48 = vrot.slane %v1098_v40, 6  ;;  %v300_v49 = vcombine.high %v298_v41, %v298_v41 }
  0xe9   :  { %v1115_v50 = vunpack.c.l.b16 %v1035_v42  ;;  %v1157_v52 = vrot.slane %v1113_v43, 7  ;;  %v1159_v53 = vrot.slane %v1114_v44, 6  ;;  %v1273_v54 = vrot.slane %v1516_v59, 9 }
  0xea   :  { %v1134_v56 = vsel %vm1125_vm2, %v1133_v47, %v1096_v32  ;;  %v1137_v57 = vrot.slane %v1099_v46, 5  ;;  %v1274_v55 = vrot.slane %v299_v45, 9  ;;  %v1275_v58 = vrot.slane %v298_v41, 9 }
  0xeb   :  { %v1136_v60 = vsel %vm1128_vm3, %v1135_v48, %v1134_v56  ;;  %v1158_v61 = vsel %vm1125_vm2, %v1157_v52, %v1112_v37  ;;  %v1161_v62 = vrot.slane %v1115_v50, 5  ;;  %v1276_v63 = vrot.slane %v300_v49, 9 }
  0xec   :  { %v1138_v0 = vsel %vm1131_vm4, %v1137_v57, %v1136_v60  ;;  %v1160_v1 = vsel %vm1128_vm3, %v1159_v53, %v1158_v61  ;;  %v548_v2 = vmax.f32 %v1516_v59, %v1273_v54  ;;  %v549_v4 = vmax.f32 %v299_v45, %v1274_v55 }
  0xed   :  { %v1176_v5 = vpack.c.b16 %v1138_v0, %v1138_v0  ;;  %v1162_v6 = vsel %vm1131_vm4, %v1161_v62, %v1160_v1  ;;  %v550_v7 = vmax.f32 %v298_v41, %v1275_v58  ;;  %v551_v8 = vmax.f32 %v300_v49, %v1276_v63  ;;  %v1373_v49 = vpop.f32.mrf.mxu1 }
  0xee   :  { %v1180_v10 = vpack.c.b16 %v1162_v6, %v1162_v6  ;;  %v580_v11 = vpack.c.bf16 %v548_v2, %v548_v2  ;;  %v581_v13 = vpack.c.bf16 %v549_v4, %v549_v4  ;;  %v352_v14 = vcombine.high %v1511_v51, %v1511_v51 }
  0xef   :  { %v1196_v16 = vrot.slane %v1176_v5, %v1501_v34  ;;  %v582_v17 = vpack.c.bf16 %v550_v7, %v550_v7  ;;  %v583_v18 = vpack.c.bf16 %v551_v8, %v551_v8  ;;  %v359_v59 = vrot.slane %v1511_v51, %v1501_v34  ;;  %v221_v51 = vpop.f32.mrf.mxu0  ;;  %v256_v6 = vpop.f32.mrf.mxu1 }
  0xf0   :  { %v1224_v19 = vrot.slane %v1180_v10, %v1501_v34  ;;  %v650_v20 = vrot.slane %v580_v11, %v1501_v34  ;;  %v657_v21 = vrot.slane %v581_v13, %v1501_v34  ;;  %v366_v3 = vrot.slane %v352_v14, %v1501_v34 }
  0xf1   :  { %1249 = vst.msk [vmem:[%s1690_s5 + $0x2] sm:$0x3] %vm1247_vm5, %v1196_v16  ;;  %v664_v22 = vrot.slane %v582_v17, %v1501_v34  ;;  %v671_v23 = vrot.slane %v583_v18, %v1501_v34  ;;  %v367_v24 = vcombine.high %v359_v59, %v359_v59  ;;  %v1289_v25 = vrot.slane %v359_v59, 9  ;;  %v1365_v44 = vpop.f32.mrf.mxu0 }
  0xf2   :  { %1253 = vst.msk [vmem:[%s1690_s5 + $0xa] sm:$0x3] %vm1247_vm5, %v1224_v19  ;;  %v874_v26 = vrot.slane %v650_v20, %v1501_v34  ;;  %v881_v12 = vrot.slane %v657_v21, %v1501_v34  ;;  %v368_v27 = vcombine.high %v366_v3, %v366_v3  ;;  %v1291_v29 = vrot.slane %v366_v3, 9 }
  0xf3   :  { %v888_v31 = vrot.slane %v664_v22, %v1501_v34  ;;  %v895_v32 = vrot.slane %v671_v23, %v1501_v34  ;;  %v1290_v33 = vrot.slane %v367_v24, 9  ;;  %v564_v35 = vmax.f32 %v359_v59, %v1289_v25  ;;  %v224_v0 = vpop.f32.mrf.mxu0 }
  0xf4   :  { %v1092_v36 = vunpack.c.l.b16 %v874_v26  ;;  %v1093_v37 = vunpack.c.l.b16 %v881_v12  ;;  %v1292_v38 = vrot.slane %v368_v27, 9  ;;  %v566_v39 = vmax.f32 %v366_v3, %v1291_v29 }
  0xf5   :  { %v1094_v40 = vunpack.c.l.b16 %v888_v31  ;;  %v1095_v41 = vunpack.c.l.b16 %v895_v32  ;;  %v565_v42 = vmax.f32 %v367_v24, %v1290_v33  ;;  %v596_v43 = vpack.c.bf16 %v564_v35, %v564_v35 }
  0xf6   :  { %v1124_v45 = vrot.slane %v1093_v37, 7  ;;  %v567_v46 = vmax.f32 %v368_v27, %v1292_v38  ;;  %v598_v47 = vpack.c.bf16 %v566_v39, %v566_v39  ;;  %v230_v48 = vadd.f32 %v1364_v9, %v1497_v28 }
  0xf7   :  { %v1127_v50 = vrot.slane %v1094_v40, 6  ;;  %v1130_v52 = vrot.slane %v1095_v41, 5  ;;  %v597_v53 = vpack.c.bf16 %v565_v42, %v565_v42  ;;  %v762_v54 = vrot.slane %v596_v43, %v1501_v34 }
  0xf8   :  { %v1126_v56 = vsel %vm1125_vm2, %v1124_v45, %v1092_v36  ;;  %v599_v57 = vpack.c.bf16 %v567_v46, %v567_v46  ;;  %v776_v55 = vrot.slane %v598_v47, %v1501_v34  ;;  %v262_v58 = vadd.f32 %v1372_v15, %v1497_v28 }
  0xf9   :  { %v1129_v60 = vsel %vm1128_vm3, %v1127_v50, %v1126_v56  ;;  %v769_v61 = vrot.slane %v597_v53, %v1501_v34  ;;  %v986_v62 = vrot.slane %v762_v54, %v1501_v34  ;;  %v222_v63 = vadd.f32 %v1497_v28, %v221_v51 }
  0xfa   :  { %v1132_v1 = vsel %vm1131_vm4, %v1130_v52, %v1129_v60  ;;  %v783_v2 = vrot.slane %v599_v57, %v1501_v34  ;;  %v1000_v4 = vrot.slane %v776_v55, %v1501_v34  ;;  %v254_v5 = vadd.f32 %v1497_v28, %v253_v30 }
  0xfb   :  { %v1175_v7 = vpack.c.b16 %v1132_v1, %v1132_v1  ;;  %v993_v8 = vrot.slane %v769_v61, %v1501_v34  ;;  %v1108_v9 = vunpack.c.l.b16 %v986_v62  ;;  %v233_v10 = vadd.f32 %v1365_v44, %v1497_v28 }
  0xfc   :  { %v1007_v11 = vrot.slane %v783_v2, %v1501_v34  ;;  %v1110_v13 = vunpack.c.l.b16 %v1000_v4  ;;  %v265_v14 = vadd.f32 %v1373_v49, %v1497_v28  ;;  %v225_v15 = vadd.f32 %v1497_v28, %v224_v0 }
  0xfd   :  { %v1189_v16 = vrot.slane %v1175_v7, %v1501_v34  ;;  %v1109_v17 = vunpack.c.l.b16 %v993_v8  ;;  %v271_v18 = vmax.f32 %v230_v48, %v233_v10  ;;  %v257_v59 = vadd.f32 %v1497_v28, %v256_v6 }
  0xfe   :  { %v1111_v19 = vunpack.c.l.b16 %v1007_v11  ;;  %v1153_v20 = vrot.slane %v1110_v13, 6  ;;  %v275_v21 = vmax.f32 %v262_v58, %v265_v14  ;;  %v1588_v3 = vmax.f32 %v222_v63, %v225_v15 }
  0xff   :  { %1248 = vst.msk [vmem:[%s1690_s5] sm:$0x3] %vm1247_vm5, %v1189_v16  ;;  %v1151_v22 = vrot.slane %v1109_v17, 7  ;;  %v335_v23 = vcombine.high %v271_v18, %v271_v18  ;;  %v342_v24 = vrot.slane %v271_v18, %v1501_v34  ;;  %v1595_v25 = vmax.f32 %v254_v5, %v257_v59 }
 0x100   :  { %v1155_v51 = vrot.slane %v1111_v19, 5  ;;  %v403_v26 = vcombine.high %v275_v21, %v275_v21  ;;  %v410_v28 = vrot.slane %v275_v21, %v1501_v34  ;;  %v318_v12 = vcombine.high %v1588_v3, %v1588_v3 }
 0x101   :  { %v1152_v27 = vsel %vm1125_vm2, %v1151_v22, %v1108_v9  ;;  %v349_v29 = vrot.slane %v335_v23, %v1501_v34  ;;  %v350_v30 = vcombine.high %v342_v24, %v342_v24  ;;  %v1285_v31 = vrot.slane %v342_v24, 9 }
 0x102   :  { %v1154_v32 = vsel %vm1128_vm3, %v1153_v20, %v1152_v27  ;;  %v417_v33 = vrot.slane %v403_v26, %v1501_v34  ;;  %v418_v35 = vcombine.high %v410_v28, %v410_v28  ;;  %v1301_v36 = vrot.slane %v410_v28, 9 }
 0x103   :  { %v1156_v37 = vsel %vm1131_vm4, %v1155_v51, %v1154_v32  ;;  %v351_v38 = vcombine.high %v349_v29, %v349_v29  ;;  %v1286_v39 = vrot.slane %v350_v30, 9  ;;  %v1287_v40 = vrot.slane %v349_v29, 9 }
 0x104   :  { %v1179_v41 = vpack.c.b16 %v1156_v37, %v1156_v37  ;;  %v560_v42 = vmax.f32 %v342_v24, %v1285_v31  ;;  %v419_v43 = vcombine.high %v417_v33, %v417_v33  ;;  %v1302_v44 = vrot.slane %v418_v35, 9 }
 0x105   :  { %v1288_v45 = vrot.slane %v351_v38, 9  ;;  %v561_v46 = vmax.f32 %v350_v30, %v1286_v39  ;;  %v562_v47 = vmax.f32 %v349_v29, %v1287_v40  ;;  %v1303_v48 = vrot.slane %v417_v33, 9 }
 0x106   :  { %v1217_v49 = vrot.slane %v1179_v41, %v1501_v34  ;;  %v592_v50 = vpack.c.bf16 %v560_v42, %v560_v42  ;;  %v1304_v52 = vrot.slane %v419_v43, 9  ;;  %v576_v53 = vmax.f32 %v410_v28, %v1301_v36 }
 0x107   :  { %v563_v54 = vmax.f32 %v351_v38, %v1288_v45  ;;  %v593_v56 = vpack.c.bf16 %v561_v46, %v561_v46  ;;  %v594_v57 = vpack.c.bf16 %v562_v47, %v562_v47  ;;  %v577_v55 = vmax.f32 %v418_v35, %v1302_v44 }
 0x108   :  { %1252 = vst.msk [vmem:[%s1690_s5 + $0x8] sm:$0x3] %vm1247_vm5, %v1217_v49  ;;  %v734_v58 = vrot.slane %v592_v50, %v1501_v34  ;;  %v578_v60 = vmax.f32 %v417_v33, %v1303_v48  ;;  %v579_v61 = vmax.f32 %v419_v43, %v1304_v52  ;;  %v608_v62 = vpack.c.bf16 %v576_v53, %v576_v53 }
 0x109   :  { %v595_v63 = vpack.c.bf16 %v563_v54, %v563_v54  ;;  %v741_v0 = vrot.slane %v593_v56, %v1501_v34  ;;  %v748_v1 = vrot.slane %v594_v57, %v1501_v34  ;;  %v609_v2 = vpack.c.bf16 %v577_v55, %v577_v55 }
 0x10a   :  { %v958_v4 = vrot.slane %v734_v58, %v1501_v34  ;;  %v610_v5 = vpack.c.bf16 %v578_v60, %v578_v60  ;;  %v611_v6 = vpack.c.bf16 %v579_v61, %v579_v61  ;;  %v846_v7 = vrot.slane %v608_v62, %v1501_v34 }
 0x10b   :  { %v755_v8 = vrot.slane %v595_v63, %v1501_v34  ;;  %v965_v9 = vrot.slane %v741_v0, %v1501_v34  ;;  %v972_v10 = vrot.slane %v748_v1, %v1501_v34  ;;  %v853_v11 = vrot.slane %v609_v2, %v1501_v34 }
 0x10c   :  { %v1104_v13 = vunpack.c.l.b16 %v958_v4  ;;  %v860_v14 = vrot.slane %v610_v5, %v1501_v34  ;;  %v867_v15 = vrot.slane %v611_v6, %v1501_v34  ;;  %v1070_v16 = vrot.slane %v846_v7, %v1501_v34 }
 0x10d   :  { %v979_v17 = vrot.slane %v755_v8, %v1501_v34  ;;  %v1105_v18 = vunpack.c.l.b16 %v965_v9  ;;  %v1106_v59 = vunpack.c.l.b16 %v972_v10  ;;  %v1077_v19 = vrot.slane %v853_v11, %v1501_v34 }
 0x10e   :  { %v1084_v20 = vrot.slane %v860_v14, %v1501_v34  ;;  %v1091_v21 = vrot.slane %v867_v15, %v1501_v34  ;;  %v1120_v22 = vunpack.c.l.b16 %v1070_v16  ;;  %v325_v23 = vrot.slane %v1588_v3, %v1501_v34 }
 0x10f   :  { %v1107_v24 = vunpack.c.l.b16 %v979_v17  ;;  %v1145_v51 = vrot.slane %v1105_v18, 7  ;;  %v1147_v26 = vrot.slane %v1106_v59, 6  ;;  %v1121_v28 = vunpack.c.l.b16 %v1077_v19 }
 0x110   :  { %v1122_v27 = vunpack.c.l.b16 %v1084_v20  ;;  %v1123_v29 = vunpack.c.l.b16 %v1091_v21  ;;  %v332_v30 = vrot.slane %v318_v12, %v1501_v34  ;;  %v333_v31 = vcombine.high %v325_v23, %v325_v23 }
 0x111   :  { %v1146_v32 = vsel %vm1125_vm2, %v1145_v51, %v1104_v13  ;;  %v1149_v33 = vrot.slane %v1107_v24, 5  ;;  %v1169_v35 = vrot.slane %v1121_v28, 7  ;;  %v1281_v36 = vrot.slane %v325_v23, 9 }
 0x112   :  { %v1148_v37 = vsel %vm1128_vm3, %v1147_v26, %v1146_v32  ;;  %v1171_v38 = vrot.slane %v1122_v27, 6  ;;  %v1173_v39 = vrot.slane %v1123_v29, 5  ;;  %v334_v40 = vcombine.high %v332_v30, %v332_v30 }
 0x113   :  { %v1150_v41 = vsel %vm1131_vm4, %v1149_v33, %v1148_v37  ;;  %v1170_v42 = vsel %vm1125_vm2, %v1169_v35, %v1120_v22  ;;  %v1282_v43 = vrot.slane %v333_v31, 9  ;;  %v1283_v44 = vrot.slane %v332_v30, 9 }
 0x114   :  { %v1178_v45 = vpack.c.b16 %v1150_v41, %v1150_v41  ;;  %v1172_v3 = vsel %vm1128_vm3, %v1171_v38, %v1170_v42  ;;  %v1284_v12 = vrot.slane %v334_v40, 9  ;;  %v556_v46 = vmax.f32 %v325_v23, %v1281_v36 }
 0x115   :  { %v1174_v47 = vsel %vm1131_vm4, %v1173_v39, %v1172_v3  ;;  %v557_v48 = vmax.f32 %v333_v31, %v1282_v43  ;;  %v558_v49 = vmax.f32 %v332_v30, %v1283_v44  ;;  %v386_v50 = vcombine.high %v1595_v25, %v1595_v25 }
 0x116   :  { %v1210_v52 = vrot.slane %v1178_v45, %v1501_v34  ;;  %v1182_v53 = vpack.c.b16 %v1174_v47, %v1174_v47  ;;  %v559_v54 = vmax.f32 %v334_v40, %v1284_v12  ;;  %v588_v56 = vpack.c.bf16 %v556_v46, %v556_v46 }
 0x117   :  { %v589_v57 = vpack.c.bf16 %v557_v48, %v557_v48  ;;  %v590_v55 = vpack.c.bf16 %v558_v49, %v558_v49  ;;  %v393_v58 = vrot.slane %v1595_v25, %v1501_v34  ;;  %v400_v60 = vrot.slane %v386_v50, %v1501_v34 }
 0x118   :  { %1251 = vst.msk [vmem:[%s1690_s5 + $0x6] sm:$0x3] %vm1247_vm5, %v1210_v52  ;;  %v1238_v61 = vrot.slane %v1182_v53, %v1501_v34  ;;  %v591_v62 = vpack.c.bf16 %v559_v54, %v559_v54  ;;  %v706_v63 = vrot.slane %v588_v56, %v1501_v34 }
 0x119   :  { %v713_v0 = vrot.slane %v589_v57, %v1501_v34  ;;  %v720_v1 = vrot.slane %v590_v55, %v1501_v34  ;;  %v401_v2 = vcombine.high %v393_v58, %v393_v58  ;;  %v402_v4 = vcombine.high %v400_v60, %v400_v60 }
 0x11a   :  { %1255 = vst.msk [vmem:[%s1690_s5 + $0xe] sm:$0x3] %vm1247_vm5, %v1238_v61  ;;  %v727_v25 = vrot.slane %v591_v62, %v1501_v34  ;;  %v930_v5 = vrot.slane %v706_v63, %v1501_v34  ;;  %v1297_v6 = vrot.slane %v393_v58, 9  ;;  %v1299_v7 = vrot.slane %v400_v60, 9 }
 0x11b   :  { %v937_v8 = vrot.slane %v713_v0, %v1501_v34  ;;  %v944_v9 = vrot.slane %v720_v1, %v1501_v34  ;;  %v1298_v10 = vrot.slane %v401_v2, 9  ;;  %v1300_v11 = vrot.slane %v402_v4, 9 }
 0x11c   :  { %v951_v13 = vrot.slane %v727_v25, %v1501_v34  ;;  %v572_v14 = vmax.f32 %v393_v58, %v1297_v6  ;;  %v574_v15 = vmax.f32 %v400_v60, %v1299_v7  ;;  %v1100_v19 = vunpack.c.l.b16 %v930_v5 }
 0x11d   :  { %v1101_v16 = vunpack.c.l.b16 %v937_v8  ;;  %v1102_v17 = vunpack.c.l.b16 %v944_v9  ;;  %v573_v18 = vmax.f32 %v401_v2, %v1298_v10  ;;  %v575_v59 = vmax.f32 %v402_v4, %v1300_v11 }
 0x11e   :  { %v1103_v20 = vunpack.c.l.b16 %v951_v13  ;;  %v604_v21 = vpack.c.bf16 %v572_v14, %v572_v14  ;;  %v606_v22 = vpack.c.bf16 %v574_v15, %v574_v15 }
 0x11f   :  { %v1139_v23 = vrot.slane %v1101_v16, 7  ;;  %v1141_v24 = vrot.slane %v1102_v17, 6  ;;  %v605_v51 = vpack.c.bf16 %v573_v18, %v573_v18  ;;  %v607_v26 = vpack.c.bf16 %v575_v59, %v575_v59 }
 0x120   :  { %v1143_v28 = vrot.slane %v1103_v20, 5  ;;  %v818_v27 = vrot.slane %v604_v21, %v1501_v34  ;;  %v832_v29 = vrot.slane %v606_v22, %v1501_v34 }
 0x121   :  { %v1140_v30 = vsel %vm1125_vm2, %v1139_v23, %v1100_v19  ;;  %v825_v31 = vrot.slane %v605_v51, %v1501_v34  ;;  %v839_v32 = vrot.slane %v607_v26, %v1501_v34 }
 0x122   :  { %v1142_v33 = vsel %vm1128_vm3, %v1141_v24, %v1140_v30  ;;  %v1056_v35 = vrot.slane %v832_v29, %v1501_v34  ;;  %v1042_v37 = vrot.slane %v818_v27, %v1501_v34 }
 0x123   :  { %v1144_v36 = vsel %vm1131_vm4, %v1143_v28, %v1142_v33  ;;  %v1049_v38 = vrot.slane %v825_v31, %v1501_v34  ;;  %v1063_v39 = vrot.slane %v839_v32, %v1501_v34 }
 0x124   :  { %v1177_v40 = vpack.c.b16 %v1144_v36, %v1144_v36  ;;  %v1118_v41 = vunpack.c.l.b16 %v1056_v35  ;;  %v1116_v3 = vunpack.c.l.b16 %v1042_v37 }
 0x125   :  { %v1117_v42 = vunpack.c.l.b16 %v1049_v38  ;;  %v1119_v43 = vunpack.c.l.b16 %v1063_v39 }
 0x126   :  { %v1203_v44 = vrot.slane %v1177_v40, %v1501_v34  ;;  %v1165_v45 = vrot.slane %v1118_v41, 6 }
 0x127   :  { %v1163_v12 = vrot.slane %v1117_v42, 7  ;;  %v1167_v46 = vrot.slane %v1119_v43, 5 }
 0x128   :  { %1250 = vst.msk [vmem:[%s1690_s5 + $0x4] sm:$0x3] %vm1247_vm5, %v1203_v44 }
 0x129   :  { %v1164_v47 = vsel %vm1125_vm2, %v1163_v12, %v1116_v3 }
 0x12a   :  { %v1166_v48 = vsel %vm1128_vm3, %v1165_v45, %v1164_v47 }
 0x12b   :  { %v1168_v49 = vsel %vm1131_vm4, %v1167_v46, %v1166_v48 }
 0x12c   :  { %v1181_v50 = vpack.c.b16 %v1168_v49, %v1168_v49 }
 0x12e   :  { %v1231_v52 = vrot.slane %v1181_v50, %v1501_v34 }
 0x130   :  { %1254 = vst.msk [vmem:[%s1690_s5 + $0xc] sm:$0x3] %vm1247_vm5, %v1231_v52 }

// kernel: _lambda_.24
= control target key start
LH: loop header
LB: loop body
LE: loop exit
PB: predicated region body
PF: predicated region fallthrough
CT: control target
= control target key end

     0   :  { %s733_s30 = smov 0   ;;  %s782_s0 = inlined_call_operand.vmem [shape: bf16[32,24], index: 0, kind: input, shape index: {}]   ;;  %s783_s1 = inlined_call_operand.vmem [shape: bf16[32,4], index: 1, kind: input, shape index: {}]   ;;  %s784_s2 = inlined_call_operand.vmem [shape: bf16[24,36], index: 2, kind: input, shape index: {}]   ;;  %s785_s3 = inlined_call_operand.vmem [shape: bf16[4,36], index: 3, kind: input, shape index: {}]   ;;  %s786_s4 = inlined_call_operand.vmem [shape: f32[1,24], index: 4, kind: input, shape index: {}]   ;;  %s787_s5 = inlined_call_operand.vmem [shape: f32[1,4], index: 5, kind: input, shape index: {}]   ;;  %s788_s6 = inlined_call_operand.vmem [shape: f32[1,24], index: 6, kind: input, shape index: {}]   ;;  %s789_s7 = inlined_call_operand.vmem [shape: f32[1,4], index: 7, kind: input, shape index: {}]   ;;  %s790_s8 = inlined_call_operand.vmem [shape: f32[1,36], index: 8, kind: input, shape index: {}]   ;;  %s791_s9 = inlined_call_operand.vmem [shape: bf16[32,36], index: 9, kind: output, shape index: {}]  }
   0x1 LB: > { %s608_s10 = sadd.s32 4294967295, %s679_s30   ;;  %p612_p0 = scmp.ge.s32.totalorder %s679_s30, 1  ;;  %s679_s30 = sphi %s733_s30, %s19_s30  }
   0x2   : > { %p299_p1 = scmp.lt.s32.totalorder %s679_s30, 3 }
   0x4   : > { %p300_p2 = pnand %p612_p0, %p299_p1 }
   0x5   : > { %s613_s15 = sshll.u32 (!%p300_p2), %s608_s10, 1 }
   0x6   : > { %303 = sbr.rel (%p300_p2) target bundleno = 231 (0xe7), region = 56  ;;  %p341_p3 = scmp.lt.s32.totalorder (!%p300_p2), %s613_s15, 3 }
   0xb   : > { %v671_v0 = vld [vmem:[%s784_s2 + $0x8] ss:$0 sps:$4 sm:$0xff]   ;;  %vm475_vm0 = vcmask 1043456   ;;  %v681_v1 = vmov 0.0   ;;  %v412_v2 = vld [vmem:[%s785_s3] sm:$0x3] }
   0xc   : > { %653 = vmatprep.subr.bf16.mxu1 %v681_v1  ;;  %647 = vmatprep.subr.bf16.mxu0 %v681_v1  ;;  %vm417_vm1 = vcmask 1041408   ;;  %v477_v3 = vsel %vm475_vm0, %v671_v0, 0  ;;  %v672_v5 = vld [vmem:[%s784_s2] sm:$0xff]   ;;  %vm682_vm2 = vmmov 0   ;;  %s793_s15 = smov (!%p341_p3, %s613_s15), 3  ;;  %vm413_vm3 = vcmask 31744  }
   0xd   : > { %v419_v4 = vsel %vm417_vm1, %v412_v2, 0  ;;  %654 = vmatpush3.bf16.msra.mxu1 %v477_v3  ;;  %649 = vmatprep.mubr.msk.bf16.mxu0 %vm682_vm2, %v681_v1  ;;  %s750_s18 = sshll.u32 %s793_s15, 2  ;;  %v621_v6 = vld [vmem:[%s787_s5] ss:$0 sm:$0xff]  ;;  %vm471_vm4 = vcmask 195584   ;;  %vm537_vm5 = vcmask 289792  }
   0xe   : > { %648 = vmatpush3.bf16.msra.mxu0 %v419_v4  ;;  %655 = vmatprep.subr.bf16.mxu1 %v681_v1  ;;  %s350_s21 = scalar_lea.vmem %s783_s1, %s750_s18  ;;  %s344_s26 = scalar_lea.vmem %s782_s0, %s750_s18  ;;  %v619_v9 = vld [vmem:[%s786_s4] ss:$0 sm:$0xff] }
   0xf   : > { %657 = vmatprep.mubr.msk.bf16.mxu1 %vm682_vm2, %v681_v1  ;;  %v639_v7 = vld [vmem:[%s350_s21] sm:$0xff]   ;;  %s356_s17 = scalar_lea.vmem %s791_s9, %s750_s18 }
  0x10   : > { %v635_v8 = vld [vmem:[%s344_s26] sm:$0xff]   ;;  %v640_v10 = vunpack.c.l.bf16 %v639_v7  ;;  %v641_v11 = vunpack.c.h.bf16 %v639_v7 }
  0x11   : > { %656 = vmatpush3.bf16.msra.mxu1 %v672_v5  ;;  %v636_v12 = vunpack.c.l.bf16 %v635_v8  ;;  %v637_v13 = vunpack.c.h.bf16 %v635_v8  ;;  %v622_v14 = vld [vmem:[%s789_s7] ss:$0 sm:$0xff] }
  0x12   : > { %v620_v15 = vld [vmem:[%s788_s6] ss:$0 sm:$0xff]  ;;  %v398_v16 = vmul.f32 %v640_v10, %v621_v6  ;;  %v399_v17 = vmul.f32 %v641_v11, %v621_v6 }
  0x13   : > { %v370_v18 = vmul.f32 %v636_v12, %v619_v9  ;;  %v371_v19 = vmul.f32 %v637_v13, %v619_v9  ;;  %v627_v32 = vld [vmem:[%s790_s8] ss:$0 sm:$0xff] }
  0x14   : > { %v407_v20 = vadd.f32 %v622_v14, %v398_v16  ;;  %v408_v21 = vadd.f32 %v622_v14, %v399_v17 }
  0x15   : > { %v379_v22 = vadd.f32 %v620_v15, %v370_v18  ;;  %v380_v23 = vadd.f32 %v620_v15, %v371_v19 }
  0x16   : > { %v409_v24 = vmax.f32 %v407_v20, 0.0  ;;  %v410_v25 = vmax.f32 %v408_v21, 0.0 }
  0x17   : > { %v381_v26 = vmax.f32 %v379_v22, 0.0  ;;  %v382_v27 = vmax.f32 %v380_v23, 0.0 }
  0x18   : > { %v411_v28 = vpack.c.bf16 %v410_v25, %v409_v24 }
  0x19   : > { %v383_v29 = vpack.c.bf16 %v382_v27, %v381_v26 }
  0x1a   : > { %650 = vmatmul.mubr.msk.bf16.vlgmr.msra.gmra.mxu0 %vm413_vm3, %v411_v28 }
  0x1b   : > { %658 = vmatmul.mubr.msk.bf16.vlgmr.msra.gmra.mxu1 %vm471_vm4, %v383_v29 }
  0xda   : > { %v455_v30 = vpop.f32.mrf.mxu0 }
  0xdb   : > { %v513_v31 = vpop.f32.mrf.mxu1 }
  0xdc   : > { %v514_v33 = vadd.f32 %v513_v31, %v455_v30  ;;  %v651_v34 = vpop.f32.mrf.mxu0 }
  0xdd   : > { %v659_v35 = vpop.f32.mrf.mxu1 }
  0xde   : > { %v527_v36 = vadd.f32 %v627_v32, %v514_v33  ;;  %v458_v37 = vpop.f32.mrf.mxu0 }
  0xdf   : > { %v516_v38 = vpop.f32.mrf.mxu1 }
  0xe0   : > { %v632_v39 = vpack.c.bf16 %v527_v36, %v527_v36  ;;  %v517_v40 = vadd.f32 %v516_v38, %v458_v37  ;;  %v652_v41 = vpop.f32.mrf.mxu0 }
  0xe1   : > { %v660_v42 = vpop.f32.mrf.mxu1 }
  0xe2   : > { %538 = vst.msk [vmem:[%s356_s17] sm:$0xf] %vm537_vm5, %v632_v39  ;;  %v528_v43 = vadd.f32 %v627_v32, %v517_v40 }
  0xe4   : > { %v633_v44 = vpack.c.bf16 %v528_v43, %v528_v43 }
  0xe6   : > { %539 = vst.msk [vmem:[%s356_s17 + $0x4] sm:$0xf] %vm537_vm5, %v633_v44 }
  0xe7 PF: > { %s19_s30 = sadd.s32 1, %s679_s30  }
  0xe8   : > { %p16_p4 = scmp.ge.s32.totalorder %s19_s30, 4  }
  0xea   :  { %18 = sbr.rel (!%p16_p4) target bundleno = 1 (0x1), region = 89 }

// kernel: _lambda_.25
= control target key start
LH: loop header
LB: loop body
LE: loop exit
PB: predicated region body
PF: predicated region fallthrough
CT: control target
= control target key end

     0   :  { %s391_s12 = smov 0   ;;  %s417_s0 = inlined_call_operand.vmem [shape: bf16[32,32], index: 0, kind: input, shape index: {}]   ;;  %s418_s1 = inlined_call_operand.vmem [shape: bf16[32,32], index: 1, kind: input, shape index: {}]   ;;  %s419_s2 = inlined_call_operand.vmem [shape: f32[1,32], index: 2, kind: input, shape index: {}]   ;;  %s420_s3 = inlined_call_operand.vmem [shape: bf16[32,32], index: 3, kind: output, shape index: {}]  }
   0x1 LB: > { %s317_s13 = sadd.s32 4294967295, %s367_s12   ;;  %p321_p0 = scmp.ge.s32.totalorder %s367_s12, 1  ;;  %s367_s12 = sphi %s391_s12, %s13_s12  }
   0x2   : > { %p138_p1 = scmp.lt.s32.totalorder %s367_s12, 3 }
   0x4   : > { %p139_p2 = pnand %p321_p0, %p138_p1 }
   0x5   : > { %s322_s18 = sshll.u32 (!%p139_p2), %s317_s13, 1 }
   0x6   : > { %142 = sbr.rel (%p139_p2) target bundleno = 222 (0xde), region = 32  ;;  %p163_p3 = scmp.lt.s32.totalorder (!%p139_p2), %s322_s18, 3 }
   0xb   : > { %v358_v0 = vld [vmem:[%s418_s1 + $0x8] sm:$0xff]   ;;  %v369_v1 = vmov 0.0   ;;  %v359_v2 = vld [vmem:[%s418_s1] sm:$0xff]   ;;  %vm370_vm0 = vmmov 0   ;;  %s422_s18 = smov (!%p163_p3, %s322_s18), 3  ;;  %vm205_vm1 = vcmask 261120  }
   0xc   : > { %340 = vmatprep.subr.bf16.mxu0 %v369_v1  ;;  %344 = vmatprep.mubr.msk.bf16.mxu0 %vm370_vm0, %v369_v1  ;;  %s323_s19 = sshll.u32 %s422_s18, 2  ;;  %v326_v4 = vld [vmem:[%s419_s2] ss:$0 sm:$0xff]  ;;  %vm258_vm2 = vcmask 257024  }
   0xd   : > { %341 = vmatpush3.bf16.msra.mxu0 %v358_v0  ;;  %s166_s22 = scalar_lea.vmem %s417_s0, %s323_s19  ;;  %s172_s27 = scalar_lea.vmem %s420_s3, %s323_s19 }
   0xe   : > { %342 = vmatprep.subr.bf16.mxu0 %v369_v1  ;;  %v360_v3 = vld [vmem:[%s166_s22] sm:$0xff]  }
  0x11   : > { %343 = vmatpush3.bf16.msra.mxu0 %v359_v2 }
  0x14   : > { %345 = vmatmul.mubr.msk.bf16.vlgmr.msra.gmra.mxu0 %vm205_vm1, %v360_v3 }
  0xd4   : > { %v243_v5 = vpop.f32.mrf.mxu0 }
  0xd5   : > { %v244_v6 = vadd.f32 %v326_v4, %v243_v5 }
  0xd6   : > { %v346_v7 = vpop.f32.mrf.mxu0 }
  0xd7   : > { %v335_v8 = vpack.c.bf16 %v244_v6, %v244_v6 }
  0xd8   : > { %v246_v9 = vpop.f32.mrf.mxu0 }
  0xd9   : > { %259 = vst.msk [vmem:[%s172_s27] sm:$0xf] %vm258_vm2, %v335_v8  ;;  %v247_v10 = vadd.f32 %v326_v4, %v246_v9 }
  0xda   : > { %v347_v11 = vpop.f32.mrf.mxu0 }
  0xdb   : > { %v336_v12 = vpack.c.bf16 %v247_v10, %v247_v10 }
  0xdd   : > { %260 = vst.msk [vmem:[%s172_s27 + $0x4] sm:$0xf] %vm258_vm2, %v336_v12 }
  0xde PF: > { %s13_s12 = sadd.s32 1, %s367_s12  }
  0xdf   : > { %p10_p4 = scmp.ge.s32.totalorder %s13_s12, 4  }
  0xe1   :  { %12 = sbr.rel (!%p10_p4) target bundleno = 1 (0x1), region = 62 }

// kernel: _lambda_.26
= control target key start
LH: loop header
LB: loop body
LE: loop exit
PB: predicated region body
PF: predicated region fallthrough
CT: control target
= control target key end

     0   :  { %s960_s30 = smov 0   ;;  %s1077_s0 = inlined_call_operand.vmem [shape: bf16[128,8], index: 0, kind: input, shape index: {}]   ;;  %s1078_s1 = inlined_call_operand.vmem [shape: bf16[128,24], index: 1, kind: input, shape index: {}]   ;;  %s1079_s2 = inlined_call_operand.vmem [shape: bf16[8,36], index: 2, kind: input, shape index: {}]   ;;  %s1080_s3 = inlined_call_operand.vmem [shape: bf16[24,36], index: 3, kind: input, shape index: {}]   ;;  %s1081_s4 = inlined_call_operand.vmem [shape: f32[1,8], index: 4, kind: input, shape index: {}]   ;;  %s1082_s5 = inlined_call_operand.vmem [shape: f32[1,24], index: 5, kind: input, shape index: {}]   ;;  %s1083_s6 = inlined_call_operand.vmem [shape: f32[1,8], index: 6, kind: input, shape index: {}]   ;;  %s1084_s7 = inlined_call_operand.vmem [shape: f32[1,24], index: 7, kind: input, shape index: {}]   ;;  %s1085_s8 = inlined_call_operand.vmem [shape: f32[1,36], index: 8, kind: input, shape index: {}]   ;;  %s1086_s9 = inlined_call_operand.vmem [shape: bf16[128,36], index: 9, kind: output, shape index: {}]  }
   0x1 LB: > { %s775_s10 = sadd.s32 4294967295, %s908_s30   ;;  %p779_p0 = scmp.ge.s32.totalorder %s908_s30, 1  ;;  %s908_s30 = sphi %s960_s30, %s19_s30  }
   0x2   : > { %p299_p1 = scmp.lt.s32.totalorder %s908_s30, 3 }
   0x4   : > { %p300_p2 = pnand %p779_p0, %p299_p1 }
   0x5   : > { %s780_s17 = sshll.u32 (!%p300_p2), %s775_s10, 3 }
   0x6   : > { %303 = sbr.rel (%p300_p2) target bundleno = 242 (0xf2), region = 56  ;;  %p341_p3 = scmp.lt.s32.totalorder (!%p300_p2), %s780_s17, 15 }
   0xb   : > { %v900_v0 = vld [vmem:[%s1080_s3 + $0x8] ss:$0 sps:$4 sm:$0xff]   ;;  %vm501_vm0 = vcmask 1043456   ;;  %v901_v1 = vld [vmem:[%s1080_s3] sm:$0xff]   ;;  %s1088_s17 = smov (!%p341_p3, %s780_s17), 15  ;;  %vm488_vm1 = vcmask 195584  }
   0xc   : > { %v417_v2 = vld [vmem:[%s1079_s2] sm:$0xf]  ;;  %890 = vmatprep.subr.msk.bf16.mxu0 %vm501_vm0, %v900_v0  ;;  %v503_v3 = vsel %vm501_vm0, %v900_v0, 0  ;;  %s977_s18 = sshll.u32 %s1088_s17, 2  ;;  %vm570_vm2 = vcmask 64512   ;;  %vm698_vm3 = vcmask 289792  }
   0xd   : > { %891 = vmatprep.subr.msk.bf16.mxu1 %vm501_vm0, %v417_v2  ;;  %v584_v4 = vsel %vm501_vm0, %v417_v2, 0  ;;  %869 = vmatpush3.bf16.msra.mxu0 %v503_v3  ;;  %s983_s21 = scalar_lea.vmem %s1078_s1, %s977_s18  ;;  %v989_v6 = vld [vmem:[%s1082_s5] ss:$0 sm:$0xff]  ;;  %s995_s26 = scalar_lea.vmem %s1077_s0, %s977_s18 }
   0xe   : > { %881 = vmatpush3.bf16.msra.mxu1 %v584_v4  ;;  %870 = vmatprep.subr.bf16.mxu0 %v901_v1  ;;  %v836_v5 = vld [vmem:[%s983_s21] sm:$0xff]   ;;  %v854_v7 = vld [vmem:[%s983_s21 + $0x8] sm:$0xff]   ;;  %v855_v37 = vld [vmem:[%s983_s21 + $0x10] sm:$0xff]   ;;  %s1056_s17 = scalar_lea.vmem %s1086_s9, %s977_s18 }
   0xf   : > { %v837_v8 = vunpack.c.l.bf16 %v836_v5  ;;  %v838_v9 = vunpack.c.h.bf16 %v836_v5  ;;  %v820_v10 = vld [vmem:[%s995_s26] sm:$0xff]   ;;  %v841_v12 = vunpack.c.l.bf16 %v854_v7  ;;  %v842_v13 = vunpack.c.h.bf16 %v854_v7  ;;  %v851_v14 = vld [vmem:[%s995_s26 + $0x8] sm:$0xff]   ;;  %v852_v42 = vld [vmem:[%s995_s26 + $0x10] sm:$0xff]  }
  0x10   : > { %v1002_v11 = vld [vmem:[%s1081_s4] ss:$0 sm:$0xff]  ;;  %v821_v16 = vunpack.c.l.bf16 %v820_v10  ;;  %v822_v17 = vunpack.c.h.bf16 %v820_v10  ;;  %v825_v18 = vunpack.c.l.bf16 %v851_v14  ;;  %v826_v19 = vunpack.c.h.bf16 %v851_v14  ;;  %v856_v47 = vld [vmem:[%s983_s21 + $0x18] sm:$0xff]  }
  0x11   : > { %871 = vmatpush3.bf16.msra.mxu0 %v901_v1  ;;  %v1008_v15 = vld [vmem:[%s1084_s7] ss:$0 sm:$0xff]  ;;  %v441_v20 = vmul.f32 %v837_v8, %v989_v6  ;;  %v442_v21 = vmul.f32 %v838_v9, %v989_v6  ;;  %v443_v23 = vmul.f32 %v841_v12, %v989_v6  ;;  %v444_v24 = vmul.f32 %v842_v13, %v989_v6  ;;  %v853_v52 = vld [vmem:[%s995_s26 + $0x18] sm:$0xff]  }
  0x12   : > { %v787_v22 = vld [vmem:[%s1083_s6] ss:$0 sm:$0xff]  ;;  %v382_v25 = vmul.f32 %v821_v16, %v1002_v11  ;;  %v383_v26 = vmul.f32 %v822_v17, %v1002_v11  ;;  %v384_v27 = vmul.f32 %v825_v18, %v1002_v11  ;;  %v385_v28 = vmul.f32 %v826_v19, %v1002_v11 }
  0x13   : > { %v456_v29 = vadd.f32 %v1008_v15, %v441_v20  ;;  %v457_v30 = vadd.f32 %v1008_v15, %v442_v21  ;;  %v458_v31 = vadd.f32 %v1008_v15, %v443_v23  ;;  %v459_v32 = vadd.f32 %v1008_v15, %v444_v24 }
  0x14   : > { %v397_v33 = vadd.f32 %v787_v22, %v382_v25  ;;  %v398_v34 = vadd.f32 %v787_v22, %v383_v26  ;;  %v399_v35 = vadd.f32 %v787_v22, %v384_v27  ;;  %v400_v36 = vadd.f32 %v787_v22, %v385_v28 }
  0x15   : > { %v464_v38 = vmax.f32 %v456_v29, 0.0  ;;  %v465_v39 = vmax.f32 %v457_v30, 0.0  ;;  %v466_v40 = vmax.f32 %v458_v31, 0.0  ;;  %v467_v41 = vmax.f32 %v459_v32, 0.0 }
  0x16   : > { %v405_v43 = vmax.f32 %v397_v33, 0.0  ;;  %v406_v44 = vmax.f32 %v398_v34, 0.0  ;;  %v407_v45 = vmax.f32 %v399_v35, 0.0  ;;  %v408_v46 = vmax.f32 %v400_v36, 0.0 }
  0x17   : > { %v472_v48 = vpack.c.bf16 %v465_v39, %v464_v38  ;;  %v473_v49 = vpack.c.bf16 %v467_v41, %v466_v40  ;;  %v845_v50 = vunpack.c.l.bf16 %v855_v37  ;;  %v846_v51 = vunpack.c.h.bf16 %v855_v37 }
  0x18   : > { %v413_v53 = vpack.c.bf16 %v406_v44, %v405_v43  ;;  %v414_v54 = vpack.c.bf16 %v408_v46, %v407_v45  ;;  %v829_v55 = vunpack.c.l.bf16 %v852_v42  ;;  %v830_v56 = vunpack.c.h.bf16 %v852_v42 }
  0x19   : > { %872 = vmatprep.mubr.msk.bf16.mxu0 %vm488_vm1, %v472_v48  ;;  %v445_v57 = vmul.f32 %v845_v50, %v989_v6  ;;  %v446_v58 = vmul.f32 %v846_v51, %v989_v6  ;;  %v849_v59 = vunpack.c.l.bf16 %v856_v47  ;;  %v850_v60 = vunpack.c.h.bf16 %v856_v47 }
  0x1a   : > { %882 = vmatprep.mubr.msk.bf16.mxu1 %vm570_vm2, %v413_v53  ;;  %873 = vmatmul.mubr.msk.bf16.vlgmr.msra.gmra.mxu0 %vm488_vm1, %v473_v49  ;;  %v386_v61 = vmul.f32 %v829_v55, %v1002_v11  ;;  %v387_v62 = vmul.f32 %v830_v56, %v1002_v11  ;;  %v833_v63 = vunpack.c.l.bf16 %v853_v52  ;;  %v834_v0 = vunpack.c.h.bf16 %v853_v52 }
  0x1b   : > { %883 = vmatmul.mubr.msk.bf16.vlgmr.msra.gmra.mxu1 %vm570_vm2, %v414_v54  ;;  %v460_v1 = vadd.f32 %v1008_v15, %v445_v57  ;;  %v461_v2 = vadd.f32 %v1008_v15, %v446_v58  ;;  %v447_v3 = vmul.f32 %v849_v59, %v989_v6  ;;  %v448_v4 = vmul.f32 %v850_v60, %v989_v6 }
  0x1c   : > { %v401_v5 = vadd.f32 %v787_v22, %v386_v61  ;;  %v402_v7 = vadd.f32 %v787_v22, %v387_v62  ;;  %v388_v8 = vmul.f32 %v833_v63, %v1002_v11  ;;  %v389_v9 = vmul.f32 %v834_v0, %v1002_v11 }
  0x1d   : > { %v468_v10 = vmax.f32 %v460_v1, 0.0  ;;  %v469_v12 = vmax.f32 %v461_v2, 0.0  ;;  %v462_v13 = vadd.f32 %v1008_v15, %v447_v3  ;;  %v463_v14 = vadd.f32 %v1008_v15, %v448_v4 }
  0x1e   : > { %v409_v16 = vmax.f32 %v401_v5, 0.0  ;;  %v410_v17 = vmax.f32 %v402_v7, 0.0  ;;  %v403_v18 = vadd.f32 %v787_v22, %v388_v8  ;;  %v404_v19 = vadd.f32 %v787_v22, %v389_v9  ;;  %v800_v22 = vld [vmem:[%s1085_s8] ss:$0 sm:$0xff] }
  0x1f   : > { %v474_v20 = vpack.c.bf16 %v469_v12, %v468_v10  ;;  %v470_v21 = vmax.f32 %v462_v13, 0.0  ;;  %v471_v23 = vmax.f32 %v463_v14, 0.0 }
  0x20   : > { %v415_v6 = vpack.c.bf16 %v410_v17, %v409_v16  ;;  %v411_v24 = vmax.f32 %v403_v18, 0.0  ;;  %v412_v25 = vmax.f32 %v404_v19, 0.0 }
  0x21   : > { %876 = vmatprep.mubr.msk.bf16.mxu0 %vm488_vm1, %v474_v20  ;;  %v475_v11 = vpack.c.bf16 %v471_v23, %v470_v21 }
  0x22   : > { %886 = vmatprep.mubr.msk.bf16.mxu1 %vm570_vm2, %v415_v6  ;;  %v416_v26 = vpack.c.bf16 %v412_v25, %v411_v24 }
  0x23   : > { %877 = vmatmul.mubr.msk.bf16.gmra.mxu0 %vm488_vm1, %v475_v11 }
  0x24   : > { %887 = vmatmul.mubr.msk.bf16.gmra.mxu1 %vm570_vm2, %v416_v26 }
  0xda   : > { %v874_v15 = vpop.f32.mrf.mxu0 }
  0xdb   : > { %v884_v27 = vpop.f32.mrf.mxu1 }
  0xdc   : > { %v629_v28 = vadd.f32 %v884_v27, %v874_v15  ;;  %v539_v29 = vpop.f32.mrf.mxu0 }
  0xdd   : > { %v620_v30 = vpop.f32.mrf.mxu1 }
  0xde   : > { %v660_v31 = vadd.f32 %v800_v22, %v629_v28  ;;  %v621_v32 = vadd.f32 %v620_v30, %v539_v29  ;;  %v875_v33 = vpop.f32.mrf.mxu0 }
  0xdf   : > { %v885_v34 = vpop.f32.mrf.mxu1 }
  0xe0   : > { %v813_v35 = vpack.c.bf16 %v660_v31, %v660_v31  ;;  %v658_v36 = vadd.f32 %v800_v22, %v621_v32  ;;  %v632_v37 = vadd.f32 %v885_v34, %v875_v33  ;;  %v542_v38 = vpop.f32.mrf.mxu0 }
  0xe1   : > { %v623_v39 = vpop.f32.mrf.mxu1 }
  0xe2   : > { %701 = vst.msk [vmem:[%s1056_s17 + $0x8] sm:$0xf] %vm698_vm3, %v813_v35  ;;  %v811_v40 = vpack.c.bf16 %v658_v36, %v658_v36  ;;  %v661_v41 = vadd.f32 %v800_v22, %v632_v37  ;;  %v624_v42 = vadd.f32 %v623_v39, %v542_v38 }
  0xe3   : > { %v878_v43 = vpop.f32.mrf.mxu0 }
  0xe4   : > { %699 = vst.msk [vmem:[%s1056_s17] sm:$0xf] %vm698_vm3, %v811_v40  ;;  %v814_v44 = vpack.c.bf16 %v661_v41, %v661_v41  ;;  %v659_v45 = vadd.f32 %v800_v22, %v624_v42  ;;  %v888_v46 = vpop.f32.mrf.mxu1 }
  0xe5   : > { %v645_v47 = vadd.f32 %v888_v46, %v878_v43  ;;  %v555_v48 = vpop.f32.mrf.mxu0 }
  0xe6   : > { %702 = vst.msk [vmem:[%s1056_s17 + $0xc] sm:$0xf] %vm698_vm3, %v814_v44  ;;  %v812_v49 = vpack.c.bf16 %v659_v45, %v659_v45  ;;  %v636_v50 = vpop.f32.mrf.mxu1 }
  0xe7   : > { %v664_v51 = vadd.f32 %v800_v22, %v645_v47  ;;  %v637_v52 = vadd.f32 %v636_v50, %v555_v48  ;;  %v879_v53 = vpop.f32.mrf.mxu0 }
  0xe8   : > { %700 = vst.msk [vmem:[%s1056_s17 + $0x4] sm:$0xf] %vm698_vm3, %v812_v49  ;;  %v889_v54 = vpop.f32.mrf.mxu1 }
  0xe9   : > { %v817_v55 = vpack.c.bf16 %v664_v51, %v664_v51  ;;  %v662_v56 = vadd.f32 %v800_v22, %v637_v52  ;;  %v648_v57 = vadd.f32 %v889_v54, %v879_v53  ;;  %v558_v58 = vpop.f32.mrf.mxu0 }
  0xea   : > { %v639_v59 = vpop.f32.mrf.mxu1 }
  0xeb   : > { %705 = vst.msk [vmem:[%s1056_s17 + $0x18] sm:$0xf] %vm698_vm3, %v817_v55  ;;  %v815_v60 = vpack.c.bf16 %v662_v56, %v662_v56  ;;  %v665_v61 = vadd.f32 %v800_v22, %v648_v57  ;;  %v640_v62 = vadd.f32 %v639_v59, %v558_v58 }
  0xed   : > { %703 = vst.msk [vmem:[%s1056_s17 + $0x10] sm:$0xf] %vm698_vm3, %v815_v60  ;;  %v818_v63 = vpack.c.bf16 %v665_v61, %v665_v61  ;;  %v663_v0 = vadd.f32 %v800_v22, %v640_v62 }
  0xef   : > { %706 = vst.msk [vmem:[%s1056_s17 + $0x1c] sm:$0xf] %vm698_vm3, %v818_v63  ;;  %v816_v1 = vpack.c.bf16 %v663_v0, %v663_v0 }
  0xf1   : > { %704 = vst.msk [vmem:[%s1056_s17 + $0x14] sm:$0xf] %vm698_vm3, %v816_v1 }
  0xf2 PF: > { %s19_s30 = sadd.s32 1, %s908_s30  }
  0xf3   : > { %p16_p4 = scmp.ge.s32.totalorder %s19_s30, 4  }
  0xf5   :  { %18 = sbr.rel (!%p16_p4) target bundleno = 1 (0x1), region = 89 }

// kernel: _lambda_.27
= control target key start
LH: loop header
LB: loop body
LE: loop exit
PB: predicated region body
PF: predicated region fallthrough
CT: control target
= control target key end

     0   :  { %s1317_s25 = smov 0   ;;  %s1495_s0 = inlined_call_operand.vmem [shape: bf16[128,8], index: 0, kind: input, shape index: {}]   ;;  %s1496_s1 = inlined_call_operand.vmem [shape: bf16[128,24], index: 1, kind: input, shape index: {}]   ;;  %s1497_s2 = inlined_call_operand.vmem [shape: bf16[128,4], index: 2, kind: input, shape index: {}]   ;;  %s1498_s3 = inlined_call_operand.vmem [shape: bf16[8,36], index: 3, kind: input, shape index: {}]   ;;  %s1499_s4 = inlined_call_operand.vmem [shape: bf16[24,36], index: 4, kind: input, shape index: {}]   ;;  %s1500_s5 = inlined_call_operand.vmem [shape: bf16[4,36], index: 5, kind: input, shape index: {}]   ;;  %s1501_s6 = inlined_call_operand.vmem [shape: f32[1,8], index: 6, kind: input, shape index: {}]   ;;  %s1502_s7 = inlined_call_operand.vmem [shape: f32[1,24], index: 7, kind: input, shape index: {}]   ;;  %s1503_s8 = inlined_call_operand.vmem [shape: f32[1,4], index: 8, kind: input, shape index: {}]   ;;  %s1504_s9 = inlined_call_operand.vmem [shape: f32[1,8], index: 9, kind: input, shape index: {}]   ;;  %s1505_s10 = inlined_call_operand.vmem [shape: f32[1,24], index: 10, kind: input, shape index: {}]   ;;  %s1506_s11 = inlined_call_operand.vmem [shape: f32[1,4], index: 11, kind: input, shape index: {}]   ;;  %s1507_s12 = inlined_call_operand.vmem [shape: f32[1,36], index: 12, kind: input, shape index: {}]   ;;  %s1508_s13 = inlined_call_operand.vmem [shape: bf16[128,36], index: 13, kind: output, shape index: {}]  }
   0x1 LB: > { %s1066_s26 = sadd.s32 4294967295, %s1245_s25   ;;  %p1070_p0 = scmp.ge.s32.totalorder %s1245_s25, 1  ;;  %s1245_s25 = sphi %s1317_s25, %s23_s25  }
   0x2   : > { %p410_p1 = scmp.lt.s32.totalorder %s1245_s25, 3 }
   0x4   : > { %p411_p2 = pnand %p1070_p0, %p410_p1 }
   0x5   : > { %s1071_s16 = sshll.u32 (!%p411_p2), %s1066_s26, 3 }
   0x6   : > { %414 = sbr.rel (%p411_p2) target bundleno = 254 (0xfe), region = 72  ;;  %p465_p3 = scmp.lt.s32.totalorder (!%p411_p2), %s1071_s16, 15 }
   0xb   : > { %v1237_v0 = vld [vmem:[%s1499_s4 + $0x8] ss:$0 sps:$4 sm:$0xff]   ;;  %vm631_vm0 = vcmask 1043456   ;;  %v1238_v1 = vld [vmem:[%s1499_s4] sm:$0xff]   ;;  %vm853_vm1 = vcmask 1041408   ;;  %s1510_s16 = smov (!%p465_p3, %s1071_s16), 15 }
   0xc   : > { %v547_v2 = vld [vmem:[%s1498_s3] sm:$0xf]  ;;  %1225 = vmatprep.subr.msk.bf16.mxu0 %vm631_vm0, %v1237_v0  ;;  %v633_v3 = vsel %vm631_vm0, %v1237_v0, 0  ;;  %s1344_s19 = sshll.u32 %s1510_s16, 2  ;;  %vm618_vm2 = vcmask 195584   ;;  %vm700_vm3 = vcmask 64512  }
   0xd   : > { %1227 = vmatprep.subr.msk.bf16.mxu1 %vm631_vm0, %v547_v2  ;;  %v1338_v4 = vsel %vm631_vm0, %v547_v2, 0  ;;  %1192 = vmatpush3.bf16.msra.mxu0 %v633_v3  ;;  %v839_v5 = vld [vmem:[%s1500_s5] sm:$0x3]  ;;  %s1350_s22 = scalar_lea.vmem %s1496_s1, %s1344_s19  ;;  %s1363_s28 = scalar_lea.vmem %s1495_s0, %s1344_s19  ;;  %vm840_vm4 = vcmask 31744   ;;  %vm977_vm5 = vcmask 289792  }
   0xe   : > { %1224 = vmatpush3.bf16.msra.mxu1 %v1338_v4  ;;  %1193 = vmatprep.subr.bf16.mxu0 %v1238_v1  ;;  %v1135_v6 = vld [vmem:[%s1350_s22] sm:$0xff]   ;;  %v1169_v8 = vld [vmem:[%s1350_s22 + $0x8] sm:$0xff]   ;;  %v1366_v9 = vsel %vm853_vm1, %v839_v5, 0  ;;  %v1167_v13 = vld [vmem:[%s1363_s28 + $0x10] sm:$0xff]   ;;  %s1402_s21 = scalar_lea.vmem %s1497_s2, %s1344_s19  ;;  %s486_s14 = scalar_lea.vmem %s1508_s13, %s1344_s19 }
   0xf   : > { %1228 = vmatprep.subr.msk.bf16.mxu1 %vm853_vm1, %v839_v5  ;;  %v1357_v7 = vld [vmem:[%s1502_s7] ss:$0 sm:$0xff]  ;;  %v1136_v10 = vunpack.c.l.bf16 %v1135_v6  ;;  %v1137_v11 = vunpack.c.h.bf16 %v1135_v6  ;;  %v1166_v12 = vld [vmem:[%s1363_s28 + $0x8] sm:$0xff]   ;;  %v1140_v15 = vunpack.c.l.bf16 %v1169_v8  ;;  %v1141_v16 = vunpack.c.h.bf16 %v1169_v8  ;;  %v1168_v27 = vld [vmem:[%s1363_s28 + $0x18] sm:$0xff]  }
  0x10   : > { %v1373_v14 = vld [vmem:[%s1501_s6] ss:$0 sm:$0xff]  ;;  %v1124_v18 = vunpack.c.l.bf16 %v1166_v12  ;;  %v1125_v19 = vunpack.c.h.bf16 %v1166_v12  ;;  %v1128_v20 = vunpack.c.l.bf16 %v1167_v13  ;;  %v1129_v21 = vunpack.c.h.bf16 %v1167_v13  ;;  %v1170_v40 = vld [vmem:[%s1350_s22 + $0x10] sm:$0xff]   ;;  %v1171_v50 = vld [vmem:[%s1350_s22 + $0x18] sm:$0xff]  }
  0x11   : > { %1194 = vmatpush3.bf16.msra.mxu0 %v1238_v1  ;;  %v1378_v17 = vld [vmem:[%s1505_s10] ss:$0 sm:$0xff]  ;;  %v571_v22 = vmul.f32 %v1136_v10, %v1357_v7  ;;  %v572_v23 = vmul.f32 %v1137_v11, %v1357_v7  ;;  %v573_v25 = vmul.f32 %v1140_v15, %v1357_v7  ;;  %v574_v26 = vmul.f32 %v1141_v16, %v1357_v7  ;;  %v1172_v1 = vld [vmem:[%s1402_s21 + $0x8] sm:$0xff]  }
  0x12   : > { %1226 = vmatprep.subr.msk.bf16.mxu0 %vm631_vm0, %v547_v2  ;;  %v1385_v24 = vld [vmem:[%s1504_s9] ss:$0 sm:$0xff]  ;;  %v1391_v28 = vmul.f32 %v1124_v18, %v1373_v14  ;;  %v1394_v29 = vmul.f32 %v1125_v19, %v1373_v14  ;;  %v516_v30 = vmul.f32 %v1128_v20, %v1373_v14  ;;  %v517_v31 = vmul.f32 %v1129_v21, %v1373_v14 }
  0x13   : > { %v586_v32 = vadd.f32 %v1378_v17, %v571_v22  ;;  %v587_v33 = vadd.f32 %v1378_v17, %v572_v23  ;;  %v588_v34 = vadd.f32 %v1378_v17, %v573_v25  ;;  %v589_v35 = vadd.f32 %v1378_v17, %v574_v26  ;;  %v1151_v45 = vld [vmem:[%s1402_s21] sm:$0xff]  }
  0x14   : > { %v531_v36 = vadd.f32 %v1385_v24, %v516_v30  ;;  %v532_v37 = vadd.f32 %v1385_v24, %v517_v31  ;;  %v1132_v38 = vunpack.c.l.bf16 %v1168_v27  ;;  %v1133_v39 = vunpack.c.h.bf16 %v1168_v27  ;;  %v1418_v55 = vld [vmem:[%s1503_s8] ss:$0 sm:$0xff]  ;;  %v1173_v30 = vld [vmem:[%s1402_s21 + $0x10] sm:$0xff]  }
  0x15   : > { %v594_v41 = vmax.f32 %v586_v32, 0.0  ;;  %v595_v42 = vmax.f32 %v587_v33, 0.0  ;;  %v596_v43 = vmax.f32 %v588_v34, 0.0  ;;  %v597_v44 = vmax.f32 %v589_v35, 0.0  ;;  %v1428_v63 = vld [vmem:[%s1506_s11] ss:$0 sm:$0xff] }
  0x16   : > { %v539_v46 = vmax.f32 %v531_v36, 0.0  ;;  %v540_v47 = vmax.f32 %v532_v37, 0.0  ;;  %v518_v48 = vmul.f32 %v1132_v38, %v1373_v14  ;;  %v519_v49 = vmul.f32 %v1133_v39, %v1373_v14  ;;  %v1119_v19 = vld [vmem:[%s1363_s28] sm:$0xff]  }
  0x17   : > { %v602_v51 = vpack.c.bf16 %v595_v42, %v594_v41  ;;  %v603_v52 = vpack.c.bf16 %v597_v44, %v596_v43  ;;  %v1144_v53 = vunpack.c.l.bf16 %v1170_v40  ;;  %v1145_v54 = vunpack.c.h.bf16 %v1170_v40  ;;  %v1174_v41 = vld [vmem:[%s1402_s21 + $0x18] sm:$0xff]  }
  0x18   : > { %v545_v56 = vpack.c.bf16 %v540_v47, %v539_v46  ;;  %v533_v57 = vadd.f32 %v1385_v24, %v518_v48  ;;  %v534_v58 = vadd.f32 %v1385_v24, %v519_v49  ;;  %v1152_v59 = vunpack.c.l.bf16 %v1151_v45 }
  0x19   : > { %1195 = vmatprep.mubr.msk.bf16.mxu0 %vm618_vm2, %v602_v51  ;;  %v575_v60 = vmul.f32 %v1144_v53, %v1357_v7  ;;  %v576_v61 = vmul.f32 %v1145_v54, %v1357_v7  ;;  %v1153_v62 = vunpack.c.h.bf16 %v1151_v45  ;;  %v1148_v0 = vunpack.c.l.bf16 %v1171_v50 }
  0x1a   : > { %1209 = vmatprep.mubr.msk.bf16.mxu1 %vm700_vm3, %v545_v56  ;;  %1196 = vmatmul.mubr.msk.bf16.vlgmr.msra.gmra.mxu0 %vm618_vm2, %v603_v52  ;;  %v541_v2 = vmax.f32 %v533_v57, 0.0  ;;  %v542_v3 = vmax.f32 %v534_v58, 0.0  ;;  %v804_v5 = vmul.f32 %v1152_v59, %v1418_v55  ;;  %v1149_v6 = vunpack.c.h.bf16 %v1171_v50 }
  0x1b   : > { %1204 = vmatpush3.bf16.msra.mxu0 %v1338_v4  ;;  %v590_v8 = vadd.f32 %v1378_v17, %v575_v60  ;;  %v591_v10 = vadd.f32 %v1378_v17, %v576_v61  ;;  %v805_v11 = vmul.f32 %v1153_v62, %v1418_v55  ;;  %v577_v12 = vmul.f32 %v1148_v0, %v1357_v7 }
  0x1c   : > { %v546_v13 = vpack.c.bf16 %v542_v3, %v541_v2  ;;  %v819_v15 = vadd.f32 %v1428_v63, %v804_v5  ;;  %v578_v16 = vmul.f32 %v1149_v6, %v1357_v7  ;;  %v1156_v18 = vunpack.c.l.bf16 %v1172_v1 }
  0x1d   : > { %v598_v20 = vmax.f32 %v590_v8, 0.0  ;;  %v599_v21 = vmax.f32 %v591_v10, 0.0  ;;  %v820_v4 = vadd.f32 %v1428_v63, %v805_v11  ;;  %v592_v22 = vadd.f32 %v1378_v17, %v577_v12 }
  0x1e   : > { %1210 = vmatmul.mubr.msk.bf16.vlgmr.msra.gmra.mxu1 %vm700_vm3, %v546_v13  ;;  %v827_v23 = vmax.f32 %v819_v15, 0.0  ;;  %v593_v25 = vadd.f32 %v1378_v17, %v578_v16  ;;  %v1157_v26 = vunpack.c.h.bf16 %v1172_v1  ;;  %v806_v27 = vmul.f32 %v1156_v18, %v1418_v55 }
  0x1f   : > { %1214 = vmatpush3.bf16.msra.mxu1 %v1366_v9  ;;  %v604_v7 = vpack.c.bf16 %v599_v21, %v598_v20  ;;  %v828_v31 = vmax.f32 %v820_v4, 0.0  ;;  %v600_v32 = vmax.f32 %v592_v22, 0.0  ;;  %v1120_v33 = vunpack.c.l.bf16 %v1119_v19 }
  0x20   : > { %v601_v34 = vmax.f32 %v593_v25, 0.0  ;;  %v807_v35 = vmul.f32 %v1157_v26, %v1418_v55  ;;  %v821_v36 = vadd.f32 %v1428_v63, %v806_v27  ;;  %v1121_v37 = vunpack.c.h.bf16 %v1119_v19 }
  0x21   : > { %1199 = vmatprep.mubr.msk.bf16.mxu0 %vm618_vm2, %v604_v7  ;;  %v835_v17 = vpack.c.bf16 %v828_v31, %v827_v23  ;;  %v512_v38 = vmul.f32 %v1120_v33, %v1373_v14  ;;  %v1160_v39 = vunpack.c.l.bf16 %v1173_v30  ;;  %v1161_v40 = vunpack.c.h.bf16 %v1173_v30 }
  0x22   : > { %v605_v42 = vpack.c.bf16 %v601_v34, %v600_v32  ;;  %v822_v9 = vadd.f32 %v1428_v63, %v807_v35  ;;  %v829_v43 = vmax.f32 %v821_v36, 0.0  ;;  %v513_v44 = vmul.f32 %v1121_v37, %v1373_v14  ;;  %v1099_v34 = vld [vmem:[%s1507_s12] ss:$0 sm:$0xff] }
  0x23   : > { %1215 = vmatprep.mubr.msk.bf16.mxu1 %vm840_vm4, %v835_v17  ;;  %v527_v45 = vadd.f32 %v1385_v24, %v512_v38  ;;  %v808_v46 = vmul.f32 %v1160_v39, %v1418_v55  ;;  %v809_v47 = vmul.f32 %v1161_v40, %v1418_v55  ;;  %v529_v48 = vadd.f32 %v1385_v24, %v1391_v28 }
  0x24   : > { %1200 = vmatmul.mubr.msk.bf16.gmra.mxu0 %vm618_vm2, %v605_v42  ;;  %v830_v49 = vmax.f32 %v822_v9, 0.0  ;;  %v528_v50 = vadd.f32 %v1385_v24, %v513_v44  ;;  %v530_v51 = vadd.f32 %v1385_v24, %v1394_v29  ;;  %v1164_v14 = vunpack.c.l.bf16 %v1174_v41 }
  0x25   : > { %v535_v52 = vmax.f32 %v527_v45, 0.0  ;;  %v823_v53 = vadd.f32 %v1428_v63, %v808_v46  ;;  %v824_v54 = vadd.f32 %v1428_v63, %v809_v47  ;;  %v537_v56 = vmax.f32 %v529_v48, 0.0 }
  0x26   : > { %v836_v57 = vpack.c.bf16 %v830_v49, %v829_v43  ;;  %v536_v58 = vmax.f32 %v528_v50, 0.0  ;;  %v538_v59 = vmax.f32 %v530_v51, 0.0  ;;  %v1165_v60 = vunpack.c.h.bf16 %v1174_v41 }
  0x27   : > { %v831_v28 = vmax.f32 %v823_v53, 0.0  ;;  %v832_v61 = vmax.f32 %v824_v54, 0.0  ;;  %v810_v62 = vmul.f32 %v1164_v14, %v1418_v55 }
  0x28   : > { %1216 = vmatmul.mubr.msk.bf16.vlgmr.msra.gmra.mxu1 %vm840_vm4, %v836_v57  ;;  %v543_v0 = vpack.c.bf16 %v536_v58, %v535_v52  ;;  %v544_v1 = vpack.c.bf16 %v538_v59, %v537_v56  ;;  %v811_v24 = vmul.f32 %v1165_v60, %v1418_v55 }
  0x29   : > { %v837_v29 = vpack.c.bf16 %v832_v61, %v831_v28  ;;  %v825_v2 = vadd.f32 %v1428_v63, %v810_v62 }
  0x2a   : > { %1205 = vmatprep.mubr.msk.bf16.mxu0 %vm700_vm3, %v543_v0  ;;  %v826_v3 = vadd.f32 %v1428_v63, %v811_v24 }
  0x2b   : > { %1219 = vmatprep.mubr.msk.bf16.mxu1 %vm840_vm4, %v837_v29  ;;  %v833_v5 = vmax.f32 %v825_v2, 0.0 }
  0x2c   : > { %1206 = vmatmul.mubr.msk.bf16.vlgmr.msra.gmra.mxu0 %vm700_vm3, %v544_v1  ;;  %v834_v6 = vmax.f32 %v826_v3, 0.0 }
  0x2e   : > { %v838_v8 = vpack.c.bf16 %v834_v6, %v833_v5 }
  0x30   : > { %1220 = vmatmul.mubr.msk.bf16.gmra.mxu1 %vm840_vm4, %v838_v8 }
  0xda   : > { %v1197_v10 = vpop.f32.mrf.mxu0 }
  0xdc   : > { %v669_v11 = vpop.f32.mrf.mxu0 }
  0xde   : > { %v1211_v12 = vpop.f32.mrf.mxu1  ;;  %v1198_v55 = vpop.f32.mrf.mxu0 }
  0xe0   : > { %v766_v13 = vpop.f32.mrf.mxu1  ;;  %v672_v15 = vpop.f32.mrf.mxu0 }
  0xe2   : > { %v1212_v16 = vpop.f32.mrf.mxu1 }
  0xe4   : > { %v769_v18 = vpop.f32.mrf.mxu1  ;;  %v1201_v19 = vpop.f32.mrf.mxu0 }
  0xe5   : > { %v775_v7 = vadd.f32 %v1211_v12, %v1201_v19 }
  0xe6   : > { %v685_v20 = vpop.f32.mrf.mxu0 }
  0xe7   : > { %v767_v33 = vadd.f32 %v766_v13, %v685_v20 }
  0xe8   : > { %v1217_v63 = vpop.f32.mrf.mxu1  ;;  %v1202_v21 = vpop.f32.mrf.mxu0 }
  0xe9   : > { %v778_v40 = vadd.f32 %v1212_v16, %v1202_v21 }
  0xea   : > { %v891_v4 = vpop.f32.mrf.mxu1  ;;  %v688_v22 = vpop.f32.mrf.mxu0 }
  0xeb   : > { %v770_v46 = vadd.f32 %v769_v18, %v688_v22 }
  0xec   : > { %v1218_v23 = vpop.f32.mrf.mxu1  ;;  %v1207_v25 = vpop.f32.mrf.mxu0 }
  0xed   : > { %v759_v26 = vadd.f32 %v1207_v25, %v1197_v10 }
  0xee   : > { %v894_v27 = vpop.f32.mrf.mxu1  ;;  %v750_v30 = vpop.f32.mrf.mxu0 }
  0xef   : > { %v924_v31 = vadd.f32 %v1217_v63, %v759_v26  ;;  %v751_v32 = vadd.f32 %v750_v30, %v669_v11 }
  0xf0   : > { %v1221_v35 = vpop.f32.mrf.mxu1  ;;  %v1208_v36 = vpop.f32.mrf.mxu0 }
  0xf1   : > { %v939_v37 = vadd.f32 %v1099_v34, %v924_v31  ;;  %v928_v17 = vadd.f32 %v1221_v35, %v775_v7  ;;  %v922_v38 = vadd.f32 %v891_v4, %v751_v32  ;;  %v762_v39 = vadd.f32 %v1208_v36, %v1198_v55 }
  0xf2   : > { %v907_v41 = vpop.f32.mrf.mxu1  ;;  %v753_v42 = vpop.f32.mrf.mxu0 }
  0xf3   : > { %v1112_v9 = vpack.c.bf16 %v939_v37, %v939_v37  ;;  %v943_v43 = vadd.f32 %v1099_v34, %v928_v17  ;;  %v937_v44 = vadd.f32 %v1099_v34, %v922_v38  ;;  %v926_v45 = vadd.f32 %v907_v41, %v767_v33 }
  0xf4   : > { %v925_v47 = vadd.f32 %v1218_v23, %v762_v39  ;;  %v1222_v48 = vpop.f32.mrf.mxu1  ;;  %v754_v49 = vadd.f32 %v753_v42, %v672_v15 }
  0xf5   : > { %980 = vst.msk [vmem:[%s486_s14 + $0x8] sm:$0xf] %vm977_vm5, %v1112_v9  ;;  %v1116_v50 = vpack.c.bf16 %v943_v43, %v943_v43  ;;  %v1110_v51 = vpack.c.bf16 %v937_v44, %v937_v44  ;;  %v941_v14 = vadd.f32 %v1099_v34, %v926_v45  ;;  %v929_v52 = vadd.f32 %v1222_v48, %v778_v40 }
  0xf6   : > { %v940_v53 = vadd.f32 %v1099_v34, %v925_v47  ;;  %v923_v54 = vadd.f32 %v894_v27, %v754_v49  ;;  %v910_v56 = vpop.f32.mrf.mxu1 }
  0xf7   : > { %984 = vst.msk [vmem:[%s486_s14 + $0x18] sm:$0xf] %vm977_vm5, %v1116_v50  ;;  %978 = vst.msk [vmem:[%s486_s14] sm:$0xf] %vm977_vm5, %v1110_v51  ;;  %v1114_v57 = vpack.c.bf16 %v941_v14, %v941_v14  ;;  %v944_v58 = vadd.f32 %v1099_v34, %v929_v52  ;;  %v927_v59 = vadd.f32 %v910_v56, %v770_v46 }
  0xf8   : > { %v1113_v60 = vpack.c.bf16 %v940_v53, %v940_v53  ;;  %v938_v28 = vadd.f32 %v1099_v34, %v923_v54 }
  0xf9   : > { %982 = vst.msk [vmem:[%s486_s14 + $0x10] sm:$0xf] %vm977_vm5, %v1114_v57  ;;  %v1117_v61 = vpack.c.bf16 %v944_v58, %v944_v58  ;;  %v942_v62 = vadd.f32 %v1099_v34, %v927_v59 }
  0xfa   : > { %981 = vst.msk [vmem:[%s486_s14 + $0xc] sm:$0xf] %vm977_vm5, %v1113_v60  ;;  %v1111_v0 = vpack.c.bf16 %v938_v28, %v938_v28 }
  0xfb   : > { %985 = vst.msk [vmem:[%s486_s14 + $0x1c] sm:$0xf] %vm977_vm5, %v1117_v61  ;;  %v1115_v1 = vpack.c.bf16 %v942_v62, %v942_v62 }
  0xfc   : > { %979 = vst.msk [vmem:[%s486_s14 + $0x4] sm:$0xf] %vm977_vm5, %v1111_v0 }
  0xfd   : > { %983 = vst.msk [vmem:[%s486_s14 + $0x14] sm:$0xf] %vm977_vm5, %v1115_v1 }
  0xfe PF: > { %s23_s25 = sadd.s32 1, %s1245_s25  }
  0xff   : > { %p20_p4 = scmp.ge.s32.totalorder %s23_s25, 4  }
 0x101   :  { %22 = sbr.rel (!%p20_p4) target bundleno = 1 (0x1), region = 108 }

// kernel: _lambda_.28
= control target key start
LH: loop header
LB: loop body
LE: loop exit
PB: predicated region body
PF: predicated region fallthrough
CT: control target
= control target key end

     0   :  { %s503_s12 = smov 0   ;;  %s537_s0 = inlined_call_operand.vmem [shape: bf16[128,32], index: 0, kind: input, shape index: {}]   ;;  %s538_s1 = inlined_call_operand.vmem [shape: bf16[32,32], index: 1, kind: input, shape index: {}]   ;;  %s539_s2 = inlined_call_operand.vmem [shape: f32[1,32], index: 2, kind: input, shape index: {}]   ;;  %s540_s3 = inlined_call_operand.vmem [shape: bf16[128,32], index: 3, kind: output, shape index: {}]  }
   0x1 LB: > { %s401_s13 = sadd.s32 4294967295, %s481_s12   ;;  %p405_p0 = scmp.ge.s32.totalorder %s481_s12, 1  ;;  %s481_s12 = sphi %s503_s12, %s13_s12  }
   0x2   : > { %p138_p1 = scmp.lt.s32.totalorder %s481_s12, 3 }
   0x4   : > { %p139_p2 = pnand %p405_p0, %p138_p1 }
   0x5   : > { %s406_s16 = sshll.u32 (!%p139_p2), %s401_s13, 3 }
   0x6   : > { %142 = sbr.rel (%p139_p2) target bundleno = 224 (0xe0), region = 32  ;;  %p163_p3 = scmp.lt.s32.totalorder (!%p139_p2), %s406_s16, 15 }
   0xb   : > { %v469_v0 = vld [vmem:[%s538_s1 + $0x8] sm:$0xff]   ;;  %v470_v1 = vld [vmem:[%s538_s1] sm:$0xff]   ;;  %s542_s16 = smov (!%p163_p3, %s406_s16), 15  ;;  %vm226_vm0 = vcmask 261120   ;;  %vm336_vm1 = vcmask 257024  }
   0xc   : > { %445 = vmatprep.subr.bf16.mxu0 %v469_v0  ;;  %457 = vmatprep.subr.bf16.mxu1 %v469_v0  ;;  %s407_s19 = sshll.u32 %s542_s16, 2  ;;  %v410_v6 = vld [vmem:[%s539_s2] ss:$0 sm:$0xff] }
   0xd   : > { %446 = vmatpush3.bf16.msra.mxu0 %v469_v0  ;;  %459 = vmatpush3.bf16.msra.mxu1 %v469_v0  ;;  %s166_s22 = scalar_lea.vmem %s537_s0, %s407_s19  ;;  %s172_s27 = scalar_lea.vmem %s540_s3, %s407_s19 }
   0xe   : > { %447 = vmatprep.subr.bf16.mxu0 %v470_v1  ;;  %458 = vmatprep.subr.bf16.mxu1 %v470_v1  ;;  %v471_v2 = vld [vmem:[%s166_s22] sm:$0xff]   ;;  %v472_v3 = vld [vmem:[%s166_s22 + $0x10] sm:$0xff]   ;;  %v473_v4 = vld [vmem:[%s166_s22 + $0x8] sm:$0xff]  }
   0xf   : > { %449 = vmatprep.mubr.msk.bf16.mxu0 %vm226_vm0, %v471_v2  ;;  %453 = vmatprep.mubr.msk.bf16.mxu1 %vm226_vm0, %v472_v3  ;;  %v474_v5 = vld [vmem:[%s166_s22 + $0x18] sm:$0xff]  }
  0x11   : > { %448 = vmatpush3.bf16.msra.mxu0 %v470_v1  ;;  %460 = vmatpush3.bf16.msra.mxu1 %v470_v1 }
  0x14   : > { %450 = vmatmul.mubr.msk.bf16.vlgmr.msra.gmra.mxu0 %vm226_vm0, %v473_v4  ;;  %454 = vmatmul.mubr.msk.bf16.vlgmr.msra.gmra.mxu1 %vm226_vm0, %v474_v5 }
  0xd4   : > { %v451_v7 = vpop.f32.mrf.mxu0  ;;  %v455_v9 = vpop.f32.mrf.mxu1 }
  0xd5   : > { %v282_v8 = vadd.f32 %v451_v7, %v410_v6  ;;  %v298_v10 = vadd.f32 %v455_v9, %v410_v6 }
  0xd6   : > { %v273_v11 = vpop.f32.mrf.mxu0  ;;  %v289_v14 = vpop.f32.mrf.mxu1 }
  0xd7   : > { %v433_v12 = vpack.c.bf16 %v282_v8, %v282_v8  ;;  %v274_v13 = vadd.f32 %v410_v6, %v273_v11  ;;  %v437_v15 = vpack.c.bf16 %v298_v10, %v298_v10  ;;  %v290_v16 = vadd.f32 %v410_v6, %v289_v14 }
  0xd8   : > { %v452_v17 = vpop.f32.mrf.mxu0  ;;  %v456_v20 = vpop.f32.mrf.mxu1 }
  0xd9   : > { %339 = vst.msk [vmem:[%s172_s27 + $0x8] sm:$0xf] %vm336_vm1, %v433_v12  ;;  %v431_v18 = vpack.c.bf16 %v274_v13, %v274_v13  ;;  %v285_v19 = vadd.f32 %v452_v17, %v410_v6  ;;  %343 = vst.msk [vmem:[%s172_s27 + $0x18] sm:$0xf] %vm336_vm1, %v437_v15  ;;  %v435_v21 = vpack.c.bf16 %v290_v16, %v290_v16 }
  0xda   : > { %v301_v22 = vadd.f32 %v456_v20, %v410_v6  ;;  %v276_v23 = vpop.f32.mrf.mxu0  ;;  %v292_v26 = vpop.f32.mrf.mxu1 }
  0xdb   : > { %337 = vst.msk [vmem:[%s172_s27] sm:$0xf] %vm336_vm1, %v431_v18  ;;  %v434_v24 = vpack.c.bf16 %v285_v19, %v285_v19  ;;  %v277_v25 = vadd.f32 %v410_v6, %v276_v23  ;;  %341 = vst.msk [vmem:[%s172_s27 + $0x10] sm:$0xf] %vm336_vm1, %v435_v21  ;;  %v293_v28 = vadd.f32 %v410_v6, %v292_v26 }
  0xdc   : > { %v438_v27 = vpack.c.bf16 %v301_v22, %v301_v22 }
  0xdd   : > { %340 = vst.msk [vmem:[%s172_s27 + $0xc] sm:$0xf] %vm336_vm1, %v434_v24  ;;  %v432_v29 = vpack.c.bf16 %v277_v25, %v277_v25  ;;  %v436_v30 = vpack.c.bf16 %v293_v28, %v293_v28 }
  0xde   : > { %344 = vst.msk [vmem:[%s172_s27 + $0x1c] sm:$0xf] %vm336_vm1, %v438_v27 }
  0xdf   : > { %338 = vst.msk [vmem:[%s172_s27 + $0x4] sm:$0xf] %vm336_vm1, %v432_v29  ;;  %342 = vst.msk [vmem:[%s172_s27 + $0x14] sm:$0xf] %vm336_vm1, %v436_v30 }
  0xe0 PF: > { %s13_s12 = sadd.s32 1, %s481_s12  }
  0xe1   : > { %p10_p4 = scmp.ge.s32.totalorder %s13_s12, 4  }
  0xe3   :  { %12 = sbr.rel (!%p10_p4) target bundleno = 1 (0x1), region = 62 }

// kernel: _lambda_.29
= control target key start
LH: loop header
LB: loop body
LE: loop exit
PB: predicated region body
PF: predicated region fallthrough
CT: control target
= control target key end

     0   :  { %s1883_s30 = smov 0   ;;  %s2233_s0 = inlined_call_operand.vmem [shape: bf16[512,8], index: 0, kind: input, shape index: {}]   ;;  %s2234_s1 = inlined_call_operand.vmem [shape: bf16[512,16], index: 1, kind: input, shape index: {}]   ;;  %s2235_s2 = inlined_call_operand.vmem [shape: bf16[8,36], index: 2, kind: input, shape index: {}]   ;;  %s2236_s3 = inlined_call_operand.vmem [shape: bf16[16,36], index: 3, kind: input, shape index: {}]   ;;  %s2237_s4 = inlined_call_operand.vmem [shape: f32[1,8], index: 4, kind: input, shape index: {}]   ;;  %s2238_s5 = inlined_call_operand.vmem [shape: f32[1,16], index: 5, kind: input, shape index: {}]   ;;  %s2239_s6 = inlined_call_operand.vmem [shape: f32[1,8], index: 6, kind: input, shape index: {}]   ;;  %s2240_s7 = inlined_call_operand.vmem [shape: f32[1,16], index: 7, kind: input, shape index: {}]   ;;  %s2241_s8 = inlined_call_operand.vmem [shape: f32[1,36], index: 8, kind: input, shape index: {}]   ;;  %s2242_s9 = inlined_call_operand.vmem [shape: bf16[512,36], index: 9, kind: output, shape index: {}]  }
   0x1 LB: > { %s1440_s10 = sadd.s32 4294967295, %s1831_s30   ;;  %p1444_p0 = scmp.ge.s32.totalorder %s1831_s30, 1  ;;  %s1831_s30 = sphi %s1883_s30, %s19_s30  }
   0x2   : > { %p299_p1 = scmp.lt.s32.totalorder %s1831_s30, 3 }
   0x4   : > { %p300_p2 = pnand %p1444_p0, %p299_p1 }
   0x5   : > { %s1445_s15 = sshll.u32 (!%p300_p2), %s1440_s10, 5 }
   0x6   : > { %303 = sbr.rel (%p300_p2) target bundleno = 298 (0x12a), region = 56  ;;  %p341_p3 = scmp.lt.s32.totalorder (!%p300_p2), %s1445_s15, 63 }
   0xb   : > { %v1824_v0 = vld [vmem:[%s2236_s3] sm:$0xff]   ;;  %vm1007_vm0 = vcmask 1043456   ;;  %s2244_s15 = smov (!%p341_p3, %s1445_s15), 63  ;;  %vm748_vm1 = vcmask 130048   ;;  %vm958_vm2 = vcmask 64512   ;;  %vm1339_vm3 = vcmask 289792  }
   0xc   : > { %v549_v1 = vld [vmem:[%s2235_s2] sm:$0xf]  ;;  %1747 = vmatprep.subr.bf16.mxu0 %v1824_v0  ;;  %s1897_s16 = sshll.u32 %s2244_s15, 2 }
   0xd   : > { %1815 = vmatprep.subr.msk.bf16.mxu1 %vm1007_vm0, %v549_v1  ;;  %v1009_v2 = vsel %vm1007_vm0, %v549_v1, 0  ;;  %1748 = vmatpush3.bf16.msra.mxu0 %v1824_v0  ;;  %s1903_s19 = scalar_lea.vmem %s2234_s1, %s1897_s16  ;;  %v1909_v4 = vld [vmem:[%s2238_s5] ss:$0 sm:$0xff]  ;;  %s1915_s24 = scalar_lea.vmem %s2233_s0, %s1897_s16 }
   0xe   : > { %1782 = vmatpush3.bf16.msra.mxu1 %v1009_v2  ;;  %v1620_v3 = vld [vmem:[%s1903_s19] sm:$0xff]   ;;  %v1698_v5 = vld [vmem:[%s1903_s19 + $0x8] sm:$0xff]   ;;  %v1699_v35 = vld [vmem:[%s1903_s19 + $0x10] sm:$0xff]   ;;  %s2133_s15 = scalar_lea.vmem %s2242_s9, %s1897_s16 }
   0xf   : > { %v1621_v6 = vunpack.c.l.bf16 %v1620_v3  ;;  %v1622_v7 = vunpack.c.h.bf16 %v1620_v3  ;;  %v1556_v8 = vld [vmem:[%s1915_s24] sm:$0xff]   ;;  %v1625_v10 = vunpack.c.l.bf16 %v1698_v5  ;;  %v1626_v11 = vunpack.c.h.bf16 %v1698_v5  ;;  %v1683_v12 = vld [vmem:[%s1915_s24 + $0x8] sm:$0xff]   ;;  %v1684_v40 = vld [vmem:[%s1915_s24 + $0x10] sm:$0xff]  }
  0x10   : > { %v1922_v9 = vld [vmem:[%s2237_s4] ss:$0 sm:$0xff]  ;;  %v1557_v14 = vunpack.c.l.bf16 %v1556_v8  ;;  %v1558_v15 = vunpack.c.h.bf16 %v1556_v8  ;;  %v1561_v16 = vunpack.c.l.bf16 %v1683_v12  ;;  %v1562_v17 = vunpack.c.h.bf16 %v1683_v12  ;;  %v1700_v45 = vld [vmem:[%s1903_s19 + $0x18] sm:$0xff]  }
  0x11   : > { %v1928_v13 = vld [vmem:[%s2240_s7] ss:$0 sm:$0xff]  ;;  %v621_v18 = vmul.f32 %v1621_v6, %v1909_v4  ;;  %v622_v19 = vmul.f32 %v1622_v7, %v1909_v4  ;;  %v623_v21 = vmul.f32 %v1625_v10, %v1909_v4  ;;  %v624_v22 = vmul.f32 %v1626_v11, %v1909_v4  ;;  %v1685_v50 = vld [vmem:[%s1915_s24 + $0x18] sm:$0xff]  }
  0x12   : > { %v1935_v20 = vld [vmem:[%s2239_s6] ss:$0 sm:$0xff]  ;;  %v430_v23 = vmul.f32 %v1557_v14, %v1922_v9  ;;  %v431_v24 = vmul.f32 %v1558_v15, %v1922_v9  ;;  %v432_v25 = vmul.f32 %v1561_v16, %v1922_v9  ;;  %v433_v26 = vmul.f32 %v1562_v17, %v1922_v9 }
  0x13   : > { %v660_v27 = vadd.f32 %v1928_v13, %v621_v18  ;;  %v661_v28 = vadd.f32 %v1928_v13, %v622_v19  ;;  %v662_v29 = vadd.f32 %v1928_v13, %v623_v21  ;;  %v663_v30 = vadd.f32 %v1928_v13, %v624_v22  ;;  %v1701_v8 = vld [vmem:[%s1903_s19 + $0x20] sm:$0xff]  }
  0x14   : > { %v469_v31 = vadd.f32 %v1935_v20, %v430_v23  ;;  %v470_v32 = vadd.f32 %v1935_v20, %v431_v24  ;;  %v471_v33 = vadd.f32 %v1935_v20, %v432_v25  ;;  %v472_v34 = vadd.f32 %v1935_v20, %v433_v26  ;;  %v1686_v19 = vld [vmem:[%s1915_s24 + $0x20] sm:$0xff]   ;;  %v1702_v25 = vld [vmem:[%s1903_s19 + $0x28] sm:$0xff]  }
  0x15   : > { %v692_v36 = vmax.f32 %v660_v27, 0.0  ;;  %v693_v37 = vmax.f32 %v661_v28, 0.0  ;;  %v694_v38 = vmax.f32 %v662_v29, 0.0  ;;  %v695_v39 = vmax.f32 %v663_v30, 0.0  ;;  %v1687_v30 = vld [vmem:[%s1915_s24 + $0x28] sm:$0xff]  }
  0x16   : > { %v501_v41 = vmax.f32 %v469_v31, 0.0  ;;  %v502_v42 = vmax.f32 %v470_v32, 0.0  ;;  %v503_v43 = vmax.f32 %v471_v33, 0.0  ;;  %v504_v44 = vmax.f32 %v472_v34, 0.0 }
  0x17   : > { %v724_v46 = vpack.c.bf16 %v693_v37, %v692_v36  ;;  %v725_v47 = vpack.c.bf16 %v695_v39, %v694_v38  ;;  %v1629_v48 = vunpack.c.l.bf16 %v1699_v35  ;;  %v1630_v49 = vunpack.c.h.bf16 %v1699_v35 }
  0x18   : > { %v533_v51 = vpack.c.bf16 %v502_v42, %v501_v41  ;;  %v534_v52 = vpack.c.bf16 %v504_v44, %v503_v43  ;;  %v1565_v53 = vunpack.c.l.bf16 %v1684_v40  ;;  %v1566_v54 = vunpack.c.h.bf16 %v1684_v40 }
  0x19   : > { %1749 = vmatprep.mubr.msk.bf16.mxu0 %vm748_vm1, %v724_v46  ;;  %v625_v55 = vmul.f32 %v1629_v48, %v1909_v4  ;;  %v626_v56 = vmul.f32 %v1630_v49, %v1909_v4  ;;  %v1633_v57 = vunpack.c.l.bf16 %v1700_v45  ;;  %v1634_v58 = vunpack.c.h.bf16 %v1700_v45 }
  0x1a   : > { %1783 = vmatprep.mubr.msk.bf16.mxu1 %vm958_vm2, %v533_v51  ;;  %1750 = vmatmul.mubr.msk.bf16.vlgmr.msra.gmra.mxu0 %vm748_vm1, %v725_v47  ;;  %v434_v59 = vmul.f32 %v1565_v53, %v1922_v9  ;;  %v435_v60 = vmul.f32 %v1566_v54, %v1922_v9  ;;  %v1569_v61 = vunpack.c.l.bf16 %v1685_v50  ;;  %v1570_v62 = vunpack.c.h.bf16 %v1685_v50  ;;  %v1703_v47 = vld [vmem:[%s1903_s19 + $0x30] sm:$0xff]  }
  0x1b   : > { %1784 = vmatmul.mubr.msk.bf16.vlgmr.msra.gmra.mxu1 %vm958_vm2, %v534_v52  ;;  %v664_v63 = vadd.f32 %v1928_v13, %v625_v55  ;;  %v665_v0 = vadd.f32 %v1928_v13, %v626_v56  ;;  %v627_v1 = vmul.f32 %v1633_v57, %v1909_v4  ;;  %v628_v2 = vmul.f32 %v1634_v58, %v1909_v4 }
  0x1c   : > { %v473_v3 = vadd.f32 %v1935_v20, %v434_v59  ;;  %v474_v5 = vadd.f32 %v1935_v20, %v435_v60  ;;  %v436_v6 = vmul.f32 %v1569_v61, %v1922_v9  ;;  %v437_v7 = vmul.f32 %v1570_v62, %v1922_v9  ;;  %v1688_v60 = vld [vmem:[%s1915_s24 + $0x30] sm:$0xff]  }
  0x1d   : > { %v696_v10 = vmax.f32 %v664_v63, 0.0  ;;  %v697_v11 = vmax.f32 %v665_v0, 0.0  ;;  %v666_v12 = vadd.f32 %v1928_v13, %v627_v1  ;;  %v667_v14 = vadd.f32 %v1928_v13, %v628_v2  ;;  %v1704_v1 = vld [vmem:[%s1903_s19 + $0x38] sm:$0xff]  }
  0x1e   : > { %v505_v15 = vmax.f32 %v473_v3, 0.0  ;;  %v506_v16 = vmax.f32 %v474_v5, 0.0  ;;  %v475_v17 = vadd.f32 %v1935_v20, %v436_v6  ;;  %v476_v18 = vadd.f32 %v1935_v20, %v437_v7  ;;  %v1689_v7 = vld [vmem:[%s1915_s24 + $0x38] sm:$0xff]  }
  0x1f   : > { %v726_v21 = vpack.c.bf16 %v697_v11, %v696_v10  ;;  %v698_v22 = vmax.f32 %v666_v12, 0.0  ;;  %v699_v23 = vmax.f32 %v667_v14, 0.0  ;;  %v1637_v24 = vunpack.c.l.bf16 %v1701_v8 }
  0x20   : > { %v535_v26 = vpack.c.bf16 %v506_v16, %v505_v15  ;;  %v507_v27 = vmax.f32 %v475_v17, 0.0  ;;  %v508_v28 = vmax.f32 %v476_v18, 0.0  ;;  %v1638_v29 = vunpack.c.h.bf16 %v1701_v8 }
  0x21   : > { %1753 = vmatprep.mubr.msk.bf16.mxu0 %vm748_vm1, %v726_v21  ;;  %v727_v31 = vpack.c.bf16 %v699_v23, %v698_v22  ;;  %v629_v32 = vmul.f32 %v1637_v24, %v1909_v4  ;;  %v1573_v33 = vunpack.c.l.bf16 %v1686_v19  ;;  %v1574_v34 = vunpack.c.h.bf16 %v1686_v19  ;;  %v1705_v23 = vld [vmem:[%s1903_s19 + $0x40] sm:$0xff]  }
  0x22   : > { %1787 = vmatprep.mubr.msk.bf16.mxu1 %vm958_vm2, %v535_v26  ;;  %v536_v35 = vpack.c.bf16 %v508_v28, %v507_v27  ;;  %v630_v36 = vmul.f32 %v1638_v29, %v1909_v4  ;;  %v1641_v37 = vunpack.c.l.bf16 %v1702_v25  ;;  %v1642_v38 = vunpack.c.h.bf16 %v1702_v25 }
  0x23   : > { %1754 = vmatmul.mubr.msk.bf16.gmra.mxu0 %vm748_vm1, %v727_v31  ;;  %v668_v39 = vadd.f32 %v1928_v13, %v629_v32  ;;  %v438_v40 = vmul.f32 %v1573_v33, %v1922_v9  ;;  %v439_v41 = vmul.f32 %v1574_v34, %v1922_v9  ;;  %v1577_v42 = vunpack.c.l.bf16 %v1687_v30 }
  0x24   : > { %1788 = vmatmul.mubr.msk.bf16.gmra.mxu1 %vm958_vm2, %v536_v35  ;;  %v669_v43 = vadd.f32 %v1928_v13, %v630_v36  ;;  %v631_v44 = vmul.f32 %v1641_v37, %v1909_v4  ;;  %v632_v45 = vmul.f32 %v1642_v38, %v1909_v4  ;;  %v1578_v46 = vunpack.c.h.bf16 %v1687_v30 }
  0x25   : > { %v700_v48 = vmax.f32 %v668_v39, 0.0  ;;  %v477_v49 = vadd.f32 %v1935_v20, %v438_v40  ;;  %v478_v50 = vadd.f32 %v1935_v20, %v439_v41  ;;  %v440_v51 = vmul.f32 %v1577_v42, %v1922_v9  ;;  %v1690_v40 = vld [vmem:[%s1915_s24 + $0x40] sm:$0xff]  }
  0x26   : > { %v701_v52 = vmax.f32 %v669_v43, 0.0  ;;  %v670_v53 = vadd.f32 %v1928_v13, %v631_v44  ;;  %v671_v54 = vadd.f32 %v1928_v13, %v632_v45  ;;  %v441_v55 = vmul.f32 %v1578_v46, %v1922_v9  ;;  %v1706_v45 = vld [vmem:[%s1903_s19 + $0x48] sm:$0xff]  }
  0x27   : > { %v509_v56 = vmax.f32 %v477_v49, 0.0  ;;  %v510_v57 = vmax.f32 %v478_v50, 0.0  ;;  %v479_v58 = vadd.f32 %v1935_v20, %v440_v51  ;;  %v1645_v59 = vunpack.c.l.bf16 %v1703_v47  ;;  %v1691_v50 = vld [vmem:[%s1915_s24 + $0x48] sm:$0xff]  }
  0x28   : > { %v728_v61 = vpack.c.bf16 %v701_v52, %v700_v48  ;;  %v702_v62 = vmax.f32 %v670_v53, 0.0  ;;  %v703_v63 = vmax.f32 %v671_v54, 0.0  ;;  %v480_v0 = vadd.f32 %v1935_v20, %v441_v55 }
  0x29   : > { %v537_v2 = vpack.c.bf16 %v510_v57, %v509_v56  ;;  %v511_v3 = vmax.f32 %v479_v58, 0.0  ;;  %v1646_v5 = vunpack.c.h.bf16 %v1703_v47  ;;  %v633_v6 = vmul.f32 %v1645_v59, %v1909_v4 }
  0x2a   : > { %1757 = vmatprep.mubr.msk.bf16.mxu0 %vm748_vm1, %v728_v61  ;;  %v729_v8 = vpack.c.bf16 %v703_v63, %v702_v62  ;;  %v512_v10 = vmax.f32 %v480_v0, 0.0  ;;  %v1581_v11 = vunpack.c.l.bf16 %v1688_v60  ;;  %v1582_v12 = vunpack.c.h.bf16 %v1688_v60  ;;  %v1707_v63 = vld [vmem:[%s1903_s19 + $0x50] sm:$0xff]  }
  0x2b   : > { %1791 = vmatprep.mubr.msk.bf16.mxu1 %vm958_vm2, %v537_v2  ;;  %v634_v14 = vmul.f32 %v1646_v5, %v1909_v4  ;;  %v672_v15 = vadd.f32 %v1928_v13, %v633_v6  ;;  %v1649_v16 = vunpack.c.l.bf16 %v1704_v1  ;;  %v1650_v17 = vunpack.c.h.bf16 %v1704_v1 }
  0x2c   : > { %1758 = vmatmul.mubr.msk.bf16.gmra.mxu0 %vm748_vm1, %v729_v8  ;;  %v538_v18 = vpack.c.bf16 %v512_v10, %v511_v3  ;;  %v442_v19 = vmul.f32 %v1581_v11, %v1922_v9  ;;  %v443_v21 = vmul.f32 %v1582_v12, %v1922_v9  ;;  %v1585_v22 = vunpack.c.l.bf16 %v1689_v7 }
  0x2d   : > { %v673_v24 = vadd.f32 %v1928_v13, %v634_v14  ;;  %v704_v25 = vmax.f32 %v672_v15, 0.0  ;;  %v635_v26 = vmul.f32 %v1649_v16, %v1909_v4  ;;  %v636_v27 = vmul.f32 %v1650_v17, %v1909_v4  ;;  %v1692_v15 = vld [vmem:[%s1915_s24 + $0x50] sm:$0xff]  }
  0x2e   : > { %1792 = vmatmul.mubr.msk.bf16.gmra.mxu1 %vm958_vm2, %v538_v18  ;;  %v481_v28 = vadd.f32 %v1935_v20, %v442_v19  ;;  %v482_v29 = vadd.f32 %v1935_v20, %v443_v21  ;;  %v1586_v30 = vunpack.c.h.bf16 %v1689_v7  ;;  %v444_v31 = vmul.f32 %v1585_v22, %v1922_v9 }
  0x2f   : > { %v705_v32 = vmax.f32 %v673_v24, 0.0  ;;  %v674_v33 = vadd.f32 %v1928_v13, %v635_v26  ;;  %v675_v34 = vadd.f32 %v1928_v13, %v636_v27  ;;  %v1653_v35 = vunpack.c.l.bf16 %v1705_v23 }
  0x30   : > { %v513_v36 = vmax.f32 %v481_v28, 0.0  ;;  %v514_v37 = vmax.f32 %v482_v29, 0.0  ;;  %v445_v38 = vmul.f32 %v1586_v30, %v1922_v9  ;;  %v483_v39 = vadd.f32 %v1935_v20, %v444_v31  ;;  %v1693_v30 = vld [vmem:[%s1915_s24 + $0x58] sm:$0xff]  }
  0x31   : > { %v730_v41 = vpack.c.bf16 %v705_v32, %v704_v25  ;;  %v706_v42 = vmax.f32 %v674_v33, 0.0  ;;  %v707_v43 = vmax.f32 %v675_v34, 0.0  ;;  %v1654_v44 = vunpack.c.h.bf16 %v1705_v23  ;;  %v1708_v25 = vld [vmem:[%s1903_s19 + $0x58] sm:$0xff]  }
  0x32   : > { %v539_v46 = vpack.c.bf16 %v514_v37, %v513_v36  ;;  %v484_v47 = vadd.f32 %v1935_v20, %v445_v38  ;;  %v515_v48 = vmax.f32 %v483_v39, 0.0  ;;  %v637_v49 = vmul.f32 %v1653_v35, %v1909_v4 }
  0x33   : > { %1761 = vmatprep.mubr.msk.bf16.mxu0 %vm748_vm1, %v730_v41  ;;  %v731_v51 = vpack.c.bf16 %v707_v43, %v706_v42  ;;  %v638_v52 = vmul.f32 %v1654_v44, %v1909_v4  ;;  %v1589_v53 = vunpack.c.l.bf16 %v1690_v40  ;;  %v1590_v54 = vunpack.c.h.bf16 %v1690_v40  ;;  %v1709_v43 = vld [vmem:[%s1903_s19 + $0x60] sm:$0xff]  }
  0x34   : > { %1795 = vmatprep.mubr.msk.bf16.mxu1 %vm958_vm2, %v539_v46  ;;  %v516_v55 = vmax.f32 %v484_v47, 0.0  ;;  %v676_v56 = vadd.f32 %v1928_v13, %v637_v49  ;;  %v1657_v57 = vunpack.c.l.bf16 %v1706_v45  ;;  %v1658_v58 = vunpack.c.h.bf16 %v1706_v45 }
  0x35   : > { %1762 = vmatmul.mubr.msk.bf16.gmra.mxu0 %vm748_vm1, %v731_v51  ;;  %v677_v59 = vadd.f32 %v1928_v13, %v638_v52  ;;  %v446_v60 = vmul.f32 %v1589_v53, %v1922_v9  ;;  %v447_v61 = vmul.f32 %v1590_v54, %v1922_v9  ;;  %v1593_v62 = vunpack.c.l.bf16 %v1691_v50 }
  0x36   : > { %v540_v0 = vpack.c.bf16 %v516_v55, %v515_v48  ;;  %v708_v1 = vmax.f32 %v676_v56, 0.0  ;;  %v639_v2 = vmul.f32 %v1657_v57, %v1909_v4  ;;  %v640_v3 = vmul.f32 %v1658_v58, %v1909_v4  ;;  %v1694_v56 = vld [vmem:[%s1915_s24 + $0x60] sm:$0xff]  }
  0x37   : > { %v709_v5 = vmax.f32 %v677_v59, 0.0  ;;  %v485_v6 = vadd.f32 %v1935_v20, %v446_v60  ;;  %v486_v7 = vadd.f32 %v1935_v20, %v447_v61  ;;  %v1594_v8 = vunpack.c.h.bf16 %v1691_v50 }
  0x38   : > { %1796 = vmatmul.mubr.msk.bf16.gmra.mxu1 %vm958_vm2, %v540_v0  ;;  %v678_v10 = vadd.f32 %v1928_v13, %v639_v2  ;;  %v679_v11 = vadd.f32 %v1928_v13, %v640_v3  ;;  %v448_v12 = vmul.f32 %v1593_v62, %v1922_v9  ;;  %v1661_v14 = vunpack.c.l.bf16 %v1707_v63 }
  0x39   : > { %v732_v16 = vpack.c.bf16 %v709_v5, %v708_v1  ;;  %v517_v17 = vmax.f32 %v485_v6, 0.0  ;;  %v518_v18 = vmax.f32 %v486_v7, 0.0  ;;  %v449_v19 = vmul.f32 %v1594_v8, %v1922_v9  ;;  %v1710_v1 = vld [vmem:[%s1903_s19 + $0x68] sm:$0xff]  }
  0x3a   : > { %v710_v21 = vmax.f32 %v678_v10, 0.0  ;;  %v711_v22 = vmax.f32 %v679_v11, 0.0  ;;  %v487_v23 = vadd.f32 %v1935_v20, %v448_v12  ;;  %v1662_v24 = vunpack.c.h.bf16 %v1707_v63  ;;  %v1695_v12 = vld [vmem:[%s1915_s24 + $0x68] sm:$0xff]  }
  0x3b   : > { %1765 = vmatprep.mubr.msk.bf16.mxu0 %vm748_vm1, %v732_v16  ;;  %v541_v26 = vpack.c.bf16 %v518_v18, %v517_v17  ;;  %v488_v27 = vadd.f32 %v1935_v20, %v449_v19  ;;  %v641_v28 = vmul.f32 %v1661_v14, %v1909_v4  ;;  %v1597_v29 = vunpack.c.l.bf16 %v1692_v15 }
  0x3c   : > { %v733_v31 = vpack.c.bf16 %v711_v22, %v710_v21  ;;  %v519_v32 = vmax.f32 %v487_v23, 0.0  ;;  %v642_v33 = vmul.f32 %v1662_v24, %v1909_v4  ;;  %v1598_v34 = vunpack.c.h.bf16 %v1692_v15  ;;  %v1711_v23 = vld [vmem:[%s1903_s19 + $0x70] sm:$0xff]  }
  0x3d   : > { %1799 = vmatprep.mubr.msk.bf16.mxu1 %vm958_vm2, %v541_v26  ;;  %v520_v35 = vmax.f32 %v488_v27, 0.0  ;;  %v680_v36 = vadd.f32 %v1928_v13, %v641_v28  ;;  %v450_v37 = vmul.f32 %v1597_v29, %v1922_v9  ;;  %v1665_v38 = vunpack.c.l.bf16 %v1708_v25 }
  0x3e   : > { %1766 = vmatmul.mubr.msk.bf16.gmra.mxu0 %vm748_vm1, %v733_v31  ;;  %v681_v39 = vadd.f32 %v1928_v13, %v642_v33  ;;  %v451_v40 = vmul.f32 %v1598_v34, %v1922_v9  ;;  %v1666_v41 = vunpack.c.h.bf16 %v1708_v25  ;;  %v1601_v42 = vunpack.c.l.bf16 %v1693_v30 }
  0x3f   : > { %v542_v44 = vpack.c.bf16 %v520_v35, %v519_v32  ;;  %v712_v45 = vmax.f32 %v680_v36, 0.0  ;;  %v489_v46 = vadd.f32 %v1935_v20, %v450_v37  ;;  %v643_v47 = vmul.f32 %v1665_v38, %v1909_v4  ;;  %v1696_v36 = vld [vmem:[%s1915_s24 + $0x70] sm:$0xff]  }
  0x40   : > { %v713_v48 = vmax.f32 %v681_v39, 0.0  ;;  %v490_v49 = vadd.f32 %v1935_v20, %v451_v40  ;;  %v644_v50 = vmul.f32 %v1666_v41, %v1909_v4  ;;  %v1602_v51 = vunpack.c.h.bf16 %v1693_v30 }
  0x41   : > { %1800 = vmatmul.mubr.msk.bf16.gmra.mxu1 %vm958_vm2, %v542_v44  ;;  %v521_v52 = vmax.f32 %v489_v46, 0.0  ;;  %v682_v53 = vadd.f32 %v1928_v13, %v643_v47  ;;  %v452_v54 = vmul.f32 %v1601_v42, %v1922_v9  ;;  %v1669_v55 = vunpack.c.l.bf16 %v1709_v43 }
  0x42   : > { %v734_v57 = vpack.c.bf16 %v713_v48, %v712_v45  ;;  %v522_v58 = vmax.f32 %v490_v49, 0.0  ;;  %v683_v59 = vadd.f32 %v1928_v13, %v644_v50  ;;  %v453_v60 = vmul.f32 %v1602_v51, %v1922_v9  ;;  %v1712_v45 = vld [vmem:[%s1903_s19 + $0x78] sm:$0xff]  }
  0x43   : > { %v714_v61 = vmax.f32 %v682_v53, 0.0  ;;  %v491_v62 = vadd.f32 %v1935_v20, %v452_v54  ;;  %v1670_v63 = vunpack.c.h.bf16 %v1709_v43  ;;  %v645_v0 = vmul.f32 %v1669_v55, %v1909_v4  ;;  %v1697_v54 = vld [vmem:[%s1915_s24 + $0x78] sm:$0xff]  }
  0x44   : > { %1769 = vmatprep.mubr.msk.bf16.mxu0 %vm748_vm1, %v734_v57  ;;  %v543_v2 = vpack.c.bf16 %v522_v58, %v521_v52  ;;  %v715_v3 = vmax.f32 %v683_v59, 0.0  ;;  %v492_v5 = vadd.f32 %v1935_v20, %v453_v60  ;;  %v1605_v6 = vunpack.c.l.bf16 %v1694_v56 }
  0x45   : > { %v523_v7 = vmax.f32 %v491_v62, 0.0  ;;  %v646_v8 = vmul.f32 %v1670_v63, %v1909_v4  ;;  %v684_v10 = vadd.f32 %v1928_v13, %v645_v0  ;;  %v1606_v11 = vunpack.c.h.bf16 %v1694_v56 }
  0x46   : > { %1803 = vmatprep.mubr.msk.bf16.mxu1 %vm958_vm2, %v543_v2  ;;  %v735_v14 = vpack.c.bf16 %v715_v3, %v714_v61  ;;  %v524_v15 = vmax.f32 %v492_v5, 0.0  ;;  %v454_v16 = vmul.f32 %v1605_v6, %v1922_v9  ;;  %v1673_v17 = vunpack.c.l.bf16 %v1710_v1 }
  0x47   : > { %v685_v18 = vadd.f32 %v1928_v13, %v646_v8  ;;  %v716_v19 = vmax.f32 %v684_v10, 0.0  ;;  %v455_v21 = vmul.f32 %v1606_v11, %v1922_v9  ;;  %v1674_v22 = vunpack.c.h.bf16 %v1710_v1 }
  0x48   : > { %1770 = vmatmul.mubr.msk.bf16.gmra.mxu0 %vm748_vm1, %v735_v14  ;;  %v544_v24 = vpack.c.bf16 %v524_v15, %v523_v7  ;;  %v493_v25 = vadd.f32 %v1935_v20, %v454_v16  ;;  %v647_v26 = vmul.f32 %v1673_v17, %v1909_v4  ;;  %v1609_v27 = vunpack.c.l.bf16 %v1695_v12 }
  0x49   : > { %v717_v28 = vmax.f32 %v685_v18, 0.0  ;;  %v494_v29 = vadd.f32 %v1935_v20, %v455_v21  ;;  %v648_v30 = vmul.f32 %v1674_v22, %v1909_v4  ;;  %v1610_v31 = vunpack.c.h.bf16 %v1695_v12 }
  0x4a   : > { %1804 = vmatmul.mubr.msk.bf16.gmra.mxu1 %vm958_vm2, %v544_v24  ;;  %v525_v32 = vmax.f32 %v493_v25, 0.0  ;;  %v686_v33 = vadd.f32 %v1928_v13, %v647_v26  ;;  %v456_v34 = vmul.f32 %v1609_v27, %v1922_v9  ;;  %v1677_v35 = vunpack.c.l.bf16 %v1711_v23  ;;  %v2126_v26 = vld [vmem:[%s2241_s8] ss:$0 sm:$0xff] }
  0x4b   : > { %v736_v37 = vpack.c.bf16 %v717_v28, %v716_v19  ;;  %v526_v38 = vmax.f32 %v494_v29, 0.0  ;;  %v687_v39 = vadd.f32 %v1928_v13, %v648_v30  ;;  %v457_v40 = vmul.f32 %v1610_v31, %v1922_v9 }
  0x4c   : > { %v718_v41 = vmax.f32 %v686_v33, 0.0  ;;  %v495_v42 = vadd.f32 %v1935_v20, %v456_v34  ;;  %v1678_v43 = vunpack.c.h.bf16 %v1711_v23  ;;  %v649_v44 = vmul.f32 %v1677_v35, %v1909_v4 }
  0x4d   : > { %1773 = vmatprep.mubr.msk.bf16.mxu0 %vm748_vm1, %v736_v37  ;;  %v545_v46 = vpack.c.bf16 %v526_v38, %v525_v32  ;;  %v719_v47 = vmax.f32 %v687_v39, 0.0  ;;  %v496_v48 = vadd.f32 %v1935_v20, %v457_v40  ;;  %v1613_v49 = vunpack.c.l.bf16 %v1696_v36 }
  0x4e   : > { %v527_v50 = vmax.f32 %v495_v42, 0.0  ;;  %v650_v51 = vmul.f32 %v1678_v43, %v1909_v4  ;;  %v688_v52 = vadd.f32 %v1928_v13, %v649_v44  ;;  %v1614_v53 = vunpack.c.h.bf16 %v1696_v36 }
  0x4f   : > { %1807 = vmatprep.mubr.msk.bf16.mxu1 %vm958_vm2, %v545_v46  ;;  %v737_v55 = vpack.c.bf16 %v719_v47, %v718_v41  ;;  %v528_v56 = vmax.f32 %v496_v48, 0.0  ;;  %v458_v57 = vmul.f32 %v1613_v49, %v1922_v9  ;;  %v1681_v58 = vunpack.c.l.bf16 %v1712_v45 }
  0x50   : > { %v689_v59 = vadd.f32 %v1928_v13, %v650_v51  ;;  %v720_v60 = vmax.f32 %v688_v52, 0.0  ;;  %v459_v61 = vmul.f32 %v1614_v53, %v1922_v9  ;;  %v1682_v62 = vunpack.c.h.bf16 %v1712_v45 }
  0x51   : > { %1774 = vmatmul.mubr.msk.bf16.gmra.mxu0 %vm748_vm1, %v737_v55  ;;  %v546_v63 = vpack.c.bf16 %v528_v56, %v527_v50  ;;  %v497_v0 = vadd.f32 %v1935_v20, %v458_v57  ;;  %v651_v1 = vmul.f32 %v1681_v58, %v1909_v4  ;;  %v1617_v2 = vunpack.c.l.bf16 %v1697_v54 }
  0x52   : > { %v721_v3 = vmax.f32 %v689_v59, 0.0  ;;  %v498_v5 = vadd.f32 %v1935_v20, %v459_v61  ;;  %v652_v6 = vmul.f32 %v1682_v62, %v1909_v4  ;;  %v1618_v7 = vunpack.c.h.bf16 %v1697_v54 }
  0x53   : > { %1808 = vmatmul.mubr.msk.bf16.gmra.mxu1 %vm958_vm2, %v546_v63  ;;  %v529_v8 = vmax.f32 %v497_v0, 0.0  ;;  %v690_v10 = vadd.f32 %v1928_v13, %v651_v1  ;;  %v460_v11 = vmul.f32 %v1617_v2, %v1922_v9 }
  0x54   : > { %v738_v12 = vpack.c.bf16 %v721_v3, %v720_v60  ;;  %v530_v14 = vmax.f32 %v498_v5, 0.0  ;;  %v691_v15 = vadd.f32 %v1928_v13, %v652_v6  ;;  %v461_v16 = vmul.f32 %v1618_v7, %v1922_v9 }
  0x55   : > { %v722_v17 = vmax.f32 %v690_v10, 0.0  ;;  %v499_v18 = vadd.f32 %v1935_v20, %v460_v11 }
  0x56   : > { %1777 = vmatprep.mubr.msk.bf16.mxu0 %vm748_vm1, %v738_v12  ;;  %v547_v4 = vpack.c.bf16 %v530_v14, %v529_v8  ;;  %v723_v19 = vmax.f32 %v691_v15, 0.0  ;;  %v500_v21 = vadd.f32 %v1935_v20, %v461_v16 }
  0x57   : > { %v531_v22 = vmax.f32 %v499_v18, 0.0 }
  0x58   : > { %1811 = vmatprep.mubr.msk.bf16.mxu1 %vm958_vm2, %v547_v4  ;;  %v739_v23 = vpack.c.bf16 %v723_v19, %v722_v17  ;;  %v532_v24 = vmax.f32 %v500_v21, 0.0 }
  0x5a   : > { %1778 = vmatmul.mubr.msk.bf16.gmra.mxu0 %vm748_vm1, %v739_v23  ;;  %v548_v13 = vpack.c.bf16 %v532_v24, %v531_v22 }
  0x5c   : > { %1812 = vmatmul.mubr.msk.bf16.gmra.mxu1 %vm958_vm2, %v548_v13 }
  0xda   : > { %v1751_v9 = vpop.f32.mrf.mxu0 }
  0xdb   : > { %v1785_v25 = vpop.f32.mrf.mxu1 }
  0xdc   : > { %v1054_v27 = vadd.f32 %v1785_v25, %v1751_v9  ;;  %v831_v20 = vpop.f32.mrf.mxu0 }
  0xdd   : > { %v1045_v28 = vpop.f32.mrf.mxu1 }
  0xde   : > { %v1181_v29 = vadd.f32 %v2126_v26, %v1054_v27  ;;  %v1046_v30 = vadd.f32 %v1045_v28, %v831_v20  ;;  %v1752_v31 = vpop.f32.mrf.mxu0 }
  0xdf   : > { %v1786_v32 = vpop.f32.mrf.mxu1 }
  0xe0   : > { %v1525_v33 = vpack.c.bf16 %v1181_v29, %v1181_v29  ;;  %v1179_v34 = vadd.f32 %v2126_v26, %v1046_v30  ;;  %v1057_v35 = vadd.f32 %v1786_v32, %v1752_v31  ;;  %v834_v36 = vpop.f32.mrf.mxu0 }
  0xe1   : > { %v1048_v37 = vpop.f32.mrf.mxu1 }
  0xe2   : > { %1342 = vst.msk [vmem:[%s2133_s15 + $0x8] sm:$0xf] %vm1339_vm3, %v1525_v33  ;;  %v1523_v38 = vpack.c.bf16 %v1179_v34, %v1179_v34  ;;  %v1182_v39 = vadd.f32 %v2126_v26, %v1057_v35  ;;  %v1049_v40 = vadd.f32 %v1048_v37, %v834_v36 }
  0xe3   : > { %v1755_v41 = vpop.f32.mrf.mxu0 }
  0xe4   : > { %1340 = vst.msk [vmem:[%s2133_s15] sm:$0xf] %vm1339_vm3, %v1523_v38  ;;  %v1526_v42 = vpack.c.bf16 %v1182_v39, %v1182_v39  ;;  %v1180_v43 = vadd.f32 %v2126_v26, %v1049_v40  ;;  %v1789_v44 = vpop.f32.mrf.mxu1 }
  0xe5   : > { %v1070_v45 = vadd.f32 %v1789_v44, %v1755_v41  ;;  %v847_v46 = vpop.f32.mrf.mxu0 }
  0xe6   : > { %1343 = vst.msk [vmem:[%s2133_s15 + $0xc] sm:$0xf] %vm1339_vm3, %v1526_v42  ;;  %v1524_v47 = vpack.c.bf16 %v1180_v43, %v1180_v43  ;;  %v1061_v48 = vpop.f32.mrf.mxu1 }
  0xe7   : > { %v1185_v49 = vadd.f32 %v2126_v26, %v1070_v45  ;;  %v1062_v50 = vadd.f32 %v1061_v48, %v847_v46  ;;  %v1756_v51 = vpop.f32.mrf.mxu0 }
  0xe8   : > { %1341 = vst.msk [vmem:[%s2133_s15 + $0x4] sm:$0xf] %vm1339_vm3, %v1524_v47  ;;  %v1790_v52 = vpop.f32.mrf.mxu1 }
  0xe9   : > { %v1529_v53 = vpack.c.bf16 %v1185_v49, %v1185_v49  ;;  %v1183_v54 = vadd.f32 %v2126_v26, %v1062_v50  ;;  %v1073_v55 = vadd.f32 %v1790_v52, %v1756_v51  ;;  %v850_v56 = vpop.f32.mrf.mxu0 }
  0xea   : > { %v1064_v57 = vpop.f32.mrf.mxu1 }
  0xeb   : > { %1346 = vst.msk [vmem:[%s2133_s15 + $0x18] sm:$0xf] %vm1339_vm3, %v1529_v53  ;;  %v1527_v58 = vpack.c.bf16 %v1183_v54, %v1183_v54  ;;  %v1186_v59 = vadd.f32 %v2126_v26, %v1073_v55  ;;  %v1065_v60 = vadd.f32 %v1064_v57, %v850_v56 }
  0xec   : > { %v1759_v61 = vpop.f32.mrf.mxu0 }
  0xed   : > { %1344 = vst.msk [vmem:[%s2133_s15 + $0x10] sm:$0xf] %vm1339_vm3, %v1527_v58  ;;  %v1530_v62 = vpack.c.bf16 %v1186_v59, %v1186_v59  ;;  %v1184_v63 = vadd.f32 %v2126_v26, %v1065_v60 }
  0xee   : > { %v1793_v0 = vpop.f32.mrf.mxu1  ;;  %v863_v1 = vpop.f32.mrf.mxu0 }
  0xef   : > { %1347 = vst.msk [vmem:[%s2133_s15 + $0x1c] sm:$0xf] %vm1339_vm3, %v1530_v62  ;;  %v1528_v2 = vpack.c.bf16 %v1184_v63, %v1184_v63  ;;  %v1086_v3 = vadd.f32 %v1793_v0, %v1759_v61 }
  0xf0   : > { %v1077_v5 = vpop.f32.mrf.mxu1  ;;  %v1760_v6 = vpop.f32.mrf.mxu0 }
  0xf1   : > { %1345 = vst.msk [vmem:[%s2133_s15 + $0x14] sm:$0xf] %vm1339_vm3, %v1528_v2  ;;  %v1189_v7 = vadd.f32 %v2126_v26, %v1086_v3  ;;  %v1078_v8 = vadd.f32 %v1077_v5, %v863_v1 }
  0xf2   : > { %v1794_v10 = vpop.f32.mrf.mxu1  ;;  %v866_v11 = vpop.f32.mrf.mxu0 }
  0xf3   : > { %v1533_v12 = vpack.c.bf16 %v1189_v7, %v1189_v7  ;;  %v1187_v14 = vadd.f32 %v2126_v26, %v1078_v8  ;;  %v1089_v15 = vadd.f32 %v1794_v10, %v1760_v6 }
  0xf4   : > { %v1080_v16 = vpop.f32.mrf.mxu1 }
  0xf5   : > { %1350 = vst.msk [vmem:[%s2133_s15 + $0x28] sm:$0xf] %vm1339_vm3, %v1533_v12  ;;  %v1531_v17 = vpack.c.bf16 %v1187_v14, %v1187_v14  ;;  %v1190_v18 = vadd.f32 %v2126_v26, %v1089_v15  ;;  %v1081_v4 = vadd.f32 %v1080_v16, %v866_v11  ;;  %v1763_v19 = vpop.f32.mrf.mxu0 }
  0xf7   : > { %1348 = vst.msk [vmem:[%s2133_s15 + $0x20] sm:$0xf] %vm1339_vm3, %v1531_v17  ;;  %v1534_v21 = vpack.c.bf16 %v1190_v18, %v1190_v18  ;;  %v1188_v22 = vadd.f32 %v2126_v26, %v1081_v4  ;;  %v879_v23 = vpop.f32.mrf.mxu0 }
  0xf8   : > { %v1797_v24 = vpop.f32.mrf.mxu1 }
  0xf9   : > { %1351 = vst.msk [vmem:[%s2133_s15 + $0x2c] sm:$0xf] %vm1339_vm3, %v1534_v21  ;;  %v1532_v13 = vpack.c.bf16 %v1188_v22, %v1188_v22  ;;  %v1102_v9 = vadd.f32 %v1797_v24, %v1763_v19  ;;  %v1764_v25 = vpop.f32.mrf.mxu0 }
  0xfa   : > { %v1093_v27 = vpop.f32.mrf.mxu1 }
  0xfb   : > { %1349 = vst.msk [vmem:[%s2133_s15 + $0x24] sm:$0xf] %vm1339_vm3, %v1532_v13  ;;  %v1193_v20 = vadd.f32 %v2126_v26, %v1102_v9  ;;  %v1094_v28 = vadd.f32 %v1093_v27, %v879_v23  ;;  %v882_v29 = vpop.f32.mrf.mxu0 }
  0xfc   : > { %v1798_v30 = vpop.f32.mrf.mxu1 }
  0xfd   : > { %v1537_v31 = vpack.c.bf16 %v1193_v20, %v1193_v20  ;;  %v1191_v32 = vadd.f32 %v2126_v26, %v1094_v28  ;;  %v1105_v33 = vadd.f32 %v1798_v30, %v1764_v25 }
  0xfe   : > { %v1096_v34 = vpop.f32.mrf.mxu1  ;;  %v1767_v35 = vpop.f32.mrf.mxu0 }
  0xff   : > { %1354 = vst.msk [vmem:[%s2133_s15 + $0x38] sm:$0xf] %vm1339_vm3, %v1537_v31  ;;  %v1535_v36 = vpack.c.bf16 %v1191_v32, %v1191_v32  ;;  %v1194_v37 = vadd.f32 %v2126_v26, %v1105_v33  ;;  %v1097_v38 = vadd.f32 %v1096_v34, %v882_v29 }
 0x100   : > { %v895_v39 = vpop.f32.mrf.mxu0 }
 0x101   : > { %1352 = vst.msk [vmem:[%s2133_s15 + $0x30] sm:$0xf] %vm1339_vm3, %v1535_v36  ;;  %v1538_v40 = vpack.c.bf16 %v1194_v37, %v1194_v37  ;;  %v1192_v41 = vadd.f32 %v2126_v26, %v1097_v38  ;;  %v1801_v42 = vpop.f32.mrf.mxu1 }
 0x102   : > { %v1118_v43 = vadd.f32 %v1801_v42, %v1767_v35  ;;  %v1768_v44 = vpop.f32.mrf.mxu0 }
 0x103   : > { %1355 = vst.msk [vmem:[%s2133_s15 + $0x3c] sm:$0xf] %vm1339_vm3, %v1538_v40  ;;  %v1536_v45 = vpack.c.bf16 %v1192_v41, %v1192_v41  ;;  %v1109_v46 = vpop.f32.mrf.mxu1 }
 0x104   : > { %v1197_v47 = vadd.f32 %v2126_v26, %v1118_v43  ;;  %v1110_v48 = vadd.f32 %v1109_v46, %v895_v39  ;;  %v898_v49 = vpop.f32.mrf.mxu0 }
 0x105   : > { %1353 = vst.msk [vmem:[%s2133_s15 + $0x34] sm:$0xf] %vm1339_vm3, %v1536_v45  ;;  %v1802_v50 = vpop.f32.mrf.mxu1 }
 0x106   : > { %v1541_v51 = vpack.c.bf16 %v1197_v47, %v1197_v47  ;;  %v1195_v52 = vadd.f32 %v2126_v26, %v1110_v48  ;;  %v1121_v53 = vadd.f32 %v1802_v50, %v1768_v44 }
 0x107   : > { %v1112_v54 = vpop.f32.mrf.mxu1 }
 0x108   : > { %1358 = vst.msk [vmem:[%s2133_s15 + $0x48] sm:$0xf] %vm1339_vm3, %v1541_v51  ;;  %v1539_v55 = vpack.c.bf16 %v1195_v52, %v1195_v52  ;;  %v1198_v56 = vadd.f32 %v2126_v26, %v1121_v53  ;;  %v1113_v57 = vadd.f32 %v1112_v54, %v898_v49  ;;  %v1771_v58 = vpop.f32.mrf.mxu0 }
 0x10a   : > { %1356 = vst.msk [vmem:[%s2133_s15 + $0x40] sm:$0xf] %vm1339_vm3, %v1539_v55  ;;  %v1542_v59 = vpack.c.bf16 %v1198_v56, %v1198_v56  ;;  %v1196_v60 = vadd.f32 %v2126_v26, %v1113_v57  ;;  %v1805_v61 = vpop.f32.mrf.mxu1  ;;  %v911_v62 = vpop.f32.mrf.mxu0 }
 0x10b   : > { %v1134_v63 = vadd.f32 %v1805_v61, %v1771_v58 }
 0x10c   : > { %1359 = vst.msk [vmem:[%s2133_s15 + $0x4c] sm:$0xf] %vm1339_vm3, %v1542_v59  ;;  %v1540_v0 = vpack.c.bf16 %v1196_v60, %v1196_v60  ;;  %v1125_v1 = vpop.f32.mrf.mxu1  ;;  %v1772_v2 = vpop.f32.mrf.mxu0 }
 0x10d   : > { %v1201_v3 = vadd.f32 %v2126_v26, %v1134_v63  ;;  %v1126_v5 = vadd.f32 %v1125_v1, %v911_v62 }
 0x10e   : > { %1357 = vst.msk [vmem:[%s2133_s15 + $0x44] sm:$0xf] %vm1339_vm3, %v1540_v0  ;;  %v1806_v6 = vpop.f32.mrf.mxu1  ;;  %v914_v7 = vpop.f32.mrf.mxu0 }
 0x10f   : > { %v1545_v8 = vpack.c.bf16 %v1201_v3, %v1201_v3  ;;  %v1199_v10 = vadd.f32 %v2126_v26, %v1126_v5  ;;  %v1137_v11 = vadd.f32 %v1806_v6, %v1772_v2 }
 0x110   : > { %v1128_v12 = vpop.f32.mrf.mxu1 }
 0x111   : > { %1362 = vst.msk [vmem:[%s2133_s15 + $0x58] sm:$0xf] %vm1339_vm3, %v1545_v8  ;;  %v1543_v14 = vpack.c.bf16 %v1199_v10, %v1199_v10  ;;  %v1202_v15 = vadd.f32 %v2126_v26, %v1137_v11  ;;  %v1129_v16 = vadd.f32 %v1128_v12, %v914_v7  ;;  %v1775_v17 = vpop.f32.mrf.mxu0 }
 0x113   : > { %1360 = vst.msk [vmem:[%s2133_s15 + $0x50] sm:$0xf] %vm1339_vm3, %v1543_v14  ;;  %v1546_v18 = vpack.c.bf16 %v1202_v15, %v1202_v15  ;;  %v1200_v4 = vadd.f32 %v2126_v26, %v1129_v16  ;;  %v1809_v19 = vpop.f32.mrf.mxu1  ;;  %v927_v21 = vpop.f32.mrf.mxu0 }
 0x114   : > { %v1150_v22 = vadd.f32 %v1809_v19, %v1775_v17 }
 0x115   : > { %1363 = vst.msk [vmem:[%s2133_s15 + $0x5c] sm:$0xf] %vm1339_vm3, %v1546_v18  ;;  %v1544_v23 = vpack.c.bf16 %v1200_v4, %v1200_v4  ;;  %v1141_v24 = vpop.f32.mrf.mxu1  ;;  %v1776_v13 = vpop.f32.mrf.mxu0 }
 0x116   : > { %v1205_v9 = vadd.f32 %v2126_v26, %v1150_v22  ;;  %v1142_v25 = vadd.f32 %v1141_v24, %v927_v21 }
 0x117   : > { %1361 = vst.msk [vmem:[%s2133_s15 + $0x54] sm:$0xf] %vm1339_vm3, %v1544_v23  ;;  %v1810_v27 = vpop.f32.mrf.mxu1  ;;  %v930_v20 = vpop.f32.mrf.mxu0 }
 0x118   : > { %v1549_v28 = vpack.c.bf16 %v1205_v9, %v1205_v9  ;;  %v1203_v29 = vadd.f32 %v2126_v26, %v1142_v25  ;;  %v1153_v30 = vadd.f32 %v1810_v27, %v1776_v13 }
 0x119   : > { %v1144_v31 = vpop.f32.mrf.mxu1 }
 0x11a   : > { %1366 = vst.msk [vmem:[%s2133_s15 + $0x68] sm:$0xf] %vm1339_vm3, %v1549_v28  ;;  %v1547_v32 = vpack.c.bf16 %v1203_v29, %v1203_v29  ;;  %v1206_v33 = vadd.f32 %v2126_v26, %v1153_v30  ;;  %v1145_v34 = vadd.f32 %v1144_v31, %v930_v20  ;;  %v1779_v35 = vpop.f32.mrf.mxu0 }
 0x11c   : > { %1364 = vst.msk [vmem:[%s2133_s15 + $0x60] sm:$0xf] %vm1339_vm3, %v1547_v32  ;;  %v1550_v36 = vpack.c.bf16 %v1206_v33, %v1206_v33  ;;  %v1204_v37 = vadd.f32 %v2126_v26, %v1145_v34  ;;  %v1813_v38 = vpop.f32.mrf.mxu1  ;;  %v943_v39 = vpop.f32.mrf.mxu0 }
 0x11d   : > { %v1166_v40 = vadd.f32 %v1813_v38, %v1779_v35 }
 0x11e   : > { %1367 = vst.msk [vmem:[%s2133_s15 + $0x6c] sm:$0xf] %vm1339_vm3, %v1550_v36  ;;  %v1548_v41 = vpack.c.bf16 %v1204_v37, %v1204_v37  ;;  %v1157_v42 = vpop.f32.mrf.mxu1  ;;  %v1780_v43 = vpop.f32.mrf.mxu0 }
 0x11f   : > { %v1209_v44 = vadd.f32 %v2126_v26, %v1166_v40  ;;  %v1158_v45 = vadd.f32 %v1157_v42, %v943_v39 }
 0x120   : > { %1365 = vst.msk [vmem:[%s2133_s15 + $0x64] sm:$0xf] %vm1339_vm3, %v1548_v41  ;;  %v1814_v46 = vpop.f32.mrf.mxu1  ;;  %v946_v47 = vpop.f32.mrf.mxu0 }
 0x121   : > { %v1553_v48 = vpack.c.bf16 %v1209_v44, %v1209_v44  ;;  %v1207_v49 = vadd.f32 %v2126_v26, %v1158_v45  ;;  %v1169_v50 = vadd.f32 %v1814_v46, %v1780_v43 }
 0x122   : > { %v1160_v51 = vpop.f32.mrf.mxu1 }
 0x123   : > { %1370 = vst.msk [vmem:[%s2133_s15 + $0x78] sm:$0xf] %vm1339_vm3, %v1553_v48  ;;  %v1551_v52 = vpack.c.bf16 %v1207_v49, %v1207_v49  ;;  %v1210_v53 = vadd.f32 %v2126_v26, %v1169_v50  ;;  %v1161_v54 = vadd.f32 %v1160_v51, %v946_v47 }
 0x125   : > { %1368 = vst.msk [vmem:[%s2133_s15 + $0x70] sm:$0xf] %vm1339_vm3, %v1551_v52  ;;  %v1554_v55 = vpack.c.bf16 %v1210_v53, %v1210_v53  ;;  %v1208_v56 = vadd.f32 %v2126_v26, %v1161_v54 }
 0x127   : > { %1371 = vst.msk [vmem:[%s2133_s15 + $0x7c] sm:$0xf] %vm1339_vm3, %v1554_v55  ;;  %v1552_v57 = vpack.c.bf16 %v1208_v56, %v1208_v56 }
 0x129   : > { %1369 = vst.msk [vmem:[%s2133_s15 + $0x74] sm:$0xf] %vm1339_vm3, %v1552_v57 }
 0x12a PF: > { %s19_s30 = sadd.s32 1, %s1831_s30  }
 0x12b   : > { %p16_p4 = scmp.ge.s32.totalorder %s19_s30, 4  }
 0x12d   :  { %18 = sbr.rel (!%p16_p4) target bundleno = 1 (0x1), region = 89 }

// kernel: _lambda_.30
= control target key start
LH: loop header
LB: loop body
LE: loop exit
PB: predicated region body
PF: predicated region fallthrough
CT: control target
= control target key end

     0   :  { %s2635_s25 = smov 0   ;;  %s3175_s0 = inlined_call_operand.vmem [shape: bf16[512,8], index: 0, kind: input, shape index: {}]   ;;  %s3176_s1 = inlined_call_operand.vmem [shape: bf16[512,16], index: 1, kind: input, shape index: {}]   ;;  %s3177_s2 = inlined_call_operand.vmem [shape: bf16[512,4], index: 2, kind: input, shape index: {}]   ;;  %s3178_s3 = inlined_call_operand.vmem [shape: bf16[8,36], index: 3, kind: input, shape index: {}]   ;;  %s3179_s4 = inlined_call_operand.vmem [shape: bf16[16,36], index: 4, kind: input, shape index: {}]   ;;  %s3180_s5 = inlined_call_operand.vmem [shape: bf16[4,36], index: 5, kind: input, shape index: {}]   ;;  %s3181_s6 = inlined_call_operand.vmem [shape: f32[1,8], index: 6, kind: input, shape index: {}]   ;;  %s3182_s7 = inlined_call_operand.vmem [shape: f32[1,16], index: 7, kind: input, shape index: {}]   ;;  %s3183_s8 = inlined_call_operand.vmem [shape: f32[1,4], index: 8, kind: input, shape index: {}]   ;;  %s3184_s9 = inlined_call_operand.vmem [shape: f32[1,8], index: 9, kind: input, shape index: {}]   ;;  %s3185_s10 = inlined_call_operand.vmem [shape: f32[1,16], index: 10, kind: input, shape index: {}]   ;;  %s3186_s11 = inlined_call_operand.vmem [shape: f32[1,4], index: 11, kind: input, shape index: {}]   ;;  %s3187_s12 = inlined_call_operand.vmem [shape: f32[1,36], index: 12, kind: input, shape index: {}]   ;;  %s3188_s13 = inlined_call_operand.vmem [shape: bf16[512,36], index: 13, kind: output, shape index: {}]  }
   0x1 LB: > { %s2019_s26 = sadd.s32 4294967295, %s2563_s25   ;;  %p2023_p0 = scmp.ge.s32.totalorder %s2563_s25, 1  ;;  %s2563_s25 = sphi %s2635_s25, %s23_s25  }
   0x2   : > { %p410_p1 = scmp.lt.s32.totalorder %s2563_s25, 3 }
   0x4   : > { %p411_p2 = pnand %p2023_p0, %p410_p1 }
   0x5   : > { %s2024_s29 = sshll.u32 (!%p411_p2), %s2019_s26, 5 }
   0x6   : > { %414 = sbr.rel (%p411_p2) target bundleno = 334 (0x14e), region = 72  ;;  %p465_p3 = scmp.lt.s32.totalorder (!%p411_p2), %s2024_s29, 63 }
   0xb   : > { %v2556_v0 = vld [vmem:[%s3179_s4] sm:$0xff]   ;;  %vm1137_vm0 = vcmask 1043456   ;;  %vm1542_vm1 = vcmask 1041408   ;;  %s3190_s29 = smov (!%p465_p3, %s2024_s29), 63  ;;  %vm878_vm2 = vcmask 130048   ;;  %vm1088_vm3 = vcmask 64512  }
   0xc   : > { %2544 = vmatprep.subr.bf16.mxu1 %v2556_v0  ;;  %2442 = vmatprep.subr.bf16.mxu0 %v2556_v0  ;;  %v679_v1 = vld [vmem:[%s3178_s3] sm:$0xf]  ;;  %s2652_s17 = sshll.u32 %s3190_s29, 2  ;;  %vm1493_vm4 = vcmask 31744   ;;  %vm1906_vm5 = vcmask 289792  }
   0xd   : > { %v1492_v2 = vld [vmem:[%s3180_s5] sm:$0x3]  ;;  %2545 = vmatpush3.bf16.msra.mxu1 %v2556_v0  ;;  %2443 = vmatpush3.bf16.msra.mxu0 %v2556_v0  ;;  %s2658_s20 = scalar_lea.vmem %s3176_s1, %s2652_s17  ;;  %v1139_v7 = vsel %vm1137_vm0, %v679_v1, 0  ;;  %s2748_s28 = scalar_lea.vmem %s3175_s0, %s2652_s17 }
   0xe   : > { %2546 = vmatprep.subr.msk.bf16.mxu1 %vm1137_vm0, %v679_v1  ;;  %2547 = vmatprep.subr.msk.bf16.mxu0 %vm1542_vm1, %v1492_v2  ;;  %v2663_v3 = vld [vmem:[%s3182_s7] ss:$0 sm:$0xff]  ;;  %v2361_v6 = vld [vmem:[%s2658_s20 + $0x8] sm:$0xff]   ;;  %v1544_v8 = vsel %vm1542_vm1, %v1492_v2, 0  ;;  %v2362_v35 = vld [vmem:[%s2658_s20 + $0x10] sm:$0xff]   ;;  %s2762_s14 = scalar_lea.vmem %s3177_s2, %s2652_s17  ;;  %s3050_s29 = scalar_lea.vmem %s3188_s13, %s2652_s17 }
   0xf   : > { %v2219_v4 = vld [vmem:[%s2658_s20] sm:$0xff]   ;;  %v2369_v13 = vld [vmem:[%s2658_s20 + $0x48] sm:$0xff]   ;;  %v2224_v15 = vunpack.c.l.bf16 %v2361_v6  ;;  %v2225_v16 = vunpack.c.h.bf16 %v2361_v6  ;;  %v2370_v40 = vld [vmem:[%s2658_s20 + $0x50] sm:$0xff]   ;;  %v2228_v48 = vunpack.c.l.bf16 %v2362_v35  ;;  %v2229_v49 = vunpack.c.h.bf16 %v2362_v35 }
  0x10   : > { %v2368_v5 = vld [vmem:[%s2658_s20 + $0x40] sm:$0xff]   ;;  %v2220_v9 = vunpack.c.l.bf16 %v2219_v4  ;;  %v2221_v10 = vunpack.c.h.bf16 %v2219_v4  ;;  %v2256_v17 = vunpack.c.l.bf16 %v2369_v13  ;;  %v2257_v18 = vunpack.c.h.bf16 %v2369_v13  ;;  %v2363_v45 = vld [vmem:[%s2658_s20 + $0x18] sm:$0xff]  }
  0x11   : > { %v2252_v11 = vunpack.c.l.bf16 %v2368_v5  ;;  %v2253_v12 = vunpack.c.h.bf16 %v2368_v5  ;;  %v2672_v14 = vld [vmem:[%s3185_s10] ss:$0 sm:$0xff]  ;;  %v753_v23 = vmul.f32 %v2224_v15, %v2663_v3  ;;  %v754_v24 = vmul.f32 %v2225_v16, %v2663_v3  ;;  %v2371_v50 = vld [vmem:[%s2658_s20 + $0x58] sm:$0xff]  }
  0x12   : > { %v751_v19 = vmul.f32 %v2220_v9, %v2663_v3  ;;  %v752_v20 = vmul.f32 %v2221_v10, %v2663_v3  ;;  %v769_v25 = vmul.f32 %v2256_v17, %v2663_v3  ;;  %v770_v26 = vmul.f32 %v2257_v18, %v2663_v3  ;;  %v2364_v55 = vld [vmem:[%s2658_s20 + $0x20] sm:$0xff]  }
  0x13   : > { %v767_v21 = vmul.f32 %v2252_v11, %v2663_v3  ;;  %v768_v22 = vmul.f32 %v2253_v12, %v2663_v3  ;;  %v792_v31 = vadd.f32 %v2672_v14, %v753_v23  ;;  %v793_v32 = vadd.f32 %v2672_v14, %v754_v24  ;;  %v2372_v18 = vld [vmem:[%s2658_s20 + $0x60] sm:$0xff]   ;;  %v2365_v23 = vld [vmem:[%s2658_s20 + $0x28] sm:$0xff]  }
  0x14   : > { %v790_v27 = vadd.f32 %v2672_v14, %v751_v19  ;;  %v791_v28 = vadd.f32 %v2672_v14, %v752_v20  ;;  %v808_v33 = vadd.f32 %v2672_v14, %v769_v25  ;;  %v809_v34 = vadd.f32 %v2672_v14, %v770_v26 }
  0x15   : > { %v806_v29 = vadd.f32 %v2672_v14, %v767_v21  ;;  %v807_v30 = vadd.f32 %v2672_v14, %v768_v22  ;;  %v824_v41 = vmax.f32 %v792_v31, 0.0  ;;  %v825_v42 = vmax.f32 %v793_v32, 0.0  ;;  %v2373_v32 = vld [vmem:[%s2658_s20 + $0x68] sm:$0xff]  }
  0x16   : > { %v822_v36 = vmax.f32 %v790_v27, 0.0  ;;  %v823_v37 = vmax.f32 %v791_v28, 0.0  ;;  %v840_v43 = vmax.f32 %v808_v33, 0.0  ;;  %v841_v44 = vmax.f32 %v809_v34, 0.0 }
  0x17   : > { %v838_v38 = vmax.f32 %v806_v29, 0.0  ;;  %v839_v39 = vmax.f32 %v807_v30, 0.0  ;;  %v855_v51 = vpack.c.bf16 %v825_v42, %v824_v41  ;;  %v2260_v53 = vunpack.c.l.bf16 %v2370_v40  ;;  %v2366_v41 = vld [vmem:[%s2658_s20 + $0x30] sm:$0xff]  }
  0x18   : > { %v854_v46 = vpack.c.bf16 %v823_v37, %v822_v36  ;;  %v863_v52 = vpack.c.bf16 %v841_v44, %v840_v43  ;;  %v2261_v54 = vunpack.c.h.bf16 %v2370_v40  ;;  %v755_v56 = vmul.f32 %v2228_v48, %v2663_v3 }
  0x19   : > { %v862_v47 = vpack.c.bf16 %v839_v39, %v838_v38  ;;  %v756_v57 = vmul.f32 %v2229_v49, %v2663_v3  ;;  %v2232_v58 = vunpack.c.l.bf16 %v2363_v45  ;;  %v2233_v59 = vunpack.c.h.bf16 %v2363_v45 }
  0x1a   : > { %2444 = vmatprep.mubr.msk.bf16.mxu0 %vm878_vm2, %v854_v46  ;;  %v771_v60 = vmul.f32 %v2260_v53, %v2663_v3  ;;  %v772_v61 = vmul.f32 %v2261_v54, %v2663_v3  ;;  %v2264_v62 = vunpack.c.l.bf16 %v2371_v50  ;;  %v2265_v63 = vunpack.c.h.bf16 %v2371_v50  ;;  %v2374_v54 = vld [vmem:[%s2658_s20 + $0x70] sm:$0xff]  }
  0x1b   : > { %2460 = vmatprep.mubr.msk.bf16.mxu1 %vm878_vm2, %v862_v47  ;;  %2445 = vmatmul.mubr.msk.bf16.vlgmr.msra.gmra.mxu0 %vm878_vm2, %v855_v51  ;;  %v794_v0 = vadd.f32 %v2672_v14, %v755_v56  ;;  %v795_v1 = vadd.f32 %v2672_v14, %v756_v57  ;;  %v757_v2 = vmul.f32 %v2232_v58, %v2663_v3  ;;  %v2236_v4 = vunpack.c.l.bf16 %v2364_v55 }
  0x1c   : > { %2461 = vmatmul.mubr.msk.bf16.vlgmr.msra.gmra.mxu1 %vm878_vm2, %v863_v52  ;;  %2511 = vmatpush3.bf16.msra.mxu0 %v1544_v8  ;;  %v810_v5 = vadd.f32 %v2672_v14, %v771_v60  ;;  %v811_v6 = vadd.f32 %v2672_v14, %v772_v61  ;;  %v758_v9 = vmul.f32 %v2233_v59, %v2663_v3  ;;  %v2237_v22 = vunpack.c.h.bf16 %v2364_v55 }
  0x1d   : > { %2477 = vmatpush3.bf16.msra.mxu1 %v1139_v7  ;;  %v773_v10 = vmul.f32 %v2264_v62, %v2663_v3  ;;  %v826_v11 = vmax.f32 %v794_v0, 0.0  ;;  %v827_v7 = vmax.f32 %v795_v1, 0.0  ;;  %v796_v8 = vadd.f32 %v2672_v14, %v757_v2 }
  0x1e   : > { %v774_v12 = vmul.f32 %v2265_v63, %v2663_v3  ;;  %v842_v13 = vmax.f32 %v810_v5, 0.0  ;;  %v843_v15 = vmax.f32 %v811_v6, 0.0  ;;  %v797_v16 = vadd.f32 %v2672_v14, %v758_v9  ;;  %v2367_v63 = vld [vmem:[%s2658_s20 + $0x38] sm:$0xff]  }
  0x1f   : > { %v812_v17 = vadd.f32 %v2672_v14, %v773_v10  ;;  %v856_v19 = vpack.c.bf16 %v827_v7, %v826_v11  ;;  %v828_v20 = vmax.f32 %v796_v8, 0.0  ;;  %v759_v27 = vmul.f32 %v2236_v4, %v2663_v3  ;;  %v2375_v5 = vld [vmem:[%s2658_s20 + $0x78] sm:$0xff]  }
  0x20   : > { %v813_v21 = vadd.f32 %v2672_v14, %v774_v12  ;;  %v864_v24 = vpack.c.bf16 %v843_v15, %v842_v13  ;;  %v829_v25 = vmax.f32 %v797_v16, 0.0  ;;  %v760_v29 = vmul.f32 %v2237_v22, %v2663_v3 }
  0x21   : > { %v844_v26 = vmax.f32 %v812_v17, 0.0  ;;  %2448 = vmatprep.mubr.msk.bf16.mxu0 %vm878_vm2, %v856_v19  ;;  %v2268_v30 = vunpack.c.l.bf16 %v2372_v18  ;;  %v2269_v31 = vunpack.c.h.bf16 %v2372_v18  ;;  %v798_v34 = vadd.f32 %v2672_v14, %v759_v27  ;;  %v2155_v19 = vld [vmem:[%s2748_s28] sm:$0xff]  }
  0x22   : > { %v845_v28 = vmax.f32 %v813_v21, 0.0  ;;  %2464 = vmatprep.mubr.msk.bf16.mxu1 %vm878_vm2, %v864_v24  ;;  %v857_v33 = vpack.c.bf16 %v829_v25, %v828_v20  ;;  %v2240_v35 = vunpack.c.l.bf16 %v2365_v23  ;;  %v2241_v36 = vunpack.c.h.bf16 %v2365_v23 }
  0x23   : > { %v799_v38 = vadd.f32 %v2672_v14, %v760_v29  ;;  %v775_v39 = vmul.f32 %v2268_v30, %v2663_v3  ;;  %v776_v40 = vmul.f32 %v2269_v31, %v2663_v3  ;;  %v830_v42 = vmax.f32 %v798_v34, 0.0 }
  0x24   : > { %v865_v37 = vpack.c.bf16 %v845_v28, %v844_v26  ;;  %2449 = vmatmul.mubr.msk.bf16.gmra.mxu0 %vm878_vm2, %v857_v33  ;;  %v761_v43 = vmul.f32 %v2240_v35, %v2663_v3  ;;  %v762_v44 = vmul.f32 %v2241_v36, %v2663_v3  ;;  %v2272_v45 = vunpack.c.l.bf16 %v2373_v32  ;;  %v2771_v28 = vld [vmem:[%s3181_s6] ss:$0 sm:$0xff] }
  0x25   : > { %v831_v46 = vmax.f32 %v799_v38, 0.0  ;;  %v814_v47 = vadd.f32 %v2672_v14, %v775_v39  ;;  %v815_v48 = vadd.f32 %v2672_v14, %v776_v40  ;;  %v2273_v49 = vunpack.c.h.bf16 %v2373_v32  ;;  %v2283_v33 = vld [vmem:[%s2762_s14] sm:$0xff]  }
  0x26   : > { %2465 = vmatmul.mubr.msk.bf16.gmra.mxu1 %vm878_vm2, %v865_v37  ;;  %v800_v50 = vadd.f32 %v2672_v14, %v761_v43  ;;  %v801_v51 = vadd.f32 %v2672_v14, %v762_v44  ;;  %v777_v52 = vmul.f32 %v2272_v45, %v2663_v3  ;;  %v2244_v53 = vunpack.c.l.bf16 %v2366_v41  ;;  %v2782_v38 = vld [vmem:[%s3184_s9] ss:$0 sm:$0xff]  ;;  %v2346_v44 = vld [vmem:[%s2748_s28 + $0x8] sm:$0xff]  }
  0x27   : > { %v858_v55 = vpack.c.bf16 %v831_v46, %v830_v42  ;;  %v846_v56 = vmax.f32 %v814_v47, 0.0  ;;  %v847_v57 = vmax.f32 %v815_v48, 0.0  ;;  %v778_v58 = vmul.f32 %v2273_v49, %v2663_v3  ;;  %v2789_v43 = vld [vmem:[%s3183_s8] ss:$0 sm:$0xff] }
  0x28   : > { %v832_v59 = vmax.f32 %v800_v50, 0.0  ;;  %v833_v60 = vmax.f32 %v801_v51, 0.0  ;;  %v816_v61 = vadd.f32 %v2672_v14, %v777_v52  ;;  %v2245_v62 = vunpack.c.h.bf16 %v2366_v41  ;;  %v2799_v52 = vld [vmem:[%s3186_s11] ss:$0 sm:$0xff] }
  0x29   : > { %2452 = vmatprep.mubr.msk.bf16.mxu0 %vm878_vm2, %v858_v55  ;;  %v866_v0 = vpack.c.bf16 %v847_v57, %v846_v56  ;;  %v817_v1 = vadd.f32 %v2672_v14, %v778_v58  ;;  %v763_v2 = vmul.f32 %v2244_v53, %v2663_v3  ;;  %v2276_v4 = vunpack.c.l.bf16 %v2374_v54  ;;  %v2376_v53 = vld [vmem:[%s2762_s14 + $0x8] sm:$0xff]  }
  0x2a   : > { %v859_v6 = vpack.c.bf16 %v833_v60, %v832_v59  ;;  %v848_v9 = vmax.f32 %v816_v61, 0.0  ;;  %v764_v10 = vmul.f32 %v2245_v62, %v2663_v3  ;;  %v2277_v11 = vunpack.c.h.bf16 %v2374_v54  ;;  %v2347_v61 = vld [vmem:[%s2748_s28 + $0x10] sm:$0xff]  }
  0x2b   : > { %2468 = vmatprep.mubr.msk.bf16.mxu1 %vm878_vm2, %v866_v0  ;;  %v849_v7 = vmax.f32 %v817_v1, 0.0  ;;  %v802_v8 = vadd.f32 %v2672_v14, %v763_v2  ;;  %v779_v12 = vmul.f32 %v2276_v4, %v2663_v3  ;;  %v2248_v13 = vunpack.c.l.bf16 %v2367_v63 }
  0x2c   : > { %2453 = vmatmul.mubr.msk.bf16.gmra.mxu0 %vm878_vm2, %v859_v6  ;;  %v803_v15 = vadd.f32 %v2672_v14, %v764_v10  ;;  %v780_v16 = vmul.f32 %v2277_v11, %v2663_v3  ;;  %v2249_v17 = vunpack.c.h.bf16 %v2367_v63  ;;  %v2280_v18 = vunpack.c.l.bf16 %v2375_v5 }
  0x2d   : > { %v867_v20 = vpack.c.bf16 %v849_v7, %v848_v9  ;;  %v834_v21 = vmax.f32 %v802_v8, 0.0  ;;  %v818_v22 = vadd.f32 %v2672_v14, %v779_v12  ;;  %v765_v23 = vmul.f32 %v2248_v13, %v2663_v3  ;;  %v2377_v8 = vld [vmem:[%s2762_s14 + $0x10] sm:$0xff]  }
  0x2e   : > { %v835_v24 = vmax.f32 %v803_v15, 0.0  ;;  %v819_v25 = vadd.f32 %v2672_v14, %v780_v16  ;;  %v766_v26 = vmul.f32 %v2249_v17, %v2663_v3  ;;  %v2281_v27 = vunpack.c.h.bf16 %v2375_v5 }
  0x2f   : > { %2469 = vmatmul.mubr.msk.bf16.gmra.mxu1 %vm878_vm2, %v867_v20  ;;  %v850_v29 = vmax.f32 %v818_v22, 0.0  ;;  %v804_v30 = vadd.f32 %v2672_v14, %v765_v23  ;;  %v781_v31 = vmul.f32 %v2280_v18, %v2663_v3  ;;  %v2156_v32 = vunpack.c.l.bf16 %v2155_v19 }
  0x30   : > { %v860_v34 = vpack.c.bf16 %v835_v24, %v834_v21  ;;  %v851_v35 = vmax.f32 %v819_v25, 0.0  ;;  %v805_v36 = vadd.f32 %v2672_v14, %v766_v26  ;;  %v782_v37 = vmul.f32 %v2281_v27, %v2663_v3  ;;  %v2348_v21 = vld [vmem:[%s2748_s28 + $0x18] sm:$0xff]  }
  0x31   : > { %v836_v39 = vmax.f32 %v804_v30, 0.0  ;;  %v820_v40 = vadd.f32 %v2672_v14, %v781_v31  ;;  %v2157_v41 = vunpack.c.h.bf16 %v2155_v19  ;;  %v560_v42 = vmul.f32 %v2156_v32, %v2771_v28  ;;  %v2378_v31 = vld [vmem:[%s2762_s14 + $0x18] sm:$0xff]  }
  0x32   : > { %2456 = vmatprep.mubr.msk.bf16.mxu0 %vm878_vm2, %v860_v34  ;;  %v868_v3 = vpack.c.bf16 %v851_v35, %v850_v29  ;;  %v837_v45 = vmax.f32 %v805_v36, 0.0  ;;  %v821_v46 = vadd.f32 %v2672_v14, %v782_v37  ;;  %v2284_v47 = vunpack.c.l.bf16 %v2283_v33 }
  0x33   : > { %v852_v48 = vmax.f32 %v820_v40, 0.0  ;;  %v561_v49 = vmul.f32 %v2157_v41, %v2771_v28  ;;  %v599_v50 = vadd.f32 %v2782_v38, %v560_v42  ;;  %v2285_v51 = vunpack.c.h.bf16 %v2283_v33  ;;  %v2349_v41 = vld [vmem:[%s2748_s28 + $0x20] sm:$0xff]  }
  0x34   : > { %2472 = vmatprep.mubr.msk.bf16.mxu1 %vm878_vm2, %v868_v3  ;;  %v861_v54 = vpack.c.bf16 %v837_v45, %v836_v39  ;;  %v853_v55 = vmax.f32 %v821_v46, 0.0  ;;  %v1373_v14 = vmul.f32 %v2284_v47, %v2789_v43  ;;  %v2160_v56 = vunpack.c.l.bf16 %v2346_v44 }
  0x35   : > { %v600_v57 = vadd.f32 %v2782_v38, %v561_v49  ;;  %v631_v58 = vmax.f32 %v599_v50, 0.0  ;;  %v1374_v59 = vmul.f32 %v2285_v51, %v2789_v43  ;;  %v2161_v60 = vunpack.c.h.bf16 %v2346_v44 }
  0x36   : > { %2457 = vmatmul.mubr.msk.bf16.gmra.mxu0 %vm878_vm2, %v861_v54  ;;  %v869_v62 = vpack.c.bf16 %v853_v55, %v852_v48  ;;  %v1412_v63 = vadd.f32 %v2799_v52, %v1373_v14  ;;  %v562_v0 = vmul.f32 %v2160_v56, %v2771_v28  ;;  %v2288_v1 = vunpack.c.l.bf16 %v2376_v53  ;;  %v2379_v55 = vld [vmem:[%s2762_s14 + $0x20] sm:$0xff]  }
  0x37   : > { %v632_v2 = vmax.f32 %v600_v57, 0.0  ;;  %v1413_v4 = vadd.f32 %v2799_v52, %v1374_v59  ;;  %v563_v5 = vmul.f32 %v2161_v60, %v2771_v28  ;;  %v2289_v6 = vunpack.c.h.bf16 %v2376_v53 }
  0x38   : > { %2473 = vmatmul.mubr.msk.bf16.gmra.mxu1 %vm878_vm2, %v869_v62  ;;  %v1444_v9 = vmax.f32 %v1412_v63, 0.0  ;;  %v601_v10 = vadd.f32 %v2782_v38, %v562_v0  ;;  %v1375_v11 = vmul.f32 %v2288_v1, %v2789_v43  ;;  %v2164_v7 = vunpack.c.l.bf16 %v2347_v61  ;;  %v2350_v63 = vld [vmem:[%s2748_s28 + $0x28] sm:$0xff]  }
  0x39   : > { %v663_v12 = vpack.c.bf16 %v632_v2, %v631_v58  ;;  %v1445_v13 = vmax.f32 %v1413_v4, 0.0  ;;  %v602_v15 = vadd.f32 %v2782_v38, %v563_v5  ;;  %v1376_v16 = vmul.f32 %v2289_v6, %v2789_v43 }
  0x3a   : > { %v633_v17 = vmax.f32 %v601_v10, 0.0  ;;  %v1414_v18 = vadd.f32 %v2799_v52, %v1375_v11  ;;  %v2165_v19 = vunpack.c.h.bf16 %v2347_v61  ;;  %v564_v20 = vmul.f32 %v2164_v7, %v2771_v28  ;;  %v2380_v11 = vld [vmem:[%s2762_s14 + $0x28] sm:$0xff]  }
  0x3b   : > { %2478 = vmatprep.mubr.msk.bf16.mxu1 %vm1088_vm3, %v663_v12  ;;  %v1476_v22 = vpack.c.bf16 %v1445_v13, %v1444_v9  ;;  %v634_v23 = vmax.f32 %v602_v15, 0.0  ;;  %v1415_v24 = vadd.f32 %v2799_v52, %v1376_v16  ;;  %v2292_v25 = vunpack.c.l.bf16 %v2377_v8 }
  0x3c   : > { %v1446_v26 = vmax.f32 %v1414_v18, 0.0  ;;  %v565_v27 = vmul.f32 %v2165_v19, %v2771_v28  ;;  %v603_v29 = vadd.f32 %v2782_v38, %v564_v20  ;;  %v2293_v30 = vunpack.c.h.bf16 %v2377_v8  ;;  %v2351_v19 = vld [vmem:[%s2748_s28 + $0x30] sm:$0xff]  }
  0x3d   : > { %2512 = vmatprep.mubr.msk.bf16.mxu0 %vm1493_vm4, %v1476_v22  ;;  %v664_v32 = vpack.c.bf16 %v634_v23, %v633_v17  ;;  %v1447_v33 = vmax.f32 %v1415_v24, 0.0  ;;  %v1377_v34 = vmul.f32 %v2292_v25, %v2789_v43  ;;  %v2168_v35 = vunpack.c.l.bf16 %v2348_v21 }
  0x3e   : > { %v604_v36 = vadd.f32 %v2782_v38, %v565_v27  ;;  %v635_v37 = vmax.f32 %v603_v29, 0.0  ;;  %v1378_v39 = vmul.f32 %v2293_v30, %v2789_v43  ;;  %v2169_v40 = vunpack.c.h.bf16 %v2348_v21 }
  0x3f   : > { %v1477_v42 = vpack.c.bf16 %v1447_v33, %v1446_v26  ;;  %v1416_v44 = vadd.f32 %v2799_v52, %v1377_v34  ;;  %v566_v3 = vmul.f32 %v2168_v35, %v2771_v28  ;;  %v2296_v45 = vunpack.c.l.bf16 %v2378_v31  ;;  %v2381_v33 = vld [vmem:[%s2762_s14 + $0x30] sm:$0xff]  }
  0x40   : > { %2479 = vmatmul.mubr.msk.bf16.vlgmr.msra.gmra.mxu1 %vm1088_vm3, %v664_v32  ;;  %v636_v46 = vmax.f32 %v604_v36, 0.0  ;;  %v1417_v47 = vadd.f32 %v2799_v52, %v1378_v39  ;;  %v567_v48 = vmul.f32 %v2169_v40, %v2771_v28  ;;  %v2297_v49 = vunpack.c.h.bf16 %v2378_v31 }
  0x41   : > { %2513 = vmatmul.mubr.msk.bf16.vlgmr.msra.gmra.mxu0 %vm1493_vm4, %v1477_v42  ;;  %v1448_v50 = vmax.f32 %v1416_v44, 0.0  ;;  %v605_v51 = vadd.f32 %v2782_v38, %v566_v3  ;;  %v1379_v53 = vmul.f32 %v2296_v45, %v2789_v43  ;;  %v2172_v54 = vunpack.c.l.bf16 %v2349_v41  ;;  %v2352_v44 = vld [vmem:[%s2748_s28 + $0x38] sm:$0xff]  }
  0x42   : > { %v665_v14 = vpack.c.bf16 %v636_v46, %v635_v37  ;;  %v1449_v56 = vmax.f32 %v1417_v47, 0.0  ;;  %v606_v57 = vadd.f32 %v2782_v38, %v567_v48  ;;  %v1380_v58 = vmul.f32 %v2297_v49, %v2789_v43 }
  0x43   : > { %v637_v59 = vmax.f32 %v605_v51, 0.0  ;;  %v1418_v60 = vadd.f32 %v2799_v52, %v1379_v53  ;;  %v2173_v61 = vunpack.c.h.bf16 %v2349_v41  ;;  %v568_v62 = vmul.f32 %v2172_v54, %v2771_v28  ;;  %v2382_v53 = vld [vmem:[%s2762_s14 + $0x38] sm:$0xff]  }
  0x44   : > { %2482 = vmatprep.mubr.msk.bf16.mxu1 %vm1088_vm3, %v665_v14  ;;  %v1478_v0 = vpack.c.bf16 %v1449_v56, %v1448_v50  ;;  %v638_v1 = vmax.f32 %v606_v57, 0.0  ;;  %v1419_v2 = vadd.f32 %v2799_v52, %v1380_v58  ;;  %v2300_v4 = vunpack.c.l.bf16 %v2379_v55 }
  0x45   : > { %v1450_v5 = vmax.f32 %v1418_v60, 0.0  ;;  %v569_v6 = vmul.f32 %v2173_v61, %v2771_v28  ;;  %v607_v9 = vadd.f32 %v2782_v38, %v568_v62  ;;  %v2301_v10 = vunpack.c.h.bf16 %v2379_v55  ;;  %v2353_v61 = vld [vmem:[%s2748_s28 + $0x40] sm:$0xff]  }
  0x46   : > { %2516 = vmatprep.mubr.msk.bf16.mxu0 %vm1493_vm4, %v1478_v0  ;;  %v666_v7 = vpack.c.bf16 %v638_v1, %v637_v59  ;;  %v1451_v8 = vmax.f32 %v1419_v2, 0.0  ;;  %v1381_v12 = vmul.f32 %v2300_v4, %v2789_v43  ;;  %v2176_v13 = vunpack.c.l.bf16 %v2350_v63 }
  0x47   : > { %v608_v15 = vadd.f32 %v2782_v38, %v569_v6  ;;  %v639_v16 = vmax.f32 %v607_v9, 0.0  ;;  %v1382_v17 = vmul.f32 %v2301_v10, %v2789_v43  ;;  %v2177_v18 = vunpack.c.h.bf16 %v2350_v63 }
  0x48   : > { %2483 = vmatmul.mubr.msk.bf16.gmra.mxu1 %vm1088_vm3, %v666_v7  ;;  %v1479_v20 = vpack.c.bf16 %v1451_v8, %v1450_v5  ;;  %v1420_v21 = vadd.f32 %v2799_v52, %v1381_v12  ;;  %v570_v22 = vmul.f32 %v2176_v13, %v2771_v28  ;;  %v2304_v23 = vunpack.c.l.bf16 %v2380_v11  ;;  %v2383_v8 = vld [vmem:[%s2762_s14 + $0x40] sm:$0xff]  }
  0x49   : > { %v640_v24 = vmax.f32 %v608_v15, 0.0  ;;  %v1421_v25 = vadd.f32 %v2799_v52, %v1382_v17  ;;  %v571_v26 = vmul.f32 %v2177_v18, %v2771_v28  ;;  %v2305_v27 = vunpack.c.h.bf16 %v2380_v11 }
  0x4a   : > { %2517 = vmatmul.mubr.msk.bf16.gmra.mxu0 %vm1493_vm4, %v1479_v20  ;;  %v1452_v29 = vmax.f32 %v1420_v21, 0.0  ;;  %v609_v30 = vadd.f32 %v2782_v38, %v570_v22  ;;  %v1383_v31 = vmul.f32 %v2304_v23, %v2789_v43  ;;  %v2180_v32 = vunpack.c.l.bf16 %v2351_v19  ;;  %v2354_v21 = vld [vmem:[%s2748_s28 + $0x48] sm:$0xff]  }
  0x4b   : > { %v667_v34 = vpack.c.bf16 %v640_v24, %v639_v16  ;;  %v1453_v35 = vmax.f32 %v1421_v25, 0.0  ;;  %v610_v36 = vadd.f32 %v2782_v38, %v571_v26  ;;  %v1384_v37 = vmul.f32 %v2305_v27, %v2789_v43 }
  0x4c   : > { %v641_v39 = vmax.f32 %v609_v30, 0.0  ;;  %v1422_v40 = vadd.f32 %v2799_v52, %v1383_v31  ;;  %v2181_v41 = vunpack.c.h.bf16 %v2351_v19  ;;  %v572_v42 = vmul.f32 %v2180_v32, %v2771_v28  ;;  %v2384_v31 = vld [vmem:[%s2762_s14 + $0x48] sm:$0xff]  }
  0x4d   : > { %2486 = vmatprep.mubr.msk.bf16.mxu1 %vm1088_vm3, %v667_v34  ;;  %v1480_v3 = vpack.c.bf16 %v1453_v35, %v1452_v29  ;;  %v642_v45 = vmax.f32 %v610_v36, 0.0  ;;  %v1423_v46 = vadd.f32 %v2799_v52, %v1384_v37  ;;  %v2308_v47 = vunpack.c.l.bf16 %v2381_v33 }
  0x4e   : > { %v1454_v48 = vmax.f32 %v1422_v40, 0.0  ;;  %v573_v49 = vmul.f32 %v2181_v41, %v2771_v28  ;;  %v611_v50 = vadd.f32 %v2782_v38, %v572_v42  ;;  %v2309_v51 = vunpack.c.h.bf16 %v2381_v33  ;;  %v2355_v41 = vld [vmem:[%s2748_s28 + $0x50] sm:$0xff]  }
  0x4f   : > { %2520 = vmatprep.mubr.msk.bf16.mxu0 %vm1493_vm4, %v1480_v3  ;;  %v668_v54 = vpack.c.bf16 %v642_v45, %v641_v39  ;;  %v1455_v55 = vmax.f32 %v1423_v46, 0.0  ;;  %v1385_v14 = vmul.f32 %v2308_v47, %v2789_v43  ;;  %v2184_v56 = vunpack.c.l.bf16 %v2352_v44 }
  0x50   : > { %v612_v57 = vadd.f32 %v2782_v38, %v573_v49  ;;  %v643_v58 = vmax.f32 %v611_v50, 0.0  ;;  %v1386_v59 = vmul.f32 %v2309_v51, %v2789_v43  ;;  %v2185_v60 = vunpack.c.h.bf16 %v2352_v44 }
  0x51   : > { %2487 = vmatmul.mubr.msk.bf16.gmra.mxu1 %vm1088_vm3, %v668_v54  ;;  %v1481_v62 = vpack.c.bf16 %v1455_v55, %v1454_v48  ;;  %v1424_v63 = vadd.f32 %v2799_v52, %v1385_v14  ;;  %v574_v0 = vmul.f32 %v2184_v56, %v2771_v28  ;;  %v2312_v1 = vunpack.c.l.bf16 %v2382_v53  ;;  %v2385_v55 = vld [vmem:[%s2762_s14 + $0x50] sm:$0xff]  }
  0x52   : > { %v644_v2 = vmax.f32 %v612_v57, 0.0  ;;  %v1425_v4 = vadd.f32 %v2799_v52, %v1386_v59  ;;  %v575_v5 = vmul.f32 %v2185_v60, %v2771_v28  ;;  %v2313_v6 = vunpack.c.h.bf16 %v2382_v53 }
  0x53   : > { %2521 = vmatmul.mubr.msk.bf16.gmra.mxu0 %vm1493_vm4, %v1481_v62  ;;  %v1456_v9 = vmax.f32 %v1424_v63, 0.0  ;;  %v613_v10 = vadd.f32 %v2782_v38, %v574_v0  ;;  %v1387_v11 = vmul.f32 %v2312_v1, %v2789_v43  ;;  %v2188_v7 = vunpack.c.l.bf16 %v2353_v61  ;;  %v2356_v63 = vld [vmem:[%s2748_s28 + $0x58] sm:$0xff]  }
  0x54   : > { %v669_v12 = vpack.c.bf16 %v644_v2, %v643_v58  ;;  %v1457_v13 = vmax.f32 %v1425_v4, 0.0  ;;  %v614_v15 = vadd.f32 %v2782_v38, %v575_v5  ;;  %v1388_v16 = vmul.f32 %v2313_v6, %v2789_v43 }
  0x55   : > { %v645_v17 = vmax.f32 %v613_v10, 0.0  ;;  %v1426_v18 = vadd.f32 %v2799_v52, %v1387_v11  ;;  %v2189_v19 = vunpack.c.h.bf16 %v2353_v61  ;;  %v576_v20 = vmul.f32 %v2188_v7, %v2771_v28  ;;  %v2386_v11 = vld [vmem:[%s2762_s14 + $0x58] sm:$0xff]  }
  0x56   : > { %2490 = vmatprep.mubr.msk.bf16.mxu1 %vm1088_vm3, %v669_v12  ;;  %v1482_v22 = vpack.c.bf16 %v1457_v13, %v1456_v9  ;;  %v646_v23 = vmax.f32 %v614_v15, 0.0  ;;  %v1427_v24 = vadd.f32 %v2799_v52, %v1388_v16  ;;  %v2316_v25 = vunpack.c.l.bf16 %v2383_v8 }
  0x57   : > { %v1458_v26 = vmax.f32 %v1426_v18, 0.0  ;;  %v577_v27 = vmul.f32 %v2189_v19, %v2771_v28  ;;  %v615_v29 = vadd.f32 %v2782_v38, %v576_v20  ;;  %v2317_v30 = vunpack.c.h.bf16 %v2383_v8  ;;  %v2357_v19 = vld [vmem:[%s2748_s28 + $0x60] sm:$0xff]  }
  0x58   : > { %2524 = vmatprep.mubr.msk.bf16.mxu0 %vm1493_vm4, %v1482_v22  ;;  %v670_v32 = vpack.c.bf16 %v646_v23, %v645_v17  ;;  %v1459_v33 = vmax.f32 %v1427_v24, 0.0  ;;  %v1389_v34 = vmul.f32 %v2316_v25, %v2789_v43  ;;  %v2192_v35 = vunpack.c.l.bf16 %v2354_v21 }
  0x59   : > { %v616_v36 = vadd.f32 %v2782_v38, %v577_v27  ;;  %v647_v37 = vmax.f32 %v615_v29, 0.0  ;;  %v1390_v39 = vmul.f32 %v2317_v30, %v2789_v43  ;;  %v2193_v40 = vunpack.c.h.bf16 %v2354_v21 }
  0x5a   : > { %2491 = vmatmul.mubr.msk.bf16.gmra.mxu1 %vm1088_vm3, %v670_v32  ;;  %v1483_v42 = vpack.c.bf16 %v1459_v33, %v1458_v26  ;;  %v1428_v44 = vadd.f32 %v2799_v52, %v1389_v34  ;;  %v578_v3 = vmul.f32 %v2192_v35, %v2771_v28  ;;  %v2320_v45 = vunpack.c.l.bf16 %v2384_v31  ;;  %v2387_v33 = vld [vmem:[%s2762_s14 + $0x60] sm:$0xff]  }
  0x5b   : > { %v648_v46 = vmax.f32 %v616_v36, 0.0  ;;  %v1429_v47 = vadd.f32 %v2799_v52, %v1390_v39  ;;  %v579_v48 = vmul.f32 %v2193_v40, %v2771_v28  ;;  %v2321_v49 = vunpack.c.h.bf16 %v2384_v31 }
  0x5c   : > { %2525 = vmatmul.mubr.msk.bf16.gmra.mxu0 %vm1493_vm4, %v1483_v42  ;;  %v1460_v50 = vmax.f32 %v1428_v44, 0.0  ;;  %v617_v51 = vadd.f32 %v2782_v38, %v578_v3  ;;  %v1391_v53 = vmul.f32 %v2320_v45, %v2789_v43  ;;  %v2196_v54 = vunpack.c.l.bf16 %v2355_v41  ;;  %v2358_v44 = vld [vmem:[%s2748_s28 + $0x68] sm:$0xff]  }
  0x5d   : > { %v671_v14 = vpack.c.bf16 %v648_v46, %v647_v37  ;;  %v1461_v56 = vmax.f32 %v1429_v47, 0.0  ;;  %v618_v57 = vadd.f32 %v2782_v38, %v579_v48  ;;  %v1392_v58 = vmul.f32 %v2321_v49, %v2789_v43 }
  0x5e   : > { %v649_v59 = vmax.f32 %v617_v51, 0.0  ;;  %v1430_v60 = vadd.f32 %v2799_v52, %v1391_v53  ;;  %v2197_v61 = vunpack.c.h.bf16 %v2355_v41  ;;  %v580_v62 = vmul.f32 %v2196_v54, %v2771_v28  ;;  %v2388_v53 = vld [vmem:[%s2762_s14 + $0x68] sm:$0xff]  }
  0x5f   : > { %2494 = vmatprep.mubr.msk.bf16.mxu1 %vm1088_vm3, %v671_v14  ;;  %v1484_v0 = vpack.c.bf16 %v1461_v56, %v1460_v50  ;;  %v650_v1 = vmax.f32 %v618_v57, 0.0  ;;  %v1431_v2 = vadd.f32 %v2799_v52, %v1392_v58  ;;  %v2324_v4 = vunpack.c.l.bf16 %v2385_v55 }
  0x60   : > { %v1462_v5 = vmax.f32 %v1430_v60, 0.0  ;;  %v581_v6 = vmul.f32 %v2197_v61, %v2771_v28  ;;  %v619_v9 = vadd.f32 %v2782_v38, %v580_v62  ;;  %v2325_v10 = vunpack.c.h.bf16 %v2385_v55  ;;  %v2359_v61 = vld [vmem:[%s2748_s28 + $0x70] sm:$0xff]  }
  0x61   : > { %2528 = vmatprep.mubr.msk.bf16.mxu0 %vm1493_vm4, %v1484_v0  ;;  %v672_v7 = vpack.c.bf16 %v650_v1, %v649_v59  ;;  %v1463_v8 = vmax.f32 %v1431_v2, 0.0  ;;  %v1393_v12 = vmul.f32 %v2324_v4, %v2789_v43  ;;  %v2200_v13 = vunpack.c.l.bf16 %v2356_v63 }
  0x62   : > { %v620_v15 = vadd.f32 %v2782_v38, %v581_v6  ;;  %v651_v16 = vmax.f32 %v619_v9, 0.0  ;;  %v1394_v17 = vmul.f32 %v2325_v10, %v2789_v43  ;;  %v2201_v18 = vunpack.c.h.bf16 %v2356_v63 }
  0x63   : > { %2495 = vmatmul.mubr.msk.bf16.gmra.mxu1 %vm1088_vm3, %v672_v7  ;;  %v1485_v20 = vpack.c.bf16 %v1463_v8, %v1462_v5  ;;  %v1432_v21 = vadd.f32 %v2799_v52, %v1393_v12  ;;  %v582_v22 = vmul.f32 %v2200_v13, %v2771_v28  ;;  %v2328_v23 = vunpack.c.l.bf16 %v2386_v11  ;;  %v2389_v8 = vld [vmem:[%s2762_s14 + $0x70] sm:$0xff]  }
  0x64   : > { %v652_v24 = vmax.f32 %v620_v15, 0.0  ;;  %v1433_v25 = vadd.f32 %v2799_v52, %v1394_v17  ;;  %v583_v26 = vmul.f32 %v2201_v18, %v2771_v28  ;;  %v2329_v27 = vunpack.c.h.bf16 %v2386_v11 }
  0x65   : > { %2529 = vmatmul.mubr.msk.bf16.gmra.mxu0 %vm1493_vm4, %v1485_v20  ;;  %v1464_v29 = vmax.f32 %v1432_v21, 0.0  ;;  %v621_v30 = vadd.f32 %v2782_v38, %v582_v22  ;;  %v1395_v31 = vmul.f32 %v2328_v23, %v2789_v43  ;;  %v2204_v32 = vunpack.c.l.bf16 %v2357_v19  ;;  %v2360_v21 = vld [vmem:[%s2748_s28 + $0x78] sm:$0xff]  }
  0x66   : > { %v673_v34 = vpack.c.bf16 %v652_v24, %v651_v16  ;;  %v1465_v35 = vmax.f32 %v1433_v25, 0.0  ;;  %v622_v36 = vadd.f32 %v2782_v38, %v583_v26  ;;  %v1396_v37 = vmul.f32 %v2329_v27, %v2789_v43 }
  0x67   : > { %v653_v39 = vmax.f32 %v621_v30, 0.0  ;;  %v1434_v40 = vadd.f32 %v2799_v52, %v1395_v31  ;;  %v2205_v41 = vunpack.c.h.bf16 %v2357_v19  ;;  %v584_v42 = vmul.f32 %v2204_v32, %v2771_v28  ;;  %v2390_v31 = vld [vmem:[%s2762_s14 + $0x78] sm:$0xff]  }
  0x68   : > { %2498 = vmatprep.mubr.msk.bf16.mxu1 %vm1088_vm3, %v673_v34  ;;  %v1486_v3 = vpack.c.bf16 %v1465_v35, %v1464_v29  ;;  %v654_v45 = vmax.f32 %v622_v36, 0.0  ;;  %v1435_v46 = vadd.f32 %v2799_v52, %v1396_v37  ;;  %v2332_v47 = vunpack.c.l.bf16 %v2387_v33 }
  0x69   : > { %v1466_v48 = vmax.f32 %v1434_v40, 0.0  ;;  %v585_v49 = vmul.f32 %v2205_v41, %v2771_v28  ;;  %v623_v50 = vadd.f32 %v2782_v38, %v584_v42  ;;  %v2333_v51 = vunpack.c.h.bf16 %v2387_v33 }
  0x6a   : > { %2532 = vmatprep.mubr.msk.bf16.mxu0 %vm1493_vm4, %v1486_v3  ;;  %v674_v54 = vpack.c.bf16 %v654_v45, %v653_v39  ;;  %v1467_v55 = vmax.f32 %v1435_v46, 0.0  ;;  %v1397_v14 = vmul.f32 %v2332_v47, %v2789_v43  ;;  %v2208_v56 = vunpack.c.l.bf16 %v2358_v44 }
  0x6b   : > { %v624_v57 = vadd.f32 %v2782_v38, %v585_v49  ;;  %v655_v58 = vmax.f32 %v623_v50, 0.0  ;;  %v1398_v59 = vmul.f32 %v2333_v51, %v2789_v43  ;;  %v2209_v60 = vunpack.c.h.bf16 %v2358_v44 }
  0x6c   : > { %2499 = vmatmul.mubr.msk.bf16.gmra.mxu1 %vm1088_vm3, %v674_v54  ;;  %v1487_v62 = vpack.c.bf16 %v1467_v55, %v1466_v48  ;;  %v1436_v63 = vadd.f32 %v2799_v52, %v1397_v14  ;;  %v586_v0 = vmul.f32 %v2208_v56, %v2771_v28  ;;  %v2336_v1 = vunpack.c.l.bf16 %v2388_v53 }
  0x6d   : > { %v656_v2 = vmax.f32 %v624_v57, 0.0  ;;  %v1437_v4 = vadd.f32 %v2799_v52, %v1398_v59  ;;  %v587_v5 = vmul.f32 %v2209_v60, %v2771_v28  ;;  %v2337_v6 = vunpack.c.h.bf16 %v2388_v53 }
  0x6e   : > { %2533 = vmatmul.mubr.msk.bf16.gmra.mxu0 %vm1493_vm4, %v1487_v62  ;;  %v1468_v9 = vmax.f32 %v1436_v63, 0.0  ;;  %v625_v10 = vadd.f32 %v2782_v38, %v586_v0  ;;  %v1399_v11 = vmul.f32 %v2336_v1, %v2789_v43  ;;  %v2212_v7 = vunpack.c.l.bf16 %v2359_v61 }
  0x6f   : > { %v675_v12 = vpack.c.bf16 %v656_v2, %v655_v58  ;;  %v1469_v13 = vmax.f32 %v1437_v4, 0.0  ;;  %v626_v15 = vadd.f32 %v2782_v38, %v587_v5  ;;  %v1400_v16 = vmul.f32 %v2337_v6, %v2789_v43 }
  0x70   : > { %v657_v17 = vmax.f32 %v625_v10, 0.0  ;;  %v1438_v18 = vadd.f32 %v2799_v52, %v1399_v11  ;;  %v2213_v19 = vunpack.c.h.bf16 %v2359_v61  ;;  %v588_v20 = vmul.f32 %v2212_v7, %v2771_v28 }
  0x71   : > { %2502 = vmatprep.mubr.msk.bf16.mxu1 %vm1088_vm3, %v675_v12  ;;  %v1488_v22 = vpack.c.bf16 %v1469_v13, %v1468_v9  ;;  %v658_v23 = vmax.f32 %v626_v15, 0.0  ;;  %v1439_v24 = vadd.f32 %v2799_v52, %v1400_v16  ;;  %v2340_v25 = vunpack.c.l.bf16 %v2389_v8 }
  0x72   : > { %v1470_v26 = vmax.f32 %v1438_v18, 0.0  ;;  %v589_v27 = vmul.f32 %v2213_v19, %v2771_v28  ;;  %v627_v29 = vadd.f32 %v2782_v38, %v588_v20  ;;  %v2341_v30 = vunpack.c.h.bf16 %v2389_v8 }
  0x73   : > { %2536 = vmatprep.mubr.msk.bf16.mxu0 %vm1493_vm4, %v1488_v22  ;;  %v676_v32 = vpack.c.bf16 %v658_v23, %v657_v17  ;;  %v1471_v33 = vmax.f32 %v1439_v24, 0.0  ;;  %v1401_v34 = vmul.f32 %v2340_v25, %v2789_v43  ;;  %v2216_v35 = vunpack.c.l.bf16 %v2360_v21 }
  0x74   : > { %v628_v36 = vadd.f32 %v2782_v38, %v589_v27  ;;  %v659_v37 = vmax.f32 %v627_v29, 0.0  ;;  %v1402_v39 = vmul.f32 %v2341_v30, %v2789_v43  ;;  %v2217_v40 = vunpack.c.h.bf16 %v2360_v21 }
  0x75   : > { %2503 = vmatmul.mubr.msk.bf16.gmra.mxu1 %vm1088_vm3, %v676_v32  ;;  %v1489_v41 = vpack.c.bf16 %v1471_v33, %v1470_v26  ;;  %v1440_v42 = vadd.f32 %v2799_v52, %v1401_v34  ;;  %v590_v44 = vmul.f32 %v2216_v35, %v2771_v28  ;;  %v2344_v3 = vunpack.c.l.bf16 %v2390_v31  ;;  %v3043_v35 = vld [vmem:[%s3187_s12] ss:$0 sm:$0xff] }
  0x76   : > { %v660_v45 = vmax.f32 %v628_v36, 0.0  ;;  %v1441_v46 = vadd.f32 %v2799_v52, %v1402_v39  ;;  %v591_v47 = vmul.f32 %v2217_v40, %v2771_v28  ;;  %v2345_v48 = vunpack.c.h.bf16 %v2390_v31 }
  0x77   : > { %2537 = vmatmul.mubr.msk.bf16.gmra.mxu0 %vm1493_vm4, %v1489_v41  ;;  %v1472_v49 = vmax.f32 %v1440_v42, 0.0  ;;  %v629_v50 = vadd.f32 %v2782_v38, %v590_v44  ;;  %v1403_v51 = vmul.f32 %v2344_v3, %v2789_v43 }
  0x78   : > { %v677_v53 = vpack.c.bf16 %v660_v45, %v659_v37  ;;  %v1473_v54 = vmax.f32 %v1441_v46, 0.0  ;;  %v630_v55 = vadd.f32 %v2782_v38, %v591_v47  ;;  %v1404_v14 = vmul.f32 %v2345_v48, %v2789_v43 }
  0x79   : > { %v661_v56 = vmax.f32 %v629_v50, 0.0  ;;  %v1442_v57 = vadd.f32 %v2799_v52, %v1403_v51 }
  0x7a   : > { %2506 = vmatprep.mubr.msk.bf16.mxu1 %vm1088_vm3, %v677_v53  ;;  %v1490_v28 = vpack.c.bf16 %v1473_v54, %v1472_v49  ;;  %v662_v58 = vmax.f32 %v630_v55, 0.0  ;;  %v1443_v59 = vadd.f32 %v2799_v52, %v1404_v14 }
  0x7b   : > { %v1474_v60 = vmax.f32 %v1442_v57, 0.0 }
  0x7c   : > { %2540 = vmatprep.mubr.msk.bf16.mxu0 %vm1493_vm4, %v1490_v28  ;;  %v678_v61 = vpack.c.bf16 %v662_v58, %v661_v56  ;;  %v1475_v62 = vmax.f32 %v1443_v59, 0.0 }
  0x7e   : > { %2507 = vmatmul.mubr.msk.bf16.gmra.mxu1 %vm1088_vm3, %v678_v61  ;;  %v1491_v63 = vpack.c.bf16 %v1475_v62, %v1474_v60 }
  0x80   : > { %2541 = vmatmul.mubr.msk.bf16.gmra.mxu0 %vm1493_vm4, %v1491_v63 }
  0xdb   : > { %v2446_v38 = vpop.f32.mrf.mxu0 }
  0xdc   : > { %v2990_v43 = vpop.f32.mrf.mxu1 }
  0xdd   : > { %v961_v0 = vpop.f32.mrf.mxu0 }
  0xde   : > { %v2992_v1 = vpop.f32.mrf.mxu1 }
  0xdf   : > { %v2447_v2 = vpop.f32.mrf.mxu0 }
  0xe0   : > { %v2994_v4 = vpop.f32.mrf.mxu1 }
  0xe1   : > { %v964_v52 = vpop.f32.mrf.mxu0 }
  0xe2   : > { %v2996_v5 = vpop.f32.mrf.mxu1 }
  0xe4   : > { %v2450_v6 = vpop.f32.mrf.mxu0 }
  0xe6   : > { %v2998_v9 = vpop.f32.mrf.mxu1  ;;  %v977_v10 = vpop.f32.mrf.mxu0 }
  0xe8   : > { %v3000_v11 = vpop.f32.mrf.mxu1  ;;  %v2451_v7 = vpop.f32.mrf.mxu0 }
  0xea   : > { %v3002_v8 = vpop.f32.mrf.mxu1  ;;  %v3004_v12 = vpop.f32.mrf.mxu0 }
  0xec   : > { %v3006_v13 = vpop.f32.mrf.mxu1  ;;  %v3008_v15 = vpop.f32.mrf.mxu0 }
  0xee   : > { %v3010_v16 = vpop.f32.mrf.mxu0 }
  0xef   : > { %v3012_v17 = vpop.f32.mrf.mxu1 }
  0xf0   : > { %v3014_v18 = vpop.f32.mrf.mxu0 }
  0xf1   : > { %v3016_v19 = vpop.f32.mrf.mxu1 }
  0xf2   : > { %v3018_v20 = vpop.f32.mrf.mxu0 }
  0xf3   : > { %v3020_v21 = vpop.f32.mrf.mxu1 }
  0xf5   : > { %v3022_v22 = vpop.f32.mrf.mxu1 }
  0xf6   : > { %v3024_v23 = vpop.f32.mrf.mxu0 }
  0xf8   : > { %v3026_v24 = vpop.f32.mrf.mxu1  ;;  %v3028_v25 = vpop.f32.mrf.mxu0 }
  0xfa   : > { %v3030_v26 = vpop.f32.mrf.mxu1  ;;  %v3032_v27 = vpop.f32.mrf.mxu0 }
  0xfc   : > { %v3034_v29 = vpop.f32.mrf.mxu1  ;;  %v3036_v30 = vpop.f32.mrf.mxu0 }
  0xfe   : > { %v3038_v31 = vpop.f32.mrf.mxu1 }
 0x100   : > { %v2480_v32 = vpop.f32.mrf.mxu1 }
 0x101   : > { %v1184_v33 = vadd.f32 %v2480_v32, %v2446_v38  ;;  %v2514_v34 = vpop.f32.mrf.mxu0 }
 0x102   : > { %v1175_v36 = vpop.f32.mrf.mxu1 }
 0x103   : > { %v1709_v37 = vadd.f32 %v2514_v34, %v1184_v33  ;;  %v1176_v39 = vadd.f32 %v1175_v36, %v961_v0  ;;  %v1580_v40 = vpop.f32.mrf.mxu0 }
 0x104   : > { %v2481_v41 = vpop.f32.mrf.mxu1 }
 0x105   : > { %v1748_v42 = vadd.f32 %v3043_v35, %v1709_v37  ;;  %v1707_v44 = vadd.f32 %v1580_v40, %v1176_v39  ;;  %v1187_v3 = vadd.f32 %v2481_v41, %v2447_v2  ;;  %v2515_v45 = vpop.f32.mrf.mxu0 }
 0x106   : > { %v1178_v46 = vpop.f32.mrf.mxu1 }
 0x107   : > { %v2124_v47 = vpack.c.bf16 %v1748_v42, %v1748_v42  ;;  %v1746_v48 = vadd.f32 %v3043_v35, %v1707_v44  ;;  %v1710_v49 = vadd.f32 %v2515_v45, %v1187_v3  ;;  %v1179_v50 = vadd.f32 %v1178_v46, %v964_v52  ;;  %v1583_v51 = vpop.f32.mrf.mxu0 }
 0x108   : > { %v2484_v53 = vpop.f32.mrf.mxu1 }
 0x109   : > { %1909 = vst.msk [vmem:[%s3050_s29 + $0x8] sm:$0xf] %vm1906_vm5, %v2124_v47  ;;  %v2122_v54 = vpack.c.bf16 %v1746_v48, %v1746_v48  ;;  %v1749_v55 = vadd.f32 %v3043_v35, %v1710_v49  ;;  %v1708_v14 = vadd.f32 %v1583_v51, %v1179_v50  ;;  %v1200_v56 = vadd.f32 %v2484_v53, %v2450_v6 }
 0x10a   : > { %v2518_v57 = vpop.f32.mrf.mxu0  ;;  %v1191_v28 = vpop.f32.mrf.mxu1 }
 0x10b   : > { %1907 = vst.msk [vmem:[%s3050_s29] sm:$0xf] %vm1906_vm5, %v2122_v54  ;;  %v2125_v58 = vpack.c.bf16 %v1749_v55, %v1749_v55  ;;  %v1747_v59 = vadd.f32 %v3043_v35, %v1708_v14  ;;  %v1713_v60 = vadd.f32 %v2518_v57, %v1200_v56  ;;  %v1192_v61 = vadd.f32 %v1191_v28, %v977_v10 }
 0x10c   : > { %v1596_v62 = vpop.f32.mrf.mxu0  ;;  %v2485_v63 = vpop.f32.mrf.mxu1 }
 0x10d   : > { %1910 = vst.msk [vmem:[%s3050_s29 + $0xc] sm:$0xf] %vm1906_vm5, %v2125_v58  ;;  %v2123_v38 = vpack.c.bf16 %v1747_v59, %v1747_v59  ;;  %v1752_v0 = vadd.f32 %v3043_v35, %v1713_v60  ;;  %v1711_v2 = vadd.f32 %v1596_v62, %v1192_v61  ;;  %v1203_v52 = vadd.f32 %v2485_v63, %v2451_v7 }
 0x10e   : > { %v2519_v6 = vpop.f32.mrf.mxu0  ;;  %v1194_v32 = vpop.f32.mrf.mxu1 }
 0x10f   : > { %1908 = vst.msk [vmem:[%s3050_s29 + $0x4] sm:$0xf] %vm1906_vm5, %v2123_v38  ;;  %v2128_v33 = vpack.c.bf16 %v1752_v0, %v1752_v0  ;;  %v1750_v34 = vadd.f32 %v3043_v35, %v1711_v2  ;;  %v1714_v36 = vadd.f32 %v2519_v6, %v1203_v52  ;;  %v1195_v10 = vadd.f32 %v1194_v32, %v3004_v12 }
 0x110   : > { %v1599_v37 = vpop.f32.mrf.mxu0 }
 0x111   : > { %1913 = vst.msk [vmem:[%s3050_s29 + $0x18] sm:$0xf] %vm1906_vm5, %v2128_v33  ;;  %v2126_v39 = vpack.c.bf16 %v1750_v34, %v1750_v34  ;;  %v1753_v40 = vadd.f32 %v3043_v35, %v1714_v36  ;;  %v1712_v41 = vadd.f32 %v1599_v37, %v1195_v10  ;;  %v2488_v42 = vpop.f32.mrf.mxu1 }
 0x112   : > { %v1216_v7 = vadd.f32 %v2488_v42, %v3008_v15 }
 0x113   : > { %1911 = vst.msk [vmem:[%s3050_s29 + $0x10] sm:$0xf] %vm1906_vm5, %v2126_v39  ;;  %v2129_v44 = vpack.c.bf16 %v1753_v40, %v1753_v40  ;;  %v1751_v3 = vadd.f32 %v3043_v35, %v1712_v41  ;;  %v2522_v45 = vpop.f32.mrf.mxu0  ;;  %v1207_v46 = vpop.f32.mrf.mxu1 }
 0x114   : > { %v1717_v47 = vadd.f32 %v2522_v45, %v1216_v7  ;;  %v1208_v12 = vadd.f32 %v1207_v46, %v3010_v16 }
 0x115   : > { %1914 = vst.msk [vmem:[%s3050_s29 + $0x1c] sm:$0xf] %vm1906_vm5, %v2129_v44  ;;  %v2127_v48 = vpack.c.bf16 %v1751_v3, %v1751_v3  ;;  %v1612_v49 = vpop.f32.mrf.mxu0  ;;  %v2489_v50 = vpop.f32.mrf.mxu1 }
 0x116   : > { %v1756_v51 = vadd.f32 %v3043_v35, %v1717_v47  ;;  %v1715_v53 = vadd.f32 %v1612_v49, %v1208_v12  ;;  %v1219_v15 = vadd.f32 %v2489_v50, %v3014_v18 }
 0x117   : > { %1912 = vst.msk [vmem:[%s3050_s29 + $0x14] sm:$0xf] %vm1906_vm5, %v2127_v48  ;;  %v2523_v54 = vpop.f32.mrf.mxu0  ;;  %v1210_v55 = vpop.f32.mrf.mxu1 }
 0x118   : > { %v2132_v14 = vpack.c.bf16 %v1756_v51, %v1756_v51  ;;  %v1754_v56 = vadd.f32 %v3043_v35, %v1715_v53  ;;  %v1718_v16 = vadd.f32 %v2523_v54, %v1219_v15  ;;  %v1211_v57 = vadd.f32 %v1210_v55, %v3018_v20 }
 0x119   : > { %v1615_v28 = vpop.f32.mrf.mxu0 }
 0x11a   : > { %1917 = vst.msk [vmem:[%s3050_s29 + $0x28] sm:$0xf] %vm1906_vm5, %v2132_v14  ;;  %v2130_v58 = vpack.c.bf16 %v1754_v56, %v1754_v56  ;;  %v1757_v59 = vadd.f32 %v3043_v35, %v1718_v16  ;;  %v1716_v60 = vadd.f32 %v1615_v28, %v1211_v57  ;;  %v2492_v61 = vpop.f32.mrf.mxu1 }
 0x11b   : > { %v1232_v18 = vadd.f32 %v2492_v61, %v3024_v23 }
 0x11c   : > { %1915 = vst.msk [vmem:[%s3050_s29 + $0x20] sm:$0xf] %vm1906_vm5, %v2130_v58  ;;  %v2133_v62 = vpack.c.bf16 %v1757_v59, %v1757_v59  ;;  %v1755_v63 = vadd.f32 %v3043_v35, %v1716_v60  ;;  %v2526_v38 = vpop.f32.mrf.mxu0  ;;  %v1223_v0 = vpop.f32.mrf.mxu1 }
 0x11d   : > { %v1721_v2 = vadd.f32 %v2526_v38, %v1232_v18  ;;  %v1224_v20 = vadd.f32 %v1223_v0, %v3028_v25 }
 0x11e   : > { %1918 = vst.msk [vmem:[%s3050_s29 + $0x2c] sm:$0xf] %vm1906_vm5, %v2133_v62  ;;  %v2131_v52 = vpack.c.bf16 %v1755_v63, %v1755_v63  ;;  %v1628_v6 = vpop.f32.mrf.mxu0  ;;  %v2493_v32 = vpop.f32.mrf.mxu1 }
 0x11f   : > { %v1760_v33 = vadd.f32 %v3043_v35, %v1721_v2  ;;  %v1719_v34 = vadd.f32 %v1628_v6, %v1224_v20  ;;  %v1235_v23 = vadd.f32 %v2493_v32, %v3032_v27 }
 0x120   : > { %1916 = vst.msk [vmem:[%s3050_s29 + $0x24] sm:$0xf] %vm1906_vm5, %v2131_v52  ;;  %v2527_v36 = vpop.f32.mrf.mxu0  ;;  %v1226_v10 = vpop.f32.mrf.mxu1 }
 0x121   : > { %v2136_v37 = vpack.c.bf16 %v1760_v33, %v1760_v33  ;;  %v1758_v39 = vadd.f32 %v3043_v35, %v1719_v34  ;;  %v1722_v25 = vadd.f32 %v2527_v36, %v1235_v23  ;;  %v1227_v40 = vadd.f32 %v1226_v10, %v3036_v30 }
 0x122   : > { %v1631_v41 = vpop.f32.mrf.mxu0 }
 0x123   : > { %1921 = vst.msk [vmem:[%s3050_s29 + $0x38] sm:$0xf] %vm1906_vm5, %v2136_v37  ;;  %v2134_v42 = vpack.c.bf16 %v1758_v39, %v1758_v39  ;;  %v1761_v7 = vadd.f32 %v3043_v35, %v1722_v25  ;;  %v1720_v44 = vadd.f32 %v1631_v41, %v1227_v40  ;;  %v2496_v3 = vpop.f32.mrf.mxu1 }
 0x124   : > { %v1248_v27 = vadd.f32 %v2496_v3, %v2990_v43 }
 0x125   : > { %1919 = vst.msk [vmem:[%s3050_s29 + $0x30] sm:$0xf] %vm1906_vm5, %v2134_v42  ;;  %v2137_v45 = vpack.c.bf16 %v1761_v7, %v1761_v7  ;;  %v1759_v46 = vadd.f32 %v3043_v35, %v1720_v44  ;;  %v2530_v47 = vpop.f32.mrf.mxu0  ;;  %v1239_v12 = vpop.f32.mrf.mxu1 }
 0x126   : > { %v1725_v48 = vadd.f32 %v2530_v47, %v1248_v27  ;;  %v1240_v30 = vadd.f32 %v1239_v12, %v2992_v1 }
 0x127   : > { %1922 = vst.msk [vmem:[%s3050_s29 + $0x3c] sm:$0xf] %vm1906_vm5, %v2137_v45  ;;  %v2135_v49 = vpack.c.bf16 %v1759_v46, %v1759_v46  ;;  %v1644_v50 = vpop.f32.mrf.mxu0  ;;  %v2497_v51 = vpop.f32.mrf.mxu1 }
 0x128   : > { %v1764_v53 = vadd.f32 %v3043_v35, %v1725_v48  ;;  %v1723_v15 = vadd.f32 %v1644_v50, %v1240_v30  ;;  %v1251_v43 = vadd.f32 %v2497_v51, %v2994_v4 }
 0x129   : > { %1920 = vst.msk [vmem:[%s3050_s29 + $0x34] sm:$0xf] %vm1906_vm5, %v2135_v49  ;;  %v2531_v54 = vpop.f32.mrf.mxu0  ;;  %v1242_v55 = vpop.f32.mrf.mxu1 }
 0x12a   : > { %v2140_v14 = vpack.c.bf16 %v1764_v53, %v1764_v53  ;;  %v1762_v56 = vadd.f32 %v3043_v35, %v1723_v15  ;;  %v1726_v1 = vadd.f32 %v2531_v54, %v1251_v43  ;;  %v1243_v16 = vadd.f32 %v1242_v55, %v2996_v5 }
 0x12b   : > { %v1647_v57 = vpop.f32.mrf.mxu0 }
 0x12c   : > { %1925 = vst.msk [vmem:[%s3050_s29 + $0x48] sm:$0xf] %vm1906_vm5, %v2140_v14  ;;  %v2138_v28 = vpack.c.bf16 %v1762_v56, %v1762_v56  ;;  %v1765_v58 = vadd.f32 %v3043_v35, %v1726_v1  ;;  %v1724_v59 = vadd.f32 %v1647_v57, %v1243_v16  ;;  %v2500_v60 = vpop.f32.mrf.mxu1 }
 0x12d   : > { %v1264_v4 = vadd.f32 %v2500_v60, %v2998_v9 }
 0x12e   : > { %1923 = vst.msk [vmem:[%s3050_s29 + $0x40] sm:$0xf] %vm1906_vm5, %v2138_v28  ;;  %v2141_v61 = vpack.c.bf16 %v1765_v58, %v1765_v58  ;;  %v1763_v18 = vadd.f32 %v3043_v35, %v1724_v59  ;;  %v2534_v62 = vpop.f32.mrf.mxu0  ;;  %v1255_v63 = vpop.f32.mrf.mxu1 }
 0x12f   : > { %v1729_v38 = vadd.f32 %v2534_v62, %v1264_v4  ;;  %v1256_v5 = vadd.f32 %v1255_v63, %v3000_v11 }
 0x130   : > { %1926 = vst.msk [vmem:[%s3050_s29 + $0x4c] sm:$0xf] %vm1906_vm5, %v2141_v61  ;;  %v2139_v0 = vpack.c.bf16 %v1763_v18, %v1763_v18  ;;  %v1660_v2 = vpop.f32.mrf.mxu0  ;;  %v2501_v20 = vpop.f32.mrf.mxu1 }
 0x131   : > { %v1768_v52 = vadd.f32 %v3043_v35, %v1729_v38  ;;  %v1727_v6 = vadd.f32 %v1660_v2, %v1256_v5  ;;  %v1267_v9 = vadd.f32 %v2501_v20, %v3002_v8 }
 0x132   : > { %1924 = vst.msk [vmem:[%s3050_s29 + $0x44] sm:$0xf] %vm1906_vm5, %v2139_v0  ;;  %v2535_v32 = vpop.f32.mrf.mxu0  ;;  %v1258_v33 = vpop.f32.mrf.mxu1 }
 0x133   : > { %v2144_v34 = vpack.c.bf16 %v1768_v52, %v1768_v52  ;;  %v1766_v23 = vadd.f32 %v3043_v35, %v1727_v6  ;;  %v1730_v11 = vadd.f32 %v2535_v32, %v1267_v9  ;;  %v1259_v36 = vadd.f32 %v1258_v33, %v3006_v13 }
 0x134   : > { %v1663_v10 = vpop.f32.mrf.mxu0 }
 0x135   : > { %1929 = vst.msk [vmem:[%s3050_s29 + $0x58] sm:$0xf] %vm1906_vm5, %v2144_v34  ;;  %v2142_v37 = vpack.c.bf16 %v1766_v23, %v1766_v23  ;;  %v1769_v39 = vadd.f32 %v3043_v35, %v1730_v11  ;;  %v1728_v25 = vadd.f32 %v1663_v10, %v1259_v36  ;;  %v2504_v40 = vpop.f32.mrf.mxu1 }
 0x136   : > { %v1280_v8 = vadd.f32 %v2504_v40, %v3012_v17 }
 0x137   : > { %1927 = vst.msk [vmem:[%s3050_s29 + $0x50] sm:$0xf] %vm1906_vm5, %v2142_v37  ;;  %v2145_v41 = vpack.c.bf16 %v1769_v39, %v1769_v39  ;;  %v1767_v42 = vadd.f32 %v3043_v35, %v1728_v25  ;;  %v2538_v7 = vpop.f32.mrf.mxu0  ;;  %v1271_v44 = vpop.f32.mrf.mxu1 }
 0x138   : > { %v1733_v3 = vadd.f32 %v2538_v7, %v1280_v8  ;;  %v1272_v13 = vadd.f32 %v1271_v44, %v3016_v19 }
 0x139   : > { %1930 = vst.msk [vmem:[%s3050_s29 + $0x5c] sm:$0xf] %vm1906_vm5, %v2145_v41  ;;  %v2143_v27 = vpack.c.bf16 %v1767_v42, %v1767_v42  ;;  %v1676_v45 = vpop.f32.mrf.mxu0  ;;  %v2505_v46 = vpop.f32.mrf.mxu1 }
 0x13a   : > { %v1772_v47 = vadd.f32 %v3043_v35, %v1733_v3  ;;  %v1731_v12 = vadd.f32 %v1676_v45, %v1272_v13  ;;  %v1283_v17 = vadd.f32 %v2505_v46, %v3020_v21 }
 0x13b   : > { %1928 = vst.msk [vmem:[%s3050_s29 + $0x54] sm:$0xf] %vm1906_vm5, %v2143_v27  ;;  %v2539_v48 = vpop.f32.mrf.mxu0  ;;  %v1274_v30 = vpop.f32.mrf.mxu1 }
 0x13c   : > { %v2148_v49 = vpack.c.bf16 %v1772_v47, %v1772_v47  ;;  %v1770_v50 = vadd.f32 %v3043_v35, %v1731_v12  ;;  %v1734_v19 = vadd.f32 %v2539_v48, %v1283_v17  ;;  %v1275_v51 = vadd.f32 %v1274_v30, %v3022_v22 }
 0x13d   : > { %v1679_v53 = vpop.f32.mrf.mxu0 }
 0x13e   : > { %1933 = vst.msk [vmem:[%s3050_s29 + $0x68] sm:$0xf] %vm1906_vm5, %v2148_v49  ;;  %v2146_v15 = vpack.c.bf16 %v1770_v50, %v1770_v50  ;;  %v1773_v43 = vadd.f32 %v3043_v35, %v1734_v19  ;;  %v1732_v54 = vadd.f32 %v1679_v53, %v1275_v51  ;;  %v2508_v55 = vpop.f32.mrf.mxu1 }
 0x13f   : > { %v1296_v21 = vadd.f32 %v2508_v55, %v3026_v24 }
 0x140   : > { %1931 = vst.msk [vmem:[%s3050_s29 + $0x60] sm:$0xf] %vm1906_vm5, %v2146_v15  ;;  %v2149_v14 = vpack.c.bf16 %v1773_v43, %v1773_v43  ;;  %v1771_v56 = vadd.f32 %v3043_v35, %v1732_v54  ;;  %v2542_v1 = vpop.f32.mrf.mxu0  ;;  %v1287_v16 = vpop.f32.mrf.mxu1 }
 0x141   : > { %v1737_v57 = vadd.f32 %v2542_v1, %v1296_v21  ;;  %v1288_v22 = vadd.f32 %v1287_v16, %v3030_v26 }
 0x142   : > { %1934 = vst.msk [vmem:[%s3050_s29 + $0x6c] sm:$0xf] %vm1906_vm5, %v2149_v14  ;;  %v2147_v28 = vpack.c.bf16 %v1771_v56, %v1771_v56  ;;  %v1692_v58 = vpop.f32.mrf.mxu0  ;;  %v2509_v59 = vpop.f32.mrf.mxu1 }
 0x143   : > { %v1776_v60 = vadd.f32 %v3043_v35, %v1737_v57  ;;  %v1735_v24 = vadd.f32 %v1692_v58, %v1288_v22  ;;  %v1299_v4 = vadd.f32 %v2509_v59, %v3034_v29 }
 0x144   : > { %1932 = vst.msk [vmem:[%s3050_s29 + $0x64] sm:$0xf] %vm1906_vm5, %v2147_v28  ;;  %v2543_v61 = vpop.f32.mrf.mxu0  ;;  %v1290_v18 = vpop.f32.mrf.mxu1 }
 0x145   : > { %v2152_v62 = vpack.c.bf16 %v1776_v60, %v1776_v60  ;;  %v1774_v26 = vadd.f32 %v3043_v35, %v1735_v24  ;;  %v1738_v63 = vadd.f32 %v2543_v61, %v1299_v4  ;;  %v1291_v38 = vadd.f32 %v1290_v18, %v3038_v31 }
 0x146   : > { %v1695_v5 = vpop.f32.mrf.mxu0 }
 0x147   : > { %1937 = vst.msk [vmem:[%s3050_s29 + $0x78] sm:$0xf] %vm1906_vm5, %v2152_v62  ;;  %v2150_v0 = vpack.c.bf16 %v1774_v26, %v1774_v26  ;;  %v1777_v2 = vadd.f32 %v3043_v35, %v1738_v63  ;;  %v1736_v20 = vadd.f32 %v1695_v5, %v1291_v38 }
 0x149   : > { %1935 = vst.msk [vmem:[%s3050_s29 + $0x70] sm:$0xf] %vm1906_vm5, %v2150_v0  ;;  %v2153_v29 = vpack.c.bf16 %v1777_v2, %v1777_v2  ;;  %v1775_v52 = vadd.f32 %v3043_v35, %v1736_v20 }
 0x14b   : > { %1938 = vst.msk [vmem:[%s3050_s29 + $0x7c] sm:$0xf] %vm1906_vm5, %v2153_v29  ;;  %v2151_v6 = vpack.c.bf16 %v1775_v52, %v1775_v52 }
 0x14d   : > { %1936 = vst.msk [vmem:[%s3050_s29 + $0x74] sm:$0xf] %vm1906_vm5, %v2151_v6 }
 0x14e PF: > { %s23_s25 = sadd.s32 1, %s2563_s25  }
 0x14f   : > { %p20_p4 = scmp.ge.s32.totalorder %s23_s25, 4  }
 0x151   :  { %22 = sbr.rel (!%p20_p4) target bundleno = 1 (0x1), region = 108 }

// kernel: _lambda_.31
= control target key start
LH: loop header
LB: loop body
LE: loop exit
PB: predicated region body
PF: predicated region fallthrough
CT: control target
= control target key end

     0   :  { %s2425_s30 = smov 0   ;;  %s2905_s0 = inlined_call_operand.vmem [shape: bf16[512,8], index: 0, kind: input, shape index: {}]   ;;  %s2906_s1 = inlined_call_operand.vmem [shape: bf16[512,16], index: 1, kind: input, shape index: {}]   ;;  %s2907_s2 = inlined_call_operand.vmem [shape: bf16[512,4], index: 2, kind: input, shape index: {}]   ;;  %s2908_s3 = inlined_call_operand.vmem [shape: bf16[512,4], index: 3, kind: input, shape index: {}]   ;;  %s2909_s4 = inlined_call_operand.vmem [shape: bf16[8,3], index: 4, kind: input, shape index: {}]   ;;  %s2910_s5 = inlined_call_operand.vmem [shape: bf16[16,3], index: 5, kind: input, shape index: {}]   ;;  %s2911_s6 = inlined_call_operand.vmem [shape: bf16[4,3], index: 6, kind: input, shape index: {}]   ;;  %s2912_s7 = inlined_call_operand.vmem [shape: bf16[4,3], index: 7, kind: input, shape index: {}]   ;;  %s2913_s8 = inlined_call_operand.vmem [shape: f32[1,3], index: 8, kind: input, shape index: {}]   ;;  %s2914_s9 = inlined_call_operand.vmem [shape: f32[512,3], index: 9, kind: output, shape index: {}]  }
   0x1 LB: > { %s1940_s10 = sadd.s32 4294967295, %s2373_s30   ;;  %p1944_p0 = scmp.ge.s32.totalorder %s2373_s30, 1  ;;  %s2373_s30 = sphi %s2425_s30, %s19_s30  }
   0x2   : > { %p321_p1 = scmp.lt.s32.totalorder %s2373_s30, 3 }
   0x4   : > { %p322_p2 = pnand %p1944_p0, %p321_p1 }
   0x6   : > { %325 = sbr.rel (%p322_p2) target bundleno = 345 (0x159), region = 56 }
   0xb   : > { %v2302_v0 = vld [vmem:[%s2910_s5] sm:$0xff]   ;;  %vm895_vm0 = vcmask 1043456   ;;  %s1945_s15 = sshll.u32 %s1940_s10, 5  ;;  %vm1222_vm1 = vcmask 1041408   ;;  %vm556_vm2 = vcmask 130048   ;;  %vm846_vm3 = vcmask 64512  }
   0xc   : > { %v435_v1 = vld [vmem:[%s2909_s4] sm:$0xf]  ;;  %2155 = vmatprep.subr.bf16.mxu0 %v2302_v0  ;;  %p373_p3 = scmp.lt.s32.totalorder %s1945_s15, 63  ;;  %vm1173_vm4 = vcmask 31744   ;;  %vm1815_vm5 = vcmask 23552  }
   0xd   : > { %2291 = vmatprep.subr.msk.bf16.mxu1 %vm895_vm0, %v435_v1  ;;  %v897_v2 = vsel %vm895_vm0, %v435_v1, 0  ;;  %v1092_v3 = vld [vmem:[%s2911_s6] sm:$0x3]  ;;  %2156 = vmatpush3.bf16.msra.mxu0 %v2302_v0 }
   0xe   : > { %v1451_v4 = vld [vmem:[%s2912_s7] sm:$0x3]  ;;  %2190 = vmatpush3.bf16.msra.mxu1 %v897_v2  ;;  %s2940_s15 = smov (!%p373_p3, %s1945_s15), 63  ;;  %2292 = vmatprep.subr.msk.bf16.mxu0 %vm1222_vm1, %v1092_v3  ;;  %v1224_v8 = vsel %vm1222_vm1, %v1092_v3, 0 }
   0xf   : > { %2293 = vmatprep.subr.msk.bf16.mxu1 %vm1222_vm1, %v1451_v4  ;;  %s2450_s20 = sshll.u32 %s2940_s15, 2  ;;  %v1581_v10 = vsel %vm1222_vm1, %v1451_v4, 0  ;;  %s1954_s13 = sshll.u32 %s2940_s15, 3 }
  0x10   : > { %s2456_s23 = scalar_lea.vmem %s2906_s1, %s2450_s20  ;;  %s2462_s26 = scalar_lea.vmem %s2905_s0, %s2450_s20 }
  0x11   : > { %v2303_v5 = vld [vmem:[%s2456_s23] sm:$0xff]   ;;  %v2305_v7 = vld [vmem:[%s2456_s23 + $0x8] sm:$0xff]   ;;  %v2307_v11 = vld [vmem:[%s2456_s23 + $0x10] sm:$0xff]   ;;  %s2507_s29 = scalar_lea.vmem %s2907_s2, %s2450_s20  ;;  %s2514_s12 = scalar_lea.vmem %s2908_s3, %s2450_s20 }
  0x12   : > { %v2304_v6 = vld [vmem:[%s2462_s26] sm:$0xff]   ;;  %2157 = vmatprep.mubr.msk.bf16.mxu0 %vm556_vm2, %v2303_v5  ;;  %v2306_v9 = vld [vmem:[%s2462_s26 + $0x8] sm:$0xff]   ;;  %v2308_v12 = vld [vmem:[%s2462_s26 + $0x10] sm:$0xff]   ;;  %s2746_s19 = scalar_lea.vmem %s2914_s9, %s1954_s13 }
  0x13   : > { %2191 = vmatprep.mubr.msk.bf16.mxu1 %vm846_vm3, %v2304_v6  ;;  %2158 = vmatmul.mubr.msk.bf16.vlgmr.msra.gmra.mxu0 %vm556_vm2, %v2305_v7  ;;  %v2309_v13 = vld [vmem:[%s2456_s23 + $0x18] sm:$0xff]   ;;  %v2311_v15 = vld [vmem:[%s2456_s23 + $0x20] sm:$0xff]   ;;  %v2313_v17 = vld [vmem:[%s2456_s23 + $0x28] sm:$0xff]  }
  0x14   : > { %2192 = vmatmul.mubr.msk.bf16.vlgmr.msra.gmra.mxu1 %vm846_vm3, %v2306_v9  ;;  %2224 = vmatpush3.bf16.msra.mxu0 %v1224_v8  ;;  %v2310_v14 = vld [vmem:[%s2462_s26 + $0x18] sm:$0xff]   ;;  %v2312_v16 = vld [vmem:[%s2462_s26 + $0x20] sm:$0xff]   ;;  %v2314_v18 = vld [vmem:[%s2462_s26 + $0x28] sm:$0xff]  }
  0x15   : > { %2258 = vmatpush3.bf16.msra.mxu1 %v1581_v10  ;;  %2161 = vmatprep.mubr.msk.bf16.mxu0 %vm556_vm2, %v2307_v11  ;;  %v2315_v19 = vld [vmem:[%s2456_s23 + $0x30] sm:$0xff]   ;;  %v2317_v21 = vld [vmem:[%s2456_s23 + $0x38] sm:$0xff]   ;;  %v2319_v23 = vld [vmem:[%s2456_s23 + $0x40] sm:$0xff]  }
  0x16   : > { %2195 = vmatprep.mubr.msk.bf16.mxu1 %vm846_vm3, %v2308_v12  ;;  %v2316_v20 = vld [vmem:[%s2462_s26 + $0x30] sm:$0xff]   ;;  %v2318_v22 = vld [vmem:[%s2462_s26 + $0x38] sm:$0xff]   ;;  %v2320_v24 = vld [vmem:[%s2462_s26 + $0x40] sm:$0xff]  }
  0x17   : > { %v2321_v25 = vld [vmem:[%s2456_s23 + $0x48] sm:$0xff]   ;;  %v2323_v27 = vld [vmem:[%s2456_s23 + $0x50] sm:$0xff]   ;;  %v2325_v29 = vld [vmem:[%s2456_s23 + $0x58] sm:$0xff]  }
  0x18   : > { %v2322_v26 = vld [vmem:[%s2462_s26 + $0x48] sm:$0xff]   ;;  %v2324_v28 = vld [vmem:[%s2462_s26 + $0x50] sm:$0xff]   ;;  %v2326_v30 = vld [vmem:[%s2462_s26 + $0x58] sm:$0xff]  }
  0x19   : > { %v2327_v31 = vld [vmem:[%s2456_s23 + $0x60] sm:$0xff]   ;;  %v2329_v33 = vld [vmem:[%s2456_s23 + $0x68] sm:$0xff]   ;;  %v2331_v35 = vld [vmem:[%s2456_s23 + $0x70] sm:$0xff]  }
  0x1a   : > { %v2328_v32 = vld [vmem:[%s2462_s26 + $0x60] sm:$0xff]   ;;  %v2330_v34 = vld [vmem:[%s2462_s26 + $0x68] sm:$0xff]   ;;  %v2332_v36 = vld [vmem:[%s2462_s26 + $0x70] sm:$0xff]  }
  0x1b   : > { %2162 = vmatmul.mubr.msk.bf16.gmra.mxu0 %vm556_vm2, %v2309_v13  ;;  %v2333_v37 = vld [vmem:[%s2456_s23 + $0x78] sm:$0xff]   ;;  %v2335_v39 = vld [vmem:[%s2507_s29] sm:$0xff]   ;;  %v2337_v41 = vld [vmem:[%s2507_s29 + $0x8] sm:$0xff]  }
  0x1c   : > { %2196 = vmatmul.mubr.msk.bf16.gmra.mxu1 %vm846_vm3, %v2310_v14  ;;  %2165 = vmatprep.mubr.msk.bf16.mxu0 %vm556_vm2, %v2311_v15  ;;  %v2334_v38 = vld [vmem:[%s2462_s26 + $0x78] sm:$0xff]   ;;  %v2336_v40 = vld [vmem:[%s2514_s12] sm:$0xff]   ;;  %v2338_v42 = vld [vmem:[%s2514_s12 + $0x8] sm:$0xff]  }
  0x1d   : > { %2199 = vmatprep.mubr.msk.bf16.mxu1 %vm846_vm3, %v2312_v16  ;;  %v2339_v43 = vld [vmem:[%s2507_s29 + $0x10] sm:$0xff]   ;;  %v2341_v45 = vld [vmem:[%s2507_s29 + $0x18] sm:$0xff]   ;;  %v2343_v47 = vld [vmem:[%s2507_s29 + $0x20] sm:$0xff]  }
  0x1e   : > { %v2340_v44 = vld [vmem:[%s2514_s12 + $0x10] sm:$0xff]   ;;  %v2342_v46 = vld [vmem:[%s2514_s12 + $0x18] sm:$0xff]   ;;  %v2344_v48 = vld [vmem:[%s2514_s12 + $0x20] sm:$0xff]  }
  0x1f   : > { %v2345_v49 = vld [vmem:[%s2507_s29 + $0x28] sm:$0xff]   ;;  %v2347_v51 = vld [vmem:[%s2507_s29 + $0x30] sm:$0xff]   ;;  %v2349_v53 = vld [vmem:[%s2507_s29 + $0x38] sm:$0xff]  }
  0x20   : > { %v2346_v50 = vld [vmem:[%s2514_s12 + $0x28] sm:$0xff]   ;;  %v2348_v52 = vld [vmem:[%s2514_s12 + $0x30] sm:$0xff]   ;;  %v2350_v54 = vld [vmem:[%s2514_s12 + $0x38] sm:$0xff]  }
  0x21   : > { %v2351_v55 = vld [vmem:[%s2507_s29 + $0x40] sm:$0xff]   ;;  %v2353_v57 = vld [vmem:[%s2507_s29 + $0x48] sm:$0xff]   ;;  %v2355_v59 = vld [vmem:[%s2507_s29 + $0x50] sm:$0xff]  }
  0x22   : > { %v2352_v56 = vld [vmem:[%s2514_s12 + $0x40] sm:$0xff]   ;;  %v2354_v58 = vld [vmem:[%s2514_s12 + $0x48] sm:$0xff]   ;;  %v2356_v60 = vld [vmem:[%s2514_s12 + $0x50] sm:$0xff]  }
  0x23   : > { %2166 = vmatmul.mubr.msk.bf16.gmra.mxu0 %vm556_vm2, %v2313_v17  ;;  %v2357_v61 = vld [vmem:[%s2507_s29 + $0x58] sm:$0xff]   ;;  %v2359_v63 = vld [vmem:[%s2507_s29 + $0x60] sm:$0xff]   ;;  %v2361_v1 = vld [vmem:[%s2507_s29 + $0x68] sm:$0xff]  }
  0x24   : > { %2200 = vmatmul.mubr.msk.bf16.gmra.mxu1 %vm846_vm3, %v2314_v18  ;;  %2169 = vmatprep.mubr.msk.bf16.mxu0 %vm556_vm2, %v2315_v19  ;;  %v2358_v62 = vld [vmem:[%s2514_s12 + $0x58] sm:$0xff]   ;;  %v2360_v0 = vld [vmem:[%s2514_s12 + $0x60] sm:$0xff]   ;;  %v2362_v2 = vld [vmem:[%s2514_s12 + $0x68] sm:$0xff]  }
  0x25   : > { %2203 = vmatprep.mubr.msk.bf16.mxu1 %vm846_vm3, %v2316_v20  ;;  %v2363_v3 = vld [vmem:[%s2507_s29 + $0x70] sm:$0xff]   ;;  %v2365_v5 = vld [vmem:[%s2507_s29 + $0x78] sm:$0xff]  }
  0x26   : > { %v2364_v4 = vld [vmem:[%s2514_s12 + $0x70] sm:$0xff]   ;;  %v2366_v6 = vld [vmem:[%s2514_s12 + $0x78] sm:$0xff]  }
  0x2b   : > { %2170 = vmatmul.mubr.msk.bf16.gmra.mxu0 %vm556_vm2, %v2317_v21 }
  0x2c   : > { %2204 = vmatmul.mubr.msk.bf16.gmra.mxu1 %vm846_vm3, %v2318_v22  ;;  %2173 = vmatprep.mubr.msk.bf16.mxu0 %vm556_vm2, %v2319_v23 }
  0x2d   : > { %2207 = vmatprep.mubr.msk.bf16.mxu1 %vm846_vm3, %v2320_v24 }
  0x33   : > { %2174 = vmatmul.mubr.msk.bf16.gmra.mxu0 %vm556_vm2, %v2321_v25 }
  0x34   : > { %2208 = vmatmul.mubr.msk.bf16.gmra.mxu1 %vm846_vm3, %v2322_v26  ;;  %2177 = vmatprep.mubr.msk.bf16.mxu0 %vm556_vm2, %v2323_v27 }
  0x35   : > { %2211 = vmatprep.mubr.msk.bf16.mxu1 %vm846_vm3, %v2324_v28 }
  0x3b   : > { %2178 = vmatmul.mubr.msk.bf16.gmra.mxu0 %vm556_vm2, %v2325_v29 }
  0x3c   : > { %2212 = vmatmul.mubr.msk.bf16.gmra.mxu1 %vm846_vm3, %v2326_v30  ;;  %2181 = vmatprep.mubr.msk.bf16.mxu0 %vm556_vm2, %v2327_v31 }
  0x3d   : > { %2215 = vmatprep.mubr.msk.bf16.mxu1 %vm846_vm3, %v2328_v32 }
  0x43   : > { %2182 = vmatmul.mubr.msk.bf16.gmra.mxu0 %vm556_vm2, %v2329_v33 }
  0x44   : > { %2216 = vmatmul.mubr.msk.bf16.gmra.mxu1 %vm846_vm3, %v2330_v34  ;;  %2185 = vmatprep.mubr.msk.bf16.mxu0 %vm556_vm2, %v2331_v35 }
  0x45   : > { %2219 = vmatprep.mubr.msk.bf16.mxu1 %vm846_vm3, %v2332_v36 }
  0x4b   : > { %2186 = vmatmul.mubr.msk.bf16.gmra.mxu0 %vm556_vm2, %v2333_v37 }
  0x4c   : > { %2220 = vmatmul.mubr.msk.bf16.gmra.mxu1 %vm846_vm3, %v2334_v38  ;;  %2225 = vmatprep.mubr.msk.bf16.mxu0 %vm1173_vm4, %v2335_v39 }
  0x4d   : > { %2259 = vmatprep.mubr.msk.bf16.mxu1 %vm1173_vm4, %v2336_v40 }
  0x53   : > { %2226 = vmatmul.mubr.msk.bf16.vlgmr.msra.gmra.mxu0 %vm1173_vm4, %v2337_v41 }
  0x54   : > { %2260 = vmatmul.mubr.msk.bf16.vlgmr.msra.gmra.mxu1 %vm1173_vm4, %v2338_v42  ;;  %2229 = vmatprep.mubr.msk.bf16.mxu0 %vm1173_vm4, %v2339_v43 }
  0x55   : > { %2263 = vmatprep.mubr.msk.bf16.mxu1 %vm1173_vm4, %v2340_v44 }
  0x5b   : > { %2230 = vmatmul.mubr.msk.bf16.gmra.mxu0 %vm1173_vm4, %v2341_v45 }
  0x5c   : > { %2264 = vmatmul.mubr.msk.bf16.gmra.mxu1 %vm1173_vm4, %v2342_v46  ;;  %2233 = vmatprep.mubr.msk.bf16.mxu0 %vm1173_vm4, %v2343_v47 }
  0x5d   : > { %2267 = vmatprep.mubr.msk.bf16.mxu1 %vm1173_vm4, %v2344_v48 }
  0x63   : > { %2234 = vmatmul.mubr.msk.bf16.gmra.mxu0 %vm1173_vm4, %v2345_v49 }
  0x64   : > { %2268 = vmatmul.mubr.msk.bf16.gmra.mxu1 %vm1173_vm4, %v2346_v50  ;;  %2237 = vmatprep.mubr.msk.bf16.mxu0 %vm1173_vm4, %v2347_v51 }
  0x65   : > { %2271 = vmatprep.mubr.msk.bf16.mxu1 %vm1173_vm4, %v2348_v52 }
  0x6b   : > { %2238 = vmatmul.mubr.msk.bf16.gmra.mxu0 %vm1173_vm4, %v2349_v53 }
  0x6c   : > { %2272 = vmatmul.mubr.msk.bf16.gmra.mxu1 %vm1173_vm4, %v2350_v54  ;;  %2241 = vmatprep.mubr.msk.bf16.mxu0 %vm1173_vm4, %v2351_v55 }
  0x6d   : > { %2275 = vmatprep.mubr.msk.bf16.mxu1 %vm1173_vm4, %v2352_v56 }
  0x73   : > { %2242 = vmatmul.mubr.msk.bf16.gmra.mxu0 %vm1173_vm4, %v2353_v57 }
  0x74   : > { %2276 = vmatmul.mubr.msk.bf16.gmra.mxu1 %vm1173_vm4, %v2354_v58  ;;  %2245 = vmatprep.mubr.msk.bf16.mxu0 %vm1173_vm4, %v2355_v59 }
  0x75   : > { %2279 = vmatprep.mubr.msk.bf16.mxu1 %vm1173_vm4, %v2356_v60 }
  0x7b   : > { %2246 = vmatmul.mubr.msk.bf16.gmra.mxu0 %vm1173_vm4, %v2357_v61 }
  0x7c   : > { %2280 = vmatmul.mubr.msk.bf16.gmra.mxu1 %vm1173_vm4, %v2358_v62  ;;  %2249 = vmatprep.mubr.msk.bf16.mxu0 %vm1173_vm4, %v2359_v63 }
  0x7d   : > { %2283 = vmatprep.mubr.msk.bf16.mxu1 %vm1173_vm4, %v2360_v0 }
  0x83   : > { %2250 = vmatmul.mubr.msk.bf16.gmra.mxu0 %vm1173_vm4, %v2361_v1 }
  0x84   : > { %2284 = vmatmul.mubr.msk.bf16.gmra.mxu1 %vm1173_vm4, %v2362_v2  ;;  %2253 = vmatprep.mubr.msk.bf16.mxu0 %vm1173_vm4, %v2363_v3 }
  0x85   : > { %2287 = vmatprep.mubr.msk.bf16.mxu1 %vm1173_vm4, %v2364_v4 }
  0x8b   : > { %2254 = vmatmul.mubr.msk.bf16.gmra.mxu0 %vm1173_vm4, %v2365_v5 }
  0x8c   : > { %2288 = vmatmul.mubr.msk.bf16.gmra.mxu1 %vm1173_vm4, %v2366_v6 }
  0xd3   : > { %v2606_v7 = vpop.f32.mrf.mxu0 }
  0xd4   : > { %v2193_v8 = vpop.f32.mrf.mxu1 }
  0xd5   : > { %v2608_v9 = vpop.f32.mrf.mxu0  ;;  %v942_v6 = vadd.f32 %v2193_v8, %v2606_v7 }
  0xd6   : > { %v2610_v10 = vpop.f32.mrf.mxu1 }
  0xd7   : > { %v2612_v11 = vpop.f32.mrf.mxu0 }
  0xd8   : > { %v2614_v12 = vpop.f32.mrf.mxu1 }
  0xd9   : > { %v2616_v13 = vpop.f32.mrf.mxu0 }
  0xda   : > { %v2618_v14 = vpop.f32.mrf.mxu1 }
  0xdb   : > { %v2620_v15 = vpop.f32.mrf.mxu0 }
  0xdc   : > { %v2622_v16 = vpop.f32.mrf.mxu1 }
  0xdd   : > { %v2624_v17 = vpop.f32.mrf.mxu0 }
  0xde   : > { %v2626_v18 = vpop.f32.mrf.mxu1 }
  0xdf   : > { %v2628_v19 = vpop.f32.mrf.mxu0 }
  0xe0   : > { %v2630_v20 = vpop.f32.mrf.mxu1 }
  0xe1   : > { %v2632_v21 = vpop.f32.mrf.mxu0 }
  0xe2   : > { %v2634_v22 = vpop.f32.mrf.mxu1 }
  0xe3   : > { %v2636_v23 = vpop.f32.mrf.mxu0 }
  0xe4   : > { %v2638_v24 = vpop.f32.mrf.mxu1 }
  0xe5   : > { %v2640_v25 = vpop.f32.mrf.mxu0 }
  0xe6   : > { %v2642_v26 = vpop.f32.mrf.mxu1 }
  0xe7   : > { %v2644_v27 = vpop.f32.mrf.mxu0 }
  0xe8   : > { %v2646_v28 = vpop.f32.mrf.mxu1 }
  0xe9   : > { %v2648_v29 = vpop.f32.mrf.mxu0 }
  0xea   : > { %v2650_v30 = vpop.f32.mrf.mxu1 }
  0xeb   : > { %v2652_v31 = vpop.f32.mrf.mxu0 }
  0xec   : > { %v2654_v32 = vpop.f32.mrf.mxu1 }
  0xed   : > { %v2656_v33 = vpop.f32.mrf.mxu0 }
  0xee   : > { %v2658_v34 = vpop.f32.mrf.mxu1 }
  0xef   : > { %v2660_v35 = vpop.f32.mrf.mxu0 }
  0xf0   : > { %v2662_v36 = vpop.f32.mrf.mxu1 }
  0xf1   : > { %v2664_v37 = vpop.f32.mrf.mxu0 }
  0xf2   : > { %v2666_v38 = vpop.f32.mrf.mxu1 }
  0xf3   : > { %v2668_v39 = vpop.f32.mrf.mxu0 }
  0xf4   : > { %v2670_v40 = vpop.f32.mrf.mxu1 }
  0xf5   : > { %v2672_v41 = vpop.f32.mrf.mxu0 }
  0xf6   : > { %v2674_v42 = vpop.f32.mrf.mxu1 }
  0xf7   : > { %v2676_v43 = vpop.f32.mrf.mxu0 }
  0xf8   : > { %v2678_v44 = vpop.f32.mrf.mxu1 }
  0xf9   : > { %v2680_v45 = vpop.f32.mrf.mxu0 }
  0xfa   : > { %v2682_v46 = vpop.f32.mrf.mxu1 }
  0xfb   : > { %v2684_v47 = vpop.f32.mrf.mxu0 }
  0xfc   : > { %v2686_v48 = vpop.f32.mrf.mxu1 }
  0xfd   : > { %v2688_v49 = vpop.f32.mrf.mxu0 }
  0xfe   : > { %v2690_v50 = vpop.f32.mrf.mxu1 }
  0xff   : > { %v2692_v51 = vpop.f32.mrf.mxu0 }
 0x100   : > { %v2694_v52 = vpop.f32.mrf.mxu1 }
 0x101   : > { %v2696_v53 = vpop.f32.mrf.mxu0 }
 0x102   : > { %v2698_v54 = vpop.f32.mrf.mxu1 }
 0x103   : > { %v2700_v55 = vpop.f32.mrf.mxu0 }
 0x104   : > { %v2702_v56 = vpop.f32.mrf.mxu1 }
 0x105   : > { %v2704_v57 = vpop.f32.mrf.mxu0 }
 0x106   : > { %v2706_v58 = vpop.f32.mrf.mxu1 }
 0x107   : > { %v2708_v59 = vpop.f32.mrf.mxu0 }
 0x108   : > { %2915 = vst [vmem:[#allocation2_spill] sm:$0xff] %v2708_v59  ;;  %v2710_v60 = vpop.f32.mrf.mxu1 }
 0x109   : > { %2916 = vst [vmem:[#allocation3_spill] sm:$0xff] %v2710_v60  ;;  %v2712_v61 = vpop.f32.mrf.mxu0 }
 0x10a   : > { %2917 = vst [vmem:[#allocation4_spill] sm:$0xff] %v2712_v61  ;;  %v2714_v62 = vpop.f32.mrf.mxu1 }
 0x10b   : > { %2918 = vst [vmem:[#allocation5_spill] sm:$0xff] %v2714_v62  ;;  %v2716_v63 = vpop.f32.mrf.mxu0 }
 0x10c   : > { %2919 = vst [vmem:[#allocation6_spill] sm:$0xff] %v2716_v63  ;;  %v2718_v0 = vpop.f32.mrf.mxu1  ;;  %v934_v63 = vadd.f32 %v2610_v10, %v2608_v9  ;;  %v937_v10 = vadd.f32 %v2618_v14, %v2616_v13  ;;  %v950_v13 = vadd.f32 %v2626_v18, %v2624_v17  ;;  %v953_v18 = vadd.f32 %v2634_v22, %v2632_v21 }
 0x10d   : > { %2920 = vst [vmem:[#allocation7_spill] sm:$0xff] %v2718_v0  ;;  %v2720_v1 = vpop.f32.mrf.mxu0  ;;  %v966_v22 = vadd.f32 %v2642_v26, %v2640_v25  ;;  %v969_v26 = vadd.f32 %v2650_v30, %v2648_v29  ;;  %v982_v30 = vadd.f32 %v2658_v34, %v2656_v33  ;;  %v985_v34 = vadd.f32 %v2666_v38, %v2664_v37 }
 0x10e   : > { %2921 = vst [vmem:[#allocation8_spill] sm:$0xff] %v2720_v1  ;;  %v2722_v2 = vpop.f32.mrf.mxu1  ;;  %v998_v38 = vadd.f32 %v2674_v42, %v2672_v41  ;;  %v1001_v42 = vadd.f32 %v2682_v46, %v2680_v45  ;;  %v1014_v46 = vadd.f32 %v2690_v50, %v2688_v49  ;;  %v1017_v50 = vadd.f32 %v2698_v54, %v2696_v53 }
 0x10f   : > { %2922 = vst [vmem:[#allocation9_spill] sm:$0xff] %v2722_v2  ;;  %v2724_v3 = vpop.f32.mrf.mxu0  ;;  %v2739_v2 = vld [vmem:[%s2913_s8] ss:$0 sm:$0xff]  ;;  %v1030_v54 = vadd.f32 %v2706_v58, %v2704_v57 }
 0x110   : > { %2923 = vst [vmem:[#allocation10_spill] sm:$0xff] %v2724_v3  ;;  %v2726_v4 = vpop.f32.mrf.mxu1 }
 0x111   : > { %2924 = vst [vmem:[#allocation11_spill] sm:$0xff] %v2726_v4  ;;  %v2728_v5 = vpop.f32.mrf.mxu0  ;;  %v2929_v58 = vld [vmem:[#allocation4_spill] sm:$0xff] }
 0x112   : > { %2925 = vst [vmem:[#allocation12_spill] sm:$0xff] %v2728_v5  ;;  %v2731_v60 = vpop.f32.mrf.mxu1  ;;  %v945_v5 = vadd.f32 %v2614_v12, %v2612_v11 }
 0x113   : > { %2926 = vst [vmem:[#allocation13_spill] sm:$0xff] %v2731_v60  ;;  %v2227_v61 = vpop.f32.mrf.mxu0 }
 0x114   : > { %v1389_v62 = vadd.f32 %v2227_v61, %v942_v6  ;;  %v2261_v0 = vpop.f32.mrf.mxu1 }
 0x115   : > { %v1260_v3 = vpop.f32.mrf.mxu0 }
 0x116   : > { %v1746_v4 = vadd.f32 %v2261_v0, %v1389_v62  ;;  %v1387_v7 = vadd.f32 %v1260_v3, %v934_v63  ;;  %v1617_v8 = vpop.f32.mrf.mxu1  ;;  %v958_v62 = vadd.f32 %v2622_v16, %v2620_v15  ;;  %v961_v16 = vadd.f32 %v2630_v20, %v2628_v19 }
 0x117   : > { %v2228_v9 = vpop.f32.mrf.mxu0  ;;  %v974_v20 = vadd.f32 %v2638_v24, %v2636_v23  ;;  %v977_v24 = vadd.f32 %v2646_v28, %v2644_v27  ;;  %v990_v28 = vadd.f32 %v2654_v32, %v2652_v31  ;;  %v993_v32 = vadd.f32 %v2662_v36, %v2660_v35 }
 0x118   : > { %v1785_v61 = vadd.f32 %v2739_v2, %v1746_v4  ;;  %v1744_v6 = vadd.f32 %v1617_v8, %v1387_v7  ;;  %v1390_v60 = vadd.f32 %v2228_v9, %v945_v5  ;;  %v2262_v11 = vpop.f32.mrf.mxu1  ;;  %v1006_v36 = vadd.f32 %v2670_v40, %v2668_v39 }
 0x119   : > { %v1263_v12 = vpop.f32.mrf.mxu0  ;;  %v1009_v40 = vadd.f32 %v2678_v44, %v2676_v43  ;;  %v1022_v44 = vadd.f32 %v2686_v48, %v2684_v47  ;;  %v1025_v48 = vadd.f32 %v2694_v52, %v2692_v51  ;;  %v1038_v52 = vadd.f32 %v2702_v56, %v2700_v55  ;;  %v2927_v56 = vld [vmem:[#allocation2_spill] sm:$0xff] }
 0x11a   : > { %1818 = vst.msk [vmem:[%s2746_s19 + $0x10] sm:$0xff] %vm1815_vm5, %v1785_v61  ;;  %v1783_v63 = vadd.f32 %v2739_v2, %v1744_v6  ;;  %v1747_v0 = vadd.f32 %v2262_v11, %v1390_v60  ;;  %v1388_v3 = vadd.f32 %v1263_v12, %v937_v10  ;;  %v1620_v1 = vpop.f32.mrf.mxu1 }
 0x11b   : > { %v2231_v59 = vpop.f32.mrf.mxu0 }
 0x11c   : > { %1816 = vst.msk [vmem:[%s2746_s19] sm:$0xff] %vm1815_vm5, %v1783_v63  ;;  %v1786_v14 = vadd.f32 %v2739_v2, %v1747_v0  ;;  %v1745_v4 = vadd.f32 %v1620_v1, %v1388_v3  ;;  %v1393_v5 = vadd.f32 %v2231_v59, %v958_v62  ;;  %v2265_v7 = vpop.f32.mrf.mxu1 }
 0x11d   : > { %v1276_v15 = vpop.f32.mrf.mxu0 }
 0x11e   : > { %1819 = vst.msk [vmem:[%s2746_s19 + $0x18] sm:$0xff] %vm1815_vm5, %v1786_v14  ;;  %v1784_v60 = vadd.f32 %v2739_v2, %v1745_v4  ;;  %v1750_v8 = vadd.f32 %v2265_v7, %v1393_v5  ;;  %v1391_v9 = vadd.f32 %v1276_v15, %v950_v13  ;;  %v1633_v10 = vpop.f32.mrf.mxu1 }
 0x11f   : > { %v2232_v17 = vpop.f32.mrf.mxu0 }
 0x120   : > { %1817 = vst.msk [vmem:[%s2746_s19 + $0x8] sm:$0xff] %vm1815_vm5, %v1784_v60  ;;  %v1789_v59 = vadd.f32 %v2739_v2, %v1750_v8  ;;  %v1748_v1 = vadd.f32 %v1633_v10, %v1391_v9  ;;  %v1394_v61 = vadd.f32 %v2232_v17, %v961_v16  ;;  %v2266_v6 = vpop.f32.mrf.mxu1 }
 0x121   : > { %v1279_v19 = vpop.f32.mrf.mxu0 }
 0x122   : > { %1822 = vst.msk [vmem:[%s2746_s19 + $0x30] sm:$0xff] %vm1815_vm5, %v1789_v59  ;;  %v1787_v11 = vadd.f32 %v2739_v2, %v1748_v1  ;;  %v1751_v12 = vadd.f32 %v2266_v6, %v1394_v61  ;;  %v1392_v62 = vadd.f32 %v1279_v19, %v953_v18  ;;  %v1636_v63 = vpop.f32.mrf.mxu1 }
 0x123   : > { %v2235_v21 = vpop.f32.mrf.mxu0 }
 0x124   : > { %1820 = vst.msk [vmem:[%s2746_s19 + $0x20] sm:$0xff] %vm1815_vm5, %v1787_v11  ;;  %v1790_v0 = vadd.f32 %v2739_v2, %v1751_v12  ;;  %v1749_v3 = vadd.f32 %v1636_v63, %v1392_v62  ;;  %v1397_v13 = vadd.f32 %v2235_v21, %v974_v20  ;;  %v2269_v14 = vpop.f32.mrf.mxu1 }
 0x125   : > { %v1292_v23 = vpop.f32.mrf.mxu0 }
 0x126   : > { %1823 = vst.msk [vmem:[%s2746_s19 + $0x38] sm:$0xff] %vm1815_vm5, %v1790_v0  ;;  %v1788_v4 = vadd.f32 %v2739_v2, %v1749_v3  ;;  %v1754_v5 = vadd.f32 %v2269_v14, %v1397_v13  ;;  %v1395_v7 = vadd.f32 %v1292_v23, %v966_v22  ;;  %v1649_v15 = vpop.f32.mrf.mxu1 }
 0x127   : > { %v2236_v25 = vpop.f32.mrf.mxu0 }
 0x128   : > { %1821 = vst.msk [vmem:[%s2746_s19 + $0x28] sm:$0xff] %vm1815_vm5, %v1788_v4  ;;  %v1793_v16 = vadd.f32 %v2739_v2, %v1754_v5  ;;  %v1752_v60 = vadd.f32 %v1649_v15, %v1395_v7  ;;  %v1398_v8 = vadd.f32 %v2236_v25, %v977_v24  ;;  %v2270_v9 = vpop.f32.mrf.mxu1 }
 0x129   : > { %v1295_v27 = vpop.f32.mrf.mxu0 }
 0x12a   : > { %1826 = vst.msk [vmem:[%s2746_s19 + $0x50] sm:$0xff] %vm1815_vm5, %v1793_v16  ;;  %v1791_v10 = vadd.f32 %v2739_v2, %v1752_v60  ;;  %v1755_v17 = vadd.f32 %v2270_v9, %v1398_v8  ;;  %v1396_v18 = vadd.f32 %v1295_v27, %v969_v26  ;;  %v1652_v59 = vpop.f32.mrf.mxu1 }
 0x12b   : > { %v2239_v29 = vpop.f32.mrf.mxu0 }
 0x12c   : > { %1824 = vst.msk [vmem:[%s2746_s19 + $0x40] sm:$0xff] %vm1815_vm5, %v1791_v10  ;;  %v1794_v1 = vadd.f32 %v2739_v2, %v1755_v17  ;;  %v1753_v61 = vadd.f32 %v1652_v59, %v1396_v18  ;;  %v1401_v6 = vadd.f32 %v2239_v29, %v990_v28  ;;  %v2273_v19 = vpop.f32.mrf.mxu1 }
 0x12d   : > { %v1308_v31 = vpop.f32.mrf.mxu0 }
 0x12e   : > { %1827 = vst.msk [vmem:[%s2746_s19 + $0x58] sm:$0xff] %vm1815_vm5, %v1794_v1  ;;  %v1792_v20 = vadd.f32 %v2739_v2, %v1753_v61  ;;  %v1758_v11 = vadd.f32 %v2273_v19, %v1401_v6  ;;  %v1399_v12 = vadd.f32 %v1308_v31, %v982_v30  ;;  %v1665_v62 = vpop.f32.mrf.mxu1 }
 0x12f   : > { %v2240_v33 = vpop.f32.mrf.mxu0 }
 0x130   : > { %1825 = vst.msk [vmem:[%s2746_s19 + $0x48] sm:$0xff] %vm1815_vm5, %v1792_v20  ;;  %v1797_v63 = vadd.f32 %v2739_v2, %v1758_v11  ;;  %v1756_v21 = vadd.f32 %v1665_v62, %v1399_v12  ;;  %v1402_v22 = vadd.f32 %v2240_v33, %v993_v32  ;;  %v2274_v0 = vpop.f32.mrf.mxu1 }
 0x131   : > { %v1311_v35 = vpop.f32.mrf.mxu0 }
 0x132   : > { %1830 = vst.msk [vmem:[%s2746_s19 + $0x70] sm:$0xff] %vm1815_vm5, %v1797_v63  ;;  %v1795_v3 = vadd.f32 %v2739_v2, %v1756_v21  ;;  %v1759_v13 = vadd.f32 %v2274_v0, %v1402_v22  ;;  %v1400_v14 = vadd.f32 %v1311_v35, %v985_v34  ;;  %v1668_v23 = vpop.f32.mrf.mxu1 }
 0x133   : > { %v2243_v37 = vpop.f32.mrf.mxu0 }
 0x134   : > { %1828 = vst.msk [vmem:[%s2746_s19 + $0x60] sm:$0xff] %vm1815_vm5, %v1795_v3  ;;  %v1798_v24 = vadd.f32 %v2739_v2, %v1759_v13  ;;  %v1757_v4 = vadd.f32 %v1668_v23, %v1400_v14  ;;  %v1405_v5 = vadd.f32 %v2243_v37, %v1006_v36  ;;  %v2277_v7 = vpop.f32.mrf.mxu1  ;;  %v2928_v36 = vld [vmem:[#allocation3_spill] sm:$0xff] }
 0x135   : > { %v1324_v39 = vpop.f32.mrf.mxu0  ;;  %v1041_v3 = vadd.f32 %v2928_v36, %v2927_v56 }
 0x136   : > { %1831 = vst.msk [vmem:[%s2746_s19 + $0x78] sm:$0xff] %vm1815_vm5, %v1798_v24  ;;  %v1796_v15 = vadd.f32 %v2739_v2, %v1757_v4  ;;  %v1762_v25 = vadd.f32 %v2277_v7, %v1405_v5  ;;  %v1403_v26 = vadd.f32 %v1324_v39, %v998_v38  ;;  %v1681_v16 = vpop.f32.mrf.mxu1  ;;  %v2930_v38 = vld [vmem:[#allocation5_spill] sm:$0xff] }
 0x137   : > { %v2244_v41 = vpop.f32.mrf.mxu0  ;;  %v1033_v24 = vadd.f32 %v2930_v38, %v2929_v58 }
 0x138   : > { %1829 = vst.msk [vmem:[%s2746_s19 + $0x68] sm:$0xff] %vm1815_vm5, %v1796_v15  ;;  %v1801_v60 = vadd.f32 %v2739_v2, %v1762_v25  ;;  %v1760_v8 = vadd.f32 %v1681_v16, %v1403_v26  ;;  %v1406_v9 = vadd.f32 %v2244_v41, %v1009_v40  ;;  %v2278_v27 = vpop.f32.mrf.mxu1  ;;  %v2931_v15 = vld [vmem:[#allocation6_spill] sm:$0xff]  ;;  %v2932_v25 = vld [vmem:[#allocation7_spill] sm:$0xff] }
 0x139   : > { %v1327_v43 = vpop.f32.mrf.mxu0  ;;  %v1054_v26 = vadd.f32 %v2932_v25, %v2931_v15 }
 0x13a   : > { %1834 = vst.msk [vmem:[%s2746_s19 + $0x90] sm:$0xff] %vm1815_vm5, %v1801_v60  ;;  %v1799_v28 = vadd.f32 %v2739_v2, %v1760_v8  ;;  %v1763_v10 = vadd.f32 %v2278_v27, %v1406_v9  ;;  %v1404_v17 = vadd.f32 %v1327_v43, %v1001_v42  ;;  %v1684_v18 = vpop.f32.mrf.mxu1  ;;  %v2933_v9 = vld [vmem:[#allocation8_spill] sm:$0xff]  ;;  %v2934_v27 = vld [vmem:[#allocation9_spill] sm:$0xff] }
 0x13b   : > { %v2247_v45 = vpop.f32.mrf.mxu0  ;;  %v1046_v43 = vadd.f32 %v2934_v27, %v2933_v9 }
 0x13c   : > { %1832 = vst.msk [vmem:[%s2746_s19 + $0x80] sm:$0xff] %vm1815_vm5, %v1799_v28  ;;  %v1802_v59 = vadd.f32 %v2739_v2, %v1763_v10  ;;  %v1761_v29 = vadd.f32 %v1684_v18, %v1404_v17  ;;  %v1409_v30 = vadd.f32 %v2247_v45, %v1022_v44  ;;  %v2281_v1 = vpop.f32.mrf.mxu1  ;;  %v2935_v45 = vld [vmem:[#allocation10_spill] sm:$0xff] }
 0x13d   : > { %v1340_v47 = vpop.f32.mrf.mxu0 }
 0x13e   : > { %1835 = vst.msk [vmem:[%s2746_s19 + $0x98] sm:$0xff] %vm1815_vm5, %v1802_v59  ;;  %v1800_v61 = vadd.f32 %v2739_v2, %v1761_v29  ;;  %v1766_v6 = vadd.f32 %v2281_v1, %v1409_v30  ;;  %v1407_v19 = vadd.f32 %v1340_v47, %v1014_v46  ;;  %v1697_v31 = vpop.f32.mrf.mxu1  ;;  %v2936_v46 = vld [vmem:[#allocation11_spill] sm:$0xff] }
 0x13f   : > { %v2248_v49 = vpop.f32.mrf.mxu0  ;;  %v1057_v59 = vadd.f32 %v2936_v46, %v2935_v45 }
 0x140   : > { %1833 = vst.msk [vmem:[%s2746_s19 + $0x88] sm:$0xff] %vm1815_vm5, %v1800_v61  ;;  %v1805_v32 = vadd.f32 %v2739_v2, %v1766_v6  ;;  %v1764_v20 = vadd.f32 %v1697_v31, %v1407_v19  ;;  %v1410_v11 = vadd.f32 %v2248_v49, %v1025_v48  ;;  %v2282_v12 = vpop.f32.mrf.mxu1  ;;  %v2937_v61 = vld [vmem:[#allocation12_spill] sm:$0xff]  ;;  %v2938_v6 = vld [vmem:[#allocation13_spill] sm:$0xff] }
 0x141   : > { %v1343_v51 = vpop.f32.mrf.mxu0  ;;  %v1049_v19 = vadd.f32 %v2938_v6, %v2937_v61 }
 0x142   : > { %1838 = vst.msk [vmem:[%s2746_s19 + $0xb0] sm:$0xff] %vm1815_vm5, %v1805_v32  ;;  %v1803_v62 = vadd.f32 %v2739_v2, %v1764_v20  ;;  %v1767_v33 = vadd.f32 %v2282_v12, %v1410_v11  ;;  %v1408_v34 = vadd.f32 %v1343_v51, %v1017_v50  ;;  %v1700_v63 = vpop.f32.mrf.mxu1 }
 0x143   : > { %v2251_v53 = vpop.f32.mrf.mxu0 }
 0x144   : > { %1836 = vst.msk [vmem:[%s2746_s19 + $0xa0] sm:$0xff] %vm1815_vm5, %v1803_v62  ;;  %v1806_v21 = vadd.f32 %v2739_v2, %v1767_v33  ;;  %v1765_v22 = vadd.f32 %v1700_v63, %v1408_v34  ;;  %v1413_v0 = vadd.f32 %v2251_v53, %v1038_v52  ;;  %v2285_v35 = vpop.f32.mrf.mxu1 }
 0x145   : > { %v1356_v55 = vpop.f32.mrf.mxu0 }
 0x146   : > { %1839 = vst.msk [vmem:[%s2746_s19 + $0xb8] sm:$0xff] %vm1815_vm5, %v1806_v21  ;;  %v1804_v13 = vadd.f32 %v2739_v2, %v1765_v22  ;;  %v1770_v14 = vadd.f32 %v2285_v35, %v1413_v0  ;;  %v1411_v23 = vadd.f32 %v1356_v55, %v1030_v54  ;;  %v1713_v37 = vpop.f32.mrf.mxu1 }
 0x147   : > { %v2252_v57 = vpop.f32.mrf.mxu0 }
 0x148   : > { %1837 = vst.msk [vmem:[%s2746_s19 + $0xa8] sm:$0xff] %vm1815_vm5, %v1804_v13  ;;  %v1809_v4 = vadd.f32 %v2739_v2, %v1770_v14  ;;  %v1768_v5 = vadd.f32 %v1713_v37, %v1411_v23  ;;  %v1414_v7 = vadd.f32 %v2252_v57, %v1041_v3  ;;  %v2286_v39 = vpop.f32.mrf.mxu1 }
 0x149   : > { %v1359_v40 = vpop.f32.mrf.mxu0 }
 0x14a   : > { %1842 = vst.msk [vmem:[%s2746_s19 + $0xd0] sm:$0xff] %vm1815_vm5, %v1809_v4  ;;  %v1807_v16 = vadd.f32 %v2739_v2, %v1768_v5  ;;  %v1771_v41 = vadd.f32 %v2286_v39, %v1414_v7  ;;  %v1412_v42 = vadd.f32 %v1359_v40, %v1033_v24  ;;  %v1716_v60 = vpop.f32.mrf.mxu1 }
 0x14b   : > { %v2255_v8 = vpop.f32.mrf.mxu0 }
 0x14c   : > { %1840 = vst.msk [vmem:[%s2746_s19 + $0xc0] sm:$0xff] %vm1815_vm5, %v1807_v16  ;;  %v1810_v44 = vadd.f32 %v2739_v2, %v1771_v41  ;;  %v1769_v28 = vadd.f32 %v1716_v60, %v1412_v42  ;;  %v1417_v10 = vadd.f32 %v2255_v8, %v1054_v26  ;;  %v2289_v17 = vpop.f32.mrf.mxu1 }
 0x14d   : > { %v1372_v18 = vpop.f32.mrf.mxu0 }
 0x14e   : > { %1843 = vst.msk [vmem:[%s2746_s19 + $0xd8] sm:$0xff] %vm1815_vm5, %v1810_v44  ;;  %v1808_v29 = vadd.f32 %v2739_v2, %v1769_v28  ;;  %v1774_v30 = vadd.f32 %v2289_v17, %v1417_v10  ;;  %v1415_v1 = vadd.f32 %v1372_v18, %v1046_v43  ;;  %v1729_v47 = vpop.f32.mrf.mxu1 }
 0x14f   : > { %v2256_v48 = vpop.f32.mrf.mxu0 }
 0x150   : > { %1841 = vst.msk [vmem:[%s2746_s19 + $0xc8] sm:$0xff] %vm1815_vm5, %v1808_v29  ;;  %v1813_v31 = vadd.f32 %v2739_v2, %v1774_v30  ;;  %v1772_v49 = vadd.f32 %v1729_v47, %v1415_v1  ;;  %v1418_v50 = vadd.f32 %v2256_v48, %v1057_v59  ;;  %v2290_v32 = vpop.f32.mrf.mxu1 }
 0x151   : > { %v1375_v20 = vpop.f32.mrf.mxu0 }
 0x152   : > { %1846 = vst.msk [vmem:[%s2746_s19 + $0xf0] sm:$0xff] %vm1815_vm5, %v1813_v31  ;;  %v1811_v11 = vadd.f32 %v2739_v2, %v1772_v49  ;;  %v1775_v12 = vadd.f32 %v2290_v32, %v1418_v50  ;;  %v1416_v51 = vadd.f32 %v1375_v20, %v1049_v19  ;;  %v1732_v52 = vpop.f32.mrf.mxu1 }
 0x154   : > { %1844 = vst.msk [vmem:[%s2746_s19 + $0xe0] sm:$0xff] %vm1815_vm5, %v1811_v11  ;;  %v1814_v62 = vadd.f32 %v2739_v2, %v1775_v12  ;;  %v1773_v33 = vadd.f32 %v1732_v52, %v1416_v51 }
 0x156   : > { %1847 = vst.msk [vmem:[%s2746_s19 + $0xf8] sm:$0xff] %vm1815_vm5, %v1814_v62  ;;  %v1812_v34 = vadd.f32 %v2739_v2, %v1773_v33 }
 0x158   : > { %1845 = vst.msk [vmem:[%s2746_s19 + $0xe8] sm:$0xff] %vm1815_vm5, %v1812_v34 }
 0x159 PF: > { %s19_s30 = sadd.s32 1, %s2373_s30  }
 0x15a   : > { %p16_p4 = scmp.ge.s32.totalorder %s19_s30, 4  }
 0x15c   :  { %18 = sbr.rel (!%p16_p4) target bundleno = 1 (0x1), region = 95 }

</bundles_post_ra>
